<compile_context>
chip_gen: v5e
topology: v5e:2x2
jax: 0.10.0
libtpu: 0.0.40
codegen_flags: <defaults>
</compile_context>

<pallas_src>
import jax
import jax.numpy as jnp
import numpy as np
from jax.experimental import pallas as pl
from jax.experimental.pallas import tpu as pltpu

NEG_SLOPE = 0.01   # nn.LeakyReLU default negative_slope
BN_EPS = 1e-5      # nn.BatchNorm1d default eps


def _leaky(x):
    return jnp.where(x >= 0, x, NEG_SLOPE * x)


def _round_up(a, m):
    return (a + m - 1) // m * m


def _to_bf16(w):
    """Weight dequant path shared by kernel and reference.

    int8 -> f32 -> bf16 (two standard converts; avoids relying on a direct
    i8->bf16 lowering).  No-op if the weight is already stored in bf16.
    """
    if w.dtype == jnp.bfloat16:
        return w
    return w.astype(jnp.float32).astype(jnp.bfloat16)


# --------------------------------------------------------------------------
# Kernel: four lane-dense matmuls; per-output-channel scale + bias applied to
# the f32 accumulator; exactly one bf16 live activation per layer.
# --------------------------------------------------------------------------
def _decoder_kernel(x_ref,
                    q1_ref, s1_ref, b1_ref,
                    q2_ref, s2_ref, b2_ref,
                    qc_ref, sc_ref, bc_ref,
                    q3_ref, s3_ref, b3_ref,
                    out_ref):
    def layer(h, q_ref, s_ref, b_ref):
        acc = jnp.dot(h, _to_bf16(q_ref[...]),
                      preferred_element_type=jnp.float32)
        return acc * s_ref[...] + b_ref[...]

    x = x_ref[...].astype(jnp.bfloat16)
    # lin1 (+ folded BatchNorm1d) -> LeakyReLU
    h = _leaky(layer(x, q1_ref, s1_ref, b1_ref)).astype(jnp.bfloat16)
    # lin2 (+ folded BatchNorm1d) -> LeakyReLU   (Dropout: eval-mode identity)
    h = _leaky(layer(h, q2_ref, s2_ref, b2_ref)).astype(jnp.bfloat16)
    # All ConvTranspose1d(1024, C, k=3) layers on a length-1 sequence with the
    # per-point Linear(3,3) folded in and all layers pre-concatenated.
    h = _leaky(layer(h, qc_ref, sc_ref, bc_ref)).astype(jnp.bfloat16)
    # lin3
    out_ref[...] = layer(h, q3_ref, s3_ref, b3_ref).astype(out_ref.dtype)


def decoder_forward(x, kp, *, block_b=256, out_dtype=jnp.float32):
    """x: (B, inputs) f32 -> (B, point_cloud, 3)."""
    B, d_in = x.shape
    Kin = kp["q1"].shape[0]
    P3 = kp["q3"].shape[1]

    # Lane-dense first K dim (inputs padded 64 -> 128 to match the padded w1).
    if d_in < Kin:
        x = jnp.pad(x, ((0, 0), (0, Kin - d_in)))

    # Batch tile: a multiple of 8 (unmasked sublane stores).  For B large
    # enough the grid gets >= 2 steps so both v7x TensorCores are engaged by
    # dimension_semantics=("parallel",); block_b caps the tile so per-step
    # VMEM stays comfortably under the default scoped limit on all gens.
    TB = min(block_b, max(8, _round_up(-(-B // 2), 8)))
    Bp = _round_up(B, TB)
    if Bp != B:
        x = jnp.pad(x, ((0, Bp - B), (0, 0)))

    def row_spec(n):
        return pl.BlockSpec((TB, n), lambda i: (i, 0))

    def resident(arr):
        # Constant index_map: fetched once, kept resident in VMEM across all
        # grid steps (no per-step weight DMA).
        return pl.BlockSpec(arr.shape, lambda i: (0, 0))

    order = ("q1", "s1", "b1", "q2", "s2", "b2",
             "qc", "sc", "bc", "q3", "s3", "b3")
    params = [kp[k] for k in order]

    flops = 2 * Bp * (Kin * 512 + 512 * 1024 + 1024 * P3 + P3 * P3)
    bytes_accessed = (int(x.size) * x.dtype.itemsize
                      + sum(int(p.size) * p.dtype.itemsize for p in params)
                      + Bp * P3 * jnp.dtype(out_dtype).itemsize)

    out = pl.pallas_call(
        _decoder_kernel,
        out_shape=jax.ShapeDtypeStruct((Bp, P3), out_dtype),
        grid=(Bp // TB,),
        in_specs=[row_spec(Kin)] + [resident(p) for p in params],
        out_specs=row_spec(P3),
        compiler_params=pltpu.CompilerParams(
            dimension_semantics=("parallel",)),
        cost_estimate=pl.CostEstimate(
            flops=flops, transcendentals=0, bytes_accessed=bytes_accessed),
    )(x, *params)
    return out[:B].reshape(B, P3 // 3, 3)


# --------------------------------------------------------------------------
# Parameter construction / folding / quantization
# --------------------------------------------------------------------------
def init_raw_params(key, inputs, point_cloud, num_layer):
    """Deterministic, PyTorch-module-shaped parameters (weights stored (in, out))."""
    C = point_cloud // num_layer
    P3 = point_cloud * 3
    ks = jax.random.split(key, 18)
    n = lambda k, shape, scale: scale * jax.random.normal(k, shape, jnp.float32)
    return {
        "w1": n(ks[0], (inputs, 512), 1.0 / np.sqrt(inputs)),
        "b1": n(ks[1], (512,), 0.02),
        "g1": 1.0 + n(ks[2], (512,), 0.05),
        "be1": n(ks[3], (512,), 0.05),
        "m1": n(ks[4], (512,), 0.05),
        "v1": jax.random.uniform(ks[5], (512,), jnp.float32, 0.5, 1.5),
        "w2": n(ks[6], (512, 1024), 1.0 / np.sqrt(512)),
        "b2": n(ks[7], (1024,), 0.02),
        "g2": 1.0 + n(ks[8], (1024,), 0.05),
        "be2": n(ks[9], (1024,), 0.05),
        "m2": n(ks[10], (1024,), 0.05),
        "v2": jax.random.uniform(ks[11], (1024,), jnp.float32, 0.5, 1.5),
        # ConvTranspose1d weight layout: (in_channels=1024, out_channels=C, k=3)
        "wc": n(ks[12], (num_layer, 1024, C, 3), 1.0 / np.sqrt(1024)),
        "bc": n(ks[13], (num_layer, C), 0.02),
        # Linear(3,3) weight layout: (out=3, in=3)
        "wl": n(ks[14], (num_layer, 3, 3), 1.0 / np.sqrt(3)),
        "bl": n(ks[15], (num_layer, 3), 0.02),
        "w3": n(ks[16], (P3, P3), 1.0 / np.sqrt(P3)),
        "b3": n(ks[17], (P3,), 0.02),
    }


def _quantize_int8(w):
    """Symmetric per-output-channel (per-column) int8 quantization."""
    amax = jnp.max(jnp.abs(w), axis=0)
    scale = jnp.maximum(amax, 1e-12) / 127.0
    q = jnp.clip(jnp.round(w / scale[None, :]), -127.0, 127.0).astype(jnp.int8)
    return q, scale.reshape(1, -1).astype(jnp.float32)


def build_kernel_params(raw, *, quantize=True, lane=128):
    """Fold BN + Linear(3,3) + concat, pad K, and quantize to int8."""
    f32 = jnp.float32

    # Fold inference BatchNorm into the preceding Linear:
    #   w' = w * (g * rsqrt(v+eps)),  b' = (b - m) * g * rsqrt(v+eps) + beta
    s1 = raw["g1"] * jax.lax.rsqrt(raw["v1"] + BN_EPS)
    w1 = raw["w1"] * s1[None, :]
    b1 = (raw["b1"] - raw["m1"]) * s1 + raw["be1"]
    s2 = raw["g2"] * jax.lax.rsqrt(raw["v2"] + BN_EPS)
    w2 = raw["w2"] * s2[None, :]
    b2 = (raw["b2"] - raw["m2"]) * s2 + raw["be2"]

    # Fold the per-point Linear(3,3) into each ConvTranspose1d kernel (valid:
    # the module applies LeakyReLU only after the Linear; nothing in between).
    #   z[b,c,k'] = sum_i h[b,i]*(sum_j wc[i,c,j]*wl[k',j]) + bc[c]*sum_j wl[k',j] + bl[k']
    L, Cin, C, K = raw["wc"].shape
    wl = raw["wl"]                                              # (L, 3out, 3in)
    wcf = jnp.einsum("licj,lkj->lick", raw["wc"], wl)           # (L, Cin, C, 3)
    bcf = (raw["bc"][:, :, None] * wl.sum(-1)[:, None, :]
           + raw["bl"][:, None, :])                             # (L, C, 3)
    # Pre-concatenate all layers; column order (layer, channel, k) matches
    # cat(dim=1) + flatten(start_dim=1) of the reference module.
    wcat = jnp.transpose(wcf, (1, 0, 2, 3)).reshape(Cin, L * C * K)
    bcat = bcf.reshape(-1)

    # Zero-pad the input feature dim to a lane multiple (64 -> 128) so the
    # first dot's K dimension is lane-dense.
    d_in = w1.shape[0]
    d_pad = _round_up(d_in, lane)
    if d_pad != d_in:
        w1 = jnp.pad(w1, ((0, d_pad - d_in), (0, 0)))

    def pack(w, b):
        b = b.reshape(1, -1).astype(f32)
        if quantize:
            q, s = _quantize_int8(w)
            return q, s, b
        return w.astype(jnp.bfloat16), jnp.ones((1, w.shape[1]), f32), b

    q1, s1q, b1q = pack(w1, b1)
    q2, s2q, b2q = pack(w2, b2)
    qc, scq, bcq = pack(wcat, bcat)
    q3, s3q, b3q = pack(raw["w3"], raw["b3"])
    return {
        "q1": q1, "s1": s1q, "b1": b1q,
        "q2": q2, "s2": s2q, "b2": b2q,
        "qc": qc, "sc": scq, "bc": bcq,
        "q3": q3, "s3": s3q, "b3": b3q,
    }


# --------------------------------------------------------------------------
# References
# --------------------------------------------------------------------------
def reference_forward(x, raw):
    """Pure-JAX f32 reference mirroring the PyTorch module (eval mode)."""
    h = x @ raw["w1"] + raw["b1"]
    h = (h - raw["m1"]) / jnp.sqrt(raw["v1"] + BN_EPS) * raw["g1"] + raw["be1"]
    h = _leaky(h)
    h = h @ raw["w2"] + raw["b2"]
    h = (h - raw["m2"]) / jnp.sqrt(raw["v2"] + BN_EPS) * raw["g2"] + raw["be2"]
    h = _leaky(h)
    outs = []
    for i in range(raw["wc"].shape[0]):
        y = jnp.einsum("bi,icj->bcj", h, raw["wc"][i]) + raw["bc"][i][None, :, None]
        z = jnp.einsum("bcj,kj->bck", y, raw["wl"][i]) + raw["bl"][i]
        outs.append(_leaky(z))
    cat = jnp.concatenate(outs, axis=1)            # (B, point_cloud, 3)
    flat = cat.reshape(x.shape[0], -1)
    out = flat @ raw["w3"] + raw["b3"]
    return out.reshape(x.shape[0], -1, 3)


def folded_reference(x, kp):
    """Pure-JAX reference of the exact folded/quantized math (kernel fidelity)."""
    Kin = kp["q1"].shape[0]
    if x.shape[1] < Kin:
        x = jnp.pad(x, ((0, 0), (0, Kin - x.shape[1])))

    def layer(h, q, s, b):
        return jnp.dot(h, _to_bf16(q), preferred_element_type=jnp.float32) * s + b

    h = x.astype(jnp.bfloat16)
    h = _leaky(layer(h, kp["q1"], kp["s1"], kp["b1"])).astype(jnp.bfloat16)
    h = _leaky(layer(h, kp["q2"], kp["s2"], kp["b2"])).astype(jnp.bfloat16)
    h = _leaky(layer(h, kp["qc"], kp["sc"], kp["bc"])).astype(jnp.bfloat16)
    out = layer(h, kp["q3"], kp["s3"], kp["b3"])
    return out.reshape(x.shape[0], -1, 3)


if __name__ == "__main__":
    B, INPUTS, POINT_CLOUD, NUM_LAYER = 2, 64, 256, 4
    key = jax.random.PRNGKey(0)
    kx, kparam = jax.random.split(key)
    raw = init_raw_params(kparam, INPUTS, POINT_CLOUD, NUM_LAYER)
    kparams = build_kernel_params(raw)                   # int8 + per-col scales
    x = jax.random.normal(kx, (B, INPUTS), jnp.float32)

    out = jax.block_until_ready(decoder_forward(x, kparams))
    assert out.shape == (B, POINT_CLOUD, 3), out.shape

    # Kernel fidelity: identical folded int8/bf16 math in plain XLA (tight).
    ref_q = jax.block_until_ready(folded_reference(x, kparams))
    np.testing.assert_allclose(np.asarray(out), np.asarray(ref_q),
                               rtol=2e-3, atol=2e-3)

    # Full-module (eval-mode, f32) semantics.  int8 weight storage + bf16
    # activations trade ~1-2% precision, so the end-to-end check uses a
    # relative-L2 bound plus a loose elementwise bound.
    ref = reference_forward(x, raw)
    o, r = np.asarray(out), np.asarray(ref)
    rel_l2 = np.linalg.norm(o - r) / np.linalg.norm(r)
    assert rel_l2 < 3.5e-2, f"relative L2 error too large: {rel_l2}"
    np.testing.assert_allclose(o, r, rtol=6e-2, atol=6e-2)
    print("KERNEL_OK")
</pallas_src>

<mosaic_0001>
module attributes {stable_mosaic.version = 11 : i64} {
  func.func @_decoder_kernel(%arg0: i32, %arg1: memref<8x128xf32, #tpu.memory_space<vmem>>, %arg2: memref<128x512xi8, #tpu.memory_space<vmem>>, %arg3: memref<1x512xf32, #tpu.memory_space<vmem>>, %arg4: memref<1x512xf32, #tpu.memory_space<vmem>>, %arg5: memref<512x1024xi8, #tpu.memory_space<vmem>>, %arg6: memref<1x1024xf32, #tpu.memory_space<vmem>>, %arg7: memref<1x1024xf32, #tpu.memory_space<vmem>>, %arg8: memref<1024x768xi8, #tpu.memory_space<vmem>>, %arg9: memref<1x768xf32, #tpu.memory_space<vmem>>, %arg10: memref<1x768xf32, #tpu.memory_space<vmem>>, %arg11: memref<768x768xi8, #tpu.memory_space<vmem>>, %arg12: memref<1x768xf32, #tpu.memory_space<vmem>>, %arg13: memref<1x768xf32, #tpu.memory_space<vmem>>, %arg14: memref<8x768xf32, #tpu.memory_space<vmem>>) attributes {dimension_semantics = [#tpu.dimension_semantics<parallel>], iteration_bounds = array<i64: 1>, scalar_prefetch = 0 : i64, scratch_operands = 0 : i64, tpu.core_type = #tpu.core_type<tc>, window_params = [{transform_indices = @transform_0, window_bounds = array<i64: 8, 128>}, {pipeline_mode = #tpu.pipeline_mode<synchronous>, transform_indices = @transform_1, window_bounds = array<i64: 128, 512>}, {pipeline_mode = #tpu.pipeline_mode<synchronous>, transform_indices = @transform_2, window_bounds = array<i64: 1, 512>}, {pipeline_mode = #tpu.pipeline_mode<synchronous>, transform_indices = @transform_3, window_bounds = array<i64: 1, 512>}, {pipeline_mode = #tpu.pipeline_mode<synchronous>, transform_indices = @transform_4, window_bounds = array<i64: 512, 1024>}, {pipeline_mode = #tpu.pipeline_mode<synchronous>, transform_indices = @transform_5, window_bounds = array<i64: 1, 1024>}, {pipeline_mode = #tpu.pipeline_mode<synchronous>, transform_indices = @transform_6, window_bounds = array<i64: 1, 1024>}, {pipeline_mode = #tpu.pipeline_mode<synchronous>, transform_indices = @transform_7, window_bounds = array<i64: 1024, 768>}, {pipeline_mode = #tpu.pipeline_mode<synchronous>, transform_indices = @transform_8, window_bounds = array<i64: 1, 768>}, {pipeline_mode = #tpu.pipeline_mode<synchronous>, transform_indices = @transform_9, window_bounds = array<i64: 1, 768>}, {pipeline_mode = #tpu.pipeline_mode<synchronous>, transform_indices = @transform_10, window_bounds = array<i64: 768, 768>}, {pipeline_mode = #tpu.pipeline_mode<synchronous>, transform_indices = @transform_11, window_bounds = array<i64: 1, 768>}, {pipeline_mode = #tpu.pipeline_mode<synchronous>, transform_indices = @transform_12, window_bounds = array<i64: 1, 768>}, {transform_indices = @transform_13, window_bounds = array<i64: 8, 768>}]} {
    %c0 = arith.constant 0 : index
    %c0_0 = arith.constant 0 : index
    %0 = vector.load %arg1[%c0, %c0_0] : memref<8x128xf32, #tpu.memory_space<vmem>>, vector<8x128xf32>
    %1 = arith.truncf %0 : vector<8x128xf32> to vector<8x128xbf16>
    %c0_1 = arith.constant 0 : index
    %c0_2 = arith.constant 0 : index
    %2 = vector.load %arg2[%c0_1, %c0_2] : memref<128x512xi8, #tpu.memory_space<vmem>>, vector<128x512xi8>
    %3 = arith.sitofp %2 : vector<128x512xi8> to vector<128x512xf32>
    %4 = arith.truncf %3 : vector<128x512xf32> to vector<128x512xbf16>
    %cst = arith.constant dense<0.000000e+00> : vector<8x512xf32>
    %5 = tpu.matmul %1, %4, %cst {dimension_numbers = #tpu.dot_dimension_numbers<[1], [0], [0], [1], [0, 0, 1, 1], [], []>} : vector<8x128xbf16>, vector<128x512xbf16>, vector<8x512xf32> -> vector<8x512xf32>
    %c0_3 = arith.constant 0 : index
    %c0_4 = arith.constant 0 : index
    %6 = vector.load %arg3[%c0_3, %c0_4] : memref<1x512xf32, #tpu.memory_space<vmem>>, vector<1x512xf32>
    %7 = vector.broadcast %6 : vector<1x512xf32> to vector<8x512xf32>
    %8 = arith.mulf %5, %7 : vector<8x512xf32>
    %c0_5 = arith.constant 0 : index
    %c0_6 = arith.constant 0 : index
    %9 = vector.load %arg4[%c0_5, %c0_6] : memref<1x512xf32, #tpu.memory_space<vmem>>, vector<1x512xf32>
    %10 = vector.broadcast %9 : vector<1x512xf32> to vector<8x512xf32>
    %11 = arith.addf %8, %10 : vector<8x512xf32>
    %cst_7 = arith.constant 0.000000e+00 : f32
    %12 = vector.broadcast %cst_7 : f32 to vector<8x512xf32>
    %13 = arith.cmpf oge, %11, %12 : vector<8x512xf32>
    %cst_8 = arith.constant 0.00999999977 : f32
    %14 = vector.broadcast %cst_8 : f32 to vector<8x512xf32>
    %15 = arith.mulf %14, %11 : vector<8x512xf32>
    %16 = arith.select %13, %11, %15 : vector<8x512xi1>, vector<8x512xf32>
    %17 = arith.truncf %16 : vector<8x512xf32> to vector<8x512xbf16>
    %c0_9 = arith.constant 0 : index
    %c0_10 = arith.constant 0 : index
    %18 = vector.load %arg5[%c0_9, %c0_10] : memref<512x1024xi8, #tpu.memory_space<vmem>>, vector<512x1024xi8>
    %19 = arith.sitofp %18 : vector<512x1024xi8> to vector<512x1024xf32>
    %20 = arith.truncf %19 : vector<512x1024xf32> to vector<512x1024xbf16>
    %cst_11 = arith.constant dense<0.000000e+00> : vector<8x1024xf32>
    %21 = tpu.matmul %17, %20, %cst_11 {dimension_numbers = #tpu.dot_dimension_numbers<[1], [0], [0], [1], [0, 0, 1, 1], [], []>} : vector<8x512xbf16>, vector<512x1024xbf16>, vector<8x1024xf32> -> vector<8x1024xf32>
    %c0_12 = arith.constant 0 : index
    %c0_13 = arith.constant 0 : index
    %22 = vector.load %arg6[%c0_12, %c0_13] : memref<1x1024xf32, #tpu.memory_space<vmem>>, vector<1x1024xf32>
    %23 = vector.broadcast %22 : vector<1x1024xf32> to vector<8x1024xf32>
    %24 = arith.mulf %21, %23 : vector<8x1024xf32>
    %c0_14 = arith.constant 0 : index
    %c0_15 = arith.constant 0 : index
    %25 = vector.load %arg7[%c0_14, %c0_15] : memref<1x1024xf32, #tpu.memory_space<vmem>>, vector<1x1024xf32>
    %26 = vector.broadcast %25 : vector<1x1024xf32> to vector<8x1024xf32>
    %27 = arith.addf %24, %26 : vector<8x1024xf32>
    %cst_16 = arith.constant 0.000000e+00 : f32
    %28 = vector.broadcast %cst_16 : f32 to vector<8x1024xf32>
    %29 = arith.cmpf oge, %27, %28 : vector<8x1024xf32>
    %cst_17 = arith.constant 0.00999999977 : f32
    %30 = vector.broadcast %cst_17 : f32 to vector<8x1024xf32>
    %31 = arith.mulf %30, %27 : vector<8x1024xf32>
    %32 = arith.select %29, %27, %31 : vector<8x1024xi1>, vector<8x1024xf32>
    %33 = arith.truncf %32 : vector<8x1024xf32> to vector<8x1024xbf16>
    %c0_18 = arith.constant 0 : index
    %c0_19 = arith.constant 0 : index
    %34 = vector.load %arg8[%c0_18, %c0_19] : memref<1024x768xi8, #tpu.memory_space<vmem>>, vector<1024x768xi8>
    %35 = arith.sitofp %34 : vector<1024x768xi8> to vector<1024x768xf32>
    %36 = arith.truncf %35 : vector<1024x768xf32> to vector<1024x768xbf16>
    %cst_20 = arith.constant dense<0.000000e+00> : vector<8x768xf32>
    %37 = tpu.matmul %33, %36, %cst_20 {dimension_numbers = #tpu.dot_dimension_numbers<[1], [0], [0], [1], [0, 0, 1, 1], [], []>} : vector<8x1024xbf16>, vector<1024x768xbf16>, vector<8x768xf32> -> vector<8x768xf32>
    %c0_21 = arith.constant 0 : index
    %c0_22 = arith.constant 0 : index
    %38 = vector.load %arg9[%c0_21, %c0_22] : memref<1x768xf32, #tpu.memory_space<vmem>>, vector<1x768xf32>
    %39 = vector.broadcast %38 : vector<1x768xf32> to vector<8x768xf32>
    %40 = arith.mulf %37, %39 : vector<8x768xf32>
    %c0_23 = arith.constant 0 : index
    %c0_24 = arith.constant 0 : index
    %41 = vector.load %arg10[%c0_23, %c0_24] : memref<1x768xf32, #tpu.memory_space<vmem>>, vector<1x768xf32>
    %42 = vector.broadcast %41 : vector<1x768xf32> to vector<8x768xf32>
    %43 = arith.addf %40, %42 : vector<8x768xf32>
    %cst_25 = arith.constant 0.000000e+00 : f32
    %44 = vector.broadcast %cst_25 : f32 to vector<8x768xf32>
    %45 = arith.cmpf oge, %43, %44 : vector<8x768xf32>
    %cst_26 = arith.constant 0.00999999977 : f32
    %46 = vector.broadcast %cst_26 : f32 to vector<8x768xf32>
    %47 = arith.mulf %46, %43 : vector<8x768xf32>
    %48 = arith.select %45, %43, %47 : vector<8x768xi1>, vector<8x768xf32>
    %49 = arith.truncf %48 : vector<8x768xf32> to vector<8x768xbf16>
    %c0_27 = arith.constant 0 : index
    %c0_28 = arith.constant 0 : index
    %50 = vector.load %arg11[%c0_27, %c0_28] : memref<768x768xi8, #tpu.memory_space<vmem>>, vector<768x768xi8>
    %51 = arith.sitofp %50 : vector<768x768xi8> to vector<768x768xf32>
    %52 = arith.truncf %51 : vector<768x768xf32> to vector<768x768xbf16>
    %cst_29 = arith.constant dense<0.000000e+00> : vector<8x768xf32>
    %53 = tpu.matmul %49, %52, %cst_29 {dimension_numbers = #tpu.dot_dimension_numbers<[1], [0], [0], [1], [0, 0, 1, 1], [], []>} : vector<8x768xbf16>, vector<768x768xbf16>, vector<8x768xf32> -> vector<8x768xf32>
    %c0_30 = arith.constant 0 : index
    %c0_31 = arith.constant 0 : index
    %54 = vector.load %arg12[%c0_30, %c0_31] : memref<1x768xf32, #tpu.memory_space<vmem>>, vector<1x768xf32>
    %55 = vector.broadcast %54 : vector<1x768xf32> to vector<8x768xf32>
    %56 = arith.mulf %53, %55 : vector<8x768xf32>
    %c0_32 = arith.constant 0 : index
    %c0_33 = arith.constant 0 : index
    %57 = vector.load %arg13[%c0_32, %c0_33] : memref<1x768xf32, #tpu.memory_space<vmem>>, vector<1x768xf32>
    %58 = vector.broadcast %57 : vector<1x768xf32> to vector<8x768xf32>
    %59 = arith.addf %56, %58 : vector<8x768xf32>
    %c0_34 = arith.constant 0 : index
    %c0_35 = arith.constant 0 : index
    %60 = vector.load %arg14[%c0_34, %c0_35] : memref<8x768xf32, #tpu.memory_space<vmem>>, vector<8x768xf32>
    tpu.vector_store %arg14[%c0_34, %c0_35], %59 {strides = array<i32>} : memref<8x768xf32, #tpu.memory_space<vmem>>, vector<8x768xf32>,
    return
  }
  func.func @transform_0(%arg0: i32) -> (i32, i32) {
    %c0_i32 = arith.constant 0 : i32
    %c0_i32_0 = arith.constant 0 : i32
    return %arg0, %c0_i32 : i32, i32
  }
  func.func @transform_1(%arg0: i32) -> (i32, i32) {
    %c0_i32 = arith.constant 0 : i32
    %c0_i32_0 = arith.constant 0 : i32
    %c0_i32_1 = arith.constant 0 : i32
    return %c0_i32, %c0_i32_0 : i32, i32
  }
  func.func @transform_2(%arg0: i32) -> (i32, i32) {
    %c0_i32 = arith.constant 0 : i32
    %c0_i32_0 = arith.constant 0 : i32
    %c0_i32_1 = arith.constant 0 : i32
    return %c0_i32, %c0_i32_0 : i32, i32
  }
  func.func @transform_3(%arg0: i32) -> (i32, i32) {
    %c0_i32 = arith.constant 0 : i32
    %c0_i32_0 = arith.constant 0 : i32
    %c0_i32_1 = arith.constant 0 : i32
    return %c0_i32, %c0_i32_0 : i32, i32
  }
  func.func @transform_4(%arg0: i32) -> (i32, i32) {
    %c0_i32 = arith.constant 0 : i32
    %c0_i32_0 = arith.constant 0 : i32
    %c0_i32_1 = arith.constant 0 : i32
    return %c0_i32, %c0_i32_0 : i32, i32
  }
  func.func @transform_5(%arg0: i32) -> (i32, i32) {
    %c0_i32 = arith.constant 0 : i32
    %c0_i32_0 = arith.constant 0 : i32
    %c0_i32_1 = arith.constant 0 : i32
    return %c0_i32, %c0_i32_0 : i32, i32
  }
  func.func @transform_6(%arg0: i32) -> (i32, i32) {
    %c0_i32 = arith.constant 0 : i32
    %c0_i32_0 = arith.constant 0 : i32
    %c0_i32_1 = arith.constant 0 : i32
    return %c0_i32, %c0_i32_0 : i32, i32
  }
  func.func @transform_7(%arg0: i32) -> (i32, i32) {
    %c0_i32 = arith.constant 0 : i32
    %c0_i32_0 = arith.constant 0 : i32
    %c0_i32_1 = arith.constant 0 : i32
    return %c0_i32, %c0_i32_0 : i32, i32
  }
  func.func @transform_8(%arg0: i32) -> (i32, i32) {
    %c0_i32 = arith.constant 0 : i32
    %c0_i32_0 = arith.constant 0 : i32
    %c0_i32_1 = arith.constant 0 : i32
    return %c0_i32, %c0_i32_0 : i32, i32
  }
  func.func @transform_9(%arg0: i32) -> (i32, i32) {
    %c0_i32 = arith.constant 0 : i32
    %c0_i32_0 = arith.constant 0 : i32
    %c0_i32_1 = arith.constant 0 : i32
    return %c0_i32, %c0_i32_0 : i32, i32
  }
  func.func @transform_10(%arg0: i32) -> (i32, i32) {
    %c0_i32 = arith.constant 0 : i32
    %c0_i32_0 = arith.constant 0 : i32
    %c0_i32_1 = arith.constant 0 : i32
    return %c0_i32, %c0_i32_0 : i32, i32
  }
  func.func @transform_11(%arg0: i32) -> (i32, i32) {
    %c0_i32 = arith.constant 0 : i32
    %c0_i32_0 = arith.constant 0 : i32
    %c0_i32_1 = arith.constant 0 : i32
    return %c0_i32, %c0_i32_0 : i32, i32
  }
  func.func @transform_12(%arg0: i32) -> (i32, i32) {
    %c0_i32 = arith.constant 0 : i32
    %c0_i32_0 = arith.constant 0 : i32
    %c0_i32_1 = arith.constant 0 : i32
    return %c0_i32, %c0_i32_0 : i32, i32
  }
  func.func @transform_13(%arg0: i32) -> (i32, i32) {
    %c0_i32 = arith.constant 0 : i32
    %c0_i32_0 = arith.constant 0 : i32
    return %arg0, %c0_i32 : i32, i32
  }
}

</mosaic_0001>

<bundles_post_ra>
// kernel: tpu_custom_call.1
= control target key start
LH: loop header
LB: loop body
LE: loop exit
PB: predicated region body
PF: predicated region fallthrough
CT: control target
= control target key end

     0   :  { %18 = vsyncpa [#allocation3], 0  ;;  %s9281_s0 = inlined_call_operand.hbm [shape: f32[8,128], index: 0, kind: input, shape index: {}]   ;;  %s9282_s1 = inlined_call_operand.hbm [shape: s8[128,512], index: 1, kind: input, shape index: {}]   ;;  %s9283_s2 = inlined_call_operand.hbm [shape: f32[1,512], index: 2, kind: input, shape index: {}]   ;;  %s9284_s3 = inlined_call_operand.hbm [shape: f32[1,512], index: 3, kind: input, shape index: {}]   ;;  %s9285_s4 = inlined_call_operand.hbm [shape: s8[512,1024], index: 4, kind: input, shape index: {}]   ;;  %s9286_s5 = inlined_call_operand.hbm [shape: f32[1,1024], index: 5, kind: input, shape index: {}]   ;;  %s9287_s6 = inlined_call_operand.hbm [shape: f32[1,1024], index: 6, kind: input, shape index: {}]   ;;  %s9288_s7 = inlined_call_operand.hbm [shape: s8[1024,768], index: 7, kind: input, shape index: {}]   ;;  %s9289_s8 = inlined_call_operand.vmem [shape: f32[1,768], index: 8, kind: input, shape index: {}]   ;;  %s9290_s9 = inlined_call_operand.hbm [shape: f32[1,768], index: 9, kind: input, shape index: {}]   ;;  %s9291_s10 = inlined_call_operand.hbm [shape: s8[768,768], index: 10, kind: input, shape index: {}]   ;;  %s9292_s11 = inlined_call_operand.hbm [shape: f32[1,768], index: 11, kind: input, shape index: {}]   ;;  %s9293_s12 = inlined_call_operand.hbm [shape: f32[1,768], index: 12, kind: input, shape index: {}]   ;;  %s9294_s13 = inlined_call_operand.hbm [shape: f32[8,768], index: 13, kind: output, shape index: {}]  }
   0x1   :  { %19 = vsyncpa [#allocation6], 0 }
   0x2   :  { %20 = vsyncpa [#allocation9], 0 }
   0x3   :  { %21 = vsyncpa [#allocation12], 0 }
   0x4   :  { %22 = vsyncpa [#allocation15], 0 }
   0x5   :  { %23 = vsyncpa [#allocation18], 0 }
   0x6   :  { %24 = vsyncpa [#allocation21], 0  ;;  %s41_s27 = sshll.u32 %s9282_s1, 4  ;;  %s42_s27 = int_to_ptr.hbm [resolvable:$true] %s41_s27 }
   0x7   :  { %25 = vsyncpa [#allocation4], 0  ;;  %s7674_s28 = smov [#allocation5]   ;;  %s66_s15 = sshll.u32 %s9284_s3, 4  ;;  %s67_s15 = int_to_ptr.hbm [resolvable:$true] %s66_s15 }
   0x8   :  { %s43_s29 = sshll.u32 %s7674_s28, 4  ;;  %s7675_s16 = smov 512   ;;  %s44_s29 = int_to_ptr.vmem [resolvable:$true] %s43_s29 }
   0x9   :  { %s7676_s17 = smov 32   ;;  %s7677_s18 = smov [#allocation8]  }
   0xa   :  { %49 = dma.hbm_to_vmem [thread:$0]  %s42_s27, 2048, %s44_s29, [#allocation6], %s7675_s16, %s7675_s16, %s7676_s17  }
   0xb   :  { %s68_s19 = sshll.u32 %s7677_s18, 4  ;;  %s90_s22 = sshll.u32 %s9286_s5, 4  ;;  %s69_s19 = int_to_ptr.vmem [resolvable:$true] %s68_s19  ;;  %s91_s22 = int_to_ptr.hbm [resolvable:$true] %s90_s22 }
   0xc   :  { %71 = dma.hbm_to_vmem [thread:$0]  %s67_s15, 64, %s69_s19, [#allocation9]  }
   0xd   :  { %s111_s24 = sshll.u32 %s9288_s7, 4  ;;  %s7678_s25 = smov [#allocation11]   ;;  %s112_s24 = int_to_ptr.hbm [resolvable:$true] %s111_s24 }
   0xe   :  { %s92_s26 = sshll.u32 %s7678_s25, 4  ;;  %s7679_s3 = smov [#allocation14]   ;;  %s93_s26 = int_to_ptr.vmem [resolvable:$true] %s92_s26 }
   0xf   :  { %95 = dma.hbm_to_vmem [thread:$0]  %s91_s22, 128, %s93_s26, [#allocation12]  }
  0x10   :  { %s113_s27 = sshll.u32 %s7679_s3, 4  ;;  %s7680_s28 = smov 768   ;;  %s114_s27 = int_to_ptr.vmem [resolvable:$true] %s113_s27 }
  0x11   :  { %s7681_s29 = smov 48   ;;  %s137_s14 = sshll.u32 %s9291_s10, 4  ;;  %s138_s14 = int_to_ptr.hbm [resolvable:$true] %s137_s14 }
  0x12   :  { %119 = dma.hbm_to_vmem [thread:$0]  %s112_s24, 24576, %s114_s27, [#allocation15], %s7680_s28, %s7680_s28, %s7681_s29  }
  0x13   :  { %s7682_s15 = smov [#allocation17]   ;;  %s31_s18 = sshll.u32 %s9281_s0, 4  ;;  %s32_s18 = int_to_ptr.hbm [resolvable:$true] %s31_s18 }
  0x14   :  { %s139_s16 = sshll.u32 %s7682_s15, 4  ;;  %s7683_s19 = smov [#allocation2]   ;;  %s140_s16 = int_to_ptr.vmem [resolvable:$true] %s139_s16 }
  0x15   :  { %145 = dma.hbm_to_vmem [thread:$0]  %s138_s14, 18432, %s140_s16, [#allocation18], %s7680_s28, %s7680_s28, %s7681_s29  }
  0x16   :  { %s33_s20 = sshll.u32 %s7683_s19, 4  ;;  %s55_s1 = sshll.u32 %s9283_s2, 4  ;;  %s34_s20 = int_to_ptr.vmem [resolvable:$true] %s33_s20  ;;  %s56_s1 = int_to_ptr.hbm [resolvable:$true] %s55_s1 }
  0x17   :  { %36 = dma.hbm_to_vmem [thread:$0]  %s32_s18, 128, %s34_s20, [#allocation3]  }
  0x18   :  { %s76_s24 = sshll.u32 %s9285_s4, 4  ;;  %s7684_s25 = smov [#allocation7]   ;;  %s77_s24 = int_to_ptr.hbm [resolvable:$true] %s76_s24 }
  0x19   :  { %s57_s26 = sshll.u32 %s7684_s25, 4  ;;  %s7685_s0 = smov [#allocation10]   ;;  %s58_s26 = int_to_ptr.vmem [resolvable:$true] %s57_s26 }
  0x1a   :  { %60 = dma.hbm_to_vmem [thread:$0]  %s56_s1, 64, %s58_s26, [#allocation6]  }
  0x1b   :  { %s78_s3 = sshll.u32 %s7685_s0, 4  ;;  %s7686_s27 = smov 1024   ;;  %s79_s3 = int_to_ptr.vmem [resolvable:$true] %s78_s3 }
  0x1c   :  { %s7687_s28 = smov 64   ;;  %s101_s30 = sshll.u32 %s9287_s6, 4  ;;  %s102_s30 = int_to_ptr.hbm [resolvable:$true] %s101_s30 }
  0x1d   :  { %84 = dma.hbm_to_vmem [thread:$0]  %s77_s24, 16384, %s79_s3, [#allocation9], %s7686_s27, %s7686_s27, %s7687_s28  }
  0x1e   :  { %s7688_s5 = smov [#allocation13]   ;;  %s127_s16 = sshll.u32 %s9290_s9, 4  ;;  %s128_s16 = int_to_ptr.hbm [resolvable:$true] %s127_s16 }
  0x1f   :  { %s103_s14 = sshll.u32 %s7688_s5, 4  ;;  %s7689_s7 = smov [#allocation16]   ;;  %s104_s14 = int_to_ptr.vmem [resolvable:$true] %s103_s14 }
  0x20   :  { %106 = dma.hbm_to_vmem [thread:$0]  %s102_s30, 128, %s104_s14, [#allocation12]  }
  0x21   :  { %s129_s17 = sshll.u32 %s7689_s7, 4  ;;  %s151_s20 = sshll.u32 %s9292_s11, 4  ;;  %s130_s17 = int_to_ptr.vmem [resolvable:$true] %s129_s17  ;;  %s152_s20 = int_to_ptr.hbm [resolvable:$true] %s151_s20 }
  0x22   :  { %132 = dma.hbm_to_vmem [thread:$0]  %s128_s16, 96, %s130_s17, [#allocation15]  }
  0x23   :  { %s162_s22 = sshll.u32 %s9293_s12, 4  ;;  %s7690_s1 = smov [#allocation19]   ;;  %s163_s22 = int_to_ptr.hbm [resolvable:$true] %s162_s22 }
  0x24   :  { %s153_s10 = sshll.u32 %s7690_s1, 4  ;;  %s7691_s9 = smov [#allocation20]   ;;  %s154_s10 = int_to_ptr.vmem [resolvable:$true] %s153_s10 }
  0x25   :  { %156 = dma.hbm_to_vmem [thread:$0]  %s152_s20, 96, %s154_s10, [#allocation18]  }
  0x26   :  { %s164_s23 = sshll.u32 %s7691_s9, 4  ;;  %s165_s23 = int_to_ptr.vmem [resolvable:$true] %s164_s23 }
  0x27   :  { %167 = dma.hbm_to_vmem [thread:$0]  %s163_s22, 96, %s165_s23, [#allocation21]  }
  0x28   :  { %7658 = dma.done.wait [#allocation3], 128  }
  0x29   :  { %7659 = vsyncadd [#allocation3], 4294967168 }
  0x2a   :  { %7660 = dma.done.wait [#allocation6], 2112  }
  0x2b   :  { %7661 = vsyncadd [#allocation6], 4294965184 }
  0x2c   :  { %7662 = dma.done.wait [#allocation9], 16448  }
  0x2d   :  { %7663 = vsyncadd [#allocation9], 4294950848 }
  0x2e   :  { %7664 = dma.done.wait [#allocation12], 256  }
  0x2f   :  { %7665 = vsyncadd [#allocation12], 4294967040 }
  0x30   :  { %7666 = dma.done.wait [#allocation15], 24672  }
  0x31   :  { %7667 = vsyncadd [#allocation15], 4294942624 }
  0x32   :  { %7668 = dma.done.wait [#allocation18], 18528  }
  0x33   :  { %7669 = vsyncadd [#allocation18], 4294948768 }
  0x34   :  { %7670 = dma.done.wait [#allocation21], 96  }
  0x35   :  { %7671 = vsyncadd [#allocation21], 4294967200  ;;  %v230_v0 = vld [vmem:[#allocation5 + $0x60] sm:$0xff]  ;;  %v231_v1 = vld [vmem:[#allocation5 + $0x68] sm:$0xff]  ;;  %s7303_s29 = sshll.u32 %s9294_s13, 4  ;;  %s7304_s29 = int_to_ptr.hbm [resolvable:$true] %s7303_s29 }
  0x36   :  { %v232_v2 = vld [vmem:[#allocation5 + $0x70] sm:$0xff]  ;;  %v290_v3 = vunpack.c.2.s8 %v230_v0  ;;  %v294_v4 = vunpack.c.3.s8 %v230_v0  ;;  %v291_v5 = vunpack.c.2.s8 %v231_v1  ;;  %v295_v6 = vunpack.c.3.s8 %v231_v1  ;;  %v233_v7 = vld [vmem:[#allocation5 + $0x78] sm:$0xff]  ;;  %v226_v28 = vld [vmem:[#allocation5 + $0x40] sm:$0xff] }
  0x37   :  { %v292_v8 = vunpack.c.2.s8 %v232_v2  ;;  %v296_v9 = vunpack.c.3.s8 %v232_v2  ;;  %v293_v10 = vunpack.c.2.s8 %v233_v7  ;;  %v297_v11 = vunpack.c.3.s8 %v233_v7  ;;  %v227_v37 = vld [vmem:[#allocation5 + $0x48] sm:$0xff]  ;;  %v228_v42 = vld [vmem:[#allocation5 + $0x50] sm:$0xff]  ;;  %v229_v47 = vld [vmem:[#allocation5 + $0x58] sm:$0xff] }
  0x38   :  { %v354_v12 = vcvt.s32.f32 %v290_v3  ;;  %v358_v13 = vcvt.s32.f32 %v294_v4  ;;  %v355_v14 = vcvt.s32.f32 %v291_v5  ;;  %v359_v15 = vcvt.s32.f32 %v295_v6 }
  0x39   :  { %v356_v16 = vcvt.s32.f32 %v292_v8  ;;  %v360_v17 = vcvt.s32.f32 %v296_v9  ;;  %v357_v18 = vcvt.s32.f32 %v293_v10  ;;  %v361_v19 = vcvt.s32.f32 %v297_v11  ;;  %v222_v8 = vld [vmem:[#allocation5 + $0x20] sm:$0xff] }
  0x3a   :  { %v390_v20 = vpack.c.bf16 %v358_v13, %v354_v12  ;;  %v391_v21 = vpack.c.bf16 %v359_v15, %v355_v14  ;;  %v282_v22 = vunpack.c.0.s8 %v230_v0  ;;  %v286_v23 = vunpack.c.1.s8 %v230_v0 }
  0x3b   :  { %v392_v24 = vpack.c.bf16 %v360_v17, %v356_v16  ;;  %v393_v25 = vpack.c.bf16 %v361_v19, %v357_v18  ;;  %v283_v26 = vunpack.c.0.s8 %v231_v1  ;;  %v287_v27 = vunpack.c.1.s8 %v231_v1  ;;  %v223_v17 = vld [vmem:[#allocation5 + $0x28] sm:$0xff] }
  0x3c   :  { %394 = vmatpush.bf16.msra.mxu0 %v390_v20  ;;  %407 = vmatpush.bf16.msra.mxu1 %v391_v21  ;;  %v346_v29 = vcvt.s32.f32 %v282_v22  ;;  %v350_v30 = vcvt.s32.f32 %v286_v23  ;;  %v284_v31 = vunpack.c.0.s8 %v232_v2  ;;  %v288_v32 = vunpack.c.1.s8 %v232_v2  ;;  %v224_v22 = vld [vmem:[#allocation5 + $0x30] sm:$0xff] }
  0x3d   :  { %420 = vmatpush.bf16.msra.mxu2 %v392_v24  ;;  %433 = vmatpush.bf16.msra.mxu3 %v393_v25  ;;  %v347_v33 = vcvt.s32.f32 %v283_v26  ;;  %v351_v34 = vcvt.s32.f32 %v287_v27  ;;  %v285_v35 = vunpack.c.0.s8 %v233_v7  ;;  %v289_v36 = vunpack.c.1.s8 %v233_v7  ;;  %v225_v27 = vld [vmem:[#allocation5 + $0x38] sm:$0xff] }
  0x3e   :  { %v386_v38 = vpack.c.bf16 %v350_v30, %v346_v29  ;;  %v348_v39 = vcvt.s32.f32 %v284_v31  ;;  %v352_v40 = vcvt.s32.f32 %v288_v32  ;;  %v274_v41 = vunpack.c.2.s8 %v226_v28 }
  0x3f   :  { %v387_v43 = vpack.c.bf16 %v351_v34, %v347_v33  ;;  %v349_v44 = vcvt.s32.f32 %v285_v35  ;;  %v353_v45 = vcvt.s32.f32 %v289_v36  ;;  %v278_v46 = vunpack.c.3.s8 %v226_v28 }
  0x40   :  { %395 = vmatpush.bf16.msra.mxu0 %v386_v38  ;;  %v388_v48 = vpack.c.bf16 %v352_v40, %v348_v39  ;;  %v338_v49 = vcvt.s32.f32 %v274_v41  ;;  %v275_v50 = vunpack.c.2.s8 %v227_v37  ;;  %v279_v51 = vunpack.c.3.s8 %v227_v37 }
  0x41   :  { %408 = vmatpush.bf16.msra.mxu1 %v387_v43  ;;  %v389_v52 = vpack.c.bf16 %v353_v45, %v349_v44  ;;  %v342_v53 = vcvt.s32.f32 %v278_v46  ;;  %v276_v54 = vunpack.c.2.s8 %v228_v42  ;;  %v280_v55 = vunpack.c.3.s8 %v228_v42 }
  0x42   :  { %421 = vmatpush.bf16.msra.mxu2 %v388_v48  ;;  %v339_v56 = vcvt.s32.f32 %v275_v50  ;;  %v343_v57 = vcvt.s32.f32 %v279_v51  ;;  %v277_v58 = vunpack.c.2.s8 %v229_v47  ;;  %v281_v59 = vunpack.c.3.s8 %v229_v47 }
  0x43   :  { %434 = vmatpush.bf16.msra.mxu3 %v389_v52  ;;  %v382_v60 = vpack.c.bf16 %v342_v53, %v338_v49  ;;  %v340_v61 = vcvt.s32.f32 %v276_v54  ;;  %v344_v62 = vcvt.s32.f32 %v280_v55  ;;  %v266_v63 = vunpack.c.0.s8 %v226_v28  ;;  %v218_v52 = vld [vmem:[#allocation5] sm:$0xff] }
  0x44   :  { %v383_v0 = vpack.c.bf16 %v343_v57, %v339_v56  ;;  %v341_v1 = vcvt.s32.f32 %v277_v58  ;;  %v345_v2 = vcvt.s32.f32 %v281_v59  ;;  %v270_v3 = vunpack.c.1.s8 %v226_v28 }
  0x45   :  { %396 = vmatpush.bf16.msra.mxu0 %v382_v60  ;;  %v384_v4 = vpack.c.bf16 %v344_v62, %v340_v61  ;;  %v330_v5 = vcvt.s32.f32 %v266_v63  ;;  %v267_v6 = vunpack.c.0.s8 %v227_v37  ;;  %v271_v7 = vunpack.c.1.s8 %v227_v37  ;;  %v219_v61 = vld [vmem:[#allocation5 + $0x8] sm:$0xff] }
  0x46   :  { %409 = vmatpush.bf16.msra.mxu1 %v383_v0  ;;  %v385_v9 = vpack.c.bf16 %v345_v2, %v341_v1  ;;  %v334_v10 = vcvt.s32.f32 %v270_v3  ;;  %v268_v11 = vunpack.c.0.s8 %v228_v42  ;;  %v272_v12 = vunpack.c.1.s8 %v228_v42  ;;  %v220_v2 = vld [vmem:[#allocation5 + $0x10] sm:$0xff] }
  0x47   :  { %422 = vmatpush.bf16.msra.mxu2 %v384_v4  ;;  %v331_v13 = vcvt.s32.f32 %v267_v6  ;;  %v335_v14 = vcvt.s32.f32 %v271_v7  ;;  %v269_v15 = vunpack.c.0.s8 %v229_v47  ;;  %v273_v16 = vunpack.c.1.s8 %v229_v47  ;;  %v221_v7 = vld [vmem:[#allocation5 + $0x18] sm:$0xff] }
  0x48   :  { %435 = vmatpush.bf16.msra.mxu3 %v385_v9  ;;  %v378_v18 = vpack.c.bf16 %v334_v10, %v330_v5  ;;  %v332_v19 = vcvt.s32.f32 %v268_v11  ;;  %v336_v20 = vcvt.s32.f32 %v272_v12  ;;  %v258_v21 = vunpack.c.2.s8 %v222_v8 }
  0x49   :  { %v379_v23 = vpack.c.bf16 %v335_v14, %v331_v13  ;;  %v333_v24 = vcvt.s32.f32 %v269_v15  ;;  %v337_v25 = vcvt.s32.f32 %v273_v16  ;;  %v262_v26 = vunpack.c.3.s8 %v222_v8 }
  0x4a   :  { %397 = vmatpush.bf16.msra.mxu0 %v378_v18  ;;  %v380_v28 = vpack.c.bf16 %v336_v20, %v332_v19  ;;  %v322_v29 = vcvt.s32.f32 %v258_v21  ;;  %v259_v30 = vunpack.c.2.s8 %v223_v17  ;;  %v263_v31 = vunpack.c.3.s8 %v223_v17 }
  0x4b   :  { %410 = vmatpush.bf16.msra.mxu1 %v379_v23  ;;  %v381_v32 = vpack.c.bf16 %v337_v25, %v333_v24  ;;  %v326_v33 = vcvt.s32.f32 %v262_v26  ;;  %v260_v34 = vunpack.c.2.s8 %v224_v22  ;;  %v264_v35 = vunpack.c.3.s8 %v224_v22 }
  0x4c   :  { %423 = vmatpush.bf16.msra.mxu2 %v380_v28  ;;  %v323_v36 = vcvt.s32.f32 %v259_v30  ;;  %v327_v37 = vcvt.s32.f32 %v263_v31  ;;  %v261_v38 = vunpack.c.2.s8 %v225_v27  ;;  %v265_v39 = vunpack.c.3.s8 %v225_v27 }
  0x4d   :  { %436 = vmatpush.bf16.msra.mxu3 %v381_v32  ;;  %v374_v40 = vpack.c.bf16 %v326_v33, %v322_v29  ;;  %v324_v41 = vcvt.s32.f32 %v260_v34  ;;  %v328_v42 = vcvt.s32.f32 %v264_v35  ;;  %v250_v43 = vunpack.c.0.s8 %v222_v8  ;;  %v216_v32 = vld [vmem:[#allocation2] sm:$0xff] }
  0x4e   :  { %v375_v44 = vpack.c.bf16 %v327_v37, %v323_v36  ;;  %v325_v45 = vcvt.s32.f32 %v261_v38  ;;  %v329_v46 = vcvt.s32.f32 %v265_v39  ;;  %v254_v47 = vunpack.c.1.s8 %v222_v8  ;;  %v514_v37 = vld [vmem:[#allocation10 + $0xc0] sm:$0xff] }
  0x4f   :  { %398 = vmatpush.bf16.msra.mxu0 %v374_v40  ;;  %v376_v48 = vpack.c.bf16 %v328_v42, %v324_v41  ;;  %v314_v49 = vcvt.s32.f32 %v250_v43  ;;  %v251_v50 = vunpack.c.0.s8 %v223_v17  ;;  %v255_v51 = vunpack.c.1.s8 %v223_v17  ;;  %v546_v42 = vld [vmem:[#allocation10 + $0x1c0] sm:$0xff] }
  0x50   :  { %411 = vmatpush.bf16.msra.mxu1 %v375_v44  ;;  %v377_v53 = vpack.c.bf16 %v329_v46, %v325_v45  ;;  %v318_v54 = vcvt.s32.f32 %v254_v47  ;;  %v252_v55 = vunpack.c.0.s8 %v224_v22  ;;  %v256_v56 = vunpack.c.1.s8 %v224_v22 }
  0x51   :  { %424 = vmatpush.bf16.msra.mxu2 %v376_v48  ;;  %v315_v57 = vcvt.s32.f32 %v251_v50  ;;  %v319_v58 = vcvt.s32.f32 %v255_v51  ;;  %v253_v59 = vunpack.c.0.s8 %v225_v27  ;;  %v257_v60 = vunpack.c.1.s8 %v225_v27 }
  0x52   :  { %437 = vmatpush.bf16.msra.mxu3 %v377_v53  ;;  %v370_v62 = vpack.c.bf16 %v318_v54, %v314_v49  ;;  %v316_v63 = vcvt.s32.f32 %v252_v55  ;;  %v320_v0 = vcvt.s32.f32 %v256_v56  ;;  %v242_v1 = vunpack.c.2.s8 %v218_v52  ;;  %v578_v55 = vld [vmem:[#allocation10 + $0x2c0] sm:$0xff] }
  0x53   :  { %v371_v3 = vpack.c.bf16 %v319_v58, %v315_v57  ;;  %v317_v4 = vcvt.s32.f32 %v253_v59  ;;  %v321_v5 = vcvt.s32.f32 %v257_v60  ;;  %v246_v6 = vunpack.c.3.s8 %v218_v52 }
  0x54   :  { %399 = vmatpush.bf16.msra.mxu0 %v370_v62  ;;  %v372_v8 = vpack.c.bf16 %v320_v0, %v316_v63  ;;  %v306_v9 = vcvt.s32.f32 %v242_v1  ;;  %v243_v10 = vunpack.c.2.s8 %v219_v61  ;;  %v247_v11 = vunpack.c.3.s8 %v219_v61  ;;  %v610_v0 = vld [vmem:[#allocation10 + $0x3c0] sm:$0xff] }
  0x55   :  { %412 = vmatpush.bf16.msra.mxu1 %v371_v3  ;;  %v373_v12 = vpack.c.bf16 %v321_v5, %v317_v4  ;;  %v310_v13 = vcvt.s32.f32 %v246_v6  ;;  %v244_v14 = vunpack.c.2.s8 %v220_v2  ;;  %v248_v15 = vunpack.c.3.s8 %v220_v2  ;;  %v506_v5 = vld [vmem:[#allocation10 + $0x80] sm:$0xff] }
  0x56   :  { %425 = vmatpush.bf16.msra.mxu2 %v372_v8  ;;  %v307_v16 = vcvt.s32.f32 %v243_v10  ;;  %v311_v17 = vcvt.s32.f32 %v247_v11  ;;  %v245_v18 = vunpack.c.2.s8 %v221_v7  ;;  %v249_v19 = vunpack.c.3.s8 %v221_v7  ;;  %v538_v10 = vld [vmem:[#allocation10 + $0x180] sm:$0xff] }
  0x57   :  { %438 = vmatpush.bf16.msra.mxu3 %v373_v12  ;;  %v366_v20 = vpack.c.bf16 %v310_v13, %v306_v9  ;;  %v308_v21 = vcvt.s32.f32 %v244_v14  ;;  %v312_v22 = vcvt.s32.f32 %v248_v15  ;;  %v234_v23 = vunpack.c.0.s8 %v218_v52 }
  0x58   :  { %v367_v24 = vpack.c.bf16 %v311_v17, %v307_v16  ;;  %v309_v25 = vcvt.s32.f32 %v245_v18  ;;  %v313_v26 = vcvt.s32.f32 %v249_v19  ;;  %v238_v27 = vunpack.c.1.s8 %v218_v52 }
  0x59   :  { %400 = vmatpush.bf16.msra.mxu0 %v366_v20  ;;  %v368_v28 = vpack.c.bf16 %v312_v22, %v308_v21  ;;  %v298_v29 = vcvt.s32.f32 %v234_v23  ;;  %v235_v30 = vunpack.c.0.s8 %v219_v61  ;;  %v239_v31 = vunpack.c.1.s8 %v219_v61 }
  0x5a   :  { %413 = vmatpush.bf16.msra.mxu1 %v367_v24  ;;  %v369_v33 = vpack.c.bf16 %v313_v26, %v309_v25  ;;  %v302_v34 = vcvt.s32.f32 %v238_v27  ;;  %v236_v35 = vunpack.c.0.s8 %v220_v2  ;;  %v240_v36 = vunpack.c.1.s8 %v220_v2 }
  0x5b   :  { %426 = vmatpush.bf16.msra.mxu2 %v368_v28  ;;  %v299_v38 = vcvt.s32.f32 %v235_v30  ;;  %v303_v39 = vcvt.s32.f32 %v239_v31  ;;  %v237_v40 = vunpack.c.0.s8 %v221_v7  ;;  %v241_v41 = vunpack.c.1.s8 %v221_v7 }
  0x5c   :  { %439 = vmatpush.bf16.msra.mxu3 %v369_v33  ;;  %v362_v43 = vpack.c.bf16 %v302_v34, %v298_v29  ;;  %v300_v44 = vcvt.s32.f32 %v236_v35  ;;  %v304_v45 = vcvt.s32.f32 %v240_v36  ;;  %v217_v46 = vpack.c.bf16 %v216_v32, %v216_v32  ;;  %v570_v35 = vld [vmem:[#allocation10 + $0x280] sm:$0xff] }
  0x5d   :  { %v363_v47 = vpack.c.bf16 %v303_v39, %v299_v38  ;;  %v301_v48 = vcvt.s32.f32 %v237_v40  ;;  %v305_v49 = vcvt.s32.f32 %v241_v41  ;;  %v730_v50 = vunpack.c.2.s8 %v514_v37 }
  0x5e   :  { %401 = vmatpush.bf16.msra.mxu0 %v362_v43  ;;  %v364_v51 = vpack.c.bf16 %v304_v45, %v300_v44  ;;  %v738_v52 = vunpack.c.3.s8 %v514_v37  ;;  %v858_v53 = vunpack.c.2.s8 %v546_v42  ;;  %v866_v54 = vunpack.c.3.s8 %v546_v42  ;;  %v602_v44 = vld [vmem:[#allocation10 + $0x380] sm:$0xff] }
  0x5f   :  { %414 = vmatpush.bf16.msra.mxu1 %v363_v47  ;;  %v365_v56 = vpack.c.bf16 %v305_v49, %v301_v48  ;;  %v1242_v57 = vcvt.s32.f32 %v730_v50  ;;  %v714_v58 = vunpack.c.0.s8 %v514_v37  ;;  %v722_v59 = vunpack.c.1.s8 %v514_v37  ;;  %v498_v49 = vld [vmem:[#allocation10 + $0x40] sm:$0xff] }
  0x60   :  { %427 = vmatpush.bf16.msra.mxu2 %v364_v51  ;;  %v1250_v60 = vcvt.s32.f32 %v738_v52  ;;  %v1370_v61 = vcvt.s32.f32 %v858_v53  ;;  %v1378_v62 = vcvt.s32.f32 %v866_v54  ;;  %v842_v63 = vunpack.c.0.s8 %v546_v42  ;;  %v530_v54 = vld [vmem:[#allocation10 + $0x140] sm:$0xff] }
  0x61   :  { %440 = vmatpush.bf16.msra.mxu3 %v365_v56  ;;  %402 = vmatmul.bf16.vlgmr.msra.gmra.mxu0 %v217_v46  ;;  %v1226_v1 = vcvt.s32.f32 %v714_v58  ;;  %v1234_v2 = vcvt.s32.f32 %v722_v59  ;;  %v850_v3 = vunpack.c.1.s8 %v546_v42  ;;  %v986_v4 = vunpack.c.2.s8 %v578_v55 }
  0x62   :  { %415 = vmatmul.bf16.vlgmr.msra.gmra.mxu1 %v217_v46  ;;  %v1698_v6 = vpack.c.bf16 %v1250_v60, %v1242_v57  ;;  %v1762_v7 = vpack.c.bf16 %v1378_v62, %v1370_v61  ;;  %v1354_v8 = vcvt.s32.f32 %v842_v63  ;;  %v994_v9 = vunpack.c.3.s8 %v578_v55 }
  0x63   :  { %428 = vmatmul.bf16.vlgmr.msra.gmra.mxu2 %v217_v46  ;;  %v1690_v11 = vpack.c.bf16 %v1234_v2, %v1226_v1  ;;  %v1362_v12 = vcvt.s32.f32 %v850_v3  ;;  %v1498_v13 = vcvt.s32.f32 %v986_v4  ;;  %v1114_v14 = vunpack.c.2.s8 %v610_v0 }
  0x64   :  { %441 = vmatmul.bf16.vlgmr.msra.gmra.mxu3 %v217_v46  ;;  %1898 = vmatpush.bf16.msrb.mxu0 %v1698_v6  ;;  %v1506_v15 = vcvt.s32.f32 %v994_v9  ;;  %v1122_v16 = vunpack.c.3.s8 %v610_v0  ;;  %v698_v17 = vunpack.c.2.s8 %v506_v5  ;;  %v706_v18 = vunpack.c.3.s8 %v506_v5 }
  0x65   :  { %1911 = vmatpush.bf16.msrb.mxu1 %v1762_v7  ;;  %v1754_v19 = vpack.c.bf16 %v1362_v12, %v1354_v8  ;;  %v1626_v20 = vcvt.s32.f32 %v1114_v14  ;;  %v826_v21 = vunpack.c.2.s8 %v538_v10  ;;  %v834_v22 = vunpack.c.3.s8 %v538_v10 }
  0x66   :  { %v1826_v23 = vpack.c.bf16 %v1506_v15, %v1498_v13  ;;  %v1634_v24 = vcvt.s32.f32 %v1122_v16  ;;  %v1210_v25 = vcvt.s32.f32 %v698_v17  ;;  %v1218_v26 = vcvt.s32.f32 %v706_v18 }
  0x67   :  { %v1338_v27 = vcvt.s32.f32 %v826_v21  ;;  %v1346_v28 = vcvt.s32.f32 %v834_v22  ;;  %v970_v29 = vunpack.c.0.s8 %v578_v55  ;;  %v978_v30 = vunpack.c.1.s8 %v578_v55 }
  0x68   :  { %1899 = vmatpush.bf16.msrb.mxu0 %v1690_v11  ;;  %1924 = vmatpush.bf16.msrb.mxu2 %v1826_v23  ;;  %v1890_v31 = vpack.c.bf16 %v1634_v24, %v1626_v20  ;;  %v1682_v32 = vpack.c.bf16 %v1218_v26, %v1210_v25  ;;  %v1098_v33 = vunpack.c.0.s8 %v610_v0  ;;  %v1106_v34 = vunpack.c.1.s8 %v610_v0  ;;  %v594_v24 = vld [vmem:[#allocation10 + $0x340] sm:$0xff] }
  0x69   :  { %1912 = vmatpush.bf16.msrb.mxu1 %v1754_v19  ;;  %v1746_v36 = vpack.c.bf16 %v1346_v28, %v1338_v27  ;;  %v1482_v37 = vcvt.s32.f32 %v970_v29  ;;  %v1490_v38 = vcvt.s32.f32 %v978_v30  ;;  %v682_v39 = vunpack.c.0.s8 %v506_v5  ;;  %v562_v19 = vld [vmem:[#allocation10 + $0x240] sm:$0xff] }
  0x6a   :  { %1937 = vmatpush.bf16.msrb.mxu3 %v1890_v31  ;;  %v1610_v40 = vcvt.s32.f32 %v1098_v33  ;;  %v1618_v41 = vcvt.s32.f32 %v1106_v34  ;;  %v690_v42 = vunpack.c.1.s8 %v506_v5  ;;  %v810_v43 = vunpack.c.0.s8 %v538_v10  ;;  %v490_v29 = vld [vmem:[#allocation10] sm:$0xff] }
  0x6b   :  { %v1818_v45 = vpack.c.bf16 %v1490_v38, %v1482_v37  ;;  %v1194_v46 = vcvt.s32.f32 %v682_v39  ;;  %v818_v47 = vunpack.c.1.s8 %v538_v10  ;;  %v954_v48 = vunpack.c.2.s8 %v570_v35  ;;  %v522_v34 = vld [vmem:[#allocation10 + $0x100] sm:$0xff] }
  0x6c   :  { %1900 = vmatpush.bf16.msrb.mxu0 %v1682_v32  ;;  %v1882_v50 = vpack.c.bf16 %v1618_v41, %v1610_v40  ;;  %v1202_v51 = vcvt.s32.f32 %v690_v42  ;;  %v1322_v52 = vcvt.s32.f32 %v810_v43  ;;  %v962_v53 = vunpack.c.3.s8 %v570_v35 }
  0x6d   :  { %1913 = vmatpush.bf16.msrb.mxu1 %v1746_v36  ;;  %1925 = vmatpush.bf16.msrb.mxu2 %v1818_v45  ;;  %v1330_v55 = vcvt.s32.f32 %v818_v47  ;;  %v1466_v56 = vcvt.s32.f32 %v954_v48  ;;  %v1082_v57 = vunpack.c.2.s8 %v602_v44  ;;  %v1090_v58 = vunpack.c.3.s8 %v602_v44 }
  0x6e   :  { %1938 = vmatpush.bf16.msrb.mxu3 %v1882_v50  ;;  %v1674_v59 = vpack.c.bf16 %v1202_v51, %v1194_v46  ;;  %v1474_v60 = vcvt.s32.f32 %v962_v53  ;;  %v666_v61 = vunpack.c.2.s8 %v498_v49  ;;  %v674_v62 = vunpack.c.3.s8 %v498_v49 }
  0x6f   :  { %v1738_v63 = vpack.c.bf16 %v1330_v55, %v1322_v52  ;;  %v1594_v0 = vcvt.s32.f32 %v1082_v57  ;;  %v1602_v1 = vcvt.s32.f32 %v1090_v58  ;;  %v794_v2 = vunpack.c.2.s8 %v530_v54 }
  0x70   :  { %1901 = vmatpush.bf16.msrb.mxu0 %v1674_v59  ;;  %v1810_v3 = vpack.c.bf16 %v1474_v60, %v1466_v56  ;;  %v1178_v4 = vcvt.s32.f32 %v666_v61  ;;  %v1186_v5 = vcvt.s32.f32 %v674_v62  ;;  %v802_v6 = vunpack.c.3.s8 %v530_v54 }
  0x71   :  { %1914 = vmatpush.bf16.msrb.mxu1 %v1738_v63  ;;  %v1874_v7 = vpack.c.bf16 %v1602_v1, %v1594_v0  ;;  %v1306_v8 = vcvt.s32.f32 %v794_v2  ;;  %v938_v9 = vunpack.c.0.s8 %v570_v35  ;;  %v946_v10 = vunpack.c.1.s8 %v570_v35  ;;  %v515_v63 = vld [vmem:[#allocation10 + $0xc8] sm:$0xff] }
  0x72   :  { %1926 = vmatpush.bf16.msrb.mxu2 %v1810_v3  ;;  %v1666_v11 = vpack.c.bf16 %v1186_v5, %v1178_v4  ;;  %v1314_v12 = vcvt.s32.f32 %v802_v6  ;;  %v1066_v13 = vunpack.c.0.s8 %v602_v44  ;;  %v1074_v14 = vunpack.c.1.s8 %v602_v44  ;;  %v547_v4 = vld [vmem:[#allocation10 + $0x1c8] sm:$0xff] }
  0x73   :  { %1939 = vmatpush.bf16.msrb.mxu3 %v1874_v7  ;;  %v1450_v15 = vcvt.s32.f32 %v938_v9  ;;  %v1458_v16 = vcvt.s32.f32 %v946_v10  ;;  %v650_v17 = vunpack.c.0.s8 %v498_v49  ;;  %v658_v18 = vunpack.c.1.s8 %v498_v49  ;;  %v554_v9 = vld [vmem:[#allocation10 + $0x200] sm:$0xff] }
  0x74   :  { %1902 = vmatpush.bf16.msrb.mxu0 %v1666_v11  ;;  %v1730_v20 = vpack.c.bf16 %v1314_v12, %v1306_v8  ;;  %v1578_v21 = vcvt.s32.f32 %v1066_v13  ;;  %v1586_v22 = vcvt.s32.f32 %v1074_v14  ;;  %v778_v23 = vunpack.c.0.s8 %v530_v54  ;;  %v586_v14 = vld [vmem:[#allocation10 + $0x300] sm:$0xff] }
  0x75   :  { %v1802_v25 = vpack.c.bf16 %v1458_v16, %v1450_v15  ;;  %v1162_v26 = vcvt.s32.f32 %v650_v17  ;;  %v1170_v27 = vcvt.s32.f32 %v658_v18  ;;  %v786_v28 = vunpack.c.1.s8 %v530_v54 }
  0x76   :  { %1915 = vmatpush.bf16.msrb.mxu1 %v1730_v20  ;;  %v1866_v30 = vpack.c.bf16 %v1586_v22, %v1578_v21  ;;  %v1290_v31 = vcvt.s32.f32 %v778_v23  ;;  %v922_v32 = vunpack.c.2.s8 %v562_v19  ;;  %v930_v33 = vunpack.c.3.s8 %v562_v19 }
  0x77   :  { %1927 = vmatpush.bf16.msrb.mxu2 %v1802_v25  ;;  %v1658_v35 = vpack.c.bf16 %v1170_v27, %v1162_v26  ;;  %v1298_v36 = vcvt.s32.f32 %v786_v28  ;;  %v1050_v37 = vunpack.c.2.s8 %v594_v24  ;;  %v1058_v38 = vunpack.c.3.s8 %v594_v24 }
  0x78   :  { %1940 = vmatpush.bf16.msrb.mxu3 %v1866_v30  ;;  %v1434_v39 = vcvt.s32.f32 %v922_v32  ;;  %v1442_v40 = vcvt.s32.f32 %v930_v33  ;;  %v634_v41 = vunpack.c.2.s8 %v490_v29  ;;  %v642_v42 = vunpack.c.3.s8 %v490_v29 }
  0x79   :  { %1903 = vmatpush.bf16.msrb.mxu0 %v1658_v35  ;;  %v1722_v43 = vpack.c.bf16 %v1298_v36, %v1290_v31  ;;  %v1562_v44 = vcvt.s32.f32 %v1050_v37  ;;  %v1570_v45 = vcvt.s32.f32 %v1058_v38  ;;  %v762_v46 = vunpack.c.2.s8 %v522_v34 }
  0x7a   :  { %v1794_v47 = vpack.c.bf16 %v1442_v40, %v1434_v39  ;;  %v1146_v48 = vcvt.s32.f32 %v634_v41  ;;  %v1154_v49 = vcvt.s32.f32 %v642_v42  ;;  %v770_v50 = vunpack.c.3.s8 %v522_v34 }
  0x7b   :  { %1916 = vmatpush.bf16.msrb.mxu1 %v1722_v43  ;;  %v1858_v51 = vpack.c.bf16 %v1570_v45, %v1562_v44  ;;  %v1274_v52 = vcvt.s32.f32 %v762_v46  ;;  %v906_v53 = vunpack.c.0.s8 %v562_v19  ;;  %v914_v54 = vunpack.c.1.s8 %v562_v19  ;;  %v579_v43 = vld [vmem:[#allocation10 + $0x2c8] sm:$0xff] }
  0x7c   :  { %1928 = vmatpush.bf16.msrb.mxu2 %v1794_v47  ;;  %v1650_v55 = vpack.c.bf16 %v1154_v49, %v1146_v48  ;;  %v1282_v56 = vcvt.s32.f32 %v770_v50  ;;  %v1034_v57 = vunpack.c.0.s8 %v594_v24  ;;  %v1042_v58 = vunpack.c.1.s8 %v594_v24  ;;  %v611_v48 = vld [vmem:[#allocation10 + $0x3c8] sm:$0xff] }
  0x7d   :  { %1941 = vmatpush.bf16.msrb.mxu3 %v1858_v51  ;;  %v1418_v59 = vcvt.s32.f32 %v906_v53  ;;  %v1426_v60 = vcvt.s32.f32 %v914_v54  ;;  %v618_v61 = vunpack.c.0.s8 %v490_v29  ;;  %v626_v62 = vunpack.c.1.s8 %v490_v29  ;;  %v507_v53 = vld [vmem:[#allocation10 + $0x88] sm:$0xff] }
  0x7e   :  { %1904 = vmatpush.bf16.msrb.mxu0 %v1650_v55  ;;  %v1714_v0 = vpack.c.bf16 %v1282_v56, %v1274_v52  ;;  %v1546_v1 = vcvt.s32.f32 %v1034_v57  ;;  %v1554_v2 = vcvt.s32.f32 %v1042_v58  ;;  %v746_v3 = vunpack.c.0.s8 %v522_v34  ;;  %v539_v58 = vld [vmem:[#allocation10 + $0x188] sm:$0xff] }
  0x7f   :  { %v1786_v5 = vpack.c.bf16 %v1426_v60, %v1418_v59  ;;  %v1130_v6 = vcvt.s32.f32 %v618_v61  ;;  %v1138_v7 = vcvt.s32.f32 %v626_v62  ;;  %v754_v8 = vunpack.c.1.s8 %v522_v34 }
  0x80   :  { %1917 = vmatpush.bf16.msrb.mxu1 %v1714_v0  ;;  %v1850_v10 = vpack.c.bf16 %v1554_v2, %v1546_v1  ;;  %v1258_v11 = vcvt.s32.f32 %v746_v3  ;;  %v731_v12 = vunpack.c.2.s8 %v515_v63  ;;  %v739_v13 = vunpack.c.3.s8 %v515_v63 }
  0x81   :  { %1929 = vmatpush.bf16.msrb.mxu2 %v1786_v5  ;;  %v1642_v15 = vpack.c.bf16 %v1138_v7, %v1130_v6  ;;  %v1266_v16 = vcvt.s32.f32 %v754_v8  ;;  %v859_v17 = vunpack.c.2.s8 %v547_v4  ;;  %v867_v18 = vunpack.c.3.s8 %v547_v4 }
  0x82   :  { %1942 = vmatpush.bf16.msrb.mxu3 %v1850_v10  ;;  %v1243_v19 = vcvt.s32.f32 %v731_v12  ;;  %v1251_v20 = vcvt.s32.f32 %v739_v13  ;;  %v890_v21 = vunpack.c.2.s8 %v554_v9  ;;  %v898_v22 = vunpack.c.3.s8 %v554_v9 }
  0x83   :  { %1905 = vmatpush.bf16.msrb.mxu0 %v1642_v15  ;;  %v1706_v23 = vpack.c.bf16 %v1266_v16, %v1258_v11  ;;  %v1371_v24 = vcvt.s32.f32 %v859_v17  ;;  %v1379_v25 = vcvt.s32.f32 %v867_v18  ;;  %v1018_v26 = vunpack.c.2.s8 %v586_v14 }
  0x84   :  { %v1699_v27 = vpack.c.bf16 %v1251_v20, %v1243_v19  ;;  %v1402_v28 = vcvt.s32.f32 %v890_v21  ;;  %v1410_v29 = vcvt.s32.f32 %v898_v22  ;;  %v1026_v30 = vunpack.c.3.s8 %v586_v14 }
  0x85   :  { %1918 = vmatpush.bf16.msrb.mxu1 %v1706_v23  ;;  %v1763_v31 = vpack.c.bf16 %v1379_v25, %v1371_v24  ;;  %v1530_v32 = vcvt.s32.f32 %v1018_v26  ;;  %v715_v33 = vunpack.c.0.s8 %v515_v63  ;;  %v723_v34 = vunpack.c.1.s8 %v515_v63  ;;  %v571_v23 = vld [vmem:[#allocation10 + $0x288] sm:$0xff] }
  0x86   :  { %v1778_v35 = vpack.c.bf16 %v1410_v29, %v1402_v28  ;;  %v1538_v36 = vcvt.s32.f32 %v1026_v30  ;;  %v843_v37 = vunpack.c.0.s8 %v547_v4  ;;  %v851_v38 = vunpack.c.1.s8 %v547_v4  ;;  %v603_v28 = vld [vmem:[#allocation10 + $0x388] sm:$0xff] }
  0x87   :  { %1950 = vmatpush.bf16.msra.mxu0 %v1699_v27  ;;  %v1227_v39 = vcvt.s32.f32 %v715_v33  ;;  %v1235_v40 = vcvt.s32.f32 %v723_v34  ;;  %v874_v41 = vunpack.c.0.s8 %v554_v9  ;;  %v882_v42 = vunpack.c.1.s8 %v554_v9  ;;  %v499_v33 = vld [vmem:[#allocation10 + $0x48] sm:$0xff] }
  0x88   :  { %1930 = vmatpush.bf16.msrb.mxu2 %v1778_v35  ;;  %v1842_v44 = vpack.c.bf16 %v1538_v36, %v1530_v32  ;;  %v1355_v45 = vcvt.s32.f32 %v843_v37  ;;  %v1363_v46 = vcvt.s32.f32 %v851_v38  ;;  %v1002_v47 = vunpack.c.0.s8 %v586_v14  ;;  %v531_v38 = vld [vmem:[#allocation10 + $0x148] sm:$0xff] }
  0x89   :  { %1963 = vmatpush.bf16.msra.mxu1 %v1763_v31  ;;  %v1691_v49 = vpack.c.bf16 %v1235_v40, %v1227_v39  ;;  %v1386_v50 = vcvt.s32.f32 %v874_v41  ;;  %v1394_v51 = vcvt.s32.f32 %v882_v42  ;;  %v1010_v52 = vunpack.c.1.s8 %v586_v14 }
  0x8a   :  { %1943 = vmatpush.bf16.msrb.mxu3 %v1842_v44  ;;  %v1755_v54 = vpack.c.bf16 %v1363_v46, %v1355_v45  ;;  %v1514_v55 = vcvt.s32.f32 %v1002_v47  ;;  %v987_v56 = vunpack.c.2.s8 %v579_v43  ;;  %v995_v57 = vunpack.c.3.s8 %v579_v43 }
  0x8b   :  { %1951 = vmatpush.bf16.msra.mxu0 %v1691_v49  ;;  %v1770_v59 = vpack.c.bf16 %v1394_v51, %v1386_v50  ;;  %v1522_v60 = vcvt.s32.f32 %v1010_v52  ;;  %v1115_v61 = vunpack.c.2.s8 %v611_v48  ;;  %v1123_v62 = vunpack.c.3.s8 %v611_v48 }
  0x8c   :  { %v1499_v63 = vcvt.s32.f32 %v987_v56  ;;  %v1507_v0 = vcvt.s32.f32 %v995_v57  ;;  %v699_v1 = vunpack.c.2.s8 %v507_v53  ;;  %v707_v2 = vunpack.c.3.s8 %v507_v53 }
  0x8d   :  { %1964 = vmatpush.bf16.msra.mxu1 %v1755_v54  ;;  %1931 = vmatpush.bf16.msrb.mxu2 %v1770_v59  ;;  %v1834_v3 = vpack.c.bf16 %v1522_v60, %v1514_v55  ;;  %v1627_v4 = vcvt.s32.f32 %v1115_v61  ;;  %v1635_v5 = vcvt.s32.f32 %v1123_v62  ;;  %v827_v6 = vunpack.c.2.s8 %v539_v58 }
  0x8e   :  { %v1827_v7 = vpack.c.bf16 %v1507_v0, %v1499_v63  ;;  %v1211_v8 = vcvt.s32.f32 %v699_v1  ;;  %v1219_v9 = vcvt.s32.f32 %v707_v2  ;;  %v835_v10 = vunpack.c.3.s8 %v539_v58 }
  0x8f   :  { %1944 = vmatpush.bf16.msrb.mxu3 %v1834_v3  ;;  %v1891_v11 = vpack.c.bf16 %v1635_v5, %v1627_v4  ;;  %v1339_v12 = vcvt.s32.f32 %v827_v6  ;;  %v971_v13 = vunpack.c.0.s8 %v579_v43  ;;  %v979_v14 = vunpack.c.1.s8 %v579_v43 }
  0x90   :  { %v1683_v15 = vpack.c.bf16 %v1219_v9, %v1211_v8  ;;  %v1347_v16 = vcvt.s32.f32 %v835_v10  ;;  %v1099_v17 = vunpack.c.0.s8 %v611_v48  ;;  %v1107_v18 = vunpack.c.1.s8 %v611_v48  ;;  %v563_v10 = vld [vmem:[#allocation10 + $0x248] sm:$0xff] }
  0x91   :  { %1976 = vmatpush.bf16.msra.mxu2 %v1827_v7  ;;  %v1483_v19 = vcvt.s32.f32 %v971_v13  ;;  %v1491_v20 = vcvt.s32.f32 %v979_v14  ;;  %v683_v21 = vunpack.c.0.s8 %v507_v53  ;;  %v691_v22 = vunpack.c.1.s8 %v507_v53 }
  0x92   :  { %1952 = vmatpush.bf16.msra.mxu0 %v1683_v15  ;;  %v1747_v24 = vpack.c.bf16 %v1347_v16, %v1339_v12  ;;  %v1611_v25 = vcvt.s32.f32 %v1099_v17  ;;  %v1619_v26 = vcvt.s32.f32 %v1107_v18  ;;  %v811_v27 = vunpack.c.0.s8 %v539_v58  ;;  %v7799_v12 = vld [vmem:[#allocation7] sm:$0xf]  ;;  %v7802_v18 = vld [vmem:[#allocation8] sm:$0xf] }
  0x93   :  { %1989 = vmatpush.bf16.msra.mxu3 %v1891_v11  ;;  %v1819_v29 = vpack.c.bf16 %v1491_v20, %v1483_v19  ;;  %v1195_v30 = vcvt.s32.f32 %v683_v21  ;;  %v1203_v31 = vcvt.s32.f32 %v691_v22  ;;  %v819_v32 = vunpack.c.1.s8 %v539_v58  ;;  %v595_v11 = vld [vmem:[#allocation10 + $0x348] sm:$0xff] }
  0x94   :  { %1965 = vmatpush.bf16.msra.mxu1 %v1747_v24  ;;  %v1883_v34 = vpack.c.bf16 %v1619_v26, %v1611_v25  ;;  %v1323_v35 = vcvt.s32.f32 %v811_v27  ;;  %v955_v36 = vunpack.c.2.s8 %v571_v23  ;;  %v963_v37 = vunpack.c.3.s8 %v571_v23  ;;  %v491_v22 = vld [vmem:[#allocation10 + $0x8] sm:$0xff] }
  0x95   :  { %1977 = vmatpush.bf16.msra.mxu2 %v1819_v29  ;;  %v1675_v39 = vpack.c.bf16 %v1203_v31, %v1195_v30  ;;  %v1331_v40 = vcvt.s32.f32 %v819_v32  ;;  %v1083_v41 = vunpack.c.2.s8 %v603_v28  ;;  %v1091_v42 = vunpack.c.3.s8 %v603_v28 }
  0x96   :  { %v1467_v43 = vcvt.s32.f32 %v955_v36  ;;  %v1475_v44 = vcvt.s32.f32 %v963_v37  ;;  %v667_v45 = vunpack.c.2.s8 %v499_v33  ;;  %v675_v46 = vunpack.c.3.s8 %v499_v33 }
  0x97   :  { %1990 = vmatpush.bf16.msra.mxu3 %v1883_v34  ;;  %1953 = vmatpush.bf16.msra.mxu0 %v1675_v39  ;;  %v1739_v47 = vpack.c.bf16 %v1331_v40, %v1323_v35  ;;  %v1595_v48 = vcvt.s32.f32 %v1083_v41  ;;  %v1603_v49 = vcvt.s32.f32 %v1091_v42  ;;  %v795_v50 = vunpack.c.2.s8 %v531_v38 }
  0x98   :  { %v1811_v51 = vpack.c.bf16 %v1475_v44, %v1467_v43  ;;  %v1179_v52 = vcvt.s32.f32 %v667_v45  ;;  %v1187_v53 = vcvt.s32.f32 %v675_v46  ;;  %v803_v54 = vunpack.c.3.s8 %v531_v38 }
  0x99   :  { %1966 = vmatpush.bf16.msra.mxu1 %v1739_v47  ;;  %v1875_v55 = vpack.c.bf16 %v1603_v49, %v1595_v48  ;;  %v1307_v56 = vcvt.s32.f32 %v795_v50  ;;  %v939_v57 = vunpack.c.0.s8 %v571_v23  ;;  %v947_v58 = vunpack.c.1.s8 %v571_v23  ;;  %v523_v23 = vld [vmem:[#allocation10 + $0x108] sm:$0xff] }
  0x9a   :  { %1978 = vmatpush.bf16.msra.mxu2 %v1811_v51  ;;  %v1667_v59 = vpack.c.bf16 %v1187_v53, %v1179_v52  ;;  %v1315_v60 = vcvt.s32.f32 %v803_v54  ;;  %v1067_v61 = vunpack.c.0.s8 %v603_v28  ;;  %v1075_v62 = vunpack.c.1.s8 %v603_v28  ;;  %v516_v52 = vld [vmem:[#allocation10 + $0xd0] sm:$0xff] }
  0x9b   :  { %1991 = vmatpush.bf16.msra.mxu3 %v1875_v55  ;;  %v1451_v63 = vcvt.s32.f32 %v939_v57  ;;  %v1459_v0 = vcvt.s32.f32 %v947_v58  ;;  %v651_v6 = vunpack.c.0.s8 %v499_v33  ;;  %v659_v7 = vunpack.c.1.s8 %v499_v33  ;;  %v548_v57 = vld [vmem:[#allocation10 + $0x1d0] sm:$0xff] }
  0x9c   :  { %1954 = vmatpush.bf16.msra.mxu0 %v1667_v59  ;;  %v1731_v1 = vpack.c.bf16 %v1315_v60, %v1307_v56  ;;  %v1579_v2 = vcvt.s32.f32 %v1067_v61  ;;  %v1587_v3 = vcvt.s32.f32 %v1075_v62  ;;  %v779_v8 = vunpack.c.0.s8 %v531_v38 }
  0x9d   :  { %v1803_v4 = vpack.c.bf16 %v1459_v0, %v1451_v63  ;;  %v787_v9 = vunpack.c.1.s8 %v531_v38  ;;  %v1163_v13 = vcvt.s32.f32 %v651_v6  ;;  %v1171_v14 = vcvt.s32.f32 %v659_v7  ;;  %v555_v6 = vld [vmem:[#allocation10 + $0x208] sm:$0xff] }
  0x9e   :  { %1967 = vmatpush.bf16.msra.mxu1 %v1731_v1  ;;  %v1867_v5 = vpack.c.bf16 %v1587_v3, %v1579_v2  ;;  %v1291_v15 = vcvt.s32.f32 %v779_v8  ;;  %v448_v17 = vperm.slane %v7799_v12, 0  ;;  %v923_v19 = vunpack.c.2.s8 %v563_v10  ;;  %v587_v7 = vld [vmem:[#allocation10 + $0x308] sm:$0xff] }
  0x9f   :  { %1979 = vmatpush.bf16.msra.mxu2 %v1803_v4  ;;  %v1299_v16 = vcvt.s32.f32 %v787_v9  ;;  %v931_v20 = vunpack.c.3.s8 %v563_v10  ;;  %v1051_v21 = vunpack.c.2.s8 %v595_v11  ;;  %v462_v24 = vperm.slane %v7802_v18, 0 }
  0xa0   :  { %1992 = vmatpush.bf16.msra.mxu3 %v1867_v5  ;;  %v449_v25 = vperm.slane %v7799_v12, 1  ;;  %v1659_v26 = vpack.c.bf16 %v1171_v14, %v1163_v13  ;;  %v1435_v28 = vcvt.s32.f32 %v923_v19  ;;  %v1059_v30 = vunpack.c.3.s8 %v595_v11 }
  0xa1   :  { %v1723_v27 = vpack.c.bf16 %v1299_v16, %v1291_v15  ;;  %v1443_v29 = vcvt.s32.f32 %v931_v20  ;;  %v1563_v31 = vcvt.s32.f32 %v1051_v21  ;;  %v463_v32 = vperm.slane %v7802_v18, 1 }
  0xa2   :  { %1955 = vmatpush.bf16.msra.mxu0 %v1659_v26  ;;  %v635_v33 = vunpack.c.2.s8 %v491_v22  ;;  %v643_v34 = vunpack.c.3.s8 %v491_v22  ;;  %v763_v35 = vunpack.c.2.s8 %v523_v23  ;;  %v1571_v37 = vcvt.s32.f32 %v1059_v30 }
  0xa3   :  { %1968 = vmatpush.bf16.msra.mxu1 %v1723_v27  ;;  %v1795_v36 = vpack.c.bf16 %v1443_v29, %v1435_v28  ;;  %v771_v38 = vunpack.c.3.s8 %v523_v23  ;;  %v907_v39 = vunpack.c.0.s8 %v563_v10  ;;  %v915_v43 = vunpack.c.1.s8 %v563_v10 }
  0xa4   :  { %v1147_v40 = vcvt.s32.f32 %v635_v33  ;;  %v1155_v41 = vcvt.s32.f32 %v643_v34  ;;  %v1275_v42 = vcvt.s32.f32 %v763_v35  ;;  %v1859_v44 = vpack.c.bf16 %v1571_v37, %v1563_v31 }
  0xa5   :  { %1980 = vmatpush.bf16.msra.mxu2 %v1795_v36  ;;  %v1283_v45 = vcvt.s32.f32 %v771_v38  ;;  %v1419_v46 = vcvt.s32.f32 %v907_v39  ;;  %v1035_v47 = vunpack.c.0.s8 %v595_v11  ;;  %v450_v49 = vperm.slane %v7799_v12, 2 }
  0xa6   :  { %v1651_v48 = vpack.c.bf16 %v1155_v41, %v1147_v40  ;;  %v451_v50 = vperm.slane %v7799_v12, 3  ;;  %v1427_v51 = vcvt.s32.f32 %v915_v43  ;;  %1993 = vmatpush.bf16.msra.mxu3 %v1859_v44  ;;  %v464_v54 = vperm.slane %v7802_v18, 2 }
  0xa7   :  { %v1715_v53 = vpack.c.bf16 %v1283_v45, %v1275_v42  ;;  %v1043_v55 = vunpack.c.1.s8 %v595_v11  ;;  %v1547_v56 = vcvt.s32.f32 %v1035_v47  ;;  %v465_v58 = vperm.slane %v7802_v18, 3  ;;  %v580_v42 = vld [vmem:[#allocation10 + $0x2d0] sm:$0xff] }
  0xa8   :  { %1956 = vmatpush.bf16.msra.mxu0 %v1651_v48  ;;  %v1787_v59 = vpack.c.bf16 %v1427_v51, %v1419_v46  ;;  %v619_v60 = vunpack.c.0.s8 %v491_v22  ;;  %v627_v61 = vunpack.c.1.s8 %v491_v22  ;;  %v747_v63 = vunpack.c.0.s8 %v523_v23  ;;  %v612_v47 = vld [vmem:[#allocation10 + $0x3d0] sm:$0xff] }
  0xa9   :  { %1969 = vmatpush.bf16.msra.mxu1 %v1715_v53  ;;  %v1555_v62 = vcvt.s32.f32 %v1043_v55  ;;  %v755_v0 = vunpack.c.1.s8 %v523_v23  ;;  %v732_v1 = vunpack.c.2.s8 %v516_v52  ;;  %v740_v4 = vunpack.c.3.s8 %v516_v52  ;;  %v508_v55 = vld [vmem:[#allocation10 + $0x90] sm:$0xff] }
  0xaa   :  { %1981 = vmatpush.bf16.msra.mxu2 %v1787_v59  ;;  %v1131_v2 = vcvt.s32.f32 %v619_v60  ;;  %v1139_v3 = vcvt.s32.f32 %v627_v61  ;;  %v860_v5 = vunpack.c.2.s8 %v548_v57  ;;  %v1259_v9 = vcvt.s32.f32 %v747_v63 }
  0xab   :  { %v1851_v8 = vpack.c.bf16 %v1555_v62, %v1547_v56  ;;  %v1267_v10 = vcvt.s32.f32 %v755_v0  ;;  %v7811_v11 = vcvt.s32.f32 %v732_v1  ;;  %v7813_v14 = vcvt.s32.f32 %v740_v4  ;;  %v540_v1 = vld [vmem:[#allocation10 + $0x190] sm:$0xff] }
  0xac   :  { %v1643_v13 = vpack.c.bf16 %v1139_v3, %v1131_v2  ;;  %v868_v15 = vunpack.c.3.s8 %v548_v57  ;;  %v7815_v16 = vcvt.s32.f32 %v860_v5  ;;  %v891_v20 = vunpack.c.2.s8 %v555_v6 }
  0xad   :  { %1994 = vmatpush.bf16.msra.mxu3 %v1851_v8  ;;  %v1707_v19 = vpack.c.bf16 %v1267_v10, %v1259_v9  ;;  %v899_v21 = vunpack.c.3.s8 %v555_v6  ;;  %v1019_v22 = vunpack.c.2.s8 %v587_v7  ;;  %v1700_v23 = vpack.c.bf16 %v7813_v14, %v7811_v11  ;;  %v564_v11 = vld [vmem:[#allocation10 + $0x250] sm:$0xff] }
  0xae   :  { %1957 = vmatpush.bf16.msra.mxu0 %v1643_v13  ;;  %v7819_v26 = vcvt.s32.f32 %v868_v15  ;;  %v1027_v27 = vunpack.c.3.s8 %v587_v7  ;;  %v716_v28 = vunpack.c.0.s8 %v516_v52  ;;  %v1403_v29 = vcvt.s32.f32 %v891_v20 }
  0xaf   :  { %1970 = vmatpush.bf16.msra.mxu1 %v1707_v19  ;;  %v1411_v30 = vcvt.s32.f32 %v899_v21  ;;  %v1531_v31 = vcvt.s32.f32 %v1019_v22  ;;  %v724_v33 = vunpack.c.1.s8 %v516_v52  ;;  %v844_v37 = vunpack.c.0.s8 %v548_v57 }
  0xb0   :  { %v1764_v34 = vpack.c.bf16 %v7819_v26, %v7815_v16  ;;  %v1539_v35 = vcvt.s32.f32 %v1027_v27  ;;  %v7823_v36 = vcvt.s32.f32 %v716_v28  ;;  %v852_v40 = vunpack.c.1.s8 %v548_v57 }
  0xb1   :  { %v1779_v38 = vpack.c.bf16 %v1411_v30, %v1403_v29  ;;  %v7825_v39 = vcvt.s32.f32 %v724_v33  ;;  %v875_v41 = vunpack.c.0.s8 %v555_v6  ;;  %v7827_v44 = vcvt.s32.f32 %v844_v37 }
  0xb2   :  { %v1843_v43 = vpack.c.bf16 %v1539_v35, %v1531_v31  ;;  %v883_v45 = vunpack.c.1.s8 %v555_v6  ;;  %v1003_v46 = vunpack.c.0.s8 %v587_v7  ;;  %v7831_v51 = vcvt.s32.f32 %v852_v40  ;;  %v7861_v40 = vld [vmem:[#allocation10 + $0x290] sm:$0xff] }
  0xb3   :  { %1982 = vmatpush.bf16.msra.mxu2 %v1779_v38  ;;  %v1692_v48 = vpack.c.bf16 %v7825_v39, %v7823_v36  ;;  %v1387_v52 = vcvt.s32.f32 %v875_v41  ;;  %v1011_v53 = vunpack.c.1.s8 %v587_v7  ;;  %v988_v59 = vunpack.c.2.s8 %v580_v42  ;;  %v524_v39 = vld [vmem:[#allocation10 + $0x110] sm:$0xff] }
  0xb4   :  { %1995 = vmatpush.bf16.msra.mxu3 %v1843_v43  ;;  %v1395_v56 = vcvt.s32.f32 %v883_v45  ;;  %v1515_v57 = vcvt.s32.f32 %v1003_v46  ;;  %v996_v60 = vunpack.c.3.s8 %v580_v42  ;;  %v1756_v61 = vpack.c.bf16 %v7831_v51, %v7827_v44  ;;  %v7869_v46 = vld [vmem:[#allocation10 + $0x390] sm:$0xff] }
  0xb5   :  { %v1523_v62 = vcvt.s32.f32 %v1011_v53  ;;  %v1116_v63 = vunpack.c.2.s8 %v612_v47  ;;  %v1124_v0 = vunpack.c.3.s8 %v612_v47  ;;  %v7835_v3 = vcvt.s32.f32 %v988_v59 }
  0xb6   :  { %v1771_v2 = vpack.c.bf16 %v1395_v56, %v1387_v52  ;;  %v7837_v4 = vcvt.s32.f32 %v996_v60  ;;  %v700_v5 = vunpack.c.2.s8 %v508_v55  ;;  %v708_v9 = vunpack.c.3.s8 %v508_v55 }
  0xb7   :  { %v1835_v6 = vpack.c.bf16 %v1523_v62, %v1515_v57  ;;  %v7839_v7 = vcvt.s32.f32 %v1116_v63  ;;  %v7841_v8 = vcvt.s32.f32 %v1124_v0  ;;  %v828_v15 = vunpack.c.2.s8 %v540_v1 }
  0xb8   :  { %1983 = vmatpush.bf16.msra.mxu2 %v1771_v2  ;;  %v1828_v10 = vpack.c.bf16 %v7837_v4, %v7835_v3  ;;  %v7845_v13 = vcvt.s32.f32 %v700_v5  ;;  %v836_v19 = vunpack.c.3.s8 %v540_v1  ;;  %v7849_v21 = vcvt.s32.f32 %v708_v9 }
  0xb9   :  { %1996 = vmatpush.bf16.msra.mxu3 %v1835_v6  ;;  %v1892_v20 = vpack.c.bf16 %v7841_v8, %v7839_v7  ;;  %v972_v22 = vunpack.c.0.s8 %v580_v42  ;;  %v980_v27 = vunpack.c.1.s8 %v580_v42  ;;  %v7851_v28 = vcvt.s32.f32 %v828_v15  ;;  %v500_v6 = vld [vmem:[#allocation10 + $0x50] sm:$0xff] }
  0xba   :  { %v7853_v29 = vcvt.s32.f32 %v836_v19  ;;  %v1100_v30 = vunpack.c.0.s8 %v612_v47  ;;  %v1108_v31 = vunpack.c.1.s8 %v612_v47  ;;  %v1684_v33 = vpack.c.bf16 %v7849_v21, %v7845_v13 }
  0xbb   :  { %v7857_v35 = vcvt.s32.f32 %v972_v22  ;;  %v7859_v37 = vcvt.s32.f32 %v980_v27  ;;  %v684_v38 = vunpack.c.0.s8 %v508_v55  ;;  %v692_v45 = vunpack.c.1.s8 %v508_v55  ;;  %v7896_v27 = vld [vmem:[#allocation10 + $0x150] sm:$0xff] }
  0xbc   :  { %v7865_v42 = vcvt.s32.f32 %v1100_v30  ;;  %v7867_v43 = vcvt.s32.f32 %v1108_v31  ;;  %v812_v53 = vunpack.c.0.s8 %v540_v1  ;;  %v820_v56 = vunpack.c.1.s8 %v540_v1 }
  0xbd   :  { %v7873_v52 = vcvt.s32.f32 %v684_v38  ;;  %v7877_v60 = vcvt.s32.f32 %v692_v45  ;;  %v956_v62 = vunpack.c.2.s8 %v7861_v40  ;;  %v964_v63 = vunpack.c.3.s8 %v7861_v40 }
  0xbe   :  { %v7883_v2 = vcvt.s32.f32 %v812_v53  ;;  %v7885_v5 = vcvt.s32.f32 %v820_v56  ;;  %v1084_v1 = vunpack.c.2.s8 %v7869_v46  ;;  %v1092_v31 = vunpack.c.3.s8 %v7869_v46 }
  0xbf   :  { %v7892_v19 = vcvt.s32.f32 %v956_v62  ;;  %v7894_v22 = vcvt.s32.f32 %v964_v63  ;;  %v668_v53 = vunpack.c.2.s8 %v500_v6  ;;  %v676_v56 = vunpack.c.3.s8 %v500_v6 }
  0xc0   :  { %v7903_v38 = vcvt.s32.f32 %v1084_v1  ;;  %v7909_v62 = vcvt.s32.f32 %v1092_v31  ;;  %v932_v36 = vunpack.c.3.s8 %v564_v11  ;;  %v908_v13 = vunpack.c.0.s8 %v564_v11 }
  0xc1   :  { %v916_v21 = vunpack.c.1.s8 %v564_v11 }
  0xde   :  { %v403_v57 = vpop.f32.mrf.mxu0 }
  0xdf   :  { %v456_v55 = vmul.f32 %v448_v17, %v403_v57  ;;  %v416_v0 = vpop.f32.mrf.mxu1 }
  0xe0   :  { %v457_v9 = vmul.f32 %v449_v25, %v416_v0  ;;  %v7914_v0 = vcvt.s32.f32 %v676_v56 }
  0xe1   :  { %v470_v17 = vadd.f32 %v462_v24, %v456_v55  ;;  %v796_v24 = vunpack.c.2.s8 %v7896_v27  ;;  %v7912_v55 = vcvt.s32.f32 %v668_v53  ;;  %v940_v53 = vunpack.c.0.s8 %v7861_v40 }
  0xe2   :  { %v471_v25 = vadd.f32 %v463_v32, %v457_v9  ;;  %v804_v9 = vunpack.c.3.s8 %v7896_v27 }
  0xe3   :  { %vm474_vm0 = vcmp.ge.f32.partialorder %v470_v17, 0.0  ;;  %v478_v57 = vmul.f32 0.01, %v470_v17  ;;  %v7919_v45 = vcvt.s32.f32 %v796_v24  ;;  %v1668_v47 = vpack.c.bf16 %v7914_v0, %v7912_v55 }
  0xe4   :  { %vm475_vm1 = vcmp.ge.f32.partialorder %v471_v25, 0.0  ;;  %v479_v63 = vmul.f32 0.01, %v471_v25  ;;  %v7930_v41 = vcvt.s32.f32 %v804_v9  ;;  %v948_v24 = vunpack.c.1.s8 %v7861_v40 }
  0xe5   :  { %v482_v1 = vsel %vm474_vm0, %v470_v17, %v478_v57  ;;  %v652_v40 = vunpack.c.0.s8 %v500_v6 }
  0xe6   :  { %v7921_v30 = vpack.c.bf16 %v482_v1, %v482_v1  ;;  %v483_v31 = vsel %vm475_vm1, %v471_v25, %v479_v63  ;;  %v429_v15 = vpop.f32.mrf.mxu2  ;;  %v405_v59 = vpop.f32.mrf.mxu0  ;;  %v1068_v63 = vunpack.c.0.s8 %v7869_v46  ;;  %v1076_v1 = vunpack.c.1.s8 %v7869_v46 }
  0xe7   :  { %v7926_v56 = vpack.c.bf16 %v483_v31, %v483_v31  ;;  %v458_v17 = vmul.f32 %v450_v49, %v429_v15  ;;  %v442_v57 = vpop.f32.mrf.mxu3  ;;  %v418_v32 = vpop.f32.mrf.mxu1  ;;  %v7936_v59 = vcvt.s32.f32 %v940_v53  ;;  %v1732_v12 = vpack.c.bf16 %v7930_v41, %v7919_v45  ;;  %v596_v53 = vld [vmem:[#allocation10 + $0x350] sm:$0xff] }
  0xe8   :  { %v459_v25 = vmul.f32 %v451_v50, %v442_v57  ;;  %1906 = vmatmul.bf16.vlgmr.msrb.gmra.mxu0 %v7921_v30  ;;  %v7948_v50 = vcvt.s32.f32 %v948_v24  ;;  %v7957_v46 = vcvt.s32.f32 %v1076_v1  ;;  %v660_v32 = vunpack.c.1.s8 %v500_v6 }
  0xe9   :  { %v472_v49 = vadd.f32 %v464_v54, %v458_v17  ;;  %1919 = vmatmul.bf16.vlgmr.msrb.gmra.mxu1 %v7926_v56  ;;  %2002 = vmatpush.bf16.msrb.mxu0 %v1700_v23  ;;  %v7955_v54 = vcvt.s32.f32 %v1068_v63  ;;  %v7961_v9 = vcvt.s32.f32 %v652_v40  ;;  %v788_v6 = vunpack.c.1.s8 %v7896_v27  ;;  %v492_v17 = vld [vmem:[#allocation10 + $0x10] sm:$0xff] }
  0xea   :  { %v473_v15 = vadd.f32 %v465_v58, %v459_v25  ;;  %2015 = vmatpush.bf16.msrb.mxu1 %v1764_v34  ;;  %v1804_v23 = vpack.c.bf16 %v7948_v50, %v7936_v59  ;;  %v7965_v16 = vcvt.s32.f32 %v660_v32  ;;  %v780_v34 = vunpack.c.0.s8 %v7896_v27 }
  0xeb   :  { %vm476_vm2 = vcmp.ge.f32.partialorder %v472_v49, 0.0  ;;  %v480_v14 = vmul.f32 0.01, %v472_v49  ;;  %v1868_v58 = vpack.c.bf16 %v7957_v46, %v7955_v54  ;;  %v924_v31 = vunpack.c.2.s8 %v564_v11 }
  0xec   :  { %vm477_vm3 = vcmp.ge.f32.partialorder %v473_v15, 0.0  ;;  %v481_v18 = vmul.f32 0.01, %v473_v15  ;;  %v1660_v63 = vpack.c.bf16 %v7965_v16, %v7961_v9  ;;  %v7981_v27 = vcvt.s32.f32 %v780_v34 }
  0xed   :  { %v484_v26 = vsel %vm476_vm2, %v472_v49, %v480_v14  ;;  %2003 = vmatpush.bf16.msrb.mxu0 %v1692_v48  ;;  %v7983_v49 = vcvt.s32.f32 %v788_v6  ;;  %v7985_v40 = vcvt.s32.f32 %v924_v31  ;;  %v1052_v44 = vunpack.c.2.s8 %v596_v53 }
  0xee   :  { %v7972_v57 = vpack.c.bf16 %v484_v26, %v484_v26  ;;  %v485_v24 = vsel %vm477_vm3, %v473_v15, %v481_v18  ;;  %v431_v25 = vpop.f32.mrf.mxu2  ;;  %2016 = vmatpush.bf16.msrb.mxu1 %v1756_v61  ;;  %v7988_v15 = vcvt.s32.f32 %v932_v36  ;;  %v1060_v51 = vunpack.c.3.s8 %v596_v53 }
  0xef   :  { %v7979_v48 = vpack.c.bf16 %v485_v24, %v485_v24  ;;  %v444_v1 = vpop.f32.mrf.mxu3  ;;  %v636_v61 = vunpack.c.2.s8 %v492_v17  ;;  %v1724_v32 = vpack.c.bf16 %v7983_v49, %v7981_v27  ;;  %v644_v14 = vunpack.c.3.s8 %v492_v17  ;;  %v517_v25 = vld [vmem:[#allocation10 + $0xd8] sm:$0xff] }
  0xf0   :  { %1932 = vmatmul.bf16.vlgmr.msrb.gmra.mxu2 %v7972_v57  ;;  %v764_v18 = vunpack.c.2.s8 %v524_v39  ;;  %v772_v26 = vunpack.c.3.s8 %v524_v39  ;;  %v1796_v34 = vpack.c.bf16 %v7988_v15, %v7985_v40  ;;  %v8004_v6 = vcvt.s32.f32 %v1052_v44  ;;  %v613_v49 = vld [vmem:[#allocation10 + $0x3d8] sm:$0xff] }
  0xf1   :  { %1945 = vmatmul.bf16.vlgmr.msrb.gmra.mxu3 %v7979_v48  ;;  %2028 = vmatpush.bf16.msrb.mxu2 %v1828_v10  ;;  %v8006_v3 = vcvt.s32.f32 %v1060_v51  ;;  %v8008_v4 = vcvt.s32.f32 %v636_v61  ;;  %v9295_v10 = vpack.c.bf16 %v7853_v29, %v7851_v28  ;;  %v8013_v31 = vcvt.s32.f32 %v644_v14  ;;  %v549_v14 = vld [vmem:[#allocation10 + $0x1d8] sm:$0xff] }
  0xf2   :  { %2041 = vmatpush.bf16.msrb.mxu3 %v1892_v20  ;;  %2004 = vmatpush.bf16.msrb.mxu0 %v1684_v33  ;;  %v8015_v7 = vcvt.s32.f32 %v764_v18  ;;  %v8017_v8 = vcvt.s32.f32 %v772_v26  ;;  %v1036_v33 = vunpack.c.0.s8 %v596_v53  ;;  %v1044_v24 = vunpack.c.1.s8 %v596_v53 }
  0xf3   :  { %2017 = vmatpush.bf16.msrb.mxu1 %v9295_v10  ;;  %v1860_v20 = vpack.c.bf16 %v8006_v3, %v8004_v6  ;;  %v9296_v36 = vpack.c.bf16 %v7859_v37, %v7857_v35  ;;  %v1652_v28 = vpack.c.bf16 %v8013_v31, %v8008_v4  ;;  %v8028_v1 = vcvt.s32.f32 %v908_v13  ;;  %v556_v13 = vld [vmem:[#allocation10 + $0x210] sm:$0xff]  ;;  %v541_v6 = vld [vmem:[#allocation10 + $0x198] sm:$0xff] }
  0xf4   :  { %v1716_v29 = vpack.c.bf16 %v8017_v8, %v8015_v7  ;;  %v620_v44 = vunpack.c.0.s8 %v492_v17  ;;  %v9297_v51 = vpack.c.bf16 %v7867_v43, %v7865_v42  ;;  %v9298_v11 = vpack.c.bf16 %v7877_v60, %v7873_v52 }
  0xf5   :  { %2029 = vmatpush.bf16.msrb.mxu2 %v9296_v36  ;;  %v8036_v53 = vcvt.s32.f32 %v916_v21  ;;  %v8038_v35 = vcvt.s32.f32 %v1036_v33  ;;  %v8040_v37 = vcvt.s32.f32 %v1044_v24  ;;  %v628_v61 = vunpack.c.1.s8 %v492_v17  ;;  %v588_v33 = vld [vmem:[#allocation10 + $0x310] sm:$0xff] }
  0xf6   :  { %2042 = vmatpush.bf16.msrb.mxu3 %v9297_v51  ;;  %2005 = vmatpush.bf16.msrb.mxu0 %v9298_v11  ;;  %v9299_v18 = vpack.c.bf16 %v7885_v5, %v7883_v2  ;;  %v8045_v26 = vcvt.s32.f32 %v620_v44  ;;  %v748_v42 = vunpack.c.0.s8 %v524_v39  ;;  %v756_v43 = vunpack.c.1.s8 %v524_v39 }
  0xf7   :  { %v733_v10 = vunpack.c.2.s8 %v517_v25  ;;  %v1788_v52 = vpack.c.bf16 %v8036_v53, %v8028_v1  ;;  %v1852_v60 = vpack.c.bf16 %v8040_v37, %v8038_v35  ;;  %v8052_v17 = vcvt.s32.f32 %v628_v61 }
  0xf8   :  { %2018 = vmatpush.bf16.msrb.mxu1 %v9299_v18  ;;  %1958 = vmatmul.bf16.vlgmr.msra.gmra.mxu0 %v7921_v30  ;;  %v741_v21 = vunpack.c.3.s8 %v517_v25  ;;  %v9300_v2 = vpack.c.bf16 %v7894_v22, %v7892_v19  ;;  %v8058_v5 = vcvt.s32.f32 %v748_v42  ;;  %v8060_v39 = vcvt.s32.f32 %v756_v43 }
  0xf9   :  { %1971 = vmatmul.bf16.vlgmr.msra.gmra.mxu1 %v7926_v56  ;;  %v8062_v24 = vcvt.s32.f32 %v733_v10  ;;  %v861_v36 = vunpack.c.2.s8 %v549_v14  ;;  %v9301_v44 = vpack.c.bf16 %v7909_v62, %v7903_v38  ;;  %v1644_v19 = vpack.c.bf16 %v8052_v17, %v8045_v26 }
  0xfa   :  { %2030 = vmatpush.bf16.msrb.mxu2 %v9300_v2  ;;  %2006 = vmatpush.bf16.msrb.mxu0 %v1668_v47  ;;  %v8072_v22 = vcvt.s32.f32 %v741_v21  ;;  %v869_v51 = vunpack.c.3.s8 %v549_v14  ;;  %v892_v11 = vunpack.c.2.s8 %v556_v13  ;;  %v1708_v61 = vpack.c.bf16 %v8060_v39, %v8058_v5 }
  0xfb   :  { %2043 = vmatpush.bf16.msrb.mxu3 %v9301_v44  ;;  %v8079_v38 = vcvt.s32.f32 %v861_v36  ;;  %v900_v62 = vunpack.c.3.s8 %v556_v13  ;;  %v1020_v18 = vunpack.c.2.s8 %v588_v33  ;;  %v1028_v42 = vunpack.c.3.s8 %v588_v33  ;;  %v509_v36 = vld [vmem:[#allocation10 + $0x98] sm:$0xff] }
  0xfc   :  { %2019 = vmatpush.bf16.msrb.mxu1 %v1732_v12  ;;  %v1701_v47 = vpack.c.bf16 %v8072_v22, %v8062_v24  ;;  %v8083_v55 = vcvt.s32.f32 %v869_v51  ;;  %v8085_v0 = vcvt.s32.f32 %v892_v11  ;;  %v717_v12 = vunpack.c.0.s8 %v517_v25 }
  0xfd   :  { %v8090_v41 = vcvt.s32.f32 %v900_v62  ;;  %v8092_v45 = vcvt.s32.f32 %v1020_v18  ;;  %v725_v43 = vunpack.c.1.s8 %v517_v25  ;;  %v8102_v21 = vcvt.s32.f32 %v1028_v42 }
  0xfe   :  { %2031 = vmatpush.bf16.msrb.mxu2 %v1804_v23  ;;  %2007 = vmatpush.bf16.msrb.mxu0 %v1660_v63  ;;  %v1765_v10 = vpack.c.bf16 %v8083_v55, %v8079_v38  ;;  %v845_v59 = vunpack.c.0.s8 %v549_v14  ;;  %v853_v50 = vunpack.c.1.s8 %v549_v14  ;;  %v8109_v54 = vcvt.s32.f32 %v717_v12 }
  0xff   :  { %2044 = vmatpush.bf16.msrb.mxu3 %v1868_v58  ;;  %v1780_v23 = vpack.c.bf16 %v8090_v41, %v8085_v0  ;;  %v8111_v46 = vcvt.s32.f32 %v725_v43  ;;  %v876_v9 = vunpack.c.0.s8 %v556_v13  ;;  %v581_v58 = vld [vmem:[#allocation10 + $0x2d8] sm:$0xff]  ;;  %v1844_v16 = vpack.c.bf16 %v8102_v21, %v8092_v45 }
 0x100   :  { %2020 = vmatpush.bf16.msrb.mxu1 %v1724_v32  ;;  %1984 = vmatmul.bf16.vlgmr.msra.gmra.mxu2 %v7972_v57  ;;  %v8116_v63 = vcvt.s32.f32 %v845_v59  ;;  %v8118_v25 = vcvt.s32.f32 %v853_v50  ;;  %v884_v27 = vunpack.c.1.s8 %v556_v13  ;;  %v1004_v2 = vunpack.c.0.s8 %v588_v33  ;;  %v573_v41 = vld [vmem:[#allocation10 + $0x298] sm:$0xff] }
 0x101   :  { %1997 = vmatmul.bf16.vlgmr.msra.gmra.mxu3 %v7979_v48  ;;  %v1693_v32 = vpack.c.bf16 %v8111_v46, %v8109_v54  ;;  %v8126_v14 = vcvt.s32.f32 %v876_v9  ;;  %v1012_v24 = vunpack.c.1.s8 %v588_v33  ;;  %v997_v13 = vunpack.c.3.s8 %v581_v58  ;;  %v605_v45 = vld [vmem:[#allocation10 + $0x398] sm:$0xff] }
 0x102   :  { %2032 = vmatpush.bf16.msrb.mxu2 %v1796_v34  ;;  %2008 = vmatpush.bf16.msrb.mxu0 %v1652_v28  ;;  %v1757_v40 = vpack.c.bf16 %v8118_v25, %v8116_v63  ;;  %v1396_v15 = vcvt.s32.f32 %v884_v27  ;;  %v989_v34 = vunpack.c.2.s8 %v581_v58  ;;  %v1516_v33 = vcvt.s32.f32 %v1004_v2  ;;  %v501_v59 = vld [vmem:[#allocation10 + $0x58] sm:$0xff] }
 0x103   :  { %2045 = vmatpush.bf16.msrb.mxu3 %v1860_v20  ;;  %v1524_v44 = vcvt.s32.f32 %v1012_v24  ;;  %v1117_v22 = vunpack.c.2.s8 %v613_v49  ;;  %v1125_v51 = vunpack.c.3.s8 %v613_v49  ;;  %v1509_v4 = vcvt.s32.f32 %v997_v13  ;;  %v533_v25 = vld [vmem:[#allocation10 + $0x158] sm:$0xff] }
 0x104   :  { %2021 = vmatpush.bf16.msrb.mxu1 %v1716_v29  ;;  %v1772_v3 = vpack.c.bf16 %v1396_v15, %v8126_v14  ;;  %v1501_v20 = vcvt.s32.f32 %v989_v34  ;;  %v701_v31 = vunpack.c.2.s8 %v509_v36  ;;  %v709_v62 = vunpack.c.3.s8 %v509_v36 }
 0x105   :  { %v1836_v28 = vpack.c.bf16 %v1524_v44, %v1516_v33  ;;  %v1629_v11 = vcvt.s32.f32 %v1117_v22  ;;  %v1637_v38 = vcvt.s32.f32 %v1125_v51  ;;  %v829_v29 = vunpack.c.2.s8 %v541_v6 }
 0x106   :  { %2033 = vmatpush.bf16.msrb.mxu2 %v1788_v52  ;;  %2009 = vmatpush.bf16.msrb.mxu0 %v1644_v19  ;;  %v1829_v7 = vpack.c.bf16 %v1509_v4, %v1501_v20  ;;  %v1213_v8 = vcvt.s32.f32 %v701_v31  ;;  %v837_v18 = vunpack.c.3.s8 %v541_v6  ;;  %v1221_v53 = vcvt.s32.f32 %v709_v62 }
 0x107   :  { %2046 = vmatpush.bf16.msrb.mxu3 %v1852_v60  ;;  %v1893_v1 = vpack.c.bf16 %v1637_v38, %v1629_v11  ;;  %v973_v52 = vunpack.c.0.s8 %v581_v58  ;;  %v981_v55 = vunpack.c.1.s8 %v581_v58  ;;  %v1341_v35 = vcvt.s32.f32 %v829_v29 }
 0x108   :  { %2022 = vmatpush.bf16.msrb.mxu1 %v1708_v61  ;;  %v1349_v37 = vcvt.s32.f32 %v837_v18  ;;  %v1101_v60 = vunpack.c.0.s8 %v613_v49  ;;  %v1109_v0 = vunpack.c.1.s8 %v613_v49  ;;  %v1685_v26 = vpack.c.bf16 %v1221_v53, %v1213_v8  ;;  %v597_v53 = vld [vmem:[#allocation10 + $0x358] sm:$0xff] }
 0x109   :  { %2010 = vmatmul.bf16.vlgmr.msrb.gmra.mxu0 %v7921_v30  ;;  %v1485_v17 = vcvt.s32.f32 %v973_v52  ;;  %v1493_v19 = vcvt.s32.f32 %v981_v55  ;;  %v685_v42 = vunpack.c.0.s8 %v509_v36  ;;  %v821_v21 = vunpack.c.1.s8 %v541_v6 }
 0x10a   :  { %2054 = vmatpush.bf16.msra.mxu0 %v1701_v47  ;;  %2034 = vmatpush.bf16.msrb.mxu2 %v1780_v23  ;;  %v1749_v5 = vpack.c.bf16 %v1349_v37, %v1341_v35  ;;  %v1613_v39 = vcvt.s32.f32 %v1101_v60  ;;  %v1621_v61 = vcvt.s32.f32 %v1109_v0  ;;  %v693_v47 = vunpack.c.1.s8 %v509_v36  ;;  %v493_v60 = vld [vmem:[#allocation10 + $0x18] sm:$0xff] }
 0x10b   :  { %2047 = vmatpush.bf16.msrb.mxu3 %v1844_v16  ;;  %2023 = vmatmul.bf16.vlgmr.msrb.gmra.mxu1 %v7926_v56  ;;  %v1821_v12 = vpack.c.bf16 %v1493_v19, %v1485_v17  ;;  %v1197_v43 = vcvt.s32.f32 %v685_v42  ;;  %v957_v54 = vunpack.c.2.s8 %v573_v41  ;;  %v965_v46 = vunpack.c.3.s8 %v573_v41 }
 0x10c   :  { %2067 = vmatpush.bf16.msra.mxu1 %v1765_v10  ;;  %v813_v10 = vunpack.c.0.s8 %v541_v6  ;;  %v1885_v50 = vpack.c.bf16 %v1621_v61, %v1613_v39  ;;  %v1205_v23 = vcvt.s32.f32 %v693_v47  ;;  %v1333_v58 = vcvt.s32.f32 %v821_v21  ;;  %v525_v61 = vld [vmem:[#allocation10 + $0x118] sm:$0xff] }
 0x10d   :  { %v1085_v16 = vunpack.c.2.s8 %v605_v45  ;;  %v1093_v63 = vunpack.c.3.s8 %v605_v45  ;;  %v1469_v49 = vcvt.s32.f32 %v957_v54  ;;  %v669_v14 = vunpack.c.2.s8 %v501_v59 }
 0x10e   :  { %2055 = vmatpush.bf16.msra.mxu0 %v1693_v32  ;;  %2035 = vmatpush.bf16.msrb.mxu2 %v1772_v3  ;;  %v1325_v9 = vcvt.s32.f32 %v813_v10  ;;  %v1677_v27 = vpack.c.bf16 %v1205_v23, %v1197_v43  ;;  %v1477_v32 = vcvt.s32.f32 %v965_v46  ;;  %v797_v13 = vunpack.c.2.s8 %v533_v25 }
 0x10f   :  { %2048 = vmatpush.bf16.msrb.mxu3 %v1836_v28  ;;  %v1597_v24 = vcvt.s32.f32 %v1085_v16  ;;  %v1605_v36 = vcvt.s32.f32 %v1093_v63  ;;  %v1181_v34 = vcvt.s32.f32 %v669_v14  ;;  %v805_v33 = vunpack.c.3.s8 %v533_v25 }
 0x110   :  { %2068 = vmatpush.bf16.msra.mxu1 %v1757_v40  ;;  %v1741_v2 = vpack.c.bf16 %v1333_v58, %v1325_v9  ;;  %v677_v40 = vunpack.c.3.s8 %v501_v59  ;;  %v1813_v15 = vpack.c.bf16 %v1477_v32, %v1469_v49  ;;  %v941_v51 = vunpack.c.0.s8 %v573_v41 }
 0x111   :  { %2036 = vmatmul.bf16.vlgmr.msrb.gmra.mxu2 %v7972_v57  ;;  %v1877_v44 = vpack.c.bf16 %v1605_v36, %v1597_v24  ;;  %v949_v6 = vunpack.c.1.s8 %v573_v41  ;;  %v1309_v3 = vcvt.s32.f32 %v797_v13  ;;  %v1317_v20 = vcvt.s32.f32 %v805_v33 }
 0x112   :  { %2080 = vmatpush.bf16.msra.mxu2 %v1829_v7  ;;  %2056 = vmatpush.bf16.msra.mxu0 %v1685_v26  ;;  %v1189_v22 = vcvt.s32.f32 %v677_v40  ;;  %v1069_v4 = vunpack.c.0.s8 %v605_v45  ;;  %v1077_v31 = vunpack.c.1.s8 %v605_v45  ;;  %v1453_v11 = vcvt.s32.f32 %v941_v51  ;;  %v565_v7 = vld [vmem:[#allocation10 + $0x258] sm:$0xff] }
 0x113   :  { %2093 = vmatpush.bf16.msra.mxu3 %v1893_v1  ;;  %v1461_v38 = vcvt.s32.f32 %v949_v6  ;;  %v653_v62 = vunpack.c.0.s8 %v501_v59  ;;  %v1733_v8 = vpack.c.bf16 %v1317_v20, %v1309_v3  ;;  %v661_v1 = vunpack.c.1.s8 %v501_v59 }
 0x114   :  { %2069 = vmatpush.bf16.msra.mxu1 %v1749_v5  ;;  %2049 = vmatmul.bf16.vlgmr.msrb.gmra.mxu3 %v7979_v48  ;;  %v1669_v28 = vpack.c.bf16 %v1189_v22, %v1181_v34  ;;  %v1581_v29 = vcvt.s32.f32 %v1069_v4  ;;  %v1589_v18 = vcvt.s32.f32 %v1077_v31  ;;  %v781_v35 = vunpack.c.0.s8 %v533_v25  ;;  %v550_v22 = vld [vmem:[#allocation10 + $0x1e0] sm:$0xff]  ;;  %v557_v4 = vld [vmem:[#allocation10 + $0x218] sm:$0xff] }
 0x115   :  { %v1805_v52 = vpack.c.bf16 %v1461_v38, %v1453_v11  ;;  %v1165_v55 = vcvt.s32.f32 %v653_v62  ;;  %v789_v37 = vunpack.c.1.s8 %v533_v25  ;;  %v1173_v26 = vcvt.s32.f32 %v661_v1 }
 0x116   :  { %2081 = vmatpush.bf16.msra.mxu2 %v1821_v12  ;;  %2057 = vmatpush.bf16.msra.mxu0 %v1677_v27  ;;  %v1869_v0 = vpack.c.bf16 %v1589_v18, %v1581_v29  ;;  %v925_v17 = vunpack.c.2.s8 %v565_v7  ;;  %v933_v19 = vunpack.c.3.s8 %v565_v7  ;;  %v1293_v42 = vcvt.s32.f32 %v781_v35  ;;  %v589_v18 = vld [vmem:[#allocation10 + $0x318] sm:$0xff] }
 0x117   :  { %2094 = vmatpush.bf16.msra.mxu3 %v1885_v50  ;;  %v1301_v41 = vcvt.s32.f32 %v789_v37  ;;  %v1053_v5 = vunpack.c.2.s8 %v597_v53  ;;  %v1061_v39 = vunpack.c.3.s8 %v597_v53  ;;  %v1661_v47 = vpack.c.bf16 %v1173_v26, %v1165_v55 }
 0x118   :  { %2070 = vmatpush.bf16.msra.mxu1 %v1741_v2  ;;  %v1437_v45 = vcvt.s32.f32 %v925_v17  ;;  %v1445_v12 = vcvt.s32.f32 %v933_v19  ;;  %v637_v43 = vunpack.c.2.s8 %v493_v60  ;;  %v645_v50 = vunpack.c.3.s8 %v493_v60 }
 0x119   :  { %v1725_v10 = vpack.c.bf16 %v1301_v41, %v1293_v42  ;;  %v1565_v21 = vcvt.s32.f32 %v1053_v5  ;;  %v1573_v59 = vcvt.s32.f32 %v1061_v39  ;;  %v765_v46 = vunpack.c.2.s8 %v525_v61 }
 0x11a   :  { %2082 = vmatpush.bf16.msra.mxu2 %v1813_v15  ;;  %2058 = vmatpush.bf16.msra.mxu0 %v1669_v28  ;;  %v1797_v23 = vpack.c.bf16 %v1445_v12, %v1437_v45  ;;  %v1149_v54 = vcvt.s32.f32 %v637_v43  ;;  %v773_v9 = vunpack.c.3.s8 %v525_v61  ;;  %v1157_v16 = vcvt.s32.f32 %v645_v50  ;;  %v518_v15 = vld [vmem:[#allocation10 + $0xe0] sm:$0xff] }
 0x11b   :  { %2095 = vmatpush.bf16.msra.mxu3 %v1877_v44  ;;  %v1861_v58 = vpack.c.bf16 %v1573_v59, %v1565_v21  ;;  %v909_v63 = vunpack.c.0.s8 %v565_v7  ;;  %v917_v25 = vunpack.c.1.s8 %v565_v7  ;;  %v1277_v27 = vcvt.s32.f32 %v765_v46 }
 0x11c   :  { %2071 = vmatpush.bf16.msra.mxu1 %v1733_v8  ;;  %v1285_v49 = vcvt.s32.f32 %v773_v9  ;;  %v1037_v32 = vunpack.c.0.s8 %v597_v53  ;;  %v1045_v14 = vunpack.c.1.s8 %v597_v53  ;;  %v1653_v2 = vpack.c.bf16 %v1157_v16, %v1149_v54  ;;  %v614_v16 = vld [vmem:[#allocation10 + $0x3e0] sm:$0xff] }
 0x11d   :  { %v1421_v24 = vcvt.s32.f32 %v909_v63  ;;  %v1429_v36 = vcvt.s32.f32 %v917_v25  ;;  %v621_v40 = vunpack.c.0.s8 %v493_v60  ;;  %v629_v44 = vunpack.c.1.s8 %v493_v60 }
 0x11e   :  { %2083 = vmatpush.bf16.msra.mxu2 %v1805_v52  ;;  %2059 = vmatpush.bf16.msra.mxu0 %v1661_v47  ;;  %v1717_v34 = vpack.c.bf16 %v1285_v49, %v1277_v27  ;;  %v1549_v13 = vcvt.s32.f32 %v1037_v32  ;;  %v1557_v33 = vcvt.s32.f32 %v1045_v14  ;;  %v749_v3 = vunpack.c.0.s8 %v525_v61  ;;  %v510_v32 = vld [vmem:[#allocation10 + $0xa0] sm:$0xff] }
 0x11f   :  { %2096 = vmatpush.bf16.msra.mxu3 %v1869_v0  ;;  %v1789_v51 = vpack.c.bf16 %v1429_v36, %v1421_v24  ;;  %v1133_v6 = vcvt.s32.f32 %v621_v40  ;;  %v757_v20 = vunpack.c.1.s8 %v525_v61  ;;  %v1141_v28 = vcvt.s32.f32 %v629_v44 }
 0x120   :  { %2072 = vmatpush.bf16.msra.mxu1 %v1725_v10  ;;  %v1853_v31 = vpack.c.bf16 %v1557_v33, %v1549_v13  ;;  %v734_v11 = vunpack.c.2.s8 %v518_v15  ;;  %v742_v38 = vunpack.c.3.s8 %v518_v15  ;;  %v1261_v62 = vcvt.s32.f32 %v749_v3  ;;  %v542_v33 = vld [vmem:[#allocation10 + $0x1a0] sm:$0xff] }
 0x121   :  { %v1269_v7 = vcvt.s32.f32 %v757_v20  ;;  %v862_v8 = vunpack.c.2.s8 %v550_v22  ;;  %v870_v29 = vunpack.c.3.s8 %v550_v22  ;;  %v1645_v1 = vpack.c.bf16 %v1141_v28, %v1133_v6 }
 0x122   :  { %2084 = vmatpush.bf16.msra.mxu2 %v1797_v23  ;;  %2060 = vmatpush.bf16.msra.mxu0 %v1653_v2  ;;  %v1246_v53 = vcvt.s32.f32 %v734_v11  ;;  %v1254_v52 = vcvt.s32.f32 %v742_v38  ;;  %v893_v55 = vunpack.c.2.s8 %v557_v4  ;;  %v901_v0 = vunpack.c.3.s8 %v557_v4  ;;  %v582_v23 = vld [vmem:[#allocation10 + $0x2e0] sm:$0xff] }
 0x123   :  { %2097 = vmatpush.bf16.msra.mxu3 %v1861_v58  ;;  %v1709_v35 = vpack.c.bf16 %v1269_v7, %v1261_v62  ;;  %v1374_v37 = vcvt.s32.f32 %v862_v8  ;;  %v1382_v60 = vcvt.s32.f32 %v870_v29  ;;  %v1021_v19 = vunpack.c.2.s8 %v589_v18 }
 0x124   :  { %2073 = vmatpush.bf16.msra.mxu1 %v1717_v34  ;;  %v1702_v26 = vpack.c.bf16 %v1254_v52, %v1246_v53  ;;  %v1405_v17 = vcvt.s32.f32 %v893_v55  ;;  %v1029_v42 = vunpack.c.3.s8 %v589_v18  ;;  %v1413_v5 = vcvt.s32.f32 %v901_v0 }
 0x125   :  { %v1766_v41 = vpack.c.bf16 %v1382_v60, %v1374_v37  ;;  %v718_v39 = vunpack.c.0.s8 %v518_v15  ;;  %v726_v61 = vunpack.c.1.s8 %v518_v15  ;;  %v1533_v47 = vcvt.s32.f32 %v1021_v19 }
 0x126   :  { %2085 = vmatpush.bf16.msra.mxu2 %v1789_v51  ;;  %2061 = vmatpush.bf16.msra.mxu0 %v1645_v1  ;;  %v1541_v45 = vcvt.s32.f32 %v1029_v42  ;;  %v846_v12 = vunpack.c.0.s8 %v550_v22  ;;  %v854_v43 = vunpack.c.1.s8 %v550_v22  ;;  %v1781_v10 = vpack.c.bf16 %v1413_v5, %v1405_v17  ;;  %v606_v5 = vld [vmem:[#allocation10 + $0x3a0] sm:$0xff] }
 0x127   :  { %2098 = vmatpush.bf16.msra.mxu3 %v1853_v31  ;;  %v1230_v21 = vcvt.s32.f32 %v718_v39  ;;  %v1238_v59 = vcvt.s32.f32 %v726_v61  ;;  %v877_v50 = vunpack.c.0.s8 %v557_v4  ;;  %v885_v58 = vunpack.c.1.s8 %v557_v4 }
 0x128   :  { %2074 = vmatpush.bf16.msra.mxu1 %v1709_v35  ;;  %v1845_v54 = vpack.c.bf16 %v1541_v45, %v1533_v47  ;;  %v1358_v46 = vcvt.s32.f32 %v846_v12  ;;  %v1366_v9 = vcvt.s32.f32 %v854_v43  ;;  %v1005_v27 = vunpack.c.0.s8 %v589_v18  ;;  %v502_v12 = vld [vmem:[#allocation10 + $0x60] sm:$0xff] }
 0x129   :  { %2062 = vmatmul.bf16.vlgmr.msra.gmra.mxu0 %v7921_v30  ;;  %v1694_v63 = vpack.c.bf16 %v1238_v59, %v1230_v21  ;;  %v1389_v25 = vcvt.s32.f32 %v877_v50  ;;  %v1013_v49 = vunpack.c.1.s8 %v589_v18  ;;  %v1397_v2 = vcvt.s32.f32 %v885_v58 }
 0x12a   :  { %2106 = vmatpush.bf16.msrb.mxu0 %v1702_v26  ;;  %2086 = vmatpush.bf16.msra.mxu2 %v1781_v10  ;;  %v1758_v14 = vpack.c.bf16 %v1366_v9, %v1358_v46  ;;  %v990_v24 = vunpack.c.2.s8 %v582_v23  ;;  %v998_v36 = vunpack.c.3.s8 %v582_v23  ;;  %v1517_v40 = vcvt.s32.f32 %v1005_v27  ;;  %v574_v26 = vld [vmem:[#allocation10 + $0x2a0] sm:$0xff] }
 0x12b   :  { %2075 = vmatmul.bf16.vlgmr.msra.gmra.mxu1 %v7926_v56  ;;  %2099 = vmatpush.bf16.msra.mxu3 %v1845_v54  ;;  %v1525_v15 = vcvt.s32.f32 %v1013_v49  ;;  %v1118_v34 = vunpack.c.2.s8 %v614_v16  ;;  %v1126_v13 = vunpack.c.3.s8 %v614_v16  ;;  %v1773_v44 = vpack.c.bf16 %v1397_v2, %v1389_v25  ;;  %v534_v9 = vld [vmem:[#allocation10 + $0x160] sm:$0xff] }
 0x12c   :  { %2119 = vmatpush.bf16.msrb.mxu1 %v1766_v41  ;;  %v1502_v22 = vcvt.s32.f32 %v990_v24  ;;  %v1510_v51 = vcvt.s32.f32 %v998_v36  ;;  %v702_v6 = vunpack.c.2.s8 %v510_v32  ;;  %v710_v31 = vunpack.c.3.s8 %v510_v32 }
 0x12d   :  { %v1837_v3 = vpack.c.bf16 %v1525_v15, %v1517_v40  ;;  %v1630_v20 = vcvt.s32.f32 %v1118_v34  ;;  %v1638_v4 = vcvt.s32.f32 %v1126_v13  ;;  %v830_v38 = vunpack.c.2.s8 %v542_v33 }
 0x12e   :  { %2107 = vmatpush.bf16.msrb.mxu0 %v1694_v63  ;;  %2087 = vmatpush.bf16.msra.mxu2 %v1773_v44  ;;  %v1830_v28 = vpack.c.bf16 %v1510_v51, %v1502_v22  ;;  %v1214_v11 = vcvt.s32.f32 %v702_v6  ;;  %v838_v62 = vunpack.c.3.s8 %v542_v33  ;;  %v1222_v8 = vcvt.s32.f32 %v710_v31 }
 0x12f   :  { %2100 = vmatpush.bf16.msra.mxu3 %v1837_v3  ;;  %v1894_v7 = vpack.c.bf16 %v1638_v4, %v1630_v20  ;;  %v974_v29 = vunpack.c.0.s8 %v582_v23  ;;  %v982_v18 = vunpack.c.1.s8 %v582_v23  ;;  %v1342_v1 = vcvt.s32.f32 %v830_v38 }
 0x130   :  { %2120 = vmatpush.bf16.msrb.mxu1 %v1758_v14  ;;  %v1350_v53 = vcvt.s32.f32 %v838_v62  ;;  %v1102_v52 = vunpack.c.0.s8 %v614_v16  ;;  %v1110_v55 = vunpack.c.1.s8 %v614_v16  ;;  %v1686_v35 = vpack.c.bf16 %v1222_v8, %v1214_v11  ;;  %v598_v8 = vld [vmem:[#allocation10 + $0x360] sm:$0xff] }
 0x131   :  { %2088 = vmatmul.bf16.vlgmr.msra.gmra.mxu2 %v7972_v57  ;;  %v1486_v37 = vcvt.s32.f32 %v974_v29  ;;  %v1494_v60 = vcvt.s32.f32 %v982_v18  ;;  %v686_v0 = vunpack.c.0.s8 %v510_v32  ;;  %v694_v41 = vunpack.c.1.s8 %v510_v32 }
 0x132   :  { %2132 = vmatpush.bf16.msrb.mxu2 %v1830_v28  ;;  %2101 = vmatmul.bf16.vlgmr.msra.gmra.mxu3 %v7979_v48  ;;  %v1750_v17 = vpack.c.bf16 %v1350_v53, %v1342_v1  ;;  %v1614_v19 = vcvt.s32.f32 %v1102_v52  ;;  %v1622_v42 = vcvt.s32.f32 %v1110_v55  ;;  %v814_v47 = vunpack.c.0.s8 %v542_v33  ;;  %v566_v28 = vld [vmem:[#allocation10 + $0x260] sm:$0xff] }
 0x133   :  { %2145 = vmatpush.bf16.msrb.mxu3 %v1894_v7  ;;  %2108 = vmatpush.bf16.msrb.mxu0 %v1686_v35  ;;  %v1822_v39 = vpack.c.bf16 %v1494_v60, %v1486_v37  ;;  %v1198_v61 = vcvt.s32.f32 %v686_v0  ;;  %v822_v45 = vunpack.c.1.s8 %v542_v33  ;;  %v1206_v10 = vcvt.s32.f32 %v694_v41  ;;  %v494_v52 = vld [vmem:[#allocation10 + $0x20] sm:$0xff] }
 0x134   :  { %2121 = vmatpush.bf16.msrb.mxu1 %v1750_v17  ;;  %v1886_v43 = vpack.c.bf16 %v1622_v42, %v1614_v19  ;;  %v958_v21 = vunpack.c.2.s8 %v574_v26  ;;  %v966_v59 = vunpack.c.3.s8 %v574_v26  ;;  %v1326_v50 = vcvt.s32.f32 %v814_v47  ;;  %v526_v42 = vld [vmem:[#allocation10 + $0x120] sm:$0xff] }
 0x135   :  { %v1334_v23 = vcvt.s32.f32 %v822_v45  ;;  %v1086_v54 = vunpack.c.2.s8 %v606_v5  ;;  %v1094_v46 = vunpack.c.3.s8 %v606_v5  ;;  %v1678_v58 = vpack.c.bf16 %v1206_v10, %v1198_v61 }
 0x136   :  { %2133 = vmatpush.bf16.msrb.mxu2 %v1822_v39  ;;  %v1470_v16 = vcvt.s32.f32 %v958_v21  ;;  %v1478_v63 = vcvt.s32.f32 %v966_v59  ;;  %v670_v25 = vunpack.c.2.s8 %v502_v12  ;;  %v678_v14 = vunpack.c.3.s8 %v502_v12 }
 0x137   :  { %2146 = vmatpush.bf16.msrb.mxu3 %v1886_v43  ;;  %v1742_v27 = vpack.c.bf16 %v1334_v23, %v1326_v50  ;;  %v1598_v49 = vcvt.s32.f32 %v1086_v54  ;;  %v1606_v32 = vcvt.s32.f32 %v1094_v46  ;;  %2109 = vmatpush.bf16.msrb.mxu0 %v1678_v58  ;;  %v798_v36 = vunpack.c.2.s8 %v534_v9 }
 0x138   :  { %v1814_v2 = vpack.c.bf16 %v1478_v63, %v1470_v16  ;;  %v1182_v24 = vcvt.s32.f32 %v670_v25  ;;  %v806_v40 = vunpack.c.3.s8 %v534_v9  ;;  %v1190_v34 = vcvt.s32.f32 %v678_v14 }
 0x139   :  { %2122 = vmatpush.bf16.msrb.mxu1 %v1742_v27  ;;  %v1878_v15 = vpack.c.bf16 %v1606_v32, %v1598_v49  ;;  %v942_v13 = vunpack.c.0.s8 %v574_v26  ;;  %v950_v33 = vunpack.c.1.s8 %v574_v26  ;;  %v1310_v44 = vcvt.s32.f32 %v798_v36 }
 0x13a   :  { %2134 = vmatpush.bf16.msrb.mxu2 %v1814_v2  ;;  %v1318_v22 = vcvt.s32.f32 %v806_v40  ;;  %v1070_v51 = vunpack.c.0.s8 %v606_v5  ;;  %v1078_v6 = vunpack.c.1.s8 %v606_v5  ;;  %v1670_v3 = vpack.c.bf16 %v1190_v34, %v1182_v24  ;;  %v519_v2 = vld [vmem:[#allocation10 + $0xe8] sm:$0xff] }
 0x13b   :  { %2147 = vmatpush.bf16.msrb.mxu3 %v1878_v15  ;;  %v1454_v20 = vcvt.s32.f32 %v942_v13  ;;  %v1462_v4 = vcvt.s32.f32 %v950_v33  ;;  %v654_v31 = vunpack.c.0.s8 %v502_v12  ;;  %v662_v7 = vunpack.c.1.s8 %v502_v12  ;;  %v551_v34 = vld [vmem:[#allocation10 + $0x1e8] sm:$0xff] }
 0x13c   :  { %v1734_v11 = vpack.c.bf16 %v1318_v22, %v1310_v44  ;;  %v1582_v38 = vcvt.s32.f32 %v1070_v51  ;;  %v1590_v62 = vcvt.s32.f32 %v1078_v6  ;;  %2110 = vmatpush.bf16.msrb.mxu0 %v1670_v3  ;;  %v782_v1 = vunpack.c.0.s8 %v534_v9  ;;  %v558_v51 = vld [vmem:[#allocation10 + $0x220] sm:$0xff] }
 0x13d   :  { %v1806_v29 = vpack.c.bf16 %v1462_v4, %v1454_v20  ;;  %v1166_v18 = vcvt.s32.f32 %v654_v31  ;;  %v790_v53 = vunpack.c.1.s8 %v534_v9  ;;  %v1174_v35 = vcvt.s32.f32 %v662_v7 }
 0x13e   :  { %2123 = vmatpush.bf16.msrb.mxu1 %v1734_v11  ;;  %v1870_v55 = vpack.c.bf16 %v1590_v62, %v1582_v38  ;;  %v926_v37 = vunpack.c.2.s8 %v566_v28  ;;  %v934_v60 = vunpack.c.3.s8 %v566_v28  ;;  %v1294_v0 = vcvt.s32.f32 %v782_v1  ;;  %v590_v62 = vld [vmem:[#allocation10 + $0x320] sm:$0xff] }
 0x13f   :  { %2135 = vmatpush.bf16.msrb.mxu2 %v1806_v29  ;;  %v1302_v26 = vcvt.s32.f32 %v790_v53  ;;  %v1054_v17 = vunpack.c.2.s8 %v598_v8  ;;  %v1062_v19 = vunpack.c.3.s8 %v598_v8  ;;  %v1662_v41 = vpack.c.bf16 %v1174_v35, %v1166_v18 }
 0x140   :  { %2148 = vmatpush.bf16.msrb.mxu3 %v1870_v55  ;;  %v1438_v5 = vcvt.s32.f32 %v926_v37  ;;  %v1446_v39 = vcvt.s32.f32 %v934_v60  ;;  %v638_v61 = vunpack.c.2.s8 %v494_v52  ;;  %v646_v43 = vunpack.c.3.s8 %v494_v52 }
 0x141   :  { %v1726_v47 = vpack.c.bf16 %v1302_v26, %v1294_v0  ;;  %v1566_v45 = vcvt.s32.f32 %v1054_v17  ;;  %v1574_v12 = vcvt.s32.f32 %v1062_v19  ;;  %2111 = vmatpush.bf16.msrb.mxu0 %v1662_v41  ;;  %v766_v59 = vunpack.c.2.s8 %v526_v42 }
 0x142   :  { %v1798_v10 = vpack.c.bf16 %v1446_v39, %v1438_v5  ;;  %v1150_v21 = vcvt.s32.f32 %v638_v61  ;;  %v774_v50 = vunpack.c.3.s8 %v526_v42  ;;  %v1158_v54 = vcvt.s32.f32 %v646_v43 }
 0x143   :  { %2124 = vmatpush.bf16.msrb.mxu1 %v1726_v47  ;;  %v1862_v23 = vpack.c.bf16 %v1574_v12, %v1566_v45  ;;  %v910_v46 = vunpack.c.0.s8 %v566_v28  ;;  %v918_v9 = vunpack.c.1.s8 %v566_v28  ;;  %v1278_v58 = vcvt.s32.f32 %v766_v59 }
 0x144   :  { %2136 = vmatpush.bf16.msrb.mxu2 %v1798_v10  ;;  %v1286_v16 = vcvt.s32.f32 %v774_v50  ;;  %v1038_v63 = vunpack.c.0.s8 %v598_v8  ;;  %v1046_v25 = vunpack.c.1.s8 %v598_v8  ;;  %v1654_v27 = vpack.c.bf16 %v1158_v54, %v1150_v21  ;;  %v583_v10 = vld [vmem:[#allocation10 + $0x2e8] sm:$0xff] }
 0x145   :  { %2149 = vmatpush.bf16.msrb.mxu3 %v1862_v23  ;;  %v1422_v49 = vcvt.s32.f32 %v910_v46  ;;  %v1430_v32 = vcvt.s32.f32 %v918_v9  ;;  %v622_v14 = vunpack.c.0.s8 %v494_v52  ;;  %v630_v15 = vunpack.c.1.s8 %v494_v52  ;;  %v615_v54 = vld [vmem:[#allocation10 + $0x3e8] sm:$0xff] }
 0x146   :  { %v1718_v24 = vpack.c.bf16 %v1286_v16, %v1278_v58  ;;  %v1550_v36 = vcvt.s32.f32 %v1038_v63  ;;  %v1558_v40 = vcvt.s32.f32 %v1046_v25  ;;  %2112 = vmatpush.bf16.msrb.mxu0 %v1654_v27  ;;  %v750_v44 = vunpack.c.0.s8 %v526_v42  ;;  %v511_v63 = vld [vmem:[#allocation10 + $0xa8] sm:$0xff] }
 0x147   :  { %v1790_v13 = vpack.c.bf16 %v1430_v32, %v1422_v49  ;;  %v1134_v33 = vcvt.s32.f32 %v622_v14  ;;  %v758_v22 = vunpack.c.1.s8 %v526_v42  ;;  %v1142_v3 = vcvt.s32.f32 %v630_v15 }
 0x148   :  { %2125 = vmatpush.bf16.msrb.mxu1 %v1718_v24  ;;  %v1854_v6 = vpack.c.bf16 %v1558_v40, %v1550_v36  ;;  %v735_v20 = vunpack.c.2.s8 %v519_v2  ;;  %v743_v4 = vunpack.c.3.s8 %v519_v2  ;;  %v1262_v31 = vcvt.s32.f32 %v750_v44  ;;  %v543_v40 = vld [vmem:[#allocation10 + $0x1a8] sm:$0xff] }
 0x149   :  { %2137 = vmatpush.bf16.msrb.mxu2 %v1790_v13  ;;  %v1270_v28 = vcvt.s32.f32 %v758_v22  ;;  %v863_v11 = vunpack.c.2.s8 %v551_v34  ;;  %v871_v38 = vunpack.c.3.s8 %v551_v34  ;;  %v1646_v7 = vpack.c.bf16 %v1142_v3, %v1134_v33 }
 0x14a   :  { %2150 = vmatpush.bf16.msrb.mxu3 %v1854_v6  ;;  %v1247_v8 = vcvt.s32.f32 %v735_v20  ;;  %v1255_v29 = vcvt.s32.f32 %v743_v4  ;;  %v894_v18 = vunpack.c.2.s8 %v558_v51  ;;  %v902_v55 = vunpack.c.3.s8 %v558_v51 }
 0x14b   :  { %v1710_v1 = vpack.c.bf16 %v1270_v28, %v1262_v31  ;;  %v1375_v53 = vcvt.s32.f32 %v863_v11  ;;  %v1383_v52 = vcvt.s32.f32 %v871_v38  ;;  %2113 = vmatpush.bf16.msrb.mxu0 %v1646_v7  ;;  %v1022_v60 = vunpack.c.2.s8 %v590_v62 }
 0x14c   :  { %v1703_v35 = vpack.c.bf16 %v1255_v29, %v1247_v8  ;;  %v1406_v37 = vcvt.s32.f32 %v894_v18  ;;  %v1030_v0 = vunpack.c.3.s8 %v590_v62  ;;  %v1414_v17 = vcvt.s32.f32 %v902_v55 }
 0x14d   :  { %2126 = vmatpush.bf16.msrb.mxu1 %v1710_v1  ;;  %v1767_v26 = vpack.c.bf16 %v1383_v52, %v1375_v53  ;;  %v719_v19 = vunpack.c.0.s8 %v519_v2  ;;  %v727_v42 = vunpack.c.1.s8 %v519_v2  ;;  %v1534_v41 = vcvt.s32.f32 %v1022_v60 }
 0x14e   :  { %v1542_v5 = vcvt.s32.f32 %v1030_v0  ;;  %v847_v39 = vunpack.c.0.s8 %v551_v34  ;;  %v855_v61 = vunpack.c.1.s8 %v551_v34  ;;  %v1782_v47 = vpack.c.bf16 %v1414_v17, %v1406_v37  ;;  %2114 = vmatmul.bf16.vlgmr.msrb.gmra.mxu0 %v7921_v30  ;;  %v607_v17 = vld [vmem:[#allocation10 + $0x3a8] sm:$0xff] }
 0x14f   :  { %2158 = vmatpush.bf16.msra.mxu0 %v1703_v35  ;;  %v1231_v45 = vcvt.s32.f32 %v719_v19  ;;  %v1239_v12 = vcvt.s32.f32 %v727_v42  ;;  %v878_v43 = vunpack.c.0.s8 %v558_v51  ;;  %v886_v23 = vunpack.c.1.s8 %v558_v51  ;;  %v575_v35 = vld [vmem:[#allocation10 + $0x2a8] sm:$0xff] }
 0x150   :  { %v1846_v21 = vpack.c.bf16 %v1542_v5, %v1534_v41  ;;  %2127 = vmatmul.bf16.vlgmr.msrb.gmra.mxu1 %v7926_v56  ;;  %v1359_v59 = vcvt.s32.f32 %v847_v39  ;;  %v1367_v50 = vcvt.s32.f32 %v855_v61  ;;  %2138 = vmatpush.bf16.msrb.mxu2 %v1782_v47  ;;  %v1006_v58 = vunpack.c.0.s8 %v590_v62  ;;  %v503_v39 = vld [vmem:[#allocation10 + $0x68] sm:$0xff] }
 0x151   :  { %2171 = vmatpush.bf16.msra.mxu1 %v1767_v26  ;;  %v1695_v46 = vpack.c.bf16 %v1239_v12, %v1231_v45  ;;  %v1390_v9 = vcvt.s32.f32 %v878_v43  ;;  %v1014_v16 = vunpack.c.1.s8 %v590_v62  ;;  %v1398_v27 = vcvt.s32.f32 %v886_v23 }
 0x152   :  { %2151 = vmatpush.bf16.msrb.mxu3 %v1846_v21  ;;  %v1759_v25 = vpack.c.bf16 %v1367_v50, %v1359_v59  ;;  %v991_v49 = vunpack.c.2.s8 %v583_v10  ;;  %v999_v32 = vunpack.c.3.s8 %v583_v10  ;;  %v1518_v14 = vcvt.s32.f32 %v1006_v58  ;;  %v535_v50 = vld [vmem:[#allocation10 + $0x168] sm:$0xff] }
 0x153   :  { %2159 = vmatpush.bf16.msra.mxu0 %v1695_v46  ;;  %v1526_v2 = vcvt.s32.f32 %v1014_v16  ;;  %v1119_v24 = vunpack.c.2.s8 %v615_v54  ;;  %v1127_v36 = vunpack.c.3.s8 %v615_v54  ;;  %v1774_v15 = vpack.c.bf16 %v1398_v27, %v1390_v9 }
 0x154   :  { %v1503_v34 = vcvt.s32.f32 %v991_v49  ;;  %v1511_v13 = vcvt.s32.f32 %v999_v32  ;;  %v703_v33 = vunpack.c.2.s8 %v511_v63  ;;  %v711_v6 = vunpack.c.3.s8 %v511_v63 }
 0x155   :  { %2172 = vmatpush.bf16.msra.mxu1 %v1759_v25  ;;  %v1838_v44 = vpack.c.bf16 %v1526_v2, %v1518_v14  ;;  %v1631_v22 = vcvt.s32.f32 %v1119_v24  ;;  %v1639_v51 = vcvt.s32.f32 %v1127_v36  ;;  %2139 = vmatpush.bf16.msrb.mxu2 %v1774_v15  ;;  %v831_v4 = vunpack.c.2.s8 %v543_v40 }
 0x156   :  { %v1831_v3 = vpack.c.bf16 %v1511_v13, %v1503_v34  ;;  %v1215_v20 = vcvt.s32.f32 %v703_v33  ;;  %v839_v31 = vunpack.c.3.s8 %v543_v40  ;;  %v1223_v11 = vcvt.s32.f32 %v711_v6 }
 0x157   :  { %2152 = vmatpush.bf16.msrb.mxu3 %v1838_v44  ;;  %v1895_v28 = vpack.c.bf16 %v1639_v51, %v1631_v22  ;;  %v975_v38 = vunpack.c.0.s8 %v583_v10  ;;  %v983_v62 = vunpack.c.1.s8 %v583_v10  ;;  %v1343_v7 = vcvt.s32.f32 %v831_v4 }
 0x158   :  { %v1351_v8 = vcvt.s32.f32 %v839_v31  ;;  %v1103_v29 = vunpack.c.0.s8 %v615_v54  ;;  %v1111_v18 = vunpack.c.1.s8 %v615_v54  ;;  %2140 = vmatmul.bf16.vlgmr.msrb.gmra.mxu2 %v7972_v57  ;;  %v1687_v1 = vpack.c.bf16 %v1223_v11, %v1215_v20  ;;  %v599_v11 = vld [vmem:[#allocation10 + $0x368] sm:$0xff] }
 0x159   :  { %2184 = vmatpush.bf16.msra.mxu2 %v1831_v3  ;;  %v1487_v53 = vcvt.s32.f32 %v975_v38  ;;  %v1495_v52 = vcvt.s32.f32 %v983_v62  ;;  %v687_v55 = vunpack.c.0.s8 %v511_v63  ;;  %v695_v26 = vunpack.c.1.s8 %v511_v63  ;;  %v567_v3 = vld [vmem:[#allocation10 + $0x268] sm:$0xff] }
 0x15a   :  { %2153 = vmatmul.bf16.vlgmr.msrb.gmra.mxu3 %v7979_v48  ;;  %v1751_v37 = vpack.c.bf16 %v1351_v8, %v1343_v7  ;;  %v1615_v60 = vcvt.s32.f32 %v1103_v29  ;;  %v1623_v0 = vcvt.s32.f32 %v1111_v18  ;;  %2160 = vmatpush.bf16.msra.mxu0 %v1687_v1  ;;  %v815_v41 = vunpack.c.0.s8 %v543_v40  ;;  %v495_v29 = vld [vmem:[#allocation10 + $0x28] sm:$0xff] }
 0x15b   :  { %2197 = vmatpush.bf16.msra.mxu3 %v1895_v28  ;;  %v1823_v19 = vpack.c.bf16 %v1495_v52, %v1487_v53  ;;  %v1199_v42 = vcvt.s32.f32 %v687_v55  ;;  %v823_v5 = vunpack.c.1.s8 %v543_v40  ;;  %v1207_v47 = vcvt.s32.f32 %v695_v26 }
 0x15c   :  { %2173 = vmatpush.bf16.msra.mxu1 %v1751_v37  ;;  %v1887_v61 = vpack.c.bf16 %v1623_v0, %v1615_v60  ;;  %v959_v45 = vunpack.c.2.s8 %v575_v35  ;;  %v967_v12 = vunpack.c.3.s8 %v575_v35  ;;  %v1327_v43 = vcvt.s32.f32 %v815_v41 }
 0x15d   :  { %2185 = vmatpush.bf16.msra.mxu2 %v1823_v19  ;;  %v1335_v10 = vcvt.s32.f32 %v823_v5  ;;  %v1087_v21 = vunpack.c.2.s8 %v607_v17  ;;  %v1095_v59 = vunpack.c.3.s8 %v607_v17  ;;  %v1679_v23 = vpack.c.bf16 %v1207_v47, %v1199_v42 }
 0x15e   :  { %v1471_v54 = vcvt.s32.f32 %v959_v45  ;;  %v1479_v46 = vcvt.s32.f32 %v967_v12  ;;  %v671_v9 = vunpack.c.2.s8 %v503_v39  ;;  %v679_v25 = vunpack.c.3.s8 %v503_v39 }
 0x15f   :  { %2198 = vmatpush.bf16.msra.mxu3 %v1887_v61  ;;  %v1743_v58 = vpack.c.bf16 %v1335_v10, %v1327_v43  ;;  %v1599_v16 = vcvt.s32.f32 %v1087_v21  ;;  %v1607_v63 = vcvt.s32.f32 %v1095_v59  ;;  %2161 = vmatpush.bf16.msra.mxu0 %v1679_v23  ;;  %v799_v32 = vunpack.c.2.s8 %v535_v50 }
 0x160   :  { %v1815_v27 = vpack.c.bf16 %v1479_v46, %v1471_v54  ;;  %v1183_v49 = vcvt.s32.f32 %v671_v9  ;;  %v807_v14 = vunpack.c.3.s8 %v535_v50  ;;  %v1191_v24 = vcvt.s32.f32 %v679_v25 }
 0x161   :  { %2174 = vmatpush.bf16.msra.mxu1 %v1743_v58  ;;  %v1879_v2 = vpack.c.bf16 %v1607_v63, %v1599_v16  ;;  %v943_v36 = vunpack.c.0.s8 %v575_v35  ;;  %v951_v40 = vunpack.c.1.s8 %v575_v35  ;;  %v1311_v15 = vcvt.s32.f32 %v799_v32  ;;  %v520_v32 = vld [vmem:[#allocation10 + $0xf0] sm:$0xff] }
 0x162   :  { %2186 = vmatpush.bf16.msra.mxu2 %v1815_v27  ;;  %v1319_v34 = vcvt.s32.f32 %v807_v14  ;;  %v1071_v13 = vunpack.c.0.s8 %v607_v17  ;;  %v1079_v33 = vunpack.c.1.s8 %v607_v17  ;;  %v1671_v44 = vpack.c.bf16 %v1191_v24, %v1183_v49  ;;  %v527_v17 = vld [vmem:[#allocation10 + $0x128] sm:$0xff] }
 0x163   :  { %2199 = vmatpush.bf16.msra.mxu3 %v1879_v2  ;;  %v1455_v22 = vcvt.s32.f32 %v943_v36  ;;  %v1463_v51 = vcvt.s32.f32 %v951_v40  ;;  %v655_v6 = vunpack.c.0.s8 %v503_v39  ;;  %v663_v28 = vunpack.c.1.s8 %v503_v39 }
 0x164   :  { %v1735_v20 = vpack.c.bf16 %v1319_v34, %v1311_v15  ;;  %v1583_v4 = vcvt.s32.f32 %v1071_v13  ;;  %v1591_v31 = vcvt.s32.f32 %v1079_v33  ;;  %2162 = vmatpush.bf16.msra.mxu0 %v1671_v44  ;;  %v783_v7 = vunpack.c.0.s8 %v535_v50  ;;  %v552_v15 = vld [vmem:[#allocation10 + $0x1f0] sm:$0xff] }
 0x165   :  { %v1807_v38 = vpack.c.bf16 %v1463_v51, %v1455_v22  ;;  %v1167_v62 = vcvt.s32.f32 %v655_v6  ;;  %v791_v8 = vunpack.c.1.s8 %v535_v50  ;;  %v8164_v18 = vpop.f32.mrf.mxu0  ;;  %v1175_v53 = vcvt.s32.f32 %v663_v28  ;;  %v559_v51 = vld [vmem:[#allocation10 + $0x228] sm:$0xff] }
 0x166   :  { %2175 = vmatpush.bf16.msra.mxu1 %v1735_v20  ;;  %v1871_v1 = vpack.c.bf16 %v1591_v31, %v1583_v4  ;;  %v927_v52 = vunpack.c.2.s8 %v567_v3  ;;  %v935_v55 = vunpack.c.3.s8 %v567_v3  ;;  %v8166_v35 = vpop.f32.mrf.mxu1  ;;  %v1295_v37 = vcvt.s32.f32 %v783_v7 }
 0x167   :  { %2187 = vmatpush.bf16.msra.mxu2 %v1807_v38  ;;  %v1303_v60 = vcvt.s32.f32 %v791_v8  ;;  %v1055_v0 = vunpack.c.2.s8 %v599_v11  ;;  %v1063_v26 = vunpack.c.3.s8 %v599_v11  ;;  %v1663_v19 = vpack.c.bf16 %v1175_v53, %v1167_v62  ;;  %v591_v62 = vld [vmem:[#allocation10 + $0x328] sm:$0xff] }
 0x168   :  { %2200 = vmatpush.bf16.msra.mxu3 %v1871_v1  ;;  %v1439_v42 = vcvt.s32.f32 %v927_v52  ;;  %v1447_v41 = vcvt.s32.f32 %v935_v55  ;;  %v639_v5 = vunpack.c.2.s8 %v495_v29  ;;  %v647_v45 = vunpack.c.3.s8 %v495_v29 }
 0x169   :  { %v1727_v39 = vpack.c.bf16 %v1303_v60, %v1295_v37  ;;  %v1567_v61 = vcvt.s32.f32 %v1055_v0  ;;  %v1575_v47 = vcvt.s32.f32 %v1063_v26  ;;  %2163 = vmatpush.bf16.msra.mxu0 %v1663_v19  ;;  %v767_v10 = vunpack.c.2.s8 %v527_v17 }
 0x16a   :  { %v1799_v12 = vpack.c.bf16 %v1447_v41, %v1439_v42  ;;  %v1151_v43 = vcvt.s32.f32 %v639_v5  ;;  %v775_v21 = vunpack.c.3.s8 %v527_v17  ;;  %v1159_v50 = vcvt.s32.f32 %v647_v45 }
 0x16b   :  { %2176 = vmatpush.bf16.msra.mxu1 %v1727_v39  ;;  %v1863_v59 = vpack.c.bf16 %v1575_v47, %v1567_v61  ;;  %v911_v23 = vunpack.c.0.s8 %v567_v3  ;;  %v919_v54 = vunpack.c.1.s8 %v567_v3  ;;  %v1279_v46 = vcvt.s32.f32 %v767_v10 }
 0x16c   :  { %2188 = vmatpush.bf16.msra.mxu2 %v1799_v12  ;;  %v1287_v9 = vcvt.s32.f32 %v775_v21  ;;  %v1039_v58 = vunpack.c.0.s8 %v599_v11  ;;  %v1047_v16 = vunpack.c.1.s8 %v599_v11  ;;  %v1655_v63 = vpack.c.bf16 %v1159_v50, %v1151_v43 }
 0x16d   :  { %2201 = vmatpush.bf16.msra.mxu3 %v1863_v59  ;;  %v1423_v25 = vcvt.s32.f32 %v911_v23  ;;  %v1431_v27 = vcvt.s32.f32 %v919_v54  ;;  %v623_v49 = vunpack.c.0.s8 %v495_v29  ;;  %v1909_v14 = vpop.f32.mrf.mxu0  ;;  %v631_v40 = vunpack.c.1.s8 %v495_v29  ;;  %v584_v23 = vld [vmem:[#allocation10 + $0x2f0] sm:$0xff] }
 0x16e   :  { %v1719_v2 = vpack.c.bf16 %v1287_v9, %v1279_v46  ;;  %v1551_v24 = vcvt.s32.f32 %v1039_v58  ;;  %v1559_v36 = vcvt.s32.f32 %v1047_v16  ;;  %v1922_v34 = vpop.f32.mrf.mxu1  ;;  %2164 = vmatpush.bf16.msra.mxu0 %v1655_v63  ;;  %v751_v44 = vunpack.c.0.s8 %v527_v17  ;;  %v616_v16 = vld [vmem:[#allocation10 + $0x3f0] sm:$0xff] }
 0x16f   :  { %v1791_v13 = vpack.c.bf16 %v1431_v27, %v1423_v25  ;;  %v1135_v33 = vcvt.s32.f32 %v623_v49  ;;  %v759_v22 = vunpack.c.1.s8 %v527_v17  ;;  %v1143_v3 = vcvt.s32.f32 %v631_v40 }
 0x170   :  { %2177 = vmatpush.bf16.msra.mxu1 %v1719_v2  ;;  %v1855_v6 = vpack.c.bf16 %v1559_v36, %v1551_v24  ;;  %v736_v20 = vunpack.c.2.s8 %v520_v32  ;;  %v744_v4 = vunpack.c.3.s8 %v520_v32  ;;  %v1263_v31 = vcvt.s32.f32 %v751_v44 }
 0x171   :  { %2189 = vmatpush.bf16.msra.mxu2 %v1791_v13  ;;  %v1271_v28 = vcvt.s32.f32 %v759_v22  ;;  %v864_v11 = vunpack.c.2.s8 %v552_v15  ;;  %v872_v38 = vunpack.c.3.s8 %v552_v15  ;;  %v1647_v7 = vpack.c.bf16 %v1143_v3, %v1135_v33  ;;  %v544_v22 = vld [vmem:[#allocation10 + $0x1b0] sm:$0xff] }
 0x172   :  { %2202 = vmatpush.bf16.msra.mxu3 %v1855_v6  ;;  %v1248_v8 = vcvt.s32.f32 %v736_v20  ;;  %v1256_v29 = vcvt.s32.f32 %v744_v4  ;;  %v895_v1 = vunpack.c.2.s8 %v559_v51  ;;  %v903_v37 = vunpack.c.3.s8 %v559_v51 }
 0x173   :  { %v1711_v53 = vpack.c.bf16 %v1271_v28, %v1263_v31  ;;  %v1376_v52 = vcvt.s32.f32 %v864_v11  ;;  %v1384_v55 = vcvt.s32.f32 %v872_v38  ;;  %v8168_v60 = vpop.f32.mrf.mxu2  ;;  %2165 = vmatpush.bf16.msra.mxu0 %v1647_v7  ;;  %v1023_v17 = vunpack.c.2.s8 %v591_v62 }
 0x174   :  { %v1704_v0 = vpack.c.bf16 %v1256_v29, %v1248_v8  ;;  %v1407_v26 = vcvt.s32.f32 %v895_v1  ;;  %v1031_v19 = vunpack.c.3.s8 %v591_v62  ;;  %v8170_v42 = vpop.f32.mrf.mxu3  ;;  %v1415_v5 = vcvt.s32.f32 %v903_v37 }
 0x175   :  { %2178 = vmatpush.bf16.msra.mxu1 %v1711_v53  ;;  %v1768_v41 = vpack.c.bf16 %v1384_v55, %v1376_v52  ;;  %v720_v39 = vunpack.c.0.s8 %v520_v32  ;;  %v728_v61 = vunpack.c.1.s8 %v520_v32  ;;  %v1535_v47 = vcvt.s32.f32 %v1023_v17  ;;  %v512_v32 = vld [vmem:[#allocation10 + $0xb0] sm:$0xff]  ;;  %v8174_v40 = vpop.f32.mrf.mxu0 }
 0x176   :  { %v1543_v45 = vcvt.s32.f32 %v1031_v19  ;;  %v848_v12 = vunpack.c.0.s8 %v552_v15  ;;  %v856_v43 = vunpack.c.1.s8 %v552_v15  ;;  %v1783_v10 = vpack.c.bf16 %v1415_v5, %v1407_v26  ;;  %2166 = vmatmul.bf16.vlgmr.msra.gmra.mxu0 %v7921_v30  ;;  %v8176_v15 = vpop.f32.mrf.mxu1 }
 0x177   :  { %2210 = vmatpush.bf16.msrb.mxu0 %v1704_v0  ;;  %v1232_v21 = vcvt.s32.f32 %v720_v39  ;;  %v1240_v59 = vcvt.s32.f32 %v728_v61  ;;  %v879_v50 = vunpack.c.0.s8 %v559_v51  ;;  %v887_v58 = vunpack.c.1.s8 %v559_v51 }
 0x178   :  { %v1847_v54 = vpack.c.bf16 %v1543_v45, %v1535_v47  ;;  %2179 = vmatmul.bf16.vlgmr.msra.gmra.mxu1 %v7926_v56  ;;  %v1360_v46 = vcvt.s32.f32 %v848_v12  ;;  %v1368_v9 = vcvt.s32.f32 %v856_v43  ;;  %2190 = vmatpush.bf16.msra.mxu2 %v1783_v10  ;;  %v1007_v27 = vunpack.c.0.s8 %v591_v62  ;;  %v576_v47 = vld [vmem:[#allocation10 + $0x2b0] sm:$0xff] }
 0x179   :  { %2223 = vmatpush.bf16.msrb.mxu1 %v1768_v41  ;;  %v1696_v63 = vpack.c.bf16 %v1240_v59, %v1232_v21  ;;  %v1391_v25 = vcvt.s32.f32 %v879_v50  ;;  %v1015_v49 = vunpack.c.1.s8 %v591_v62  ;;  %v1399_v2 = vcvt.s32.f32 %v887_v58  ;;  %v608_v43 = vld [vmem:[#allocation10 + $0x3b0] sm:$0xff] }
 0x17a   :  { %2203 = vmatpush.bf16.msra.mxu3 %v1847_v54  ;;  %v1760_v14 = vpack.c.bf16 %v1368_v9, %v1360_v46  ;;  %v992_v24 = vunpack.c.2.s8 %v584_v23  ;;  %v1000_v36 = vunpack.c.3.s8 %v584_v23  ;;  %v1519_v34 = vcvt.s32.f32 %v1007_v27 }
 0x17b   :  { %2211 = vmatpush.bf16.msrb.mxu0 %v1696_v63  ;;  %v1527_v13 = vcvt.s32.f32 %v1015_v49  ;;  %v1120_v33 = vunpack.c.2.s8 %v616_v16  ;;  %v1128_v44 = vunpack.c.3.s8 %v616_v16  ;;  %v1935_v51 = vpop.f32.mrf.mxu2  ;;  %v1775_v6 = vpack.c.bf16 %v1399_v2, %v1391_v25  ;;  %v504_v63 = vld [vmem:[#allocation10 + $0x70] sm:$0xff] }
 0x17c   :  { %v1504_v3 = vcvt.s32.f32 %v992_v24  ;;  %v1512_v20 = vcvt.s32.f32 %v1000_v36  ;;  %v704_v4 = vunpack.c.2.s8 %v512_v32  ;;  %v1948_v31 = vpop.f32.mrf.mxu3  ;;  %v712_v62 = vunpack.c.3.s8 %v512_v32  ;;  %v536_v2 = vld [vmem:[#allocation10 + $0x170] sm:$0xff] }
 0x17d   :  { %2224 = vmatpush.bf16.msrb.mxu1 %v1760_v14  ;;  %v1839_v28 = vpack.c.bf16 %v1527_v13, %v1519_v34  ;;  %v1632_v11 = vcvt.s32.f32 %v1120_v33  ;;  %v1640_v38 = vcvt.s32.f32 %v1128_v44  ;;  %2191 = vmatpush.bf16.msra.mxu2 %v1775_v6  ;;  %v832_v29 = vunpack.c.2.s8 %v544_v22  ;;  %v1961_v10 = vpop.f32.mrf.mxu0 }
 0x17e   :  { %v1832_v7 = vpack.c.bf16 %v1512_v20, %v1504_v3  ;;  %v1216_v8 = vcvt.s32.f32 %v704_v4  ;;  %v840_v1 = vunpack.c.3.s8 %v544_v22  ;;  %v1224_v52 = vcvt.s32.f32 %v712_v62  ;;  %v1974_v21 = vpop.f32.mrf.mxu1 }
 0x17f   :  { %2204 = vmatpush.bf16.msra.mxu3 %v1839_v28  ;;  %v1896_v53 = vpack.c.bf16 %v1640_v38, %v1632_v11  ;;  %v8180_v55 = vadd.f32 %v8166_v35, %v8164_v18  ;;  %v976_v37 = vunpack.c.0.s8 %v584_v23  ;;  %v1344_v0 = vcvt.s32.f32 %v832_v29 }
 0x180   :  { %v1352_v26 = vcvt.s32.f32 %v840_v1  ;;  %v984_v17 = vunpack.c.1.s8 %v584_v23  ;;  %v1104_v19 = vunpack.c.0.s8 %v616_v16  ;;  %2192 = vmatmul.bf16.vlgmr.msra.gmra.mxu2 %v7972_v57  ;;  %v1688_v41 = vpack.c.bf16 %v1224_v52, %v1216_v8 }
 0x181   :  { %2236 = vmatpush.bf16.msrb.mxu2 %v1832_v7  ;;  %v1488_v5 = vcvt.s32.f32 %v976_v37  ;;  %v1112_v39 = vunpack.c.1.s8 %v616_v16  ;;  %v688_v61 = vunpack.c.0.s8 %v512_v32  ;;  %v696_v35 = vunpack.c.1.s8 %v512_v32  ;;  %v8184_v37 = vld [vmem:[#allocation11] sm:$0xff] }
 0x182   :  { %2205 = vmatmul.bf16.vlgmr.msra.gmra.mxu3 %v7979_v48  ;;  %v1752_v45 = vpack.c.bf16 %v1352_v26, %v1344_v0  ;;  %v1496_v12 = vcvt.s32.f32 %v984_v17  ;;  %v1616_v18 = vcvt.s32.f32 %v1104_v19  ;;  %2212 = vmatpush.bf16.msrb.mxu0 %v1688_v41  ;;  %v816_v23 = vunpack.c.0.s8 %v544_v22  ;;  %v8186_v41 = vld [vmem:[#allocation13] sm:$0xff] }
 0x183   :  { %2249 = vmatpush.bf16.msrb.mxu3 %v1896_v53  ;;  %v1624_v59 = vcvt.s32.f32 %v1112_v39  ;;  %v1200_v50 = vcvt.s32.f32 %v688_v61  ;;  %v824_v54 = vunpack.c.1.s8 %v544_v22  ;;  %v1208_v9 = vcvt.s32.f32 %v696_v35 }
 0x184   :  { %2225 = vmatpush.bf16.msrb.mxu1 %v1752_v45  ;;  %v1824_v46 = vpack.c.bf16 %v1496_v12, %v1488_v5  ;;  %v960_v58 = vunpack.c.2.s8 %v576_v47  ;;  %v968_v16 = vunpack.c.3.s8 %v576_v47  ;;  %v1328_v27 = vcvt.s32.f32 %v816_v23  ;;  %v8188_v5 = vpop.f32.mrf.mxu2  ;;  %v8190_v39 = vpop.f32.mrf.mxu3 }
 0x185   :  { %v1888_v25 = vpack.c.bf16 %v1624_v59, %v1616_v18  ;;  %v1336_v49 = vcvt.s32.f32 %v824_v54  ;;  %v1088_v14 = vunpack.c.2.s8 %v608_v43  ;;  %v1680_v32 = vpack.c.bf16 %v1208_v9, %v1200_v50  ;;  %v568_v18 = vld [vmem:[#allocation10 + $0x270] sm:$0xff] }
 0x186   :  { %2237 = vmatpush.bf16.msrb.mxu2 %v1824_v46  ;;  %v1472_v24 = vcvt.s32.f32 %v960_v58  ;;  %v1480_v36 = vcvt.s32.f32 %v968_v16  ;;  %v1096_v34 = vunpack.c.3.s8 %v608_v43  ;;  %v672_v44 = vunpack.c.2.s8 %v504_v63  ;;  %v600_v59 = vld [vmem:[#allocation10 + $0x370] sm:$0xff] }
 0x187   :  { %2250 = vmatpush.bf16.msrb.mxu3 %v1888_v25  ;;  %v1744_v13 = vpack.c.bf16 %v1336_v49, %v1328_v27  ;;  %v1600_v33 = vcvt.s32.f32 %v1088_v14  ;;  %v680_v22 = vunpack.c.3.s8 %v504_v63  ;;  %2213 = vmatpush.bf16.msrb.mxu0 %v1680_v32  ;;  %v800_v3 = vunpack.c.2.s8 %v536_v2  ;;  %v496_v50 = vld [vmem:[#allocation10 + $0x30] sm:$0xff] }
 0x188   :  { %v1816_v51 = vpack.c.bf16 %v1480_v36, %v1472_v24  ;;  %v1608_v6 = vcvt.s32.f32 %v1096_v34  ;;  %v808_v20 = vunpack.c.3.s8 %v536_v2  ;;  %v1184_v4 = vcvt.s32.f32 %v672_v44  ;;  %v8197_v27 = vld [vmem:[#allocation10 + $0x130] sm:$0xff]  ;;  %v8200_v44 = vpop.f32.mrf.mxu0 }
 0x189   :  { %2226 = vmatpush.bf16.msrb.mxu1 %v1744_v13  ;;  %v1192_v31 = vcvt.s32.f32 %v680_v22  ;;  %v944_v28 = vunpack.c.0.s8 %v576_v47  ;;  %v952_v11 = vunpack.c.1.s8 %v576_v47  ;;  %v1312_v62 = vcvt.s32.f32 %v800_v3  ;;  %v8202_v22 = vpop.f32.mrf.mxu1 }
 0x18a   :  { %2238 = vmatpush.bf16.msrb.mxu2 %v1816_v51  ;;  %v1880_v38 = vpack.c.bf16 %v1608_v6, %v1600_v33  ;;  %v1320_v7 = vcvt.s32.f32 %v808_v20  ;;  %v1072_v8 = vunpack.c.0.s8 %v608_v43  ;;  %v1080_v52 = vunpack.c.1.s8 %v608_v43 }
 0x18b   :  { %v1672_v29 = vpack.c.bf16 %v1192_v31, %v1184_v4  ;;  %v1456_v1 = vcvt.s32.f32 %v944_v28  ;;  %v1464_v53 = vcvt.s32.f32 %v952_v11  ;;  %v656_v17 = vunpack.c.0.s8 %v504_v63 }
 0x18c   :  { %2251 = vmatpush.bf16.msrb.mxu3 %v1880_v38  ;;  %v1736_v0 = vpack.c.bf16 %v1320_v7, %v1312_v62  ;;  %v1584_v26 = vcvt.s32.f32 %v1072_v8  ;;  %v664_v19 = vunpack.c.1.s8 %v504_v63  ;;  %v1592_v47 = vcvt.s32.f32 %v1080_v52  ;;  %v1987_v4 = vpop.f32.mrf.mxu2  ;;  %v2000_v31 = vpop.f32.mrf.mxu3 }
 0x18d   :  { %2214 = vmatpush.bf16.msrb.mxu0 %v1672_v29  ;;  %v1808_v61 = vpack.c.bf16 %v1464_v53, %v1456_v1  ;;  %v784_v45 = vunpack.c.0.s8 %v536_v2  ;;  %v792_v12 = vunpack.c.1.s8 %v536_v2  ;;  %v1168_v35 = vcvt.s32.f32 %v656_v17 }
 0x18e   :  { %2227 = vmatpush.bf16.msrb.mxu1 %v1736_v0  ;;  %v1176_v43 = vcvt.s32.f32 %v664_v19  ;;  %v1934_v10 = vadd.f32 %v8168_v60, %v8180_v55  ;;  %v2316_v21 = vperm.slane %v8184_v37, 0  ;;  %v1872_v23 = vpack.c.bf16 %v1592_v47, %v1584_v26  ;;  %v521_v47 = vld [vmem:[#allocation10 + $0xf8] sm:$0xff] }
 0x18f   :  { %2239 = vmatpush.bf16.msrb.mxu2 %v1808_v61  ;;  %v1296_v54 = vcvt.s32.f32 %v784_v45  ;;  %v1304_v46 = vcvt.s32.f32 %v792_v12  ;;  %v2342_v9 = vperm.slane %v8186_v41, 0  ;;  %v928_v63 = vunpack.c.2.s8 %v568_v18 }
 0x190   :  { %v1664_v58 = vpack.c.bf16 %v1176_v43, %v1168_v35  ;;  %v1947_v16 = vadd.f32 %v8170_v42, %v1934_v10  ;;  %v936_v25 = vunpack.c.3.s8 %v568_v18  ;;  %2252 = vmatpush.bf16.msrb.mxu3 %v1872_v23  ;;  %v1056_v60 = vunpack.c.2.s8 %v600_v59  ;;  %v553_v35 = vld [vmem:[#allocation10 + $0x1f8] sm:$0xff] }
 0x191   :  { %v1728_v49 = vpack.c.bf16 %v1304_v46, %v1296_v54  ;;  %v1064_v55 = vunpack.c.3.s8 %v600_v59  ;;  %v640_v14 = vunpack.c.2.s8 %v496_v50  ;;  %v1440_v32 = vcvt.s32.f32 %v928_v63 }
 0x192   :  { %2215 = vmatpush.bf16.msrb.mxu0 %v1664_v58  ;;  %v2332_v2 = vmul.f32 %v2316_v21, %v1947_v16  ;;  %v1448_v24 = vcvt.s32.f32 %v936_v25  ;;  %v648_v36 = vunpack.c.3.s8 %v496_v50  ;;  %v1568_v34 = vcvt.s32.f32 %v1056_v60  ;;  %v2013_v58 = vpop.f32.mrf.mxu0  ;;  %v2026_v16 = vpop.f32.mrf.mxu1 }
 0x193   :  { %2228 = vmatpush.bf16.msrb.mxu1 %v1728_v49  ;;  %v1576_v13 = vcvt.s32.f32 %v1064_v55  ;;  %v1152_v33 = vcvt.s32.f32 %v640_v14  ;;  %v768_v42 = vunpack.c.2.s8 %v8197_v27  ;;  %v776_v20 = vunpack.c.3.s8 %v8197_v27 }
 0x194   :  { %v2358_v51 = vadd.f32 %v2342_v9, %v2332_v2  ;;  %v1800_v6 = vpack.c.bf16 %v1448_v24, %v1440_v32  ;;  %v1160_v3 = vcvt.s32.f32 %v648_v36  ;;  %v8207_v38 = vadd.f32 %v8176_v15, %v8174_v40 }
 0x195   :  { %v1864_v28 = vpack.c.bf16 %v1576_v13, %v1568_v34  ;;  %v1280_v11 = vcvt.s32.f32 %v768_v42  ;;  %v912_v62 = vunpack.c.0.s8 %v568_v18  ;;  %v1288_v29 = vcvt.s32.f32 %v776_v20 }
 0x196   :  { %vm2366_vm4 = vcmp.ge.f32.partialorder %v2358_v51, 0.0  ;;  %v2374_v7 = vmul.f32 0.01, %v2358_v51  ;;  %2240 = vmatpush.bf16.msrb.mxu2 %v1800_v6  ;;  %v1656_v8 = vpack.c.bf16 %v1160_v3, %v1152_v33  ;;  %v920_v1 = vunpack.c.1.s8 %v568_v18 }
 0x197   :  { %2253 = vmatpush.bf16.msrb.mxu3 %v1864_v28  ;;  %v1424_v53 = vcvt.s32.f32 %v912_v62  ;;  %v1040_v52 = vunpack.c.0.s8 %v600_v59  ;;  %v1048_v0 = vunpack.c.1.s8 %v600_v59  ;;  %v1720_v17 = vpack.c.bf16 %v1288_v29, %v1280_v11  ;;  %v560_v59 = vld [vmem:[#allocation10 + $0x230] sm:$0xff] }
 0x198   :  { %v2382_v26 = vsel %vm2366_vm4, %v2358_v51, %v2374_v7  ;;  %2216 = vmatpush.bf16.msrb.mxu0 %v1656_v8  ;;  %v624_v19 = vunpack.c.0.s8 %v496_v50  ;;  %v632_v61 = vunpack.c.1.s8 %v496_v50  ;;  %v1432_v40 = vcvt.s32.f32 %v920_v1  ;;  %v592_v50 = vld [vmem:[#allocation10 + $0x330] sm:$0xff] }
 0x199   :  { %v8209_v45 = vpack.c.bf16 %v2382_v26, %v2382_v26  ;;  %v1552_v15 = vcvt.s32.f32 %v1040_v52  ;;  %v1560_v12 = vcvt.s32.f32 %v1048_v0  ;;  %2229 = vmatpush.bf16.msrb.mxu1 %v1720_v17  ;;  %v752_v18 = vunpack.c.0.s8 %v8197_v27 }
 0x19a   :  { %v1136_v43 = vcvt.s32.f32 %v624_v19  ;;  %v1144_v10 = vcvt.s32.f32 %v632_v61  ;;  %v760_v21 = vunpack.c.1.s8 %v8197_v27  ;;  %v1792_v23 = vpack.c.bf16 %v1432_v40, %v1424_v53  ;;  %v585_v53 = vld [vmem:[#allocation10 + $0x2f8] sm:$0xff]  ;;  %v8216_v61 = vpop.f32.mrf.mxu2 }
 0x19b   :  { %v1856_v54 = vpack.c.bf16 %v1560_v12, %v1552_v15  ;;  %v737_v46 = vunpack.c.2.s8 %v521_v47  ;;  %v745_v9 = vunpack.c.3.s8 %v521_v47  ;;  %v1264_v25 = vcvt.s32.f32 %v752_v18  ;;  %v8214_v19 = vld [vmem:[#allocation10 + $0x3f8] sm:$0xff] }
 0x19c   :  { %v1648_v63 = vpack.c.bf16 %v1144_v10, %v1136_v43  ;;  %v1272_v49 = vcvt.s32.f32 %v760_v21  ;;  %v865_v60 = vunpack.c.2.s8 %v553_v35  ;;  %2241 = vmatpush.bf16.msrb.mxu2 %v1792_v23  ;;  %v873_v2 = vunpack.c.3.s8 %v553_v35 }
 0x19d   :  { %2254 = vmatpush.bf16.msrb.mxu3 %v1856_v54  ;;  %v1249_v55 = vcvt.s32.f32 %v737_v46  ;;  %v1257_v14 = vcvt.s32.f32 %v745_v9  ;;  %v896_v32 = vunpack.c.2.s8 %v560_v59  ;;  %v904_v36 = vunpack.c.3.s8 %v560_v59  ;;  %v8223_v9 = vld [vmem:[#allocation10 + $0xb8] sm:$0xff] }
 0x19e   :  { %2217 = vmatpush.bf16.msrb.mxu0 %v1648_v63  ;;  %v1712_v27 = vpack.c.bf16 %v1272_v49, %v1264_v25  ;;  %v1377_v24 = vcvt.s32.f32 %v865_v60  ;;  %v1024_v34 = vunpack.c.2.s8 %v592_v50  ;;  %v1385_v33 = vcvt.s32.f32 %v873_v2  ;;  %v545_v25 = vld [vmem:[#allocation10 + $0x1b8] sm:$0xff] }
 0x19f   :  { %v1705_v13 = vpack.c.bf16 %v1257_v14, %v1249_v55  ;;  %v1408_v42 = vcvt.s32.f32 %v896_v32  ;;  %v1032_v51 = vunpack.c.3.s8 %v592_v50  ;;  %v1416_v6 = vcvt.s32.f32 %v904_v36 }
 0x1a0   :  { %2230 = vmatpush.bf16.msrb.mxu1 %v1712_v27  ;;  %v1536_v3 = vcvt.s32.f32 %v1024_v34  ;;  %v721_v20 = vunpack.c.0.s8 %v521_v47  ;;  %v729_v4 = vunpack.c.1.s8 %v521_v47  ;;  %v1769_v31 = vpack.c.bf16 %v1385_v33, %v1377_v24  ;;  %v8218_v47 = vpop.f32.mrf.mxu3 }
 0x1a1   :  { %v1544_v28 = vcvt.s32.f32 %v1032_v51  ;;  %v849_v11 = vunpack.c.0.s8 %v553_v35  ;;  %v857_v62 = vunpack.c.1.s8 %v553_v35  ;;  %v1784_v7 = vpack.c.bf16 %v1416_v6, %v1408_v42  ;;  %2218 = vmatmul.bf16.vlgmr.msrb.gmra.mxu0 %v7921_v30 }
 0x1a2   :  { %2262 = vmatpush.bf16.msra.mxu0 %v1705_v13  ;;  %v1233_v8 = vcvt.s32.f32 %v721_v20  ;;  %v1241_v29 = vcvt.s32.f32 %v729_v4  ;;  %v880_v1 = vunpack.c.0.s8 %v560_v59  ;;  %v888_v17 = vunpack.c.1.s8 %v560_v59  ;;  %v2039_v6 = vpop.f32.mrf.mxu2 }
 0x1a3   :  { %v1848_v52 = vpack.c.bf16 %v1544_v28, %v1536_v3  ;;  %v1361_v0 = vcvt.s32.f32 %v849_v11  ;;  %v1369_v26 = vcvt.s32.f32 %v857_v62  ;;  %2242 = vmatpush.bf16.msrb.mxu2 %v1784_v7  ;;  %2231 = vmatmul.bf16.vlgmr.msrb.gmra.mxu1 %v7926_v56  ;;  %v1008_v12 = vunpack.c.0.s8 %v592_v50 }
 0x1a4   :  { %2275 = vmatpush.bf16.msra.mxu1 %v1769_v31  ;;  %v1697_v40 = vpack.c.bf16 %v1241_v29, %v1233_v8  ;;  %v1392_v15 = vcvt.s32.f32 %v880_v1  ;;  %v1016_v35 = vunpack.c.1.s8 %v592_v50  ;;  %v1400_v10 = vcvt.s32.f32 %v888_v17 }
 0x1a5   :  { %2255 = vmatpush.bf16.msrb.mxu3 %v1848_v52  ;;  %v1761_v43 = vpack.c.bf16 %v1369_v26, %v1361_v0  ;;  %v993_v18 = vunpack.c.2.s8 %v585_v53  ;;  %v1001_v21 = vunpack.c.3.s8 %v585_v53  ;;  %v1520_v59 = vcvt.s32.f32 %v1008_v12  ;;  %v577_v52 = vld [vmem:[#allocation10 + $0x2b8] sm:$0xff] }
 0x1a6   :  { %2263 = vmatpush.bf16.msra.mxu0 %v1697_v40  ;;  %v1528_v23 = vcvt.s32.f32 %v1016_v35  ;;  %v1121_v54 = vunpack.c.2.s8 %v8214_v19  ;;  %v1129_v46 = vunpack.c.3.s8 %v8214_v19  ;;  %v1776_v58 = vpack.c.bf16 %v1400_v10, %v1392_v15  ;;  %v609_v35 = vld [vmem:[#allocation10 + $0x3b8] sm:$0xff] }
 0x1a7   :  { %v1505_v16 = vcvt.s32.f32 %v993_v18  ;;  %v1513_v63 = vcvt.s32.f32 %v1001_v21  ;;  %v1986_v50 = vadd.f32 %v8188_v5, %v8207_v38  ;;  %v2317_v14 = vperm.slane %v8184_v37, 1 }
 0x1a8   :  { %2276 = vmatpush.bf16.msra.mxu1 %v1761_v43  ;;  %v1840_v49 = vpack.c.bf16 %v1528_v23, %v1520_v59  ;;  %v1633_v60 = vcvt.s32.f32 %v1121_v54  ;;  %v1641_v55 = vcvt.s32.f32 %v1129_v46  ;;  %2243 = vmatpush.bf16.msrb.mxu2 %v1776_v58  ;;  %v2343_v27 = vperm.slane %v8186_v41, 1  ;;  %v2052_v3 = vpop.f32.mrf.mxu3  ;;  %v537_v46 = vld [vmem:[#allocation10 + $0x178] sm:$0xff] }
 0x1a9   :  { %v1833_v2 = vpack.c.bf16 %v1513_v63, %v1505_v16  ;;  %v1999_v32 = vadd.f32 %v8190_v39, %v1986_v50  ;;  %v705_v24 = vunpack.c.2.s8 %v8223_v9  ;;  %v713_v34 = vunpack.c.3.s8 %v8223_v9 }
 0x1aa   :  { %2256 = vmatpush.bf16.msrb.mxu3 %v1840_v49  ;;  %v1897_v36 = vpack.c.bf16 %v1641_v55, %v1633_v60  ;;  %v833_v13 = vunpack.c.2.s8 %v545_v25  ;;  %v841_v5 = vunpack.c.3.s8 %v545_v25  ;;  %v977_v42 = vunpack.c.0.s8 %v585_v53 }
 0x1ab   :  { %v2333_v38 = vmul.f32 %v2317_v14, %v1999_v32  ;;  %v1217_v33 = vcvt.s32.f32 %v705_v24  ;;  %v985_v51 = vunpack.c.1.s8 %v585_v53  ;;  %2244 = vmatmul.bf16.vlgmr.msrb.gmra.mxu2 %v7972_v57  ;;  %v1225_v39 = vcvt.s32.f32 %v713_v34 }
 0x1ac   :  { %2288 = vmatpush.bf16.msra.mxu2 %v1833_v2  ;;  %v1345_v20 = vcvt.s32.f32 %v833_v13  ;;  %v1353_v4 = vcvt.s32.f32 %v841_v5  ;;  %v1105_v31 = vunpack.c.0.s8 %v8214_v19  ;;  %v1489_v11 = vcvt.s32.f32 %v977_v42 }
 0x1ad   :  { %v2359_v28 = vadd.f32 %v2343_v27, %v2333_v38  ;;  %2257 = vmatmul.bf16.vlgmr.msrb.gmra.mxu3 %v7979_v48  ;;  %v1497_v62 = vcvt.s32.f32 %v985_v51  ;;  %v1113_v7 = vunpack.c.1.s8 %v8214_v19  ;;  %v1689_v8 = vpack.c.bf16 %v1225_v39, %v1217_v33  ;;  %v569_v39 = vld [vmem:[#allocation10 + $0x278] sm:$0xff] }
 0x1ae   :  { %2301 = vmatpush.bf16.msra.mxu3 %v1897_v36  ;;  %v1753_v29 = vpack.c.bf16 %v1353_v4, %v1345_v20  ;;  %v1617_v1 = vcvt.s32.f32 %v1105_v31  ;;  %v8238_v53 = vadd.f32 %v8202_v22, %v8200_v44  ;;  %v689_v40 = vunpack.c.0.s8 %v8223_v9  ;;  %v505_v22 = vld [vmem:[#allocation10 + $0x78] sm:$0xff] }
 0x1af   :  { %vm2367_vm5 = vcmp.ge.f32.partialorder %v2359_v28, 0.0  ;;  %v2375_v0 = vmul.f32 0.01, %v2359_v28  ;;  %v1825_v26 = vpack.c.bf16 %v1497_v62, %v1489_v11  ;;  %v1625_v17 = vcvt.s32.f32 %v1113_v7  ;;  %2264 = vmatpush.bf16.msra.mxu0 %v1689_v8 }
 0x1b0   :  { %2277 = vmatpush.bf16.msra.mxu1 %v1753_v29  ;;  %v697_v15 = vunpack.c.1.s8 %v8223_v9  ;;  %v817_v12 = vunpack.c.0.s8 %v545_v25  ;;  %v825_v19 = vunpack.c.1.s8 %v545_v25  ;;  %v961_v18 = vunpack.c.2.s8 %v577_v52  ;;  %v601_v29 = vld [vmem:[#allocation10 + $0x378] sm:$0xff] }
 0x1b1   :  { %v2383_v43 = vsel %vm2367_vm5, %v2359_v28, %v2375_v0  ;;  %2289 = vmatpush.bf16.msra.mxu2 %v1825_v26  ;;  %v1889_v10 = vpack.c.bf16 %v1625_v17, %v1617_v1  ;;  %v969_v44 = vunpack.c.3.s8 %v577_v52  ;;  %v1201_v59 = vcvt.s32.f32 %v689_v40 }
 0x1b2   :  { %v8242_v21 = vpack.c.bf16 %v2383_v43, %v2383_v43  ;;  %v1209_v23 = vcvt.s32.f32 %v697_v15  ;;  %v1329_v54 = vcvt.s32.f32 %v817_v12  ;;  %v1337_v58 = vcvt.s32.f32 %v825_v19 }
 0x1b3   :  { %2302 = vmatpush.bf16.msra.mxu3 %v1889_v10  ;;  %v1473_v16 = vcvt.s32.f32 %v961_v18  ;;  %v1481_v63 = vcvt.s32.f32 %v969_v44  ;;  %v1089_v9 = vunpack.c.2.s8 %v609_v35  ;;  %v1097_v25 = vunpack.c.3.s8 %v609_v35  ;;  %v497_v18 = vld [vmem:[#allocation10 + $0x38] sm:$0xff] }
 0x1b4   :  { %v1681_v50 = vpack.c.bf16 %v1209_v23, %v1201_v59  ;;  %v673_v49 = vunpack.c.2.s8 %v505_v22  ;;  %v681_v60 = vunpack.c.3.s8 %v505_v22  ;;  %v1745_v55 = vpack.c.bf16 %v1337_v58, %v1329_v54  ;;  %v529_v54 = vld [vmem:[#allocation10 + $0x138] sm:$0xff] }
 0x1b5   :  { %v1817_v14 = vpack.c.bf16 %v1481_v63, %v1473_v16  ;;  %v1601_v2 = vcvt.s32.f32 %v1089_v9  ;;  %v801_v32 = vunpack.c.2.s8 %v537_v46  ;;  %v1609_v27 = vcvt.s32.f32 %v1097_v25  ;;  %v8248_v9 = vpop.f32.mrf.mxu0 }
 0x1b6   :  { %2265 = vmatpush.bf16.msra.mxu0 %v1681_v50  ;;  %v1185_v24 = vcvt.s32.f32 %v673_v49  ;;  %v1193_v36 = vcvt.s32.f32 %v681_v60  ;;  %v809_v34 = vunpack.c.3.s8 %v537_v46  ;;  %2278 = vmatpush.bf16.msra.mxu1 %v1745_v55  ;;  %v945_v5 = vunpack.c.0.s8 %v577_v52  ;;  %v8250_v50 = vpop.f32.mrf.mxu1 }
 0x1b7   :  { %2290 = vmatpush.bf16.msra.mxu2 %v1817_v14  ;;  %v1313_v13 = vcvt.s32.f32 %v801_v32  ;;  %v953_v38 = vunpack.c.1.s8 %v577_v52  ;;  %v1073_v33 = vunpack.c.0.s8 %v609_v35  ;;  %v1881_v42 = vpack.c.bf16 %v1609_v27, %v1601_v2 }
 0x1b8   :  { %v1673_v51 = vpack.c.bf16 %v1193_v36, %v1185_v24  ;;  %v1321_v6 = vcvt.s32.f32 %v809_v34  ;;  %v1081_v3 = vunpack.c.1.s8 %v609_v35  ;;  %v1457_v20 = vcvt.s32.f32 %v945_v5 }
 0x1b9   :  { %v1465_v4 = vcvt.s32.f32 %v953_v38  ;;  %v1585_v31 = vcvt.s32.f32 %v1073_v33  ;;  %v657_v28 = vunpack.c.0.s8 %v505_v22  ;;  %2303 = vmatpush.bf16.msra.mxu3 %v1881_v42  ;;  %v665_v7 = vunpack.c.1.s8 %v505_v22 }
 0x1ba   :  { %2266 = vmatpush.bf16.msra.mxu0 %v1673_v51  ;;  %v1737_v11 = vpack.c.bf16 %v1321_v6, %v1313_v13  ;;  %v1593_v62 = vcvt.s32.f32 %v1081_v3  ;;  %v785_v8 = vunpack.c.0.s8 %v537_v46  ;;  %v793_v52 = vunpack.c.1.s8 %v537_v46 }
 0x1bb   :  { %v1809_v1 = vpack.c.bf16 %v1465_v4, %v1457_v20  ;;  %v1169_v0 = vcvt.s32.f32 %v657_v28  ;;  %v929_v26 = vunpack.c.2.s8 %v569_v39  ;;  %v1177_v40 = vcvt.s32.f32 %v665_v7  ;;  %v2416_v4 = vld [vmem:[#allocation14 + $0x90] sm:$0xff] }
 0x1bc   :  { %2279 = vmatpush.bf16.msra.mxu1 %v1737_v11  ;;  %v1873_v17 = vpack.c.bf16 %v1593_v62, %v1585_v31  ;;  %v1297_v15 = vcvt.s32.f32 %v785_v8  ;;  %v937_v12 = vunpack.c.3.s8 %v569_v39  ;;  %v1305_v19 = vcvt.s32.f32 %v793_v52 }
 0x1bd   :  { %2291 = vmatpush.bf16.msra.mxu2 %v1809_v1  ;;  %v1441_v35 = vcvt.s32.f32 %v929_v26  ;;  %v1057_v43 = vunpack.c.2.s8 %v601_v29  ;;  %v1065_v10 = vunpack.c.3.s8 %v601_v29  ;;  %v1665_v44 = vpack.c.bf16 %v1177_v40, %v1169_v0  ;;  %v2440_v1 = vld [vmem:[#allocation14 + $0x150] sm:$0xff]  ;;  %v2065_v0 = vpop.f32.mrf.mxu0 }
 0x1be   :  { %2304 = vmatpush.bf16.msra.mxu3 %v1873_v17  ;;  %v1449_v22 = vcvt.s32.f32 %v937_v12  ;;  %v2038_v59 = vadd.f32 %v8216_v61, %v8238_v53  ;;  %v2318_v23 = vperm.slane %v8184_v37, 2  ;;  %v1729_v46 = vpack.c.bf16 %v1305_v19, %v1297_v15  ;;  %v2078_v52 = vpop.f32.mrf.mxu1  ;;  %v561_v15 = vld [vmem:[#allocation10 + $0x238] sm:$0xff] }
 0x1bf   :  { %v1569_v58 = vcvt.s32.f32 %v1057_v43  ;;  %v1577_v16 = vcvt.s32.f32 %v1065_v10  ;;  %v2344_v63 = vperm.slane %v8186_v41, 2  ;;  %2267 = vmatpush.bf16.msra.mxu0 %v1665_v44  ;;  %v641_v60 = vunpack.c.2.s8 %v497_v18  ;;  %v593_v12 = vld [vmem:[#allocation10 + $0x338] sm:$0xff]  ;;  %v2434_v52 = vld [vmem:[#allocation14 + $0x120] sm:$0xff] }
 0x1c0   :  { %v1801_v25 = vpack.c.bf16 %v1449_v22, %v1441_v35  ;;  %v2051_v49 = vadd.f32 %v8218_v47, %v2038_v59  ;;  %v649_v55 = vunpack.c.3.s8 %v497_v18  ;;  %2280 = vmatpush.bf16.msra.mxu1 %v1729_v46  ;;  %v769_v53 = vunpack.c.2.s8 %v529_v54 }
 0x1c1   :  { %v1865_v61 = vpack.c.bf16 %v1577_v16, %v1569_v58  ;;  %v777_v37 = vunpack.c.3.s8 %v529_v54  ;;  %v913_v14 = vunpack.c.0.s8 %v569_v39  ;;  %v1153_v32 = vcvt.s32.f32 %v641_v60 }
 0x1c2   :  { %2292 = vmatpush.bf16.msra.mxu2 %v1801_v25  ;;  %v2334_v2 = vmul.f32 %v2318_v23, %v2051_v49  ;;  %v1161_v27 = vcvt.s32.f32 %v649_v55  ;;  %v921_v24 = vunpack.c.1.s8 %v569_v39  ;;  %v1281_v36 = vcvt.s32.f32 %v769_v53 }
 0x1c3   :  { %2305 = vmatpush.bf16.msra.mxu3 %v1865_v61  ;;  %v1289_v34 = vcvt.s32.f32 %v777_v37  ;;  %v1425_v13 = vcvt.s32.f32 %v913_v14  ;;  %v1041_v5 = vunpack.c.0.s8 %v601_v29  ;;  %v1049_v42 = vunpack.c.1.s8 %v601_v29 }
 0x1c4   :  { %v2360_v38 = vadd.f32 %v2344_v63, %v2334_v2  ;;  %v1657_v33 = vpack.c.bf16 %v1161_v27, %v1153_v32  ;;  %v1433_v47 = vcvt.s32.f32 %v921_v24  ;;  %v625_v3 = vunpack.c.0.s8 %v497_v18  ;;  %v8255_v27 = vpop.f32.mrf.mxu2  ;;  %v8257_v24 = vpop.f32.mrf.mxu3 }
 0x1c5   :  { %v1721_v51 = vpack.c.bf16 %v1289_v34, %v1281_v36  ;;  %v1553_v6 = vcvt.s32.f32 %v1041_v5  ;;  %v633_v20 = vunpack.c.1.s8 %v497_v18  ;;  %v1561_v11 = vcvt.s32.f32 %v1049_v42 }
 0x1c6   :  { %vm2368_vm6 = vcmp.ge.f32.partialorder %v2360_v38, 0.0  ;;  %v2376_v31 = vmul.f32 0.01, %v2360_v38  ;;  %2268 = vmatpush.bf16.msra.mxu0 %v1657_v33  ;;  %v1793_v28 = vpack.c.bf16 %v1433_v47, %v1425_v13  ;;  %v1137_v39 = vcvt.s32.f32 %v625_v3 }
 0x1c7   :  { %2281 = vmatpush.bf16.msra.mxu1 %v1721_v51  ;;  %v1145_v62 = vcvt.s32.f32 %v633_v20  ;;  %v753_v7 = vunpack.c.0.s8 %v529_v54  ;;  %v761_v8 = vunpack.c.1.s8 %v529_v54  ;;  %v1857_v29 = vpack.c.bf16 %v1561_v11, %v1553_v6  ;;  %v2488_v6 = vld [vmem:[#allocation14 + $0x2d0] sm:$0xff] }
 0x1c8   :  { %v2384_v26 = vsel %vm2368_vm6, %v2360_v38, %v2376_v31  ;;  %2293 = vmatpush.bf16.msra.mxu2 %v1793_v28  ;;  %v2674_v17 = vunpack.c.2.s8 %v2416_v4  ;;  %v2680_v40 = vunpack.c.3.s8 %v2416_v4  ;;  %v2770_v22 = vunpack.c.2.s8 %v2440_v1  ;;  %v2464_v38 = vld [vmem:[#allocation14 + $0x210] sm:$0xff] }
 0x1c9   :  { %v8253_v19 = vpack.c.bf16 %v2384_v26, %v2384_v26  ;;  %v1649_v35 = vpack.c.bf16 %v1145_v62, %v1137_v39  ;;  %v1265_v43 = vcvt.s32.f32 %v753_v7  ;;  %v1273_v10 = vcvt.s32.f32 %v761_v8  ;;  %2306 = vmatpush.bf16.msra.mxu3 %v1857_v29  ;;  %v2410_v62 = vld [vmem:[#allocation14 + $0x60] sm:$0xff] }
 0x1ca   :  { %v3442_v18 = vcvt.s32.f32 %v2674_v17  ;;  %v3448_v44 = vcvt.s32.f32 %v2680_v40  ;;  %v2776_v59 = vunpack.c.3.s8 %v2440_v1  ;;  %v897_v54 = vunpack.c.2.s8 %v561_v15 }
 0x1cb   :  { %2269 = vmatpush.bf16.msra.mxu0 %v1649_v35  ;;  %v1713_v23 = vpack.c.bf16 %v1273_v10, %v1265_v43  ;;  %v905_v46 = vunpack.c.3.s8 %v561_v15  ;;  %v1025_v58 = vunpack.c.2.s8 %v593_v12  ;;  %v3538_v63 = vcvt.s32.f32 %v2770_v22 }
 0x1cc   :  { %v4168_v16 = vpack.c.bf16 %v3448_v44, %v3442_v18  ;;  %v3544_v25 = vcvt.s32.f32 %v2776_v59  ;;  %v1033_v49 = vunpack.c.3.s8 %v593_v12  ;;  %v1409_v60 = vcvt.s32.f32 %v897_v54  ;;  %v2091_v22 = vpop.f32.mrf.mxu2  ;;  %v2104_v59 = vpop.f32.mrf.mxu3 }
 0x1cd   :  { %2282 = vmatpush.bf16.msra.mxu1 %v1713_v23  ;;  %v1417_v55 = vcvt.s32.f32 %v905_v46  ;;  %v1537_v61 = vcvt.s32.f32 %v1025_v58  ;;  %v2662_v53 = vunpack.c.0.s8 %v2416_v4  ;;  %v2668_v2 = vunpack.c.1.s8 %v2416_v4  ;;  %v8267_v22 = vld [vmem:[#allocation14 + $0x1b0] sm:$0xff]  ;;  %v8269_v59 = vpop.f32.mrf.mxu0 }
 0x1ce   :  { %v4216_v37 = vpack.c.bf16 %v3544_v25, %v3538_v63  ;;  %v1545_v14 = vcvt.s32.f32 %v1033_v49  ;;  %v2758_v32 = vunpack.c.0.s8 %v2440_v1  ;;  %2270 = vmatmul.bf16.vlgmr.msra.gmra.mxu0 %v7921_v30  ;;  %v2764_v13 = vunpack.c.1.s8 %v2440_v1 }
 0x1cf   :  { %4510 = vmatpush.bf16.msrb.mxu0 %v4168_v16  ;;  %v1785_v36 = vpack.c.bf16 %v1417_v55, %v1409_v60  ;;  %v3430_v34 = vcvt.s32.f32 %v2662_v53  ;;  %v881_v5 = vunpack.c.0.s8 %v561_v15  ;;  %v3436_v47 = vcvt.s32.f32 %v2668_v2 }
 0x1d0   :  { %v1849_v33 = vpack.c.bf16 %v1545_v14, %v1537_v61  ;;  %v3526_v42 = vcvt.s32.f32 %v2758_v32  ;;  %v889_v51 = vunpack.c.1.s8 %v561_v15  ;;  %2283 = vmatmul.bf16.vlgmr.msra.gmra.mxu1 %v7926_v56  ;;  %v3532_v3 = vcvt.s32.f32 %v2764_v13 }
 0x1d1   :  { %4523 = vmatpush.bf16.msrb.mxu1 %v4216_v37  ;;  %2294 = vmatpush.bf16.msra.mxu2 %v1785_v36  ;;  %v1393_v20 = vcvt.s32.f32 %v881_v5  ;;  %v1009_v4 = vunpack.c.0.s8 %v593_v12  ;;  %v1017_v31 = vunpack.c.1.s8 %v593_v12  ;;  %v4162_v28 = vpack.c.bf16 %v3436_v47, %v3430_v34  ;;  %v2458_v37 = vld [vmem:[#allocation14 + $0x1e0] sm:$0xff] }
 0x1d2   :  { %2307 = vmatpush.bf16.msra.mxu3 %v1849_v33  ;;  %v1401_v30 = vcvt.s32.f32 %v889_v51  ;;  %v2866_v11 = vunpack.c.2.s8 %v2464_v38  ;;  %v2872_v39 = vunpack.c.3.s8 %v2464_v38  ;;  %v4210_v7 = vpack.c.bf16 %v3532_v3, %v3526_v42  ;;  %v2482_v34 = vld [vmem:[#allocation14 + $0x2a0] sm:$0xff] }
 0x1d3   :  { %v1521_v8 = vcvt.s32.f32 %v1009_v4  ;;  %v1529_v1 = vcvt.s32.f32 %v1017_v31  ;;  %v2962_v0 = vunpack.c.2.s8 %v2488_v6  ;;  %4511 = vmatpush.bf16.msrb.mxu0 %v4162_v28  ;;  %v2968_v56 = vunpack.c.3.s8 %v2488_v6  ;;  %v2428_v4 = vld [vmem:[#allocation14 + $0xf0] sm:$0xff] }
 0x1d4   :  { %v1777_v26 = vpack.c.bf16 %v1401_v30, %v1393_v20  ;;  %v3634_v29 = vcvt.s32.f32 %v2866_v11  ;;  %v3640_v17 = vcvt.s32.f32 %v2872_v39  ;;  %v2650_v12 = vunpack.c.2.s8 %v2410_v62 }
 0x1d5   :  { %4524 = vmatpush.bf16.msrb.mxu1 %v4210_v7  ;;  %v1841_v40 = vpack.c.bf16 %v1529_v1, %v1521_v8  ;;  %v3730_v15 = vcvt.s32.f32 %v2962_v0  ;;  %v2656_v35 = vunpack.c.3.s8 %v2410_v62  ;;  %v3736_v10 = vcvt.s32.f32 %v2968_v56 }
 0x1d6   :  { %2295 = vmatpush.bf16.msra.mxu2 %v1777_v26  ;;  %v4264_v43 = vpack.c.bf16 %v3640_v17, %v3634_v29  ;;  %v2746_v18 = vunpack.c.2.s8 %v2434_v52  ;;  %v2752_v44 = vunpack.c.3.s8 %v2434_v52  ;;  %v3418_v23 = vcvt.s32.f32 %v2650_v12 }
 0x1d7   :  { %2308 = vmatpush.bf16.msra.mxu3 %v1841_v40  ;;  %v3424_v54 = vcvt.s32.f32 %v2656_v35  ;;  %v2854_v46 = vunpack.c.0.s8 %v2464_v38  ;;  %v2860_v58 = vunpack.c.1.s8 %v2464_v38  ;;  %v4312_v16 = vpack.c.bf16 %v3736_v10, %v3730_v15 }
 0x1d8   :  { %v3514_v63 = vcvt.s32.f32 %v2746_v18  ;;  %v3520_v25 = vcvt.s32.f32 %v2752_v44  ;;  %v2950_v49 = vunpack.c.0.s8 %v2488_v6  ;;  %v2956_v53 = vunpack.c.1.s8 %v2488_v6  ;;  %v2404_v6 = vld [vmem:[#allocation14 + $0x30] sm:$0xff] }
 0x1d9   :  { %2296 = vmatmul.bf16.vlgmr.msra.gmra.mxu2 %v7972_v57  ;;  %v4156_v60 = vpack.c.bf16 %v3424_v54, %v3418_v23  ;;  %v3622_v55 = vcvt.s32.f32 %v2854_v46  ;;  %v3628_v61 = vcvt.s32.f32 %v2860_v58  ;;  %v8264_v32 = vadd.f32 %v8250_v50, %v8248_v9  ;;  %v8271_v23 = vpop.f32.mrf.mxu1 }
 0x1da   :  { %4536 = vmatpush.bf16.msrb.mxu2 %v4264_v43  ;;  %v4204_v14 = vpack.c.bf16 %v3520_v25, %v3514_v63  ;;  %v3718_v2 = vcvt.s32.f32 %v2950_v49  ;;  %v2638_v36 = vunpack.c.0.s8 %v2410_v62  ;;  %2309 = vmatmul.bf16.vlgmr.msra.gmra.mxu3 %v7979_v48  ;;  %v3724_v5 = vcvt.s32.f32 %v2956_v53 }
 0x1db   :  { %4549 = vmatpush.bf16.msrb.mxu3 %v4312_v16  ;;  %4512 = vmatpush.bf16.msrb.mxu0 %v4156_v60  ;;  %v4258_v13 = vpack.c.bf16 %v3628_v61, %v3622_v55  ;;  %v2644_v57 = vunpack.c.1.s8 %v2410_v62  ;;  %v2734_v38 = vunpack.c.0.s8 %v2434_v52  ;;  %v2740_v47 = vunpack.c.1.s8 %v2434_v52  ;;  %v2476_v55 = vld [vmem:[#allocation14 + $0x270] sm:$0xff] }
 0x1dc   :  { %4525 = vmatpush.bf16.msrb.mxu1 %v4204_v14  ;;  %v3406_v33 = vcvt.s32.f32 %v2638_v36  ;;  %v2842_v42 = vunpack.c.2.s8 %v2458_v37  ;;  %v2848_v51 = vunpack.c.3.s8 %v2458_v37  ;;  %v4306_v3 = vpack.c.bf16 %v3724_v5, %v3718_v2  ;;  %v2398_v5 = vld [vmem:[#allocation14] sm:$0xff] }
 0x1dd   :  { %v3412_v20 = vcvt.s32.f32 %v2644_v57  ;;  %v3502_v9 = vcvt.s32.f32 %v2734_v38  ;;  %v2938_v50 = vunpack.c.2.s8 %v2482_v34  ;;  %v3508_v31 = vcvt.s32.f32 %v2740_v47 }
 0x1de   :  { %4537 = vmatpush.bf16.msrb.mxu2 %v4258_v13  ;;  %v3610_v28 = vcvt.s32.f32 %v2842_v42  ;;  %v3616_v48 = vcvt.s32.f32 %v2848_v51  ;;  %v2944_v30 = vunpack.c.3.s8 %v2482_v34  ;;  %v2626_v62 = vunpack.c.2.s8 %v2404_v6  ;;  %v8275_v42 = vld [vmem:[#allocation14 + $0xc0] sm:$0xff] }
 0x1df   :  { %4550 = vmatpush.bf16.msrb.mxu3 %v4306_v3  ;;  %v4150_v11 = vpack.c.bf16 %v3412_v20, %v3406_v33  ;;  %v3706_v39 = vcvt.s32.f32 %v2938_v50  ;;  %v2632_v7 = vunpack.c.3.s8 %v2404_v6  ;;  %v4198_v8 = vpack.c.bf16 %v3508_v31, %v3502_v9  ;;  %v8279_v20 = vld [vmem:[#allocation11] sm:$0xff] }
 0x1e0   :  { %v4252_v1 = vpack.c.bf16 %v3616_v48, %v3610_v28  ;;  %v3712_v0 = vcvt.s32.f32 %v2944_v30  ;;  %v2722_v52 = vunpack.c.2.s8 %v2428_v4  ;;  %v3394_v26 = vcvt.s32.f32 %v2626_v62  ;;  %v2117_v62 = vpop.f32.mrf.mxu0 }
 0x1e1   :  { %4513 = vmatpush.bf16.msrb.mxu0 %v4150_v11  ;;  %v3400_v29 = vcvt.s32.f32 %v2632_v7  ;;  %v2728_v17 = vunpack.c.3.s8 %v2428_v4  ;;  %v2830_v56 = vunpack.c.0.s8 %v2458_v37  ;;  %4526 = vmatpush.bf16.msrb.mxu1 %v4198_v8  ;;  %v2836_v12 = vunpack.c.1.s8 %v2458_v37  ;;  %v2130_v7 = vpop.f32.mrf.mxu1 }
 0x1e2   :  { %4538 = vmatpush.bf16.msrb.mxu2 %v4252_v1  ;;  %v4300_v40 = vpack.c.bf16 %v3712_v0, %v3706_v39  ;;  %v3490_v15 = vcvt.s32.f32 %v2722_v52  ;;  %v2926_v35 = vunpack.c.0.s8 %v2482_v34  ;;  %v2932_v44 = vunpack.c.1.s8 %v2482_v34 }
 0x1e3   :  { %v4144_v43 = vpack.c.bf16 %v3400_v29, %v3394_v26  ;;  %v3496_v10 = vcvt.s32.f32 %v2728_v17  ;;  %v3598_v18 = vcvt.s32.f32 %v2830_v56  ;;  %v3604_v54 = vcvt.s32.f32 %v2836_v12 }
 0x1e4   :  { %4551 = vmatpush.bf16.msrb.mxu3 %v4300_v40  ;;  %v3694_v46 = vcvt.s32.f32 %v2926_v35  ;;  %v2614_v58 = vunpack.c.0.s8 %v2404_v6  ;;  %v2620_v16 = vunpack.c.1.s8 %v2404_v6  ;;  %v3700_v25 = vcvt.s32.f32 %v2932_v44  ;;  %v8288_v40 = vpop.f32.mrf.mxu2 }
 0x1e5   :  { %4514 = vmatpush.bf16.msrb.mxu0 %v4144_v43  ;;  %v4192_v63 = vpack.c.bf16 %v3496_v10, %v3490_v15  ;;  %v2710_v49 = vunpack.c.0.s8 %v2428_v4  ;;  %v2716_v60 = vunpack.c.1.s8 %v2428_v4  ;;  %v4246_v61 = vpack.c.bf16 %v3604_v54, %v3598_v18  ;;  %v8290_v15 = vpop.f32.mrf.mxu3 }
 0x1e6   :  { %v3382_v53 = vcvt.s32.f32 %v2614_v58  ;;  %v3388_v37 = vcvt.s32.f32 %v2620_v16  ;;  %v2818_v14 = vunpack.c.2.s8 %v8267_v22  ;;  %v4294_v2 = vpack.c.bf16 %v3700_v25, %v3694_v46  ;;  %v2512_v58 = vld [vmem:[#allocation14 + $0x390] sm:$0xff]  ;;  %v2446_v16 = vld [vmem:[#allocation14 + $0x180] sm:$0xff] }
 0x1e7   :  { %4527 = vmatpush.bf16.msrb.mxu1 %v4192_v63  ;;  %v3478_v36 = vcvt.s32.f32 %v2710_v49  ;;  %v3484_v34 = vcvt.s32.f32 %v2716_v60  ;;  %v2824_v13 = vunpack.c.3.s8 %v8267_v22  ;;  %4539 = vmatpush.bf16.msrb.mxu2 %v4246_v61  ;;  %v2914_v33 = vunpack.c.2.s8 %v2476_v55 }
 0x1e8   :  { %v4138_v57 = vpack.c.bf16 %v3388_v37, %v3382_v53  ;;  %v3586_v38 = vcvt.s32.f32 %v2818_v14  ;;  %v2920_v47 = vunpack.c.3.s8 %v2476_v55  ;;  %4552 = vmatpush.bf16.msrb.mxu3 %v4294_v2  ;;  %v2090_v3 = vadd.f32 %v8255_v27, %v8264_v32 }
 0x1e9   :  { %v4186_v51 = vpack.c.bf16 %v3484_v34, %v3478_v36  ;;  %v3592_v6 = vcvt.s32.f32 %v2824_v13  ;;  %v2319_v9 = vperm.slane %v8279_v20, 3  ;;  %v3682_v50 = vcvt.s32.f32 %v2914_v33  ;;  %v2470_v36 = vld [vmem:[#allocation14 + $0x240] sm:$0xff] }
 0x1ea   :  { %4515 = vmatpush.bf16.msrb.mxu0 %v4138_v57  ;;  %v3688_v4 = vcvt.s32.f32 %v2920_v47  ;;  %v2345_v31 = vperm.slane %v8186_v41, 3  ;;  %v2602_v28 = vunpack.c.2.s8 %v2398_v5  ;;  %v2103_v30 = vadd.f32 %v8257_v24, %v2090_v3 }
 0x1eb   :  { %4528 = vmatpush.bf16.msrb.mxu1 %v4186_v51  ;;  %v4240_v48 = vpack.c.bf16 %v3592_v6, %v3586_v38  ;;  %v2608_v11 = vunpack.c.3.s8 %v2398_v5  ;;  %v2698_v39 = vunpack.c.2.s8 %v8275_v42  ;;  %v2704_v8 = vunpack.c.3.s8 %v8275_v42 }
 0x1ec   :  { %v4288_v27 = vpack.c.bf16 %v3688_v4, %v3682_v50  ;;  %v3370_v32 = vcvt.s32.f32 %v2602_v28  ;;  %v2806_v1 = vunpack.c.0.s8 %v8267_v22  ;;  %v2335_v0 = vmul.f32 %v2319_v9, %v2103_v30  ;;  %v2143_v50 = vpop.f32.mrf.mxu2 }
 0x1ed   :  { %4540 = vmatpush.bf16.msrb.mxu2 %v4240_v48  ;;  %v3376_v52 = vcvt.s32.f32 %v2608_v11  ;;  %v3466_v41 = vcvt.s32.f32 %v2698_v39  ;;  %v2812_v26 = vunpack.c.1.s8 %v8267_v22  ;;  %v3472_v29 = vcvt.s32.f32 %v2704_v8  ;;  %v2156_v4 = vpop.f32.mrf.mxu3  ;;  %v2506_v11 = vld [vmem:[#allocation14 + $0x360] sm:$0xff] }
 0x1ee   :  { %4553 = vmatpush.bf16.msrb.mxu3 %v4288_v27  ;;  %v3574_v24 = vcvt.s32.f32 %v2806_v1  ;;  %v2902_v17 = vunpack.c.0.s8 %v2476_v55  ;;  %v2908_v56 = vunpack.c.1.s8 %v2476_v55  ;;  %v2361_v12 = vadd.f32 %v2345_v31, %v2335_v0 }
 0x1ef   :  { %v4132_v35 = vpack.c.bf16 %v3376_v52, %v3370_v32  ;;  %v3580_v43 = vcvt.s32.f32 %v2812_v26  ;;  %v2590_v10 = vunpack.c.0.s8 %v2398_v5  ;;  %v4180_v18 = vpack.c.bf16 %v3472_v29, %v3466_v41  ;;  %v2536_v32 = vld [vmem:[#allocation14 + $0x450] sm:$0xff] }
 0x1f0   :  { %v3670_v44 = vcvt.s32.f32 %v2902_v17  ;;  %v3676_v54 = vcvt.s32.f32 %v2908_v56  ;;  %v2596_v46 = vunpack.c.1.s8 %v2398_v5  ;;  %vm2369_vm7 = vcmp.ge.f32.partialorder %v2361_v12, 0.0 }
 0x1f1   :  { %v2377_v22 = vmul.f32 0.01, %v2361_v12  ;;  %4516 = vmatpush.bf16.msrb.mxu0 %v4132_v35  ;;  %v4234_v63 = vpack.c.bf16 %v3580_v43, %v3574_v24  ;;  %v3358_v25 = vcvt.s32.f32 %v2590_v10  ;;  %4529 = vmatpush.bf16.msrb.mxu1 %v4180_v18  ;;  %v2686_v55 = vunpack.c.0.s8 %v8275_v42 }
 0x1f2   :  { %v4282_v49 = vpack.c.bf16 %v3676_v54, %v3670_v44  ;;  %v3364_v60 = vcvt.s32.f32 %v2596_v46  ;;  %v2692_v61 = vunpack.c.1.s8 %v8275_v42  ;;  %v3058_v37 = vunpack.c.2.s8 %v2512_v58  ;;  %v2500_v54 = vld [vmem:[#allocation14 + $0x330] sm:$0xff] }
 0x1f3   :  { %v2385_v53 = vsel %vm2369_vm7, %v2361_v12, %v2377_v22  ;;  %4541 = vmatpush.bf16.msrb.mxu2 %v4234_v63  ;;  %v3064_v14 = vunpack.c.3.s8 %v2512_v58  ;;  %v2794_v2 = vunpack.c.2.s8 %v2446_v16  ;;  %v3454_v5 = vcvt.s32.f32 %v2686_v55  ;;  %v2530_v55 = vld [vmem:[#allocation14 + $0x420] sm:$0xff] }
 0x1f4   :  { %v8294_v34 = vpack.c.bf16 %v2385_v53, %v2385_v53  ;;  %4554 = vmatpush.bf16.msrb.mxu3 %v4282_v49  ;;  %v4126_v13 = vpack.c.bf16 %v3364_v60, %v3358_v25  ;;  %v3460_v57 = vcvt.s32.f32 %v2692_v61  ;;  %v3826_v38 = vcvt.s32.f32 %v3058_v37 }
 0x1f5   :  { %v3832_v33 = vcvt.s32.f32 %v3064_v14  ;;  %v2800_v47 = vunpack.c.3.s8 %v2446_v16  ;;  %v3562_v51 = vcvt.s32.f32 %v2794_v2  ;;  %v2890_v3 = vunpack.c.2.s8 %v2470_v36  ;;  %v8300_v2 = vpop.f32.mrf.mxu0 }
 0x1f6   :  { %4517 = vmatpush.bf16.msrb.mxu0 %v4126_v13  ;;  %v4174_v6 = vpack.c.bf16 %v3460_v57, %v3454_v5  ;;  %v2896_v42 = vunpack.c.3.s8 %v2470_v36  ;;  %v3046_v9 = vunpack.c.0.s8 %v2512_v58  ;;  %v3052_v48 = vunpack.c.1.s8 %v2512_v58 }
 0x1f7   :  { %v4360_v31 = vpack.c.bf16 %v3832_v33, %v3826_v38  ;;  %v3568_v28 = vcvt.s32.f32 %v2800_v47  ;;  %v2782_v30 = vunpack.c.0.s8 %v2446_v16  ;;  %v3658_v39 = vcvt.s32.f32 %v2890_v3 }
 0x1f8   :  { %4530 = vmatpush.bf16.msrb.mxu1 %v4174_v6  ;;  %v3664_v62 = vcvt.s32.f32 %v2896_v42  ;;  %v3814_v7 = vcvt.s32.f32 %v3046_v9  ;;  %v2788_v27 = vunpack.c.1.s8 %v2446_v16  ;;  %v3820_v1 = vcvt.s32.f32 %v3052_v48 }
 0x1f9   :  { %v4228_v8 = vpack.c.bf16 %v3568_v28, %v3562_v51  ;;  %v3550_v0 = vcvt.s32.f32 %v2782_v30  ;;  %v2878_v52 = vunpack.c.0.s8 %v2470_v36  ;;  %4518 = vmatmul.bf16.vlgmr.msrb.gmra.mxu0 %v8209_v45  ;;  %v2884_v29 = vunpack.c.1.s8 %v2470_v36  ;;  %v8302_v36 = vpop.f32.mrf.mxu1  ;;  %v2494_v28 = vld [vmem:[#allocation14 + $0x300] sm:$0xff] }
 0x1fa   :  { %4562 = vmatpush.bf16.msra.mxu0 %v4360_v31  ;;  %v4276_v41 = vpack.c.bf16 %v3664_v62, %v3658_v39  ;;  %v3556_v26 = vcvt.s32.f32 %v2788_v27  ;;  %v3034_v24 = vunpack.c.2.s8 %v2506_v11  ;;  %v4354_v17 = vpack.c.bf16 %v3820_v1, %v3814_v7  ;;  %v2524_v62 = vld [vmem:[#allocation14 + $0x3f0] sm:$0xff] }
 0x1fb   :  { %4542 = vmatpush.bf16.msrb.mxu2 %v4228_v8  ;;  %4531 = vmatmul.bf16.vlgmr.msrb.gmra.mxu1 %v8242_v21  ;;  %v3646_v56 = vcvt.s32.f32 %v2878_v52  ;;  %v3040_v12 = vunpack.c.3.s8 %v2506_v11  ;;  %v3154_v35 = vunpack.c.2.s8 %v2536_v32  ;;  %v3652_v10 = vcvt.s32.f32 %v2884_v29  ;;  %v8308_v52 = vld [vmem:[#allocation13] sm:$0xff] }
 0x1fc   :  { %4555 = vmatpush.bf16.msrb.mxu3 %v4276_v41  ;;  %v4222_v43 = vpack.c.bf16 %v3556_v26, %v3550_v0  ;;  %v3802_v18 = vcvt.s32.f32 %v3034_v24  ;;  %v3160_v44 = vunpack.c.3.s8 %v2536_v32  ;;  %v2129_v16 = vadd.f32 %v8271_v23, %v8269_v59 }
 0x1fd   :  { %v3808_v46 = vcvt.s32.f32 %v3040_v12  ;;  %v3922_v58 = vcvt.s32.f32 %v3154_v35  ;;  %v3022_v22 = vunpack.c.0.s8 %v2506_v11  ;;  %v4270_v63 = vpack.c.bf16 %v3652_v10, %v3646_v56  ;;  %v2169_v12 = vpop.f32.mrf.mxu0 }
 0x1fe   :  { %4563 = vmatpush.bf16.msra.mxu0 %v4354_v17  ;;  %v3928_v25 = vcvt.s32.f32 %v3160_v44  ;;  %v3028_v49 = vunpack.c.1.s8 %v2506_v11  ;;  %v3142_v60 = vunpack.c.0.s8 %v2536_v32  ;;  %v3148_v37 = vunpack.c.1.s8 %v2536_v32  ;;  %v2417_v44 = vld [vmem:[#allocation14 + $0x98] sm:$0xff] }
 0x1ff   :  { %4543 = vmatpush.bf16.msrb.mxu2 %v4222_v43  ;;  %v4348_v61 = vpack.c.bf16 %v3808_v46, %v3802_v18  ;;  %v3790_v53 = vcvt.s32.f32 %v3022_v22  ;;  %v3010_v14 = vunpack.c.2.s8 %v2500_v54  ;;  %v3016_v59 = vunpack.c.3.s8 %v2500_v54 }
 0x200   :  { %4556 = vmatpush.bf16.msrb.mxu3 %v4270_v63  ;;  %v4408_v13 = vpack.c.bf16 %v3928_v25, %v3922_v58  ;;  %v3796_v5 = vcvt.s32.f32 %v3028_v49  ;;  %v3910_v57 = vcvt.s32.f32 %v3142_v60  ;;  %v3916_v23 = vcvt.s32.f32 %v3148_v37  ;;  %v2518_v49 = vld [vmem:[#allocation14 + $0x3c0] sm:$0xff] }
 0x201   :  { %v3778_v38 = vcvt.s32.f32 %v3010_v14  ;;  %v3130_v33 = vunpack.c.2.s8 %v2530_v55  ;;  %v3136_v47 = vunpack.c.3.s8 %v2530_v55  ;;  %v3784_v6 = vcvt.s32.f32 %v3016_v59  ;;  %v2182_v35 = vpop.f32.mrf.mxu1 }
 0x202   :  { %4564 = vmatpush.bf16.msra.mxu0 %v4348_v61  ;;  %4544 = vmatmul.bf16.vlgmr.msrb.gmra.mxu2 %v8253_v19  ;;  %v4342_v51 = vpack.c.bf16 %v3796_v5, %v3790_v53  ;;  %v2998_v3 = vunpack.c.0.s8 %v2500_v54  ;;  %v3004_v42 = vunpack.c.1.s8 %v2500_v54  ;;  %v4402_v9 = vpack.c.bf16 %v3916_v23, %v3910_v57 }
 0x203   :  { %4575 = vmatpush.bf16.msra.mxu1 %v4408_v13  ;;  %4557 = vmatmul.bf16.vlgmr.msrb.gmra.mxu3 %v8294_v34  ;;  %v3898_v50 = vcvt.s32.f32 %v3130_v33  ;;  %v3904_v4 = vcvt.s32.f32 %v3136_v47  ;;  %v3118_v31 = vunpack.c.0.s8 %v2530_v55  ;;  %v4336_v48 = vpack.c.bf16 %v3784_v6, %v3778_v38  ;;  %v8312_v37 = vpop.f32.mrf.mxu2 }
 0x204   :  { %v3766_v30 = vcvt.s32.f32 %v2998_v3  ;;  %v3772_v11 = vcvt.s32.f32 %v3004_v42  ;;  %v3124_v39 = vunpack.c.1.s8 %v2530_v55  ;;  %v2142_v32 = vadd.f32 %v8288_v40, %v2129_v16  ;;  %v2560_v42 = vld [vmem:[#allocation14 + $0x510] sm:$0xff] }
 0x205   :  { %v4396_v7 = vpack.c.bf16 %v3904_v4, %v3898_v50  ;;  %v3886_v27 = vcvt.s32.f32 %v3118_v31  ;;  %v2320_v8 = vperm.slane %v8279_v20, 4  ;;  %v2346_v41 = vperm.slane %v8308_v52, 4  ;;  %v8314_v14 = vpop.f32.mrf.mxu3 }
 0x206   :  { %4565 = vmatpush.bf16.msra.mxu0 %v4342_v51  ;;  %v4330_v1 = vpack.c.bf16 %v3772_v11, %v3766_v30  ;;  %v3892_v0 = vcvt.s32.f32 %v3124_v39  ;;  %v2986_v26 = vunpack.c.2.s8 %v2494_v28  ;;  %v2155_v29 = vadd.f32 %v8290_v15, %v2142_v32 }
 0x207   :  { %4576 = vmatpush.bf16.msra.mxu1 %v4402_v9  ;;  %v2992_v24 = vunpack.c.3.s8 %v2494_v28  ;;  %v3106_v17 = vunpack.c.2.s8 %v2524_v62  ;;  %v3112_v56 = vunpack.c.3.s8 %v2524_v62  ;;  %v2974_v40 = vunpack.c.0.s8 %v2494_v28 }
 0x208   :  { %v4390_v43 = vpack.c.bf16 %v3892_v0, %v3886_v27  ;;  %v3754_v10 = vcvt.s32.f32 %v2986_v26  ;;  %v2980_v18 = vunpack.c.1.s8 %v2494_v28  ;;  %v2336_v54 = vmul.f32 %v2320_v8, %v2155_v29  ;;  %v2411_v28 = vld [vmem:[#allocation14 + $0x68] sm:$0xff] }
 0x209   :  { %v3760_v46 = vcvt.s32.f32 %v2992_v24  ;;  %v3874_v58 = vcvt.s32.f32 %v3106_v17  ;;  %v3880_v16 = vcvt.s32.f32 %v3112_v56  ;;  %v3742_v22 = vcvt.s32.f32 %v2974_v40 }
 0x20a   :  { %4566 = vmatpush.bf16.msra.mxu0 %v4336_v48  ;;  %v3748_v63 = vcvt.s32.f32 %v2980_v18  ;;  %v3094_v25 = vunpack.c.0.s8 %v2524_v62  ;;  %v3100_v15 = vunpack.c.1.s8 %v2524_v62  ;;  %v2362_v60 = vadd.f32 %v2346_v41, %v2336_v54  ;;  %v2441_v62 = vld [vmem:[#allocation14 + $0x158] sm:$0xff] }
 0x20b   :  { %4577 = vmatpush.bf16.msra.mxu1 %v4396_v7  ;;  %v4324_v55 = vpack.c.bf16 %v3760_v46, %v3754_v10  ;;  %v4384_v61 = vpack.c.bf16 %v3880_v16, %v3874_v58  ;;  %v2675_v53 = vunpack.c.2.s8 %v2417_v44  ;;  %v2681_v59 = vunpack.c.3.s8 %v2417_v44  ;;  %v2195_v12 = vpop.f32.mrf.mxu2  ;;  %v2554_v16 = vld [vmem:[#allocation14 + $0x4e0] sm:$0xff] }
 0x20c   :  { %v4318_v13 = vpack.c.bf16 %v3748_v63, %v3742_v22  ;;  %v3862_v5 = vcvt.s32.f32 %v3094_v25  ;;  %v3868_v57 = vcvt.s32.f32 %v3100_v15  ;;  %vm2370_vm8 = vcmp.ge.f32.partialorder %v2362_v60, 0.0 }
 0x20d   :  { %v2378_v23 = vmul.f32 0.01, %v2362_v60  ;;  %v3443_v38 = vcvt.s32.f32 %v2675_v53  ;;  %v3082_v33 = vunpack.c.2.s8 %v2518_v49  ;;  %v3449_v51 = vcvt.s32.f32 %v2681_v59  ;;  %v2208_v35 = vpop.f32.mrf.mxu3  ;;  %v2405_v53 = vld [vmem:[#allocation14 + $0x38] sm:$0xff] }
 0x20e   :  { %4567 = vmatpush.bf16.msra.mxu0 %v4330_v1  ;;  %v4378_v47 = vpack.c.bf16 %v3868_v57, %v3862_v5  ;;  %v3088_v6 = vunpack.c.3.s8 %v2518_v49  ;;  %v2663_v3 = vunpack.c.0.s8 %v2417_v44  ;;  %v2669_v4 = vunpack.c.1.s8 %v2417_v44 }
 0x20f   :  { %4578 = vmatpush.bf16.msra.mxu1 %v4390_v43  ;;  %v2386_v9 = vsel %vm2370_vm8, %v2362_v60, %v2378_v23  ;;  %v3850_v50 = vcvt.s32.f32 %v3082_v33  ;;  %v3070_v31 = vunpack.c.0.s8 %v2518_v49  ;;  %v4169_v30 = vpack.c.bf16 %v3449_v51, %v3443_v38 }
 0x210   :  { %v8316_v48 = vpack.c.bf16 %v2386_v9, %v2386_v9  ;;  %v3856_v11 = vcvt.s32.f32 %v3088_v6  ;;  %v3431_v39 = vcvt.s32.f32 %v2663_v3  ;;  %v3437_v7 = vcvt.s32.f32 %v2669_v4 }
 0x211   :  { %v3076_v27 = vunpack.c.1.s8 %v2518_v49  ;;  %v8318_v32 = vcvt.s32.f32 %v3070_v31  ;;  %v3250_v8 = vunpack.c.2.s8 %v2560_v42  ;;  %v3256_v0 = vunpack.c.3.s8 %v2560_v42 }
 0x212   :  { %4568 = vmatpush.bf16.msra.mxu0 %v4324_v55  ;;  %v4372_v1 = vpack.c.bf16 %v3856_v11, %v3850_v50  ;;  %v2651_v41 = vunpack.c.2.s8 %v2411_v28  ;;  %v2657_v26 = vunpack.c.3.s8 %v2411_v28  ;;  %v4163_v29 = vpack.c.bf16 %v3437_v7, %v3431_v39 }
 0x213   :  { %4579 = vmatpush.bf16.msra.mxu1 %v4384_v61  ;;  %v3844_v24 = vcvt.s32.f32 %v3076_v27  ;;  %v4018_v17 = vcvt.s32.f32 %v3250_v8  ;;  %v2771_v56 = vunpack.c.2.s8 %v2441_v62  ;;  %v4024_v43 = vcvt.s32.f32 %v3256_v0 }
 0x214   :  { %v3419_v10 = vcvt.s32.f32 %v2651_v41  ;;  %v3425_v40 = vcvt.s32.f32 %v2657_v26  ;;  %v2777_v18 = vunpack.c.3.s8 %v2441_v62  ;;  %v2181_v46 = vadd.f32 %v8302_v36, %v8300_v2  ;;  %v2435_v36 = vld [vmem:[#allocation14 + $0x128] sm:$0xff] }
 0x215   :  { %v4366_v44 = vpack.c.bf16 %v3844_v24, %v8318_v32  ;;  %v3539_v54 = vcvt.s32.f32 %v2771_v56  ;;  %v3238_v58 = vunpack.c.0.s8 %v2560_v42  ;;  %v4456_v22 = vpack.c.bf16 %v4024_v43, %v4018_v17  ;;  %v2548_v17 = vld [vmem:[#allocation14 + $0x4b0] sm:$0xff] }
 0x216   :  { %4569 = vmatpush.bf16.msra.mxu0 %v4318_v13  ;;  %v4157_v63 = vpack.c.bf16 %v3425_v40, %v3419_v10  ;;  %v3545_v25 = vcvt.s32.f32 %v2777_v18  ;;  %v3244_v15 = vunpack.c.1.s8 %v2560_v42  ;;  %v2639_v60 = vunpack.c.0.s8 %v2411_v28  ;;  %v2399_v40 = vld [vmem:[#allocation14 + $0x8] sm:$0xff] }
 0x217   :  { %4580 = vmatpush.bf16.msra.mxu1 %v4378_v47  ;;  %v4006_v49 = vcvt.s32.f32 %v3238_v58  ;;  %v2645_v55 = vunpack.c.1.s8 %v2411_v28  ;;  %v2759_v61 = vunpack.c.0.s8 %v2441_v62  ;;  %4588 = vmatpush.bf16.msra.mxu2 %v4456_v22  ;;  %v2765_v57 = vunpack.c.1.s8 %v2441_v62 }
 0x218   :  { %v4217_v13 = vpack.c.bf16 %v3545_v25, %v3539_v54  ;;  %v4012_v5 = vcvt.s32.f32 %v3244_v15  ;;  %v3226_v2 = vunpack.c.2.s8 %v2554_v16  ;;  %v3407_v59 = vcvt.s32.f32 %v2639_v60 }
 0x219   :  { %4570 = vmatmul.bf16.vlgmr.msra.gmra.mxu0 %v8316_v48  ;;  %v3413_v23 = vcvt.s32.f32 %v2645_v55  ;;  %v3527_v38 = vcvt.s32.f32 %v2759_v61  ;;  %v3232_v33 = vunpack.c.3.s8 %v2554_v16  ;;  %v3533_v51 = vcvt.s32.f32 %v2765_v57 }
 0x21a   :  { %4614 = vmatpush.bf16.msrb.mxu0 %v4169_v30  ;;  %v4450_v47 = vpack.c.bf16 %v4012_v5, %v4006_v49  ;;  %v3994_v6 = vcvt.s32.f32 %v3226_v2  ;;  %v2627_v3 = vunpack.c.2.s8 %v2405_v53  ;;  %v2633_v50 = vunpack.c.3.s8 %v2405_v53 }
 0x21b   :  { %4581 = vmatpush.bf16.msra.mxu1 %v4372_v1  ;;  %v4151_v42 = vpack.c.bf16 %v3413_v23, %v3407_v59  ;;  %v4000_v9 = vcvt.s32.f32 %v3232_v33  ;;  %v2747_v4 = vunpack.c.2.s8 %v2435_v36  ;;  %v4211_v31 = vpack.c.bf16 %v3533_v51, %v3527_v38 }
 0x21c   :  { %4589 = vmatpush.bf16.msra.mxu2 %v4450_v47  ;;  %v3395_v28 = vcvt.s32.f32 %v2627_v3  ;;  %v2753_v30 = vunpack.c.3.s8 %v2435_v36  ;;  %v3214_v11 = vunpack.c.0.s8 %v2554_v16  ;;  %v3401_v62 = vcvt.s32.f32 %v2633_v50 }
 0x21d   :  { %v4444_v39 = vpack.c.bf16 %v4000_v9, %v3994_v6  ;;  %v3515_v7 = vcvt.s32.f32 %v2747_v4  ;;  %v3220_v27 = vunpack.c.1.s8 %v2554_v16  ;;  %v2615_v1 = vunpack.c.0.s8 %v2405_v53  ;;  %v2429_v16 = vld [vmem:[#allocation14 + $0xf8] sm:$0xff] }
 0x21e   :  { %4615 = vmatpush.bf16.msrb.mxu0 %v4163_v29  ;;  %v3521_v32 = vcvt.s32.f32 %v2753_v30  ;;  %v3982_v8 = vcvt.s32.f32 %v3214_v11  ;;  %v2621_v0 = vunpack.c.1.s8 %v2405_v53  ;;  %v4145_v41 = vpack.c.bf16 %v3401_v62, %v3395_v28  ;;  %v8324_v56 = vpop.f32.mrf.mxu0  ;;  %v2542_v62 = vld [vmem:[#allocation14 + $0x480] sm:$0xff] }
 0x21f   :  { %4582 = vmatpush.bf16.msra.mxu1 %v4366_v44  ;;  %v3988_v26 = vcvt.s32.f32 %v3220_v27  ;;  %v2735_v29 = vunpack.c.0.s8 %v2435_v36  ;;  %v2741_v24 = vunpack.c.1.s8 %v2435_v36  ;;  %v3383_v35 = vcvt.s32.f32 %v2615_v1 }
 0x220   :  { %4590 = vmatpush.bf16.msra.mxu2 %v4444_v39  ;;  %v4205_v12 = vpack.c.bf16 %v3521_v32, %v3515_v7  ;;  %v3389_v43 = vcvt.s32.f32 %v2621_v0  ;;  %v2194_v10 = vadd.f32 %v8312_v37, %v2181_v46  ;;  %v2321_v58 = vperm.slane %v8279_v20, 5  ;;  %v8328_v22 = vpop.f32.mrf.mxu1  ;;  %v2423_v0 = vld [vmem:[#allocation14 + $0xc8] sm:$0xff] }
 0x221   :  { %v4438_v18 = vpack.c.bf16 %v3988_v26, %v3982_v8  ;;  %v3503_v44 = vcvt.s32.f32 %v2735_v29  ;;  %v3509_v54 = vcvt.s32.f32 %v2741_v24  ;;  %v2347_v15 = vperm.slane %v8308_v52, 5 }
 0x222   :  { %4616 = vmatpush.bf16.msrb.mxu0 %v4157_v63  ;;  %v4139_v63 = vpack.c.bf16 %v3389_v43, %v3383_v35  ;;  %v2207_v25 = vadd.f32 %v8314_v14, %v2194_v10  ;;  %v3202_v49 = vunpack.c.2.s8 %v2548_v17  ;;  %v3208_v55 = vunpack.c.3.s8 %v2548_v17 }
 0x223   :  { %4627 = vmatpush.bf16.msrb.mxu1 %v4217_v13  ;;  %v4199_v60 = vpack.c.bf16 %v3509_v54, %v3503_v44  ;;  %v2603_v37 = vunpack.c.2.s8 %v2399_v40  ;;  %v2609_v46 = vunpack.c.3.s8 %v2399_v40  ;;  %v2723_v13 = vunpack.c.2.s8 %v2429_v16 }
 0x224   :  { %4591 = vmatpush.bf16.msra.mxu2 %v4438_v18  ;;  %v2337_v61 = vmul.f32 %v2321_v58, %v2207_v25  ;;  %v3970_v53 = vcvt.s32.f32 %v3202_v49  ;;  %v2729_v5 = vunpack.c.3.s8 %v2429_v16  ;;  %v3976_v57 = vcvt.s32.f32 %v3208_v55  ;;  %v2584_v55 = vld [vmem:[#allocation14 + $0x5d0] sm:$0xff] }
 0x225   :  { %v3371_v2 = vcvt.s32.f32 %v2603_v37  ;;  %v3377_v36 = vcvt.s32.f32 %v2609_v46  ;;  %v3190_v59 = vunpack.c.0.s8 %v2548_v17  ;;  %v3491_v14 = vcvt.s32.f32 %v2723_v13 }
 0x226   :  { %4617 = vmatpush.bf16.msrb.mxu0 %v4151_v42  ;;  %v2363_v23 = vadd.f32 %v2347_v15, %v2337_v61  ;;  %v3497_v38 = vcvt.s32.f32 %v2729_v5  ;;  %v3196_v33 = vunpack.c.1.s8 %v2548_v17  ;;  %v4432_v47 = vpack.c.bf16 %v3976_v57, %v3970_v53  ;;  %v2513_v42 = vld [vmem:[#allocation14 + $0x398] sm:$0xff]  ;;  %v2221_v9 = vpop.f32.mrf.mxu0 }
 0x227   :  { %4628 = vmatpush.bf16.msrb.mxu1 %v4211_v31  ;;  %v4133_v51 = vpack.c.bf16 %v3377_v36, %v3371_v2  ;;  %v3958_v6 = vcvt.s32.f32 %v3190_v59  ;;  %v2591_v3 = vunpack.c.0.s8 %v2399_v40  ;;  %v2597_v28 = vunpack.c.1.s8 %v2399_v40  ;;  %v2465_v5 = vld [vmem:[#allocation14 + $0x218] sm:$0xff] }
 0x228   :  { %vm2371_vm9 = vcmp.ge.f32.partialorder %v2363_v23, 0.0  ;;  %v2379_v50 = vmul.f32 0.01, %v2363_v23  ;;  %v4193_v4 = vpack.c.bf16 %v3497_v38, %v3491_v14  ;;  %v3964_v31 = vcvt.s32.f32 %v3196_v33  ;;  %4592 = vmatpush.bf16.msra.mxu2 %v4432_v47  ;;  %v2234_v7 = vpop.f32.mrf.mxu1  ;;  %v2507_v14 = vld [vmem:[#allocation14 + $0x368] sm:$0xff] }
 0x229   :  { %v3359_v30 = vcvt.s32.f32 %v2591_v3  ;;  %v2711_v11 = vunpack.c.0.s8 %v2429_v16  ;;  %v2717_v39 = vunpack.c.1.s8 %v2429_v16  ;;  %v3059_v8 = vunpack.c.2.s8 %v2513_v42 }
 0x22a   :  { %4618 = vmatpush.bf16.msrb.mxu0 %v4145_v41  ;;  %v2387_v27 = vsel %vm2371_vm9, %v2363_v23, %v2379_v50  ;;  %v4426_v32 = vpack.c.bf16 %v3964_v31, %v3958_v6  ;;  %v3065_v1 = vunpack.c.3.s8 %v2513_v42  ;;  %v3365_v26 = vcvt.s32.f32 %v2597_v28  ;;  %v2537_v50 = vld [vmem:[#allocation14 + $0x458] sm:$0xff] }
 0x22b   :  { %4629 = vmatpush.bf16.msrb.mxu1 %v4205_v12  ;;  %v8332_v41 = vpack.c.bf16 %v2387_v27, %v2387_v27  ;;  %v3479_v29 = vcvt.s32.f32 %v2711_v11  ;;  %v3485_v24 = vcvt.s32.f32 %v2717_v39  ;;  %v3827_v17 = vcvt.s32.f32 %v3059_v8 }
 0x22c   :  { %v3833_v12 = vcvt.s32.f32 %v3065_v1  ;;  %v3178_v35 = vunpack.c.2.s8 %v2542_v62  ;;  %v3184_v43 = vunpack.c.3.s8 %v2542_v62  ;;  %4593 = vmatpush.bf16.msra.mxu2 %v4426_v32  ;;  %v4127_v10 = vpack.c.bf16 %v3365_v26, %v3359_v30 }
 0x22d   :  { %v4187_v40 = vpack.c.bf16 %v3485_v24, %v3479_v29  ;;  %v2699_v18 = vunpack.c.2.s8 %v2423_v0  ;;  %v2705_v44 = vunpack.c.3.s8 %v2423_v0  ;;  %4583 = vmatmul.bf16.vlgmr.msra.gmra.mxu1 %v8332_v41  ;;  %v3053_v49 = vunpack.c.1.s8 %v2513_v42 }
 0x22e   :  { %4619 = vmatpush.bf16.msrb.mxu0 %v4139_v63  ;;  %v4361_v54 = vpack.c.bf16 %v3833_v12, %v3827_v17  ;;  %v3946_v58 = vcvt.s32.f32 %v3178_v35  ;;  %v3952_v16 = vcvt.s32.f32 %v3184_v43  ;;  %v3047_v63 = vunpack.c.0.s8 %v2513_v42  ;;  %v8335_v37 = vpop.f32.mrf.mxu2 }
 0x22f   :  { %4630 = vmatpush.bf16.msrb.mxu1 %v4199_v60  ;;  %v3467_v25 = vcvt.s32.f32 %v2699_v18  ;;  %v3473_v15 = vcvt.s32.f32 %v2705_v44  ;;  %v3166_v60 = vunpack.c.0.s8 %v2542_v62  ;;  %v3172_v53 = vunpack.c.1.s8 %v2542_v62 }
 0x230   :  { %v4420_v46 = vpack.c.bf16 %v3952_v16, %v3946_v58  ;;  %v3815_v61 = vcvt.s32.f32 %v3047_v63  ;;  %v2687_v13 = vunpack.c.0.s8 %v2423_v0  ;;  %v8337_v57 = vpop.f32.mrf.mxu3  ;;  %v3821_v36 = vcvt.s32.f32 %v3053_v49  ;;  %v2578_v16 = vld [vmem:[#allocation14 + $0x5a0] sm:$0xff] }
 0x231   :  { %v4181_v2 = vpack.c.bf16 %v3473_v15, %v3467_v25  ;;  %v3934_v59 = vcvt.s32.f32 %v3166_v60  ;;  %v2693_v23 = vunpack.c.1.s8 %v2423_v0  ;;  %v3940_v38 = vcvt.s32.f32 %v3172_v53 }
 0x232   :  { %4620 = vmatpush.bf16.msrb.mxu0 %v4133_v51  ;;  %4594 = vmatpush.bf16.msra.mxu2 %v4420_v46  ;;  %v3455_v33 = vcvt.s32.f32 %v2687_v13  ;;  %v3346_v47 = vunpack.c.2.s8 %v2584_v55  ;;  %v3352_v51 = vunpack.c.3.s8 %v2584_v55  ;;  %v4355_v6 = vpack.c.bf16 %v3821_v36, %v3815_v61  ;;  %v2501_v36 = vld [vmem:[#allocation14 + $0x338] sm:$0xff] }
 0x233   :  { %4631 = vmatpush.bf16.msrb.mxu1 %v4193_v4  ;;  %v3461_v3 = vcvt.s32.f32 %v2693_v23  ;;  %v2867_v42 = vunpack.c.2.s8 %v2465_v5  ;;  %v2873_v9 = vunpack.c.3.s8 %v2465_v5  ;;  %v4414_v4 = vpack.c.bf16 %v3940_v38, %v3934_v59 }
 0x234   :  { %v4114_v31 = vcvt.s32.f32 %v3346_v47  ;;  %v4120_v28 = vcvt.s32.f32 %v3352_v51  ;;  %v3035_v30 = vunpack.c.2.s8 %v2507_v14  ;;  %v3041_v7 = vunpack.c.3.s8 %v2507_v14 }
 0x235   :  { %v4175_v11 = vpack.c.bf16 %v3461_v3, %v3455_v33  ;;  %v3635_v39 = vcvt.s32.f32 %v2867_v42  ;;  %v3641_v62 = vcvt.s32.f32 %v2873_v9  ;;  %v3155_v8 = vunpack.c.2.s8 %v2537_v50  ;;  %v2531_v33 = vld [vmem:[#allocation14 + $0x428] sm:$0xff] }
 0x236   :  { %4621 = vmatpush.bf16.msrb.mxu0 %v4127_v10  ;;  %4595 = vmatpush.bf16.msra.mxu2 %v4414_v4  ;;  %v4504_v27 = vpack.c.bf16 %v4120_v28, %v4114_v31  ;;  %v3803_v32 = vcvt.s32.f32 %v3035_v30  ;;  %v3161_v1 = vunpack.c.3.s8 %v2537_v50  ;;  %v3809_v26 = vcvt.s32.f32 %v3041_v7  ;;  %v2247_v17 = vpop.f32.mrf.mxu2 }
 0x237   :  { %4632 = vmatpush.bf16.msrb.mxu1 %v4187_v40  ;;  %v4265_v0 = vpack.c.bf16 %v3641_v62, %v3635_v39  ;;  %v8342_v29 = vadd.f32 %v8328_v22, %v8324_v56  ;;  %v3334_v24 = vunpack.c.0.s8 %v2584_v55  ;;  %v3923_v12 = vcvt.s32.f32 %v3155_v8  ;;  %v2459_v56 = vld [vmem:[#allocation14 + $0x1e8] sm:$0xff] }
 0x238   :  { %4601 = vmatpush.bf16.msra.mxu3 %v4504_v27  ;;  %v3929_v35 = vcvt.s32.f32 %v3161_v1  ;;  %v3340_v43 = vunpack.c.1.s8 %v2584_v55  ;;  %v2855_v10 = vunpack.c.0.s8 %v2465_v5  ;;  %v2260_v40 = vpop.f32.mrf.mxu3  ;;  %v4349_v18 = vpack.c.bf16 %v3809_v26, %v3803_v32 }
 0x239   :  { %4622 = vmatmul.bf16.vlgmr.msrb.gmra.mxu0 %v8209_v45  ;;  %v4102_v44 = vcvt.s32.f32 %v3334_v24  ;;  %v3023_v58 = vunpack.c.0.s8 %v2507_v14  ;;  %v3029_v49 = vunpack.c.1.s8 %v2507_v14  ;;  %v3143_v46 = vunpack.c.0.s8 %v2537_v50 }
 0x23a   :  { %4666 = vmatpush.bf16.msra.mxu0 %v4361_v54  ;;  %4640 = vmatpush.bf16.msrb.mxu2 %v4265_v0  ;;  %v2861_v54 = vunpack.c.1.s8 %v2465_v5  ;;  %v4409_v63 = vpack.c.bf16 %v3929_v35, %v3923_v12  ;;  %v4108_v25 = vcvt.s32.f32 %v3340_v43  ;;  %v3623_v15 = vcvt.s32.f32 %v2855_v10 }
 0x23b   :  { %4633 = vmatpush.bf16.msrb.mxu1 %v4181_v2  ;;  %v3791_v60 = vcvt.s32.f32 %v3023_v58  ;;  %v3149_v61 = vunpack.c.1.s8 %v2537_v50  ;;  %v3797_v53 = vcvt.s32.f32 %v3029_v49  ;;  %v3322_v13 = vunpack.c.2.s8 %v2578_v16  ;;  %v2572_v58 = vld [vmem:[#allocation14 + $0x570] sm:$0xff]  ;;  %v2453_v49 = vld [vmem:[#allocation14 + $0x1b8] sm:$0xff] }
 0x23c   :  { %v3629_v22 = vcvt.s32.f32 %v2861_v54  ;;  %v4498_v55 = vpack.c.bf16 %v4108_v25, %v4102_v44  ;;  %v3328_v2 = vunpack.c.3.s8 %v2578_v16  ;;  %v3911_v59 = vcvt.s32.f32 %v3143_v46 }
 0x23d   :  { %v3917_v23 = vcvt.s32.f32 %v3149_v61  ;;  %v2843_v38 = vunpack.c.2.s8 %v2459_v56  ;;  %v4343_v14 = vpack.c.bf16 %v3797_v53, %v3791_v60  ;;  %v4090_v47 = vcvt.s32.f32 %v3322_v13 }
 0x23e   :  { %4667 = vmatpush.bf16.msra.mxu0 %v4355_v6  ;;  %v4259_v5 = vpack.c.bf16 %v3629_v22, %v3623_v15  ;;  %4602 = vmatpush.bf16.msra.mxu3 %v4498_v55  ;;  %v4096_v51 = vcvt.s32.f32 %v3328_v2  ;;  %v2849_v6 = vunpack.c.3.s8 %v2459_v56  ;;  %v3011_v9 = vunpack.c.2.s8 %v2501_v36 }
 0x23f   :  { %4634 = vmatpush.bf16.msrb.mxu1 %v4175_v11  ;;  %v4403_v3 = vpack.c.bf16 %v3917_v23, %v3911_v59  ;;  %v3611_v42 = vcvt.s32.f32 %v2843_v38  ;;  %v3017_v50 = vunpack.c.3.s8 %v2501_v36  ;;  %v3131_v28 = vunpack.c.2.s8 %v2531_v33 }
 0x240   :  { %4641 = vmatpush.bf16.msrb.mxu2 %v4259_v5  ;;  %v4492_v4 = vpack.c.bf16 %v4096_v51, %v4090_v47  ;;  %v3617_v31 = vcvt.s32.f32 %v2849_v6  ;;  %v3137_v30 = vunpack.c.3.s8 %v2531_v33  ;;  %v3779_v11 = vcvt.s32.f32 %v3011_v9 }
 0x241   :  { %v3785_v39 = vcvt.s32.f32 %v3017_v50  ;;  %v3310_v62 = vunpack.c.0.s8 %v2578_v16  ;;  %v3316_v7 = vunpack.c.1.s8 %v2578_v16  ;;  %v3899_v32 = vcvt.s32.f32 %v3131_v28 }
 0x242   :  { %4668 = vmatpush.bf16.msra.mxu0 %v4349_v18  ;;  %4635 = vmatmul.bf16.vlgmr.msrb.gmra.mxu1 %v8242_v21  ;;  %v4253_v27 = vpack.c.bf16 %v3617_v31, %v3611_v42  ;;  %v3905_v8 = vcvt.s32.f32 %v3137_v30  ;;  %v2831_v1 = vunpack.c.0.s8 %v2459_v56  ;;  %v2837_v17 = vunpack.c.1.s8 %v2459_v56  ;;  %v2495_v56 = vld [vmem:[#allocation14 + $0x308] sm:$0xff] }
 0x243   :  { %4679 = vmatpush.bf16.msra.mxu1 %v4409_v63  ;;  %4603 = vmatpush.bf16.msra.mxu3 %v4492_v4  ;;  %v4337_v0 = vpack.c.bf16 %v3785_v39, %v3779_v11  ;;  %v4078_v26 = vcvt.s32.f32 %v3310_v62  ;;  %v4084_v24 = vcvt.s32.f32 %v3316_v7  ;;  %v2999_v43 = vunpack.c.0.s8 %v2501_v36 }
 0x244   :  { %4642 = vmatpush.bf16.msrb.mxu2 %v4253_v27  ;;  %v4397_v12 = vpack.c.bf16 %v3905_v8, %v3899_v32  ;;  %v3599_v35 = vcvt.s32.f32 %v2831_v1  ;;  %v3005_v10 = vunpack.c.1.s8 %v2501_v36  ;;  %v3605_v18 = vcvt.s32.f32 %v2837_v17  ;;  %v2525_v36 = vld [vmem:[#allocation14 + $0x3f8] sm:$0xff]  ;;  %v2418_v17 = vld [vmem:[#allocation14 + $0xa0] sm:$0xff] }
 0x245   :  { %v4486_v40 = vpack.c.bf16 %v4084_v24, %v4078_v26  ;;  %v3119_v44 = vunpack.c.0.s8 %v2531_v33  ;;  %v3125_v54 = vunpack.c.1.s8 %v2531_v33  ;;  %v3767_v16 = vcvt.s32.f32 %v2999_v43 }
 0x246   :  { %4669 = vmatpush.bf16.msra.mxu0 %v4343_v14  ;;  %v3773_v63 = vcvt.s32.f32 %v3005_v10  ;;  %v2246_v25 = vadd.f32 %v8335_v37, %v8342_v29  ;;  %v2322_v15 = vperm.slane %v8279_v20, 6  ;;  %v4247_v22 = vpack.c.bf16 %v3605_v18, %v3599_v35 }
 0x247   :  { %4680 = vmatpush.bf16.msra.mxu1 %v4403_v3  ;;  %4604 = vmatpush.bf16.msra.mxu3 %v4486_v40  ;;  %v3887_v60 = vcvt.s32.f32 %v3119_v44  ;;  %v3893_v46 = vcvt.s32.f32 %v3125_v54  ;;  %v2348_v61 = vperm.slane %v8308_v52, 6  ;;  %v3298_v13 = vunpack.c.2.s8 %v2572_v58 }
 0x248   :  { %v4331_v55 = vpack.c.bf16 %v3773_v63, %v3767_v16  ;;  %v2259_v53 = vadd.f32 %v8337_v57, %v2246_v25  ;;  %v3304_v2 = vunpack.c.3.s8 %v2572_v58  ;;  %4643 = vmatpush.bf16.msrb.mxu2 %v4247_v22  ;;  %v2819_v59 = vunpack.c.2.s8 %v2453_v49  ;;  %v2447_v16 = vld [vmem:[#allocation14 + $0x188] sm:$0xff] }
 0x249   :  { %v4391_v5 = vpack.c.bf16 %v3893_v46, %v3887_v60  ;;  %v2825_v37 = vunpack.c.3.s8 %v2453_v49  ;;  %v2987_v29 = vunpack.c.2.s8 %v2495_v56  ;;  %v4066_v23 = vcvt.s32.f32 %v3298_v13  ;;  %v2519_v22 = vld [vmem:[#allocation14 + $0x3c8] sm:$0xff] }
 0x24a   :  { %4670 = vmatpush.bf16.msra.mxu0 %v4337_v0  ;;  %v2338_v20 = vmul.f32 %v2322_v15, %v2259_v53  ;;  %v4072_v38 = vcvt.s32.f32 %v3304_v2  ;;  %v2993_v33 = vunpack.c.3.s8 %v2495_v56  ;;  %v3587_v14 = vcvt.s32.f32 %v2819_v59 }
 0x24b   :  { %4681 = vmatpush.bf16.msra.mxu1 %v4397_v12  ;;  %v3593_v47 = vcvt.s32.f32 %v2825_v37  ;;  %v3755_v52 = vcvt.s32.f32 %v2987_v29  ;;  %v3107_v51 = vunpack.c.2.s8 %v2525_v36  ;;  %v3113_v42 = vunpack.c.3.s8 %v2525_v36  ;;  %v8350_v9 = vpop.f32.mrf.mxu0  ;;  %v2566_v12 = vld [vmem:[#allocation14 + $0x540] sm:$0xff] }
 0x24c   :  { %v2364_v6 = vadd.f32 %v2348_v61, %v2338_v20  ;;  %v4480_v57 = vpack.c.bf16 %v4072_v38, %v4066_v23  ;;  %v3761_v3 = vcvt.s32.f32 %v2993_v33  ;;  %v3286_v31 = vunpack.c.0.s8 %v2572_v58 }
 0x24d   :  { %v4241_v50 = vpack.c.bf16 %v3593_v47, %v3587_v14  ;;  %v3875_v4 = vcvt.s32.f32 %v3107_v51  ;;  %v3292_v28 = vunpack.c.1.s8 %v2572_v58  ;;  %v3881_v39 = vcvt.s32.f32 %v3113_v42  ;;  %v8352_v62 = vpop.f32.mrf.mxu1 }
 0x24e   :  { %4671 = vmatpush.bf16.msra.mxu0 %v4331_v55  ;;  %vm2372_vm10 = vcmp.ge.f32.partialorder %v2364_v6, 0.0  ;;  %v2380_v30 = vmul.f32 0.01, %v2364_v6  ;;  %4605 = vmatpush.bf16.msra.mxu3 %v4480_v57  ;;  %v4325_v11 = vpack.c.bf16 %v3761_v3, %v3755_v52  ;;  %v4054_v7 = vcvt.s32.f32 %v3286_v31 }
 0x24f   :  { %4682 = vmatpush.bf16.msra.mxu1 %v4391_v5  ;;  %4644 = vmatpush.bf16.msrb.mxu2 %v4241_v50  ;;  %v4060_v27 = vcvt.s32.f32 %v3292_v28  ;;  %v2807_v32 = vunpack.c.0.s8 %v2453_v49  ;;  %v2813_v8 = vunpack.c.1.s8 %v2453_v49  ;;  %v4385_v0 = vpack.c.bf16 %v3881_v39, %v3875_v4 }
 0x250   :  { %v2388_v1 = vsel %vm2372_vm10, %v2364_v6, %v2380_v30  ;;  %v2975_v26 = vunpack.c.0.s8 %v2495_v56  ;;  %v2981_v24 = vunpack.c.1.s8 %v2495_v56  ;;  %v3095_v54 = vunpack.c.0.s8 %v2525_v36 }
 0x251   :  { %v8354_v35 = vpack.c.bf16 %v2388_v1, %v2388_v1  ;;  %v4474_v43 = vpack.c.bf16 %v4060_v27, %v4054_v7  ;;  %v3575_v10 = vcvt.s32.f32 %v2807_v32  ;;  %v3581_v40 = vcvt.s32.f32 %v2813_v8  ;;  %v2561_v8 = vld [vmem:[#allocation14 + $0x518] sm:$0xff] }
 0x252   :  { %4672 = vmatpush.bf16.msra.mxu0 %v4325_v11  ;;  %v3743_v18 = vcvt.s32.f32 %v2975_v26  ;;  %v3749_v44 = vcvt.s32.f32 %v2981_v24  ;;  %v3101_v58 = vunpack.c.1.s8 %v2525_v36  ;;  %v2676_v25 = vunpack.c.2.s8 %v2418_v17  ;;  %v2489_v11 = vld [vmem:[#allocation14 + $0x2d8] sm:$0xff] }
 0x253   :  { %4683 = vmatpush.bf16.msra.mxu1 %v4385_v0  ;;  %4606 = vmatpush.bf16.msra.mxu3 %v4474_v43  ;;  %v4235_v63 = vpack.c.bf16 %v3581_v40, %v3575_v10  ;;  %v2682_v15 = vunpack.c.3.s8 %v2418_v17  ;;  %v3274_v49 = vunpack.c.2.s8 %v2566_v12  ;;  %v3863_v60 = vcvt.s32.f32 %v3095_v54  ;;  %v2273_v55 = vpop.f32.mrf.mxu0 }
 0x254   :  { %4596 = vmatmul.bf16.vlgmr.msra.gmra.mxu2 %v8354_v35  ;;  %v4319_v56 = vpack.c.bf16 %v3749_v44, %v3743_v18  ;;  %v3869_v46 = vcvt.s32.f32 %v3101_v58  ;;  %v3280_v61 = vunpack.c.3.s8 %v2566_v12  ;;  %v3444_v53 = vcvt.s32.f32 %v2676_v25  ;;  %v2442_v44 = vld [vmem:[#allocation14 + $0x160] sm:$0xff] }
 0x255   :  { %4645 = vmatpush.bf16.msrb.mxu2 %v4235_v63  ;;  %v3450_v13 = vcvt.s32.f32 %v2682_v15  ;;  %v4042_v2 = vcvt.s32.f32 %v3274_v49  ;;  %v2795_v5 = vunpack.c.2.s8 %v2447_v16  ;;  %v2801_v37 = vunpack.c.3.s8 %v2447_v16  ;;  %v2286_v20 = vpop.f32.mrf.mxu1 }
 0x256   :  { %4673 = vmatpush.bf16.msra.mxu0 %v4319_v56  ;;  %v4379_v36 = vpack.c.bf16 %v3869_v46, %v3863_v60  ;;  %v4048_v59 = vcvt.s32.f32 %v3280_v61  ;;  %v3083_v29 = vunpack.c.2.s8 %v2519_v22  ;;  %v3089_v33 = vunpack.c.3.s8 %v2519_v22 }
 0x257   :  { %v4170_v23 = vpack.c.bf16 %v3450_v13, %v3444_v53  ;;  %v3563_v38 = vcvt.s32.f32 %v2795_v5  ;;  %v2664_v14 = vunpack.c.0.s8 %v2418_v17  ;;  %v3569_v52 = vcvt.s32.f32 %v2801_v37 }
 0x258   :  { %4684 = vmatpush.bf16.msra.mxu1 %v4379_v36  ;;  %v4468_v47 = vpack.c.bf16 %v4048_v59, %v4042_v2  ;;  %v3851_v51 = vcvt.s32.f32 %v3083_v29  ;;  %v2670_v6 = vunpack.c.1.s8 %v2418_v17  ;;  %v3857_v57 = vcvt.s32.f32 %v3089_v33  ;;  %v2412_v17 = vld [vmem:[#allocation14 + $0x70] sm:$0xff] }
 0x259   :  { %v3432_v3 = vcvt.s32.f32 %v2664_v14  ;;  %v3262_v42 = vunpack.c.0.s8 %v2566_v12  ;;  %v3268_v50 = vunpack.c.1.s8 %v2566_v12  ;;  %4674 = vmatmul.bf16.vlgmr.msra.gmra.mxu0 %v8316_v48  ;;  %v4229_v4 = vpack.c.bf16 %v3569_v52, %v3563_v38 }
 0x25a   :  { %4718 = vmatpush.bf16.msrb.mxu0 %v4170_v23  ;;  %4607 = vmatpush.bf16.msra.mxu3 %v4468_v47  ;;  %v3438_v31 = vcvt.s32.f32 %v2670_v6  ;;  %v2783_v28 = vunpack.c.0.s8 %v2447_v16  ;;  %v2789_v30 = vunpack.c.1.s8 %v2447_v16  ;;  %v4373_v39 = vpack.c.bf16 %v3857_v57, %v3851_v51  ;;  %v2483_v6 = vld [vmem:[#allocation14 + $0x2a8] sm:$0xff] }
 0x25b   :  { %v4030_v7 = vcvt.s32.f32 %v3262_v42  ;;  %v4036_v27 = vcvt.s32.f32 %v3268_v50  ;;  %v3071_v32 = vunpack.c.0.s8 %v2519_v22  ;;  %4646 = vmatpush.bf16.msrb.mxu2 %v4229_v4  ;;  %v3077_v24 = vunpack.c.1.s8 %v2519_v22  ;;  %v2555_v50 = vld [vmem:[#allocation14 + $0x4e8] sm:$0xff] }
 0x25c   :  { %v4164_v1 = vpack.c.bf16 %v3438_v31, %v3432_v3  ;;  %v3551_v0 = vcvt.s32.f32 %v2783_v28  ;;  %v3557_v26 = vcvt.s32.f32 %v2789_v30  ;;  %v8358_v12 = vpop.f32.mrf.mxu2  ;;  %4685 = vmatpush.bf16.msra.mxu1 %v4373_v39  ;;  %v2963_v40 = vunpack.c.2.s8 %v2489_v11 }
 0x25d   :  { %v4462_v43 = vpack.c.bf16 %v4036_v27, %v4030_v7  ;;  %v3839_v10 = vcvt.s32.f32 %v3071_v32  ;;  %v2969_v18 = vunpack.c.3.s8 %v2489_v11  ;;  %v3845_v58 = vcvt.s32.f32 %v3077_v24  ;;  %v8360_v25 = vpop.f32.mrf.mxu3 }
 0x25e   :  { %4719 = vmatpush.bf16.msrb.mxu0 %v4164_v1  ;;  %v4223_v54 = vpack.c.bf16 %v3557_v26, %v3551_v0  ;;  %v3251_v16 = vunpack.c.2.s8 %v2561_v8  ;;  %v3257_v63 = vunpack.c.3.s8 %v2561_v8  ;;  %v3731_v15 = vcvt.s32.f32 %v2963_v40  ;;  %v2436_v1 = vld [vmem:[#allocation14 + $0x130] sm:$0xff] }
 0x25f   :  { %4608 = vmatpush.bf16.msra.mxu3 %v4462_v43  ;;  %v3737_v49 = vcvt.s32.f32 %v2969_v18  ;;  %v2652_v22 = vunpack.c.2.s8 %v2412_v17  ;;  %v2658_v56 = vunpack.c.3.s8 %v2412_v17  ;;  %v4367_v60 = vpack.c.bf16 %v3845_v58, %v3839_v10 }
 0x260   :  { %4647 = vmatpush.bf16.msrb.mxu2 %v4223_v54  ;;  %v4019_v46 = vcvt.s32.f32 %v3251_v16  ;;  %v4025_v61 = vcvt.s32.f32 %v3257_v63  ;;  %v2772_v55 = vunpack.c.2.s8 %v2442_v44  ;;  %v2778_v5 = vunpack.c.3.s8 %v2442_v44 }
 0x261   :  { %v4313_v53 = vpack.c.bf16 %v3737_v49, %v3731_v15  ;;  %v3420_v13 = vcvt.s32.f32 %v2652_v22  ;;  %v3426_v2 = vcvt.s32.f32 %v2658_v56  ;;  %4686 = vmatpush.bf16.msra.mxu1 %v4367_v60  ;;  %v8364_v37 = vadd.f32 %v8352_v62, %v8350_v9 }
 0x262   :  { %v4457_v36 = vpack.c.bf16 %v4025_v61, %v4019_v46  ;;  %v3540_v59 = vcvt.s32.f32 %v2772_v55  ;;  %v2951_v29 = vunpack.c.0.s8 %v2489_v11  ;;  %v3546_v23 = vcvt.s32.f32 %v2778_v5 }
 0x263   :  { %4653 = vmatpush.bf16.msrb.mxu3 %v4313_v53  ;;  %v4158_v20 = vpack.c.bf16 %v3426_v2, %v3420_v13  ;;  %v2957_v38 = vunpack.c.1.s8 %v2489_v11  ;;  %v3239_v33 = vunpack.c.0.s8 %v2561_v8  ;;  %v3245_v47 = vunpack.c.1.s8 %v2561_v8  ;;  %v2406_v11 = vld [vmem:[#allocation14 + $0x40] sm:$0xff] }
 0x264   :  { %4648 = vmatmul.bf16.vlgmr.msrb.gmra.mxu2 %v8253_v19  ;;  %v3719_v14 = vcvt.s32.f32 %v2951_v29  ;;  %v2640_v52 = vunpack.c.0.s8 %v2412_v17  ;;  %v2646_v51 = vunpack.c.1.s8 %v2412_v17  ;;  %v2299_v57 = vpop.f32.mrf.mxu2  ;;  %v4218_v3 = vpack.c.bf16 %v3546_v23, %v3540_v59  ;;  %4687 = vmatmul.bf16.vlgmr.msra.gmra.mxu1 %v8332_v41 }
 0x265   :  { %4692 = vmatpush.bf16.msra.mxu2 %v4457_v36  ;;  %4720 = vmatpush.bf16.msrb.mxu0 %v4158_v20  ;;  %v3725_v9 = vcvt.s32.f32 %v2957_v38  ;;  %v4007_v62 = vcvt.s32.f32 %v3239_v33  ;;  %v2760_v42 = vunpack.c.0.s8 %v2442_v44  ;;  %v4013_v4 = vcvt.s32.f32 %v3245_v47  ;;  %v2312_v39 = vpop.f32.mrf.mxu3  ;;  %v8368_v57 = vld [vmem:[#allocation14 + $0x4b8] sm:$0xff] }
 0x266   :  { %v3408_v31 = vcvt.s32.f32 %v2640_v52  ;;  %v3414_v28 = vcvt.s32.f32 %v2646_v51  ;;  %v2766_v30 = vunpack.c.1.s8 %v2442_v44  ;;  %4731 = vmatpush.bf16.msrb.mxu1 %v4218_v3  ;;  %v2939_v32 = vunpack.c.2.s8 %v2483_v6 }
 0x267   :  { %v4307_v7 = vpack.c.bf16 %v3725_v9, %v3719_v14  ;;  %v3528_v27 = vcvt.s32.f32 %v2760_v42  ;;  %v2945_v8 = vunpack.c.3.s8 %v2483_v6  ;;  %v4451_v0 = vpack.c.bf16 %v4013_v4, %v4007_v62  ;;  %v2477_v14 = vld [vmem:[#allocation14 + $0x278] sm:$0xff]  ;;  %v7340_v42 = vld [vmem:[#allocation11] sm:$0xff] }
 0x268   :  { %v4152_v26 = vpack.c.bf16 %v3414_v28, %v3408_v31  ;;  %v3534_v24 = vcvt.s32.f32 %v2766_v30  ;;  %v3227_v17 = vunpack.c.2.s8 %v2555_v50  ;;  %v3707_v43 = vcvt.s32.f32 %v2939_v32  ;;  %v2400_v4 = vld [vmem:[#allocation14 + $0x10] sm:$0xff]  ;;  %v7341_v30 = vld [vmem:[#allocation13] sm:$0xff] }
 0x269   :  { %4654 = vmatpush.bf16.msrb.mxu3 %v4307_v7  ;;  %v3713_v10 = vcvt.s32.f32 %v2945_v8  ;;  %v3233_v40 = vunpack.c.3.s8 %v2555_v50  ;;  %v2628_v18 = vunpack.c.2.s8 %v2406_v11  ;;  %4693 = vmatpush.bf16.msra.mxu2 %v4451_v0  ;;  %v2634_v58 = vunpack.c.3.s8 %v2406_v11 }
 0x26a   :  { %4721 = vmatpush.bf16.msrb.mxu0 %v4152_v26  ;;  %v4212_v44 = vpack.c.bf16 %v3534_v24, %v3528_v27  ;;  %v3995_v54 = vcvt.s32.f32 %v3227_v17  ;;  %v2748_v16 = vunpack.c.2.s8 %v2436_v1  ;;  %v2754_v22 = vunpack.c.3.s8 %v2436_v1 }
 0x26b   :  { %v4301_v63 = vpack.c.bf16 %v3713_v10, %v3707_v43  ;;  %v4001_v15 = vcvt.s32.f32 %v3233_v40  ;;  %v3396_v49 = vcvt.s32.f32 %v2628_v18  ;;  %v3402_v56 = vcvt.s32.f32 %v2634_v58 }
 0x26c   :  { %4732 = vmatpush.bf16.msrb.mxu1 %v4212_v44  ;;  %v3516_v60 = vcvt.s32.f32 %v2748_v16  ;;  %v2927_v46 = vunpack.c.0.s8 %v2483_v6  ;;  %v2933_v61 = vunpack.c.1.s8 %v2483_v6  ;;  %v3522_v53 = vcvt.s32.f32 %v2754_v22 }
 0x26d   :  { %4655 = vmatpush.bf16.msrb.mxu3 %v4301_v63  ;;  %v4445_v55 = vpack.c.bf16 %v4001_v15, %v3995_v54  ;;  %v3215_v13 = vunpack.c.0.s8 %v2555_v50  ;;  %v3221_v2 = vunpack.c.1.s8 %v2555_v50  ;;  %v4146_v5 = vpack.c.bf16 %v3402_v56, %v3396_v49 }
 0x26e   :  { %v3695_v36 = vcvt.s32.f32 %v2927_v46  ;;  %v3701_v59 = vcvt.s32.f32 %v2933_v61  ;;  %v2616_v29 = vunpack.c.0.s8 %v2406_v11  ;;  %v4206_v20 = vpack.c.bf16 %v3522_v53, %v3516_v60 }
 0x26f   :  { %4694 = vmatpush.bf16.msra.mxu2 %v4445_v55  ;;  %v3983_v23 = vcvt.s32.f32 %v3215_v13  ;;  %v3989_v38 = vcvt.s32.f32 %v3221_v2  ;;  %v2622_v33 = vunpack.c.1.s8 %v2406_v11  ;;  %4722 = vmatpush.bf16.msrb.mxu0 %v4146_v5  ;;  %v2736_v51 = vunpack.c.0.s8 %v2436_v1 }
 0x270   :  { %v4295_v47 = vpack.c.bf16 %v3701_v59, %v3695_v36  ;;  %v3384_v52 = vcvt.s32.f32 %v2616_v29  ;;  %v2742_v6 = vunpack.c.1.s8 %v2436_v1  ;;  %4733 = vmatpush.bf16.msrb.mxu1 %v4206_v20  ;;  %v2298_v62 = vadd.f32 %v8358_v12, %v8364_v37  ;;  %v2430_v1 = vld [vmem:[#allocation14 + $0x100] sm:$0xff] }
 0x271   :  { %v4439_v3 = vpack.c.bf16 %v3989_v38, %v3983_v23  ;;  %v3390_v9 = vcvt.s32.f32 %v2622_v33  ;;  %v2323_v50 = vperm.slane %v7340_v42, 7  ;;  %v3504_v31 = vcvt.s32.f32 %v2736_v51  ;;  %v2514_v38 = vld [vmem:[#allocation14 + $0x3a0] sm:$0xff]  ;;  %v2471_v33 = vld [vmem:[#allocation14 + $0x248] sm:$0xff] }
 0x272   :  { %4656 = vmatpush.bf16.msrb.mxu3 %v4295_v47  ;;  %v3510_v28 = vcvt.s32.f32 %v2742_v6  ;;  %v2349_v11 = vperm.slane %v7341_v30, 7  ;;  %v2915_v39 = vunpack.c.2.s8 %v2477_v14  ;;  %v2311_v27 = vadd.f32 %v8360_v25, %v2298_v62  ;;  %v2543_v6 = vld [vmem:[#allocation14 + $0x488] sm:$0xff] }
 0x273   :  { %4695 = vmatpush.bf16.msra.mxu2 %v4439_v3  ;;  %v4140_v7 = vpack.c.bf16 %v3390_v9, %v3384_v52  ;;  %v2921_v32 = vunpack.c.3.s8 %v2477_v14  ;;  %v3203_v8 = vunpack.c.2.s8 %v8368_v57  ;;  %v3209_v12 = vunpack.c.3.s8 %v8368_v57 }
 0x274   :  { %v4200_v0 = vpack.c.bf16 %v3510_v28, %v3504_v31  ;;  %v3683_v26 = vcvt.s32.f32 %v2915_v39  ;;  %v2604_v37 = vunpack.c.2.s8 %v2400_v4  ;;  %v2339_v24 = vmul.f32 %v2323_v50, %v2311_v27 }
 0x275   :  { %4723 = vmatpush.bf16.msrb.mxu0 %v4140_v7  ;;  %v3689_v17 = vcvt.s32.f32 %v2921_v32  ;;  %v3971_v43 = vcvt.s32.f32 %v3203_v8  ;;  %v2610_v10 = vunpack.c.3.s8 %v2400_v4  ;;  %v3977_v40 = vcvt.s32.f32 %v3209_v12 }
 0x276   :  { %4734 = vmatpush.bf16.msrb.mxu1 %v4200_v0  ;;  %v3372_v18 = vcvt.s32.f32 %v2604_v37  ;;  %v2724_v44 = vunpack.c.2.s8 %v2430_v1  ;;  %v2730_v54 = vunpack.c.3.s8 %v2430_v1  ;;  %v2365_v25 = vadd.f32 %v2349_v11, %v2339_v24  ;;  %v8375_v15 = vpop.f32.mrf.mxu0 }
 0x277   :  { %v4289_v58 = vpack.c.bf16 %v3689_v17, %v3683_v26  ;;  %v3378_v16 = vcvt.s32.f32 %v2610_v10  ;;  %v2903_v63 = vunpack.c.0.s8 %v2477_v14  ;;  %v4433_v49 = vpack.c.bf16 %v3977_v40, %v3971_v43 }
 0x278   :  { %v3492_v22 = vcvt.s32.f32 %v2724_v44  ;;  %v3498_v56 = vcvt.s32.f32 %v2730_v54  ;;  %v2909_v60 = vunpack.c.1.s8 %v2477_v14  ;;  %v8377_v46 = vpop.f32.mrf.mxu1  ;;  %vm2373_vm11 = vcmp.ge.f32.partialorder %v2365_v25, 0.0 }
 0x279   :  { %v2381_v61 = vmul.f32 0.01, %v2365_v25  ;;  %4657 = vmatpush.bf16.msrb.mxu3 %v4289_v58  ;;  %v4134_v55 = vpack.c.bf16 %v3378_v16, %v3372_v18  ;;  %v3671_v53 = vcvt.s32.f32 %v2903_v63  ;;  %4696 = vmatpush.bf16.msra.mxu2 %v4433_v49  ;;  %v3191_v5 = vunpack.c.0.s8 %v8368_v57 }
 0x27a   :  { %v4194_v13 = vpack.c.bf16 %v3498_v56, %v3492_v22  ;;  %v3677_v2 = vcvt.s32.f32 %v2909_v60  ;;  %v3197_v36 = vunpack.c.1.s8 %v8368_v57  ;;  %v2592_v29 = vunpack.c.0.s8 %v2400_v4  ;;  %v8384_v56 = vld [vmem:[#allocation14 + $0x5d8] sm:$0xff] }
 0x27b   :  { %v2389_v59 = vsel %vm2373_vm11, %v2365_v25, %v2381_v61  ;;  %4724 = vmatpush.bf16.msrb.mxu0 %v4134_v55  ;;  %v2598_v20 = vunpack.c.1.s8 %v2400_v4  ;;  %v2712_v23 = vunpack.c.0.s8 %v2430_v1  ;;  %v3959_v52 = vcvt.s32.f32 %v3191_v5  ;;  %v2424_v4 = vld [vmem:[#allocation14 + $0xd0] sm:$0xff] }
 0x27c   :  { %v8381_v14 = vpack.c.bf16 %v2389_v59, %v2389_v59  ;;  %4735 = vmatpush.bf16.msrb.mxu1 %v4194_v13  ;;  %v4283_v47 = vpack.c.bf16 %v3677_v2, %v3671_v53  ;;  %v3965_v51 = vcvt.s32.f32 %v3197_v36  ;;  %v3360_v3 = vcvt.s32.f32 %v2592_v29  ;;  %v2466_v29 = vld [vmem:[#allocation14 + $0x220] sm:$0xff] }
 0x27d   :  { %v3366_v9 = vcvt.s32.f32 %v2598_v20  ;;  %v2718_v62 = vunpack.c.1.s8 %v2430_v1  ;;  %v3480_v42 = vcvt.s32.f32 %v2712_v23  ;;  %v3060_v50 = vunpack.c.2.s8 %v2514_v38 }
 0x27e   :  { %4658 = vmatpush.bf16.msrb.mxu3 %v4283_v47  ;;  %v4427_v57 = vpack.c.bf16 %v3965_v51, %v3959_v52  ;;  %v3066_v31 = vunpack.c.3.s8 %v2514_v38  ;;  %v2891_v28 = vunpack.c.2.s8 %v2471_v33  ;;  %v2897_v39 = vunpack.c.3.s8 %v2471_v33  ;;  %v4521_v27 = vpop.f32.mrf.mxu0  ;;  %v2508_v52 = vld [vmem:[#allocation14 + $0x370] sm:$0xff] }
 0x27f   :  { %v4128_v30 = vpack.c.bf16 %v3366_v9, %v3360_v3  ;;  %v3486_v11 = vcvt.s32.f32 %v2718_v62  ;;  %v3179_v7 = vunpack.c.2.s8 %v2543_v6  ;;  %4609 = vmatmul.bf16.vlgmr.msra.gmra.mxu3 %v8381_v14  ;;  %v3828_v32 = vcvt.s32.f32 %v3060_v50  ;;  %v2538_v62 = vld [vmem:[#allocation14 + $0x460] sm:$0xff] }
 0x280   :  { %4697 = vmatpush.bf16.msra.mxu2 %v4427_v57  ;;  %v3834_v8 = vcvt.s32.f32 %v3066_v31  ;;  %v3659_v0 = vcvt.s32.f32 %v2891_v28  ;;  %v3185_v26 = vunpack.c.3.s8 %v2543_v6  ;;  %v4534_v1 = vpop.f32.mrf.mxu1  ;;  %v3665_v37 = vcvt.s32.f32 %v2897_v39 }
 0x281   :  { %4725 = vmatpush.bf16.msrb.mxu0 %v4128_v30  ;;  %v4188_v12 = vpack.c.bf16 %v3486_v11, %v3480_v42  ;;  %v3947_v24 = vcvt.s32.f32 %v3179_v7  ;;  %v2700_v17 = vunpack.c.2.s8 %v2424_v4  ;;  %v2706_v40 = vunpack.c.3.s8 %v2424_v4 }
 0x282   :  { %v4362_v43 = vpack.c.bf16 %v3834_v8, %v3828_v32  ;;  %v3953_v10 = vcvt.s32.f32 %v3185_v26  ;;  %v3048_v18 = vunpack.c.0.s8 %v2514_v38  ;;  %v4277_v44 = vpack.c.bf16 %v3665_v37, %v3659_v0 }
 0x283   :  { %4736 = vmatpush.bf16.msrb.mxu1 %v4188_v12  ;;  %v3468_v54 = vcvt.s32.f32 %v2700_v17  ;;  %v3054_v25 = vunpack.c.1.s8 %v2514_v38  ;;  %v2879_v58 = vunpack.c.0.s8 %v2471_v33  ;;  %v3474_v63 = vcvt.s32.f32 %v2706_v40 }
 0x284   :  { %v4421_v16 = vpack.c.bf16 %v3953_v10, %v3947_v24  ;;  %v3816_v49 = vcvt.s32.f32 %v3048_v18  ;;  %v2885_v22 = vunpack.c.1.s8 %v2471_v33  ;;  %4726 = vmatmul.bf16.vlgmr.msrb.gmra.mxu0 %v8209_v45  ;;  %4659 = vmatpush.bf16.msrb.mxu3 %v4277_v44  ;;  %v3167_v55 = vunpack.c.0.s8 %v2543_v6 }
 0x285   :  { %4770 = vmatpush.bf16.msra.mxu0 %v4362_v43  ;;  %v3822_v60 = vcvt.s32.f32 %v3054_v25  ;;  %v3647_v61 = vcvt.s32.f32 %v2879_v58  ;;  %v3173_v53 = vunpack.c.1.s8 %v2543_v6  ;;  %v8387_v13 = vpop.f32.mrf.mxu2  ;;  %v4182_v2 = vpack.c.bf16 %v3474_v63, %v3468_v54  ;;  %v2579_v54 = vld [vmem:[#allocation14 + $0x5a8] sm:$0xff] }
 0x286   :  { %4698 = vmatpush.bf16.msra.mxu2 %v4421_v16  ;;  %v3653_v5 = vcvt.s32.f32 %v2885_v22  ;;  %v2688_v36 = vunpack.c.0.s8 %v2424_v4  ;;  %v2694_v59 = vunpack.c.1.s8 %v2424_v4  ;;  %v8389_v20 = vpop.f32.mrf.mxu3  ;;  %v3935_v38 = vcvt.s32.f32 %v3167_v55 }
 0x287   :  { %v4356_v23 = vpack.c.bf16 %v3822_v60, %v3816_v49  ;;  %v3941_v33 = vcvt.s32.f32 %v3173_v53  ;;  %v3347_v47 = vunpack.c.2.s8 %v8384_v56  ;;  %4737 = vmatpush.bf16.msrb.mxu1 %v4182_v2  ;;  %v3353_v9 = vunpack.c.3.s8 %v8384_v56 }
 0x288   :  { %v4271_v51 = vpack.c.bf16 %v3653_v5, %v3647_v61  ;;  %v3456_v3 = vcvt.s32.f32 %v2688_v36  ;;  %v3462_v6 = vcvt.s32.f32 %v2694_v59  ;;  %v2868_v50 = vunpack.c.2.s8 %v2466_v29  ;;  %v2460_v61 = vld [vmem:[#allocation14 + $0x1f0] sm:$0xff]  ;;  %v2502_v5 = vld [vmem:[#allocation14 + $0x340] sm:$0xff] }
 0x289   :  { %4771 = vmatpush.bf16.msra.mxu0 %v4356_v23  ;;  %v4415_v42 = vpack.c.bf16 %v3941_v33, %v3935_v38  ;;  %v4115_v57 = vcvt.s32.f32 %v3347_v47  ;;  %v2874_v31 = vunpack.c.3.s8 %v2466_v29  ;;  %v4121_v4 = vcvt.s32.f32 %v3353_v9  ;;  %v2532_v38 = vld [vmem:[#allocation14 + $0x430] sm:$0xff] }
 0x28a   :  { %4660 = vmatpush.bf16.msrb.mxu3 %v4271_v51  ;;  %v4176_v28 = vpack.c.bf16 %v3462_v6, %v3456_v3  ;;  %v3036_v30 = vunpack.c.2.s8 %v2508_v52  ;;  %v3042_v11 = vunpack.c.3.s8 %v2508_v52  ;;  %v3636_v39 = vcvt.s32.f32 %v2868_v50 }
 0x28b   :  { %4699 = vmatpush.bf16.msra.mxu2 %v4415_v42  ;;  %v3642_v7 = vcvt.s32.f32 %v2874_v31  ;;  %v3156_v27 = vunpack.c.2.s8 %v2538_v62  ;;  %v3162_v32 = vunpack.c.3.s8 %v2538_v62  ;;  %v4505_v8 = vpack.c.bf16 %v4121_v4, %v4115_v57 }
 0x28c   :  { %4738 = vmatpush.bf16.msrb.mxu1 %v4176_v28  ;;  %v3804_v0 = vcvt.s32.f32 %v3036_v30  ;;  %v3810_v26 = vcvt.s32.f32 %v3042_v11  ;;  %v8395_v1 = vadd.f32 %v8377_v46, %v8375_v15  ;;  %v3335_v17 = vunpack.c.0.s8 %v8384_v56 }
 0x28d   :  { %v4266_v12 = vpack.c.bf16 %v3642_v7, %v3636_v39  ;;  %v3924_v37 = vcvt.s32.f32 %v3156_v27  ;;  %v3930_v24 = vcvt.s32.f32 %v3162_v32  ;;  %v4547_v43 = vpop.f32.mrf.mxu2  ;;  %v3341_v40 = vunpack.c.1.s8 %v8384_v56 }
 0x28e   :  { %4705 = vmatpush.bf16.msra.mxu3 %v4505_v8  ;;  %v4350_v10 = vpack.c.bf16 %v3810_v26, %v3804_v0  ;;  %4700 = vmatmul.bf16.vlgmr.msra.gmra.mxu2 %v8354_v35  ;;  %v2856_v18 = vunpack.c.0.s8 %v2466_v29  ;;  %v2862_v44 = vunpack.c.1.s8 %v2466_v29  ;;  %v4560_v25 = vpop.f32.mrf.mxu3  ;;  %v4103_v15 = vcvt.s32.f32 %v3335_v17 }
 0x28f   :  { %4744 = vmatpush.bf16.msrb.mxu2 %v4266_v12  ;;  %v4410_v58 = vpack.c.bf16 %v3930_v24, %v3924_v37  ;;  %4739 = vmatmul.bf16.vlgmr.msrb.gmra.mxu1 %v8242_v21  ;;  %v3024_v46 = vunpack.c.0.s8 %v2508_v52  ;;  %v3030_v16 = vunpack.c.1.s8 %v2508_v52  ;;  %v4109_v63 = vcvt.s32.f32 %v3341_v40 }
 0x290   :  { %4772 = vmatpush.bf16.msra.mxu0 %v4350_v10  ;;  %v3624_v49 = vcvt.s32.f32 %v2856_v18  ;;  %v3630_v22 = vcvt.s32.f32 %v2862_v44  ;;  %v3144_v60 = vunpack.c.0.s8 %v2538_v62  ;;  %4661 = vmatmul.bf16.vlgmr.msrb.gmra.mxu3 %v8294_v34  ;;  %v3150_v53 = vunpack.c.1.s8 %v2538_v62  ;;  %v2573_v10 = vld [vmem:[#allocation14 + $0x578] sm:$0xff] }
 0x291   :  { %4783 = vmatpush.bf16.msra.mxu1 %v4410_v58  ;;  %v3792_v56 = vcvt.s32.f32 %v3024_v46  ;;  %v3798_v55 = vcvt.s32.f32 %v3030_v16  ;;  %v3323_v2 = vunpack.c.2.s8 %v2579_v54  ;;  %v4499_v36 = vpack.c.bf16 %v4109_v63, %v4103_v15  ;;  %v2454_v58 = vld [vmem:[#allocation14 + $0x1c0] sm:$0xff]  ;;  %v2496_v63 = vld [vmem:[#allocation14 + $0x310] sm:$0xff] }
 0x292   :  { %v4260_v59 = vpack.c.bf16 %v3630_v22, %v3624_v49  ;;  %v3912_v29 = vcvt.s32.f32 %v3144_v60  ;;  %v3329_v23 = vunpack.c.3.s8 %v2579_v54  ;;  %v3918_v47 = vcvt.s32.f32 %v3150_v53 }
 0x293   :  { %v4344_v33 = vpack.c.bf16 %v3798_v55, %v3792_v56  ;;  %v4091_v52 = vcvt.s32.f32 %v3323_v2  ;;  %v2844_v51 = vunpack.c.2.s8 %v2460_v61  ;;  %4706 = vmatpush.bf16.msra.mxu3 %v4499_v36  ;;  %v2850_v6 = vunpack.c.3.s8 %v2460_v61 }
 0x294   :  { %4745 = vmatpush.bf16.msrb.mxu2 %v4260_v59  ;;  %v4097_v3 = vcvt.s32.f32 %v3329_v23  ;;  %v3012_v9 = vunpack.c.2.s8 %v2502_v5  ;;  %v3018_v42 = vunpack.c.3.s8 %v2502_v5  ;;  %v4404_v57 = vpack.c.bf16 %v3918_v47, %v3912_v29 }
 0x295   :  { %4773 = vmatpush.bf16.msra.mxu0 %v4344_v33  ;;  %v3612_v62 = vcvt.s32.f32 %v2844_v51  ;;  %v3132_v50 = vunpack.c.2.s8 %v2532_v38  ;;  %v3138_v31 = vunpack.c.3.s8 %v2532_v38  ;;  %v3618_v4 = vcvt.s32.f32 %v2850_v6 }
 0x296   :  { %v4493_v28 = vpack.c.bf16 %v4097_v3, %v4091_v52  ;;  %v3780_v30 = vcvt.s32.f32 %v3012_v9  ;;  %v3786_v11 = vcvt.s32.f32 %v3018_v42  ;;  %4784 = vmatpush.bf16.msra.mxu1 %v4404_v57  ;;  %v3311_v27 = vunpack.c.0.s8 %v2579_v54 }
 0x297   :  { %v3900_v39 = vcvt.s32.f32 %v3132_v50  ;;  %v3906_v7 = vcvt.s32.f32 %v3138_v31  ;;  %v3317_v32 = vunpack.c.1.s8 %v2579_v54  ;;  %v4254_v8 = vpack.c.bf16 %v3618_v4, %v3612_v62 }
 0x298   :  { %4707 = vmatpush.bf16.msra.mxu3 %v4493_v28  ;;  %v4338_v0 = vpack.c.bf16 %v3786_v11, %v3780_v30  ;;  %v2832_v26 = vunpack.c.0.s8 %v2460_v61  ;;  %v2838_v12 = vunpack.c.1.s8 %v2460_v61  ;;  %v4079_v24 = vcvt.s32.f32 %v3311_v27 }
 0x299   :  { %v4398_v37 = vpack.c.bf16 %v3906_v7, %v3900_v39  ;;  %v4085_v17 = vcvt.s32.f32 %v3317_v32  ;;  %v3000_v43 = vunpack.c.0.s8 %v2502_v5  ;;  %4746 = vmatpush.bf16.msrb.mxu2 %v4254_v8  ;;  %v3006_v44 = vunpack.c.1.s8 %v2502_v5  ;;  %v2526_v5 = vld [vmem:[#allocation14 + $0x400] sm:$0xff]  ;;  %v2419_v39 = vld [vmem:[#allocation14 + $0xa8] sm:$0xff] }
 0x29a   :  { %4774 = vmatpush.bf16.msra.mxu0 %v4338_v0  ;;  %v3600_v40 = vcvt.s32.f32 %v2832_v26  ;;  %v3606_v18 = vcvt.s32.f32 %v2838_v12  ;;  %v3120_v25 = vunpack.c.0.s8 %v2532_v38  ;;  %v3126_v46 = vunpack.c.1.s8 %v2532_v38  ;;  %v2567_v0 = vld [vmem:[#allocation14 + $0x548] sm:$0xff]  ;;  %v8407_v26 = vpop.f32.mrf.mxu0 }
 0x29b   :  { %4785 = vmatpush.bf16.msra.mxu1 %v4398_v37  ;;  %v4487_v15 = vpack.c.bf16 %v4085_v17, %v4079_v24  ;;  %v3768_v54 = vcvt.s32.f32 %v3000_v43  ;;  %v4546_v16 = vadd.f32 %v8387_v13, %v8395_v1  ;;  %v3774_v22 = vcvt.s32.f32 %v3006_v44  ;;  %v2448_v44 = vld [vmem:[#allocation14 + $0x190] sm:$0xff] }
 0x29c   :  { %v4248_v49 = vpack.c.bf16 %v3606_v18, %v3600_v40  ;;  %v3888_v60 = vcvt.s32.f32 %v3120_v25  ;;  %v3299_v61 = vunpack.c.2.s8 %v2573_v10  ;;  %v3894_v56 = vcvt.s32.f32 %v3126_v46  ;;  %v2520_v46 = vld [vmem:[#allocation14 + $0x3d0] sm:$0xff] }
 0x29d   :  { %4708 = vmatpush.bf16.msra.mxu3 %v4487_v15  ;;  %v8405_v55 = vadd.f32 %v8389_v20, %v4546_v16  ;;  %v3305_v53 = vunpack.c.3.s8 %v2573_v10  ;;  %v2820_v2 = vunpack.c.2.s8 %v2454_v58  ;;  %v4332_v36 = vpack.c.bf16 %v3774_v22, %v3768_v54 }
 0x29e   :  { %4747 = vmatpush.bf16.msrb.mxu2 %v4248_v49  ;;  %v4067_v59 = vcvt.s32.f32 %v3299_v61  ;;  %v2826_v29 = vunpack.c.3.s8 %v2454_v58  ;;  %v2988_v23 = vunpack.c.2.s8 %v2496_v63  ;;  %v4392_v38 = vpack.c.bf16 %v3894_v56, %v3888_v60 }
 0x29f   :  { %v4073_v13 = vcvt.s32.f32 %v3305_v53  ;;  %v3588_v1 = vcvt.s32.f32 %v2820_v2  ;;  %v2994_v33 = vunpack.c.3.s8 %v2496_v63  ;;  %4775 = vmatpush.bf16.msra.mxu0 %v4332_v36  ;;  %v3108_v51 = vunpack.c.2.s8 %v2526_v5 }
 0x2a0   :  { %v3594_v47 = vcvt.s32.f32 %v2826_v29  ;;  %v3756_v52 = vcvt.s32.f32 %v2988_v23  ;;  %v3114_v3 = vunpack.c.3.s8 %v2526_v5  ;;  %4786 = vmatpush.bf16.msra.mxu1 %v4392_v38  ;;  %v3287_v9 = vunpack.c.0.s8 %v2573_v10 }
 0x2a1   :  { %v4481_v20 = vpack.c.bf16 %v4073_v13, %v4067_v59  ;;  %v3762_v6 = vcvt.s32.f32 %v2994_v33  ;;  %v3293_v42 = vunpack.c.1.s8 %v2573_v10  ;;  %v3876_v62 = vcvt.s32.f32 %v3108_v51 }
 0x2a2   :  { %v4242_v57 = vpack.c.bf16 %v3594_v47, %v3588_v1  ;;  %v3882_v50 = vcvt.s32.f32 %v3114_v3  ;;  %v2808_v31 = vunpack.c.0.s8 %v2454_v58  ;;  %v4055_v4 = vcvt.s32.f32 %v3287_v9  ;;  %v4573_v51 = vpop.f32.mrf.mxu0 }
 0x2a3   :  { %4709 = vmatpush.bf16.msra.mxu3 %v4481_v20  ;;  %v4326_v28 = vpack.c.bf16 %v3762_v6, %v3756_v52  ;;  %v4061_v30 = vcvt.s32.f32 %v3293_v42  ;;  %v2814_v11 = vunpack.c.1.s8 %v2454_v58  ;;  %v2976_v32 = vunpack.c.0.s8 %v2496_v63  ;;  %v2490_v42 = vld [vmem:[#allocation14 + $0x2e0] sm:$0xff]  ;;  %v2556_v51 = vld [vmem:[#allocation14 + $0x4f0] sm:$0xff] }
 0x2a4   :  { %4748 = vmatpush.bf16.msrb.mxu2 %v4242_v57  ;;  %v4386_v7 = vpack.c.bf16 %v3882_v50, %v3876_v62  ;;  %v3576_v27 = vcvt.s32.f32 %v2808_v31  ;;  %v2982_v8 = vunpack.c.1.s8 %v2496_v63  ;;  %v3096_v24 = vunpack.c.0.s8 %v2526_v5 }
 0x2a5   :  { %4776 = vmatpush.bf16.msra.mxu0 %v4326_v28  ;;  %v4475_v12 = vpack.c.bf16 %v4061_v30, %v4055_v4  ;;  %v3582_v37 = vcvt.s32.f32 %v2814_v11  ;;  %v3102_v17 = vunpack.c.1.s8 %v2526_v5  ;;  %v3744_v43 = vcvt.s32.f32 %v2976_v32  ;;  %v2562_v28 = vld [vmem:[#allocation14 + $0x520] sm:$0xff] }
 0x2a6   :  { %4787 = vmatpush.bf16.msra.mxu1 %v4386_v7  ;;  %v3750_v10 = vcvt.s32.f32 %v2982_v8  ;;  %v2677_v40 = vunpack.c.2.s8 %v2419_v39  ;;  %v2683_v18 = vunpack.c.3.s8 %v2419_v39  ;;  %v3864_v58 = vcvt.s32.f32 %v3096_v24 }
 0x2a7   :  { %4710 = vmatpush.bf16.msra.mxu3 %v4475_v12  ;;  %v4236_v25 = vpack.c.bf16 %v3582_v37, %v3576_v27  ;;  %v3870_v15 = vcvt.s32.f32 %v3102_v17  ;;  %v3275_v54 = vunpack.c.2.s8 %v2567_v0  ;;  %v3281_v22 = vunpack.c.3.s8 %v2567_v0  ;;  %v2413_v12 = vld [vmem:[#allocation14 + $0x78] sm:$0xff] }
 0x2a8   :  { %v4320_v16 = vpack.c.bf16 %v3750_v10, %v3744_v43  ;;  %v3445_v63 = vcvt.s32.f32 %v2677_v40  ;;  %v3451_v49 = vcvt.s32.f32 %v2683_v18  ;;  %v2796_v56 = vunpack.c.2.s8 %v2448_v44  ;;  %v2443_v43 = vld [vmem:[#allocation14 + $0x168] sm:$0xff] }
 0x2a9   :  { %4749 = vmatpush.bf16.msrb.mxu2 %v4236_v25  ;;  %v4380_v60 = vpack.c.bf16 %v3870_v15, %v3864_v58  ;;  %v4043_v61 = vcvt.s32.f32 %v3275_v54  ;;  %v2802_v53 = vunpack.c.3.s8 %v2448_v44  ;;  %v4049_v5 = vcvt.s32.f32 %v3281_v22 }
 0x2aa   :  { %4777 = vmatpush.bf16.msra.mxu0 %v4320_v16  ;;  %v4171_v2 = vpack.c.bf16 %v3451_v49, %v3445_v63  ;;  %v3084_v36 = vunpack.c.2.s8 %v2520_v46  ;;  %v3090_v59 = vunpack.c.3.s8 %v2520_v46  ;;  %v3564_v29 = vcvt.s32.f32 %v2796_v56 }
 0x2ab   :  { %4788 = vmatpush.bf16.msra.mxu1 %v4380_v60  ;;  %v3570_v23 = vcvt.s32.f32 %v2802_v53  ;;  %v2665_v38 = vunpack.c.0.s8 %v2419_v39  ;;  %v2671_v13 = vunpack.c.1.s8 %v2419_v39  ;;  %v4469_v1 = vpack.c.bf16 %v4049_v5, %v4043_v61 }
 0x2ac   :  { %v3852_v33 = vcvt.s32.f32 %v3084_v36  ;;  %v3858_v47 = vcvt.s32.f32 %v3090_v59  ;;  %v3263_v52 = vunpack.c.0.s8 %v2567_v0  ;;  %v3269_v9 = vunpack.c.1.s8 %v2567_v0 }
 0x2ad   :  { %4778 = vmatmul.bf16.vlgmr.msra.gmra.mxu0 %v8316_v48  ;;  %v4230_v3 = vpack.c.bf16 %v3570_v23, %v3564_v29  ;;  %v3433_v20 = vcvt.s32.f32 %v2665_v38  ;;  %v3439_v6 = vcvt.s32.f32 %v2671_v13  ;;  %4711 = vmatpush.bf16.msra.mxu3 %v4469_v1  ;;  %v2784_v50 = vunpack.c.0.s8 %v2448_v44  ;;  %v2484_v13 = vld [vmem:[#allocation14 + $0x2b0] sm:$0xff] }
 0x2ae   :  { %4822 = vmatpush.bf16.msrb.mxu0 %v4171_v2  ;;  %v4374_v57 = vpack.c.bf16 %v3858_v47, %v3852_v33  ;;  %v4031_v62 = vcvt.s32.f32 %v3263_v52  ;;  %v2790_v31 = vunpack.c.1.s8 %v2448_v44  ;;  %v4037_v30 = vcvt.s32.f32 %v3269_v9 }
 0x2af   :  { %4750 = vmatpush.bf16.msrb.mxu2 %v4230_v3  ;;  %v4165_v4 = vpack.c.bf16 %v3439_v6, %v3433_v20  ;;  %v3072_v11 = vunpack.c.0.s8 %v2520_v46  ;;  %v3078_v39 = vunpack.c.1.s8 %v2520_v46  ;;  %v3552_v7 = vcvt.s32.f32 %v2784_v50 }
 0x2b0   :  { %4789 = vmatpush.bf16.msra.mxu1 %v4374_v57  ;;  %v3558_v27 = vcvt.s32.f32 %v2790_v31  ;;  %v2964_v32 = vunpack.c.2.s8 %v2490_v42  ;;  %v2970_v8 = vunpack.c.3.s8 %v2490_v42  ;;  %v4463_v0 = vpack.c.bf16 %v4037_v30, %v4031_v62  ;;  %v2407_v31 = vld [vmem:[#allocation14 + $0x48] sm:$0xff] }
 0x2b1   :  { %v3840_v37 = vcvt.s32.f32 %v3072_v11  ;;  %v3846_v24 = vcvt.s32.f32 %v3078_v39  ;;  %v3252_v17 = vunpack.c.2.s8 %v2562_v28  ;;  %v3258_v44 = vunpack.c.3.s8 %v2562_v28  ;;  %v2437_v39 = vld [vmem:[#allocation14 + $0x138] sm:$0xff] }
 0x2b2   :  { %4823 = vmatpush.bf16.msrb.mxu0 %v4165_v4  ;;  %v4224_v10 = vpack.c.bf16 %v3558_v27, %v3552_v7  ;;  %v3732_v40 = vcvt.s32.f32 %v2964_v32  ;;  %v3738_v18 = vcvt.s32.f32 %v2970_v8  ;;  %4712 = vmatpush.bf16.msra.mxu3 %v4463_v0  ;;  %v2653_v15 = vunpack.c.2.s8 %v2413_v12 }
 0x2b3   :  { %v4368_v25 = vpack.c.bf16 %v3846_v24, %v3840_v37  ;;  %v4020_v58 = vcvt.s32.f32 %v3252_v17  ;;  %v2659_v54 = vunpack.c.3.s8 %v2413_v12  ;;  %v4026_v16 = vcvt.s32.f32 %v3258_v44 }
 0x2b4   :  { %4751 = vmatpush.bf16.msrb.mxu2 %v4224_v10  ;;  %v4314_v46 = vpack.c.bf16 %v3738_v18, %v3732_v40  ;;  %v2773_v63 = vunpack.c.2.s8 %v2443_v43  ;;  %v2779_v49 = vunpack.c.3.s8 %v2443_v43  ;;  %v3421_v22 = vcvt.s32.f32 %v2653_v15 }
 0x2b5   :  { %4790 = vmatpush.bf16.msra.mxu1 %v4368_v25  ;;  %v3427_v60 = vcvt.s32.f32 %v2659_v54  ;;  %v2952_v61 = vunpack.c.0.s8 %v2490_v42  ;;  %v2958_v56 = vunpack.c.1.s8 %v2490_v42  ;;  %v4458_v53 = vpack.c.bf16 %v4026_v16, %v4020_v58  ;;  %4713 = vmatmul.bf16.vlgmr.msra.gmra.mxu3 %v8381_v14 }
 0x2b6   :  { %4757 = vmatpush.bf16.msrb.mxu3 %v4314_v46  ;;  %v3541_v2 = vcvt.s32.f32 %v2773_v63  ;;  %v3547_v5 = vcvt.s32.f32 %v2779_v49  ;;  %v3240_v36 = vunpack.c.0.s8 %v2562_v28  ;;  %v3246_v38 = vunpack.c.1.s8 %v2562_v28 }
 0x2b7   :  { %v4159_v59 = vpack.c.bf16 %v3427_v60, %v3421_v22  ;;  %4752 = vmatmul.bf16.vlgmr.msrb.gmra.mxu2 %v8253_v19  ;;  %v3720_v29 = vcvt.s32.f32 %v2952_v61  ;;  %v3726_v23 = vcvt.s32.f32 %v2958_v56  ;;  %v2641_v47 = vunpack.c.0.s8 %v2413_v12  ;;  %v2478_v61 = vld [vmem:[#allocation14 + $0x280] sm:$0xff] }
 0x2b8   :  { %4796 = vmatpush.bf16.msra.mxu2 %v4458_v53  ;;  %v4219_v1 = vpack.c.bf16 %v3547_v5, %v3541_v2  ;;  %4791 = vmatmul.bf16.vlgmr.msra.gmra.mxu1 %v8332_v41  ;;  %v4008_v33 = vcvt.s32.f32 %v3240_v36  ;;  %v2647_v52 = vunpack.c.1.s8 %v2413_v12  ;;  %v4014_v20 = vcvt.s32.f32 %v3246_v38  ;;  %v8417_v36 = vpop.f32.mrf.mxu0 }
 0x2b9   :  { %4824 = vmatpush.bf16.msrb.mxu0 %v4159_v59  ;;  %v4308_v3 = vpack.c.bf16 %v3726_v23, %v3720_v29  ;;  %v2761_v6 = vunpack.c.0.s8 %v2443_v43  ;;  %v2767_v9 = vunpack.c.1.s8 %v2443_v43  ;;  %v3409_v42 = vcvt.s32.f32 %v2641_v47  ;;  %v2550_v23 = vld [vmem:[#allocation14 + $0x4c0] sm:$0xff]  ;;  %v2401_v47 = vld [vmem:[#allocation14 + $0x18] sm:$0xff] }
 0x2ba   :  { %4835 = vmatpush.bf16.msrb.mxu1 %v4219_v1  ;;  %v3415_v57 = vcvt.s32.f32 %v2647_v52  ;;  %v2940_v62 = vunpack.c.2.s8 %v2484_v13  ;;  %v2946_v50 = vunpack.c.3.s8 %v2484_v13  ;;  %v4452_v28 = vpack.c.bf16 %v4014_v20, %v4008_v33 }
 0x2bb   :  { %4758 = vmatpush.bf16.msrb.mxu3 %v4308_v3  ;;  %v3529_v4 = vcvt.s32.f32 %v2761_v6  ;;  %v3535_v30 = vcvt.s32.f32 %v2767_v9  ;;  %v3228_v11 = vunpack.c.2.s8 %v2556_v51  ;;  %v3234_v8 = vunpack.c.3.s8 %v2556_v51  ;;  %v2431_v6 = vld [vmem:[#allocation14 + $0x108] sm:$0xff] }
 0x2bc   :  { %v4153_v7 = vpack.c.bf16 %v3415_v57, %v3409_v42  ;;  %v3708_v27 = vcvt.s32.f32 %v2940_v62  ;;  %v3714_v32 = vcvt.s32.f32 %v2946_v50  ;;  %4797 = vmatpush.bf16.msra.mxu2 %v4452_v28  ;;  %v2629_v37 = vunpack.c.2.s8 %v2407_v31 }
 0x2bd   :  { %v4213_v12 = vpack.c.bf16 %v3535_v30, %v3529_v4  ;;  %v3996_v0 = vcvt.s32.f32 %v3228_v11  ;;  %v2635_v24 = vunpack.c.3.s8 %v2407_v31  ;;  %v4002_v43 = vcvt.s32.f32 %v3234_v8 }
 0x2be   :  { %4825 = vmatpush.bf16.msrb.mxu0 %v4153_v7  ;;  %v4302_v17 = vpack.c.bf16 %v3714_v32, %v3708_v27  ;;  %v2749_v10 = vunpack.c.2.s8 %v2437_v39  ;;  %v2755_v40 = vunpack.c.3.s8 %v2437_v39  ;;  %v3397_v18 = vcvt.s32.f32 %v2629_v37 }
 0x2bf   :  { %4836 = vmatpush.bf16.msrb.mxu1 %v4213_v12  ;;  %v3403_v44 = vcvt.s32.f32 %v2635_v24  ;;  %v8415_v25 = vadd.f32 %v8407_v26, %v8405_v55  ;;  %v2928_v58 = vunpack.c.0.s8 %v2484_v13  ;;  %v4446_v15 = vpack.c.bf16 %v4002_v43, %v3996_v0 }
 0x2c0   :  { %4759 = vmatpush.bf16.msrb.mxu3 %v4302_v17  ;;  %v3517_v54 = vcvt.s32.f32 %v2749_v10  ;;  %v3523_v46 = vcvt.s32.f32 %v2755_v40  ;;  %v2934_v16 = vunpack.c.1.s8 %v2484_v13  ;;  %v3216_v22 = vunpack.c.0.s8 %v2556_v51  ;;  %v4625_v43 = vpop.f32.mrf.mxu0 }
 0x2c1   :  { %v4147_v63 = vpack.c.bf16 %v3403_v44, %v3397_v18  ;;  %v3696_v49 = vcvt.s32.f32 %v2928_v58  ;;  %v3222_v60 = vunpack.c.1.s8 %v2556_v51  ;;  %4798 = vmatpush.bf16.msra.mxu2 %v4446_v15  ;;  %v2617_v2 = vunpack.c.0.s8 %v2407_v31  ;;  %v2515_v58 = vld [vmem:[#allocation14 + $0x3a8] sm:$0xff] }
 0x2c2   :  { %v4207_v56 = vpack.c.bf16 %v3523_v46, %v3517_v54  ;;  %v3702_v53 = vcvt.s32.f32 %v2934_v16  ;;  %v2623_v5 = vunpack.c.1.s8 %v2407_v31  ;;  %v3984_v55 = vcvt.s32.f32 %v3216_v22 }
 0x2c3   :  { %4826 = vmatpush.bf16.msrb.mxu0 %v4147_v63  ;;  %v3990_v26 = vcvt.s32.f32 %v3222_v60  ;;  %v2737_v59 = vunpack.c.0.s8 %v2437_v39  ;;  %v2743_v29 = vunpack.c.1.s8 %v2437_v39  ;;  %v3385_v13 = vcvt.s32.f32 %v2617_v2  ;;  %v8419_v63 = vpop.f32.mrf.mxu1 }
 0x2c4   :  { %4837 = vmatpush.bf16.msrb.mxu1 %v4207_v56  ;;  %v4296_v38 = vpack.c.bf16 %v3702_v53, %v3696_v49  ;;  %v3391_v1 = vcvt.s32.f32 %v2623_v5  ;;  %v2916_v33 = vunpack.c.2.s8 %v2478_v61  ;;  %v2922_v20 = vunpack.c.3.s8 %v2478_v61 }
 0x2c5   :  { %v4440_v52 = vpack.c.bf16 %v3990_v26, %v3984_v55  ;;  %v3505_v51 = vcvt.s32.f32 %v2737_v59  ;;  %v3511_v3 = vcvt.s32.f32 %v2743_v29  ;;  %v3204_v57 = vunpack.c.2.s8 %v2550_v23  ;;  %v2544_v26 = vld [vmem:[#allocation14 + $0x490] sm:$0xff] }
 0x2c6   :  { %4760 = vmatpush.bf16.msrb.mxu3 %v4296_v38  ;;  %v4141_v9 = vpack.c.bf16 %v3391_v1, %v3385_v13  ;;  %v3684_v42 = vcvt.s32.f32 %v2916_v33  ;;  %v3210_v62 = vunpack.c.3.s8 %v2550_v23  ;;  %v3690_v31 = vcvt.s32.f32 %v2922_v20  ;;  %v2425_v13 = vld [vmem:[#allocation14 + $0xd8] sm:$0xff] }
 0x2c7   :  { %4799 = vmatpush.bf16.msra.mxu2 %v4440_v52  ;;  %v4201_v50 = vpack.c.bf16 %v3511_v3, %v3505_v51  ;;  %v2605_v28 = vunpack.c.2.s8 %v2401_v47  ;;  %v2611_v4 = vunpack.c.3.s8 %v2401_v47  ;;  %v3972_v30 = vcvt.s32.f32 %v3204_v57 }
 0x2c8   :  { %4827 = vmatpush.bf16.msrb.mxu0 %v4141_v9  ;;  %v3978_v11 = vcvt.s32.f32 %v3210_v62  ;;  %v2725_v39 = vunpack.c.2.s8 %v2431_v6  ;;  %v2731_v7 = vunpack.c.3.s8 %v2431_v6  ;;  %v4290_v27 = vpack.c.bf16 %v3690_v31, %v3684_v42 }
 0x2c9   :  { %4838 = vmatpush.bf16.msrb.mxu1 %v4201_v50  ;;  %v3373_v32 = vcvt.s32.f32 %v2605_v28  ;;  %v3379_v8 = vcvt.s32.f32 %v2611_v4  ;;  %v2904_v12 = vunpack.c.0.s8 %v2478_v61  ;;  %v2910_v17 = vunpack.c.1.s8 %v2478_v61  ;;  %v2472_v61 = vld [vmem:[#allocation14 + $0x250] sm:$0xff] }
 0x2ca   :  { %v4434_v0 = vpack.c.bf16 %v3978_v11, %v3972_v30  ;;  %v3493_v37 = vcvt.s32.f32 %v2725_v39  ;;  %v3499_v24 = vcvt.s32.f32 %v2731_v7  ;;  %4761 = vmatpush.bf16.msrb.mxu3 %v4290_v27  ;;  %v3192_v18 = vunpack.c.0.s8 %v2550_v23 }
 0x2cb   :  { %v4135_v10 = vpack.c.bf16 %v3379_v8, %v3373_v32  ;;  %v3672_v40 = vcvt.s32.f32 %v2904_v12  ;;  %v3198_v44 = vunpack.c.1.s8 %v2550_v23  ;;  %v3678_v54 = vcvt.s32.f32 %v2910_v17  ;;  %v4586_v27 = vpop.f32.mrf.mxu1 }
 0x2cc   :  { %4800 = vmatpush.bf16.msra.mxu2 %v4434_v0  ;;  %v4195_v15 = vpack.c.bf16 %v3499_v24, %v3493_v37  ;;  %v2593_v46 = vunpack.c.0.s8 %v2401_v47  ;;  %v2599_v16 = vunpack.c.1.s8 %v2401_v47  ;;  %v3960_v49 = vcvt.s32.f32 %v3192_v18  ;;  %v2586_v37 = vld [vmem:[#allocation14 + $0x5e0] sm:$0xff] }
 0x2cd   :  { %4828 = vmatpush.bf16.msrb.mxu0 %v4135_v10  ;;  %v3966_v22 = vcvt.s32.f32 %v3198_v44  ;;  %v2713_v60 = vunpack.c.0.s8 %v2431_v6  ;;  %v2719_v56 = vunpack.c.1.s8 %v2431_v6  ;;  %v4284_v53 = vpack.c.bf16 %v3678_v54, %v3672_v40 }
 0x2ce   :  { %4839 = vmatpush.bf16.msrb.mxu1 %v4195_v15  ;;  %v3361_v2 = vcvt.s32.f32 %v2593_v46  ;;  %v3367_v5 = vcvt.s32.f32 %v2599_v16  ;;  %v3061_v55 = vunpack.c.2.s8 %v2515_v58  ;;  %v3067_v38 = vunpack.c.3.s8 %v2515_v58 }
 0x2cf   :  { %v4428_v59 = vpack.c.bf16 %v3966_v22, %v3960_v49  ;;  %v3481_v29 = vcvt.s32.f32 %v2713_v60  ;;  %v3487_v23 = vcvt.s32.f32 %v2719_v56  ;;  %4762 = vmatpush.bf16.msrb.mxu3 %v4284_v53  ;;  %v2892_v47 = vunpack.c.2.s8 %v2472_v61  ;;  %v2509_v22 = vld [vmem:[#allocation14 + $0x378] sm:$0xff] }
 0x2d0   :  { %v4129_v1 = vpack.c.bf16 %v3367_v5, %v3361_v2  ;;  %v3829_v33 = vcvt.s32.f32 %v3061_v55  ;;  %v2898_v52 = vunpack.c.3.s8 %v2472_v61  ;;  %v3835_v3 = vcvt.s32.f32 %v3067_v38  ;;  %v2539_v2 = vld [vmem:[#allocation14 + $0x468] sm:$0xff] }
 0x2d1   :  { %4801 = vmatpush.bf16.msra.mxu2 %v4428_v59  ;;  %v4189_v51 = vpack.c.bf16 %v3487_v23, %v3481_v29  ;;  %v3180_v20 = vunpack.c.2.s8 %v2544_v26  ;;  %v3186_v6 = vunpack.c.3.s8 %v2544_v26  ;;  %v3660_v9 = vcvt.s32.f32 %v2892_v47 }
 0x2d2   :  { %4829 = vmatpush.bf16.msrb.mxu0 %v4129_v1  ;;  %v3666_v42 = vcvt.s32.f32 %v2898_v52  ;;  %v2701_v57 = vunpack.c.2.s8 %v2425_v13  ;;  %v2707_v62 = vunpack.c.3.s8 %v2425_v13  ;;  %v4363_v50 = vpack.c.bf16 %v3835_v3, %v3829_v33 }
 0x2d3   :  { %4840 = vmatpush.bf16.msrb.mxu1 %v4189_v51  ;;  %v3948_v31 = vcvt.s32.f32 %v3180_v20  ;;  %v3954_v28 = vcvt.s32.f32 %v3186_v6  ;;  %v3049_v4 = vunpack.c.0.s8 %v2515_v58  ;;  %v3055_v7 = vunpack.c.1.s8 %v2515_v58  ;;  %v2467_v58 = vld [vmem:[#allocation14 + $0x228] sm:$0xff] }
 0x2d4   :  { %v4278_v30 = vpack.c.bf16 %v3666_v42, %v3660_v9  ;;  %v3469_v11 = vcvt.s32.f32 %v2701_v57  ;;  %v3475_v39 = vcvt.s32.f32 %v2707_v62  ;;  %v2880_v12 = vunpack.c.0.s8 %v2472_v61 }
 0x2d5   :  { %v4422_v32 = vpack.c.bf16 %v3954_v28, %v3948_v31  ;;  %v3817_v8 = vcvt.s32.f32 %v3049_v4  ;;  %v2886_v0 = vunpack.c.1.s8 %v2472_v61  ;;  %4830 = vmatmul.bf16.vlgmr.msrb.gmra.mxu0 %v8209_v45  ;;  %v3823_v17 = vcvt.s32.f32 %v3055_v7 }
 0x2d6   :  { %4874 = vmatpush.bf16.msra.mxu0 %v4363_v50  ;;  %4763 = vmatpush.bf16.msrb.mxu3 %v4278_v30  ;;  %v4183_v24 = vpack.c.bf16 %v3475_v39, %v3469_v11  ;;  %v3168_v43 = vunpack.c.0.s8 %v2544_v26  ;;  %v3174_v10 = vunpack.c.1.s8 %v2544_v26  ;;  %v3648_v40 = vcvt.s32.f32 %v2880_v12  ;;  %v2580_v30 = vld [vmem:[#allocation14 + $0x5b0] sm:$0xff] }
 0x2d7   :  { %4802 = vmatpush.bf16.msra.mxu2 %v4422_v32  ;;  %v3654_v18 = vcvt.s32.f32 %v2886_v0  ;;  %v2689_v44 = vunpack.c.0.s8 %v2425_v13  ;;  %v2695_v15 = vunpack.c.1.s8 %v2425_v13  ;;  %v4357_v54 = vpack.c.bf16 %v3823_v17, %v3817_v8 }
 0x2d8   :  { %4841 = vmatpush.bf16.msrb.mxu1 %v4183_v24  ;;  %v3936_v46 = vcvt.s32.f32 %v3168_v43  ;;  %v3942_v16 = vcvt.s32.f32 %v3174_v10  ;;  %v3348_v49 = vunpack.c.2.s8 %v2586_v37  ;;  %v3354_v53 = vunpack.c.3.s8 %v2586_v37  ;;  %v8425_v24 = vpop.f32.mrf.mxu1 }
 0x2d9   :  { %v4272_v60 = vpack.c.bf16 %v3654_v18, %v3648_v40  ;;  %v3457_v56 = vcvt.s32.f32 %v2689_v44  ;;  %v3463_v61 = vcvt.s32.f32 %v2695_v15  ;;  %v2869_v26 = vunpack.c.2.s8 %v2467_v58  ;;  %v2503_v18 = vld [vmem:[#allocation14 + $0x348] sm:$0xff] }
 0x2da   :  { %4875 = vmatpush.bf16.msra.mxu0 %v4357_v54  ;;  %v4416_v5 = vpack.c.bf16 %v3942_v16, %v3936_v46  ;;  %v4116_v55 = vcvt.s32.f32 %v3348_v49  ;;  %v2875_v59 = vunpack.c.3.s8 %v2467_v58  ;;  %v4122_v23 = vcvt.s32.f32 %v3354_v53  ;;  %v2533_v46 = vld [vmem:[#allocation14 + $0x438] sm:$0xff] }
 0x2db   :  { %4764 = vmatpush.bf16.msrb.mxu3 %v4272_v60  ;;  %v4177_v29 = vpack.c.bf16 %v3463_v61, %v3457_v56  ;;  %v3037_v38 = vunpack.c.2.s8 %v2509_v22  ;;  %v3043_v13 = vunpack.c.3.s8 %v2509_v22  ;;  %v3637_v1 = vcvt.s32.f32 %v2869_v26 }
 0x2dc   :  { %4803 = vmatpush.bf16.msra.mxu2 %v4416_v5  ;;  %v3643_v33 = vcvt.s32.f32 %v2875_v59  ;;  %v3157_v47 = vunpack.c.2.s8 %v2539_v2  ;;  %v3163_v52 = vunpack.c.3.s8 %v2539_v2  ;;  %v4506_v51 = vpack.c.bf16 %v4122_v23, %v4116_v55 }
 0x2dd   :  { %4842 = vmatpush.bf16.msrb.mxu1 %v4177_v29  ;;  %v3805_v3 = vcvt.s32.f32 %v3037_v38  ;;  %v3811_v20 = vcvt.s32.f32 %v3043_v13  ;;  %v3336_v6 = vunpack.c.0.s8 %v2586_v37  ;;  %v3342_v62 = vunpack.c.1.s8 %v2586_v37  ;;  %v2461_v37 = vld [vmem:[#allocation14 + $0x1f8] sm:$0xff] }
 0x2de   :  { %v4267_v9 = vpack.c.bf16 %v3643_v33, %v3637_v1  ;;  %v3925_v42 = vcvt.s32.f32 %v3157_v47  ;;  %v3931_v57 = vcvt.s32.f32 %v3163_v52  ;;  %4765 = vmatmul.bf16.vlgmr.msrb.gmra.mxu3 %v8294_v34  ;;  %v2857_v28 = vunpack.c.0.s8 %v2467_v58 }
 0x2df   :  { %4809 = vmatpush.bf16.msra.mxu3 %v4506_v51  ;;  %v4351_v50 = vpack.c.bf16 %v3811_v20, %v3805_v3  ;;  %4804 = vmatmul.bf16.vlgmr.msra.gmra.mxu2 %v8354_v35  ;;  %v4104_v31 = vcvt.s32.f32 %v3336_v6  ;;  %v2863_v4 = vunpack.c.1.s8 %v2467_v58  ;;  %v4110_v39 = vcvt.s32.f32 %v3342_v62 }
 0x2e0   :  { %4848 = vmatpush.bf16.msrb.mxu2 %v4267_v9  ;;  %v4411_v11 = vpack.c.bf16 %v3931_v57, %v3925_v42  ;;  %4843 = vmatmul.bf16.vlgmr.msrb.gmra.mxu1 %v8242_v21  ;;  %v3025_v7 = vunpack.c.0.s8 %v2509_v22  ;;  %v3031_v27 = vunpack.c.1.s8 %v2509_v22  ;;  %v3625_v32 = vcvt.s32.f32 %v2857_v28  ;;  %v2574_v9 = vld [vmem:[#allocation14 + $0x580] sm:$0xff]  ;;  %v4638_v42 = vpop.f32.mrf.mxu1 }
 0x2e1   :  { %4876 = vmatpush.bf16.msra.mxu0 %v4351_v50  ;;  %v3631_v8 = vcvt.s32.f32 %v2863_v4  ;;  %v3145_v12 = vunpack.c.0.s8 %v2539_v2  ;;  %v3151_v0 = vunpack.c.1.s8 %v2539_v2  ;;  %v4500_v17 = vpack.c.bf16 %v4110_v39, %v4104_v31  ;;  %v8431_v39 = vpop.f32.mrf.mxu0 }
 0x2e2   :  { %4887 = vmatpush.bf16.msra.mxu1 %v4411_v11  ;;  %v3793_v43 = vcvt.s32.f32 %v3025_v7  ;;  %v3799_v10 = vcvt.s32.f32 %v3031_v27  ;;  %v3324_v40 = vunpack.c.2.s8 %v2580_v30  ;;  %v3330_v54 = vunpack.c.3.s8 %v2580_v30  ;;  %v2455_v11 = vld [vmem:[#allocation14 + $0x1c8] sm:$0xff] }
 0x2e3   :  { %v4261_v44 = vpack.c.bf16 %v3631_v8, %v3625_v32  ;;  %v3913_v15 = vcvt.s32.f32 %v3145_v12  ;;  %v3919_v58 = vcvt.s32.f32 %v3151_v0  ;;  %4810 = vmatpush.bf16.msra.mxu3 %v4500_v17  ;;  %v2845_v22 = vunpack.c.2.s8 %v2461_v37  ;;  %v2497_v8 = vld [vmem:[#allocation14 + $0x318] sm:$0xff] }
 0x2e4   :  { %v4345_v16 = vpack.c.bf16 %v3799_v10, %v3793_v43  ;;  %v4092_v49 = vcvt.s32.f32 %v3324_v40  ;;  %v2851_v60 = vunpack.c.3.s8 %v2461_v37  ;;  %v4098_v61 = vcvt.s32.f32 %v3330_v54  ;;  %v2527_v43 = vld [vmem:[#allocation14 + $0x408] sm:$0xff] }
 0x2e5   :  { %4849 = vmatpush.bf16.msrb.mxu2 %v4261_v44  ;;  %v4405_v56 = vpack.c.bf16 %v3919_v58, %v3913_v15  ;;  %v3013_v53 = vunpack.c.2.s8 %v2503_v18  ;;  %v3019_v2 = vunpack.c.3.s8 %v2503_v18  ;;  %v3613_v5 = vcvt.s32.f32 %v2845_v22 }
 0x2e6   :  { %4877 = vmatpush.bf16.msra.mxu0 %v4345_v16  ;;  %v3619_v55 = vcvt.s32.f32 %v2851_v60  ;;  %v3133_v26 = vunpack.c.2.s8 %v2533_v46  ;;  %v3139_v59 = vunpack.c.3.s8 %v2533_v46  ;;  %v4494_v29 = vpack.c.bf16 %v4098_v61, %v4092_v49 }
 0x2e7   :  { %4888 = vmatpush.bf16.msra.mxu1 %v4405_v56  ;;  %v3781_v23 = vcvt.s32.f32 %v3013_v53  ;;  %v3787_v38 = vcvt.s32.f32 %v3019_v2  ;;  %v8429_v13 = vadd.f32 %v8419_v63, %v8415_v25  ;;  %v3312_v52 = vunpack.c.0.s8 %v2580_v30 }
 0x2e8   :  { %v4255_v1 = vpack.c.bf16 %v3619_v55, %v3613_v5  ;;  %v3901_v33 = vcvt.s32.f32 %v3133_v26  ;;  %v3907_v47 = vcvt.s32.f32 %v3139_v59  ;;  %4811 = vmatpush.bf16.msra.mxu3 %v4494_v29  ;;  %v3318_v3 = vunpack.c.1.s8 %v2580_v30 }
 0x2e9   :  { %v4339_v51 = vpack.c.bf16 %v3787_v38, %v3781_v23  ;;  %v2833_v20 = vunpack.c.0.s8 %v2461_v37  ;;  %v2839_v6 = vunpack.c.1.s8 %v2461_v37  ;;  %v4080_v62 = vcvt.s32.f32 %v3312_v52 }
 0x2ea   :  { %4850 = vmatpush.bf16.msrb.mxu2 %v4255_v1  ;;  %v4399_v57 = vpack.c.bf16 %v3907_v47, %v3901_v33  ;;  %v3001_v50 = vunpack.c.0.s8 %v2503_v18  ;;  %v3007_v31 = vunpack.c.1.s8 %v2503_v18  ;;  %v4086_v28 = vcvt.s32.f32 %v3318_v3  ;;  %v8433_v33 = vld [vmem:[#allocation14 + $0xb0] sm:$0xff]  ;;  %v4677_v47 = vpop.f32.mrf.mxu0 }
 0x2eb   :  { %4878 = vmatpush.bf16.msra.mxu0 %v4339_v51  ;;  %v3601_v25 = vcvt.s32.f32 %v2833_v20  ;;  %v3607_v63 = vcvt.s32.f32 %v2839_v6  ;;  %v3121_v4 = vunpack.c.0.s8 %v2533_v46  ;;  %v3127_v27 = vunpack.c.1.s8 %v2533_v46  ;;  %v2491_v47 = vld [vmem:[#allocation14 + $0x2e8] sm:$0xff] }
 0x2ec   :  { %4889 = vmatpush.bf16.msra.mxu1 %v4399_v57  ;;  %v3769_v7 = vcvt.s32.f32 %v3001_v50  ;;  %v3775_v30 = vcvt.s32.f32 %v3007_v31  ;;  %v3300_v32 = vunpack.c.2.s8 %v2574_v9  ;;  %v4488_v12 = vpack.c.bf16 %v4086_v28, %v4080_v62  ;;  %v2568_v50 = vld [vmem:[#allocation14 + $0x550] sm:$0xff] }
 0x2ed   :  { %v4249_v0 = vpack.c.bf16 %v3607_v63, %v3601_v25  ;;  %v3889_v37 = vcvt.s32.f32 %v3121_v4  ;;  %v3306_v17 = vunpack.c.3.s8 %v2574_v9  ;;  %v3895_v40 = vcvt.s32.f32 %v3127_v27  ;;  %v2449_v4 = vld [vmem:[#allocation14 + $0x198] sm:$0xff] }
 0x2ee   :  { %v4333_v10 = vpack.c.bf16 %v3775_v30, %v3769_v7  ;;  %v4068_v18 = vcvt.s32.f32 %v3300_v32  ;;  %v2821_v44 = vunpack.c.2.s8 %v2455_v11  ;;  %4812 = vmatpush.bf16.msra.mxu3 %v4488_v12  ;;  %v2827_v58 = vunpack.c.3.s8 %v2455_v11  ;;  %v2521_v32 = vld [vmem:[#allocation14 + $0x3d8] sm:$0xff] }
 0x2ef   :  { %4851 = vmatpush.bf16.msrb.mxu2 %v4249_v0  ;;  %v4074_v15 = vcvt.s32.f32 %v3306_v17  ;;  %v2989_v54 = vunpack.c.2.s8 %v2497_v8  ;;  %v2995_v16 = vunpack.c.3.s8 %v2497_v8  ;;  %v4393_v49 = vpack.c.bf16 %v3895_v40, %v3889_v37 }
 0x2f0   :  { %4879 = vmatpush.bf16.msra.mxu0 %v4333_v10  ;;  %v3589_v46 = vcvt.s32.f32 %v2821_v44  ;;  %v3109_v22 = vunpack.c.2.s8 %v2527_v43  ;;  %v3115_v60 = vunpack.c.3.s8 %v2527_v43  ;;  %v3595_v61 = vcvt.s32.f32 %v2827_v58 }
 0x2f1   :  { %v4482_v56 = vpack.c.bf16 %v4074_v15, %v4068_v18  ;;  %v3757_v53 = vcvt.s32.f32 %v2989_v54  ;;  %v3763_v2 = vcvt.s32.f32 %v2995_v16  ;;  %4890 = vmatpush.bf16.msra.mxu1 %v4393_v49  ;;  %v3288_v26 = vunpack.c.0.s8 %v2574_v9  ;;  %v8439_v54 = vpop.f32.mrf.mxu2 }
 0x2f2   :  { %v3877_v5 = vcvt.s32.f32 %v3109_v22  ;;  %v3883_v55 = vcvt.s32.f32 %v3115_v60  ;;  %v3294_v59 = vunpack.c.1.s8 %v2574_v9  ;;  %v4243_v29 = vpack.c.bf16 %v3595_v61, %v3589_v46  ;;  %v8435_v9 = vpop.f32.mrf.mxu1 }
 0x2f3   :  { %4813 = vmatpush.bf16.msra.mxu3 %v4482_v56  ;;  %v4327_v23 = vpack.c.bf16 %v3763_v2, %v3757_v53  ;;  %v2809_v38 = vunpack.c.0.s8 %v2455_v11  ;;  %v2815_v1 = vunpack.c.1.s8 %v2455_v11  ;;  %v4056_v51 = vcvt.s32.f32 %v3288_v26 }
 0x2f4   :  { %v4387_v52 = vpack.c.bf16 %v3883_v55, %v3877_v5  ;;  %v4062_v3 = vcvt.s32.f32 %v3294_v59  ;;  %v2977_v20 = vunpack.c.0.s8 %v2497_v8  ;;  %4852 = vmatpush.bf16.msrb.mxu2 %v4243_v29  ;;  %v2983_v57 = vunpack.c.1.s8 %v2497_v8 }
 0x2f5   :  { %4880 = vmatpush.bf16.msra.mxu0 %v4327_v23  ;;  %v3577_v6 = vcvt.s32.f32 %v2809_v38  ;;  %v3583_v42 = vcvt.s32.f32 %v2815_v1  ;;  %v3097_v62 = vunpack.c.0.s8 %v2527_v43  ;;  %v3103_v25 = vunpack.c.1.s8 %v2527_v43 }
 0x2f6   :  { %4891 = vmatpush.bf16.msra.mxu1 %v4387_v52  ;;  %v4476_v31 = vpack.c.bf16 %v4062_v3, %v4056_v51  ;;  %v3745_v28 = vcvt.s32.f32 %v2977_v20  ;;  %v2678_v63 = vunpack.c.2.s8 %v8433_v33  ;;  %v3751_v7 = vcvt.s32.f32 %v2983_v57  ;;  %v2563_v3 = vld [vmem:[#allocation14 + $0x528] sm:$0xff]  ;;  %v2414_v57 = vld [vmem:[#allocation14 + $0x80] sm:$0xff] }
 0x2f7   :  { %v4237_v11 = vpack.c.bf16 %v3583_v42, %v3577_v6  ;;  %v3865_v30 = vcvt.s32.f32 %v3097_v62  ;;  %v2684_v27 = vunpack.c.3.s8 %v8433_v33  ;;  %v3871_v12 = vcvt.s32.f32 %v3103_v25 }
 0x2f8   :  { %4814 = vmatpush.bf16.msra.mxu3 %v4476_v31  ;;  %v3446_v8 = vcvt.s32.f32 %v2678_v63  ;;  %v3276_v0 = vunpack.c.2.s8 %v2568_v50  ;;  %v3282_v37 = vunpack.c.3.s8 %v2568_v50  ;;  %v4321_v17 = vpack.c.bf16 %v3751_v7, %v3745_v28 }
 0x2f9   :  { %4853 = vmatpush.bf16.msrb.mxu2 %v4237_v11  ;;  %v3452_v10 = vcvt.s32.f32 %v2684_v27  ;;  %v2797_v40 = vunpack.c.2.s8 %v2449_v4  ;;  %v2803_v18 = vunpack.c.3.s8 %v2449_v4  ;;  %v4381_v43 = vpack.c.bf16 %v3871_v12, %v3865_v30  ;;  %v4599_v30 = vpop.f32.mrf.mxu2 }
 0x2fa   :  { %v4044_v44 = vcvt.s32.f32 %v3276_v0  ;;  %v4050_v15 = vcvt.s32.f32 %v3282_v37  ;;  %v3085_v58 = vunpack.c.2.s8 %v2521_v32  ;;  %4881 = vmatpush.bf16.msra.mxu0 %v4321_v17  ;;  %v3091_v22 = vunpack.c.3.s8 %v2521_v32  ;;  %v4690_v59 = vpop.f32.mrf.mxu1 }
 0x2fb   :  { %v4172_v16 = vpack.c.bf16 %v3452_v10, %v3446_v8  ;;  %v3565_v49 = vcvt.s32.f32 %v2797_v40  ;;  %v3571_v46 = vcvt.s32.f32 %v2803_v18  ;;  %4892 = vmatpush.bf16.msra.mxu1 %v4381_v43  ;;  %v8443_v61 = vadd.f32 %v8425_v24, %v8417_v36 }
 0x2fc   :  { %v4470_v60 = vpack.c.bf16 %v4050_v15, %v4044_v44  ;;  %v3853_v56 = vcvt.s32.f32 %v3085_v58  ;;  %v2666_v53 = vunpack.c.0.s8 %v8433_v33  ;;  %v3859_v5 = vcvt.s32.f32 %v3091_v22 }
 0x2fd   :  { %v4231_v2 = vpack.c.bf16 %v3571_v46, %v3565_v49  ;;  %v2672_v55 = vunpack.c.1.s8 %v8433_v33  ;;  %v3264_v26 = vunpack.c.0.s8 %v2568_v50  ;;  %4882 = vmatmul.bf16.vlgmr.msra.gmra.mxu0 %v8316_v48  ;;  %v3270_v23 = vunpack.c.1.s8 %v2568_v50  ;;  %v2444_v50 = vld [vmem:[#allocation14 + $0x170] sm:$0xff] }
 0x2fe   :  { %4926 = vmatpush.bf16.msrb.mxu0 %v4172_v16  ;;  %4815 = vmatpush.bf16.msra.mxu3 %v4470_v60  ;;  %v3434_v29 = vcvt.s32.f32 %v2666_v53  ;;  %v2785_v38 = vunpack.c.0.s8 %v2449_v4  ;;  %v2791_v1 = vunpack.c.1.s8 %v2449_v4  ;;  %v4375_v36 = vpack.c.bf16 %v3859_v5, %v3853_v56 }
 0x2ff   :  { %4854 = vmatpush.bf16.msrb.mxu2 %v4231_v2  ;;  %v3440_v24 = vcvt.s32.f32 %v2672_v55  ;;  %v4032_v52 = vcvt.s32.f32 %v3264_v26  ;;  %v3073_v51 = vunpack.c.0.s8 %v2521_v32  ;;  %v4038_v20 = vcvt.s32.f32 %v3270_v23  ;;  %v2485_v26 = vld [vmem:[#allocation14 + $0x2b8] sm:$0xff] }
 0x300   :  { %v3553_v6 = vcvt.s32.f32 %v2785_v38  ;;  %v3559_v42 = vcvt.s32.f32 %v2791_v1  ;;  %v3079_v33 = vunpack.c.1.s8 %v2521_v32  ;;  %4893 = vmatpush.bf16.msra.mxu1 %v4375_v36  ;;  %v2965_v28 = vunpack.c.2.s8 %v2491_v47  ;;  %v2557_v1 = vld [vmem:[#allocation14 + $0x4f8] sm:$0xff] }
 0x301   :  { %v4166_v62 = vpack.c.bf16 %v3440_v24, %v3434_v29  ;;  %v3841_v31 = vcvt.s32.f32 %v3073_v51  ;;  %v2971_v25 = vunpack.c.3.s8 %v2491_v47  ;;  %v4464_v63 = vpack.c.bf16 %v4038_v20, %v4032_v52  ;;  %v2408_v51 = vld [vmem:[#allocation14 + $0x50] sm:$0xff] }
 0x302   :  { %v4225_v4 = vpack.c.bf16 %v3559_v42, %v3553_v6  ;;  %v3847_v11 = vcvt.s32.f32 %v3079_v33  ;;  %v3253_v7 = vunpack.c.2.s8 %v2563_v3  ;;  %v3733_v27 = vcvt.s32.f32 %v2965_v28 }
 0x303   :  { %4927 = vmatpush.bf16.msrb.mxu0 %v4166_v62  ;;  %v3739_v12 = vcvt.s32.f32 %v2971_v25  ;;  %v3259_v8 = vunpack.c.3.s8 %v2563_v3  ;;  %v2654_v0 = vunpack.c.2.s8 %v2414_v57  ;;  %4816 = vmatpush.bf16.msra.mxu3 %v4464_v63  ;;  %v2660_v17 = vunpack.c.3.s8 %v2414_v57  ;;  %v2438_v25 = vld [vmem:[#allocation14 + $0x140] sm:$0xff] }
 0x304   :  { %4855 = vmatpush.bf16.msrb.mxu2 %v4225_v4  ;;  %v4369_v32 = vpack.c.bf16 %v3847_v11, %v3841_v31  ;;  %v4021_v37 = vcvt.s32.f32 %v3253_v7  ;;  %v2774_v10 = vunpack.c.2.s8 %v2444_v50  ;;  %v2780_v44 = vunpack.c.3.s8 %v2444_v50 }
 0x305   :  { %v4315_v40 = vpack.c.bf16 %v3739_v12, %v3733_v27  ;;  %v4027_v18 = vcvt.s32.f32 %v3259_v8  ;;  %v3422_v43 = vcvt.s32.f32 %v2654_v0  ;;  %v3428_v15 = vcvt.s32.f32 %v2660_v17 }
 0x306   :  { %4894 = vmatpush.bf16.msra.mxu1 %v4369_v32  ;;  %v3542_v58 = vcvt.s32.f32 %v2774_v10  ;;  %v2953_v16 = vunpack.c.0.s8 %v2491_v47  ;;  %v2959_v49 = vunpack.c.1.s8 %v2491_v47  ;;  %v3548_v22 = vcvt.s32.f32 %v2780_v44  ;;  %4817 = vmatmul.bf16.vlgmr.msra.gmra.mxu3 %v8381_v14 }
 0x307   :  { %4861 = vmatpush.bf16.msrb.mxu3 %v4315_v40  ;;  %v4459_v46 = vpack.c.bf16 %v4027_v18, %v4021_v37  ;;  %4856 = vmatmul.bf16.vlgmr.msrb.gmra.mxu2 %v8253_v19  ;;  %v3241_v60 = vunpack.c.0.s8 %v2563_v3  ;;  %v3247_v56 = vunpack.c.1.s8 %v2563_v3  ;;  %v4160_v53 = vpack.c.bf16 %v3428_v15, %v3422_v43 }
 0x308   :  { %v3721_v2 = vcvt.s32.f32 %v2953_v16  ;;  %v3727_v5 = vcvt.s32.f32 %v2959_v49  ;;  %v2642_v55 = vunpack.c.0.s8 %v2414_v57  ;;  %v4220_v59 = vpack.c.bf16 %v3548_v22, %v3542_v58  ;;  %v2479_v22 = vld [vmem:[#allocation14 + $0x288] sm:$0xff] }
 0x309   :  { %4900 = vmatpush.bf16.msra.mxu2 %v4459_v46  ;;  %4895 = vmatmul.bf16.vlgmr.msra.gmra.mxu1 %v8332_v41  ;;  %v4009_v29 = vcvt.s32.f32 %v3241_v60  ;;  %v4015_v23 = vcvt.s32.f32 %v3247_v56  ;;  %v2648_v38 = vunpack.c.1.s8 %v2414_v57  ;;  %v2762_v24 = vunpack.c.0.s8 %v2444_v50 }
 0x30a   :  { %4928 = vmatpush.bf16.msrb.mxu0 %v4160_v53  ;;  %v4309_v47 = vpack.c.bf16 %v3727_v5, %v3721_v2  ;;  %v3410_v36 = vcvt.s32.f32 %v2642_v55  ;;  %v2768_v52 = vunpack.c.1.s8 %v2444_v50  ;;  %4939 = vmatpush.bf16.msrb.mxu1 %v4220_v59  ;;  %v2941_v6 = vunpack.c.2.s8 %v2485_v26  ;;  %v2551_v5 = vld [vmem:[#allocation14 + $0x4c8] sm:$0xff]  ;;  %v8451_v55 = vpop.f32.mrf.mxu2  ;;  %v8453_v59 = vpop.f32.mrf.mxu0 }
 0x30b   :  { %v4453_v3 = vpack.c.bf16 %v4015_v23, %v4009_v29  ;;  %v3416_v20 = vcvt.s32.f32 %v2648_v38  ;;  %v2947_v42 = vunpack.c.3.s8 %v2485_v26  ;;  %v3530_v33 = vcvt.s32.f32 %v2762_v24 }
 0x30c   :  { %4862 = vmatpush.bf16.msrb.mxu3 %v4309_v47  ;;  %v3536_v62 = vcvt.s32.f32 %v2768_v52  ;;  %v3229_v31 = vunpack.c.2.s8 %v2557_v1  ;;  %v3235_v28 = vunpack.c.3.s8 %v2557_v1  ;;  %v3709_v63 = vcvt.s32.f32 %v2941_v6 }
 0x30d   :  { %4901 = vmatpush.bf16.msra.mxu2 %v4453_v3  ;;  %v4154_v57 = vpack.c.bf16 %v3416_v20, %v3410_v36  ;;  %v3715_v4 = vcvt.s32.f32 %v2947_v42  ;;  %v2630_v11 = vunpack.c.2.s8 %v2408_v51  ;;  %v2636_v27 = vunpack.c.3.s8 %v2408_v51  ;;  %v2432_v42 = vld [vmem:[#allocation14 + $0x110] sm:$0xff] }
 0x30e   :  { %v4214_v7 = vpack.c.bf16 %v3536_v62, %v3530_v33  ;;  %v3997_v30 = vcvt.s32.f32 %v3229_v31  ;;  %v4003_v50 = vcvt.s32.f32 %v3235_v28  ;;  %v2750_v0 = vunpack.c.2.s8 %v2438_v25 }
 0x30f   :  { %4929 = vmatpush.bf16.msrb.mxu0 %v4154_v57  ;;  %v4303_v12 = vpack.c.bf16 %v3715_v4, %v3709_v63  ;;  %v3398_v8 = vcvt.s32.f32 %v2630_v11  ;;  %v2756_v32 = vunpack.c.3.s8 %v2438_v25  ;;  %v3404_v17 = vcvt.s32.f32 %v2636_v27 }
 0x310   :  { %4940 = vmatpush.bf16.msrb.mxu1 %v4214_v7  ;;  %v4447_v37 = vpack.c.bf16 %v4003_v50, %v3997_v30  ;;  %v2929_v10 = vunpack.c.0.s8 %v2485_v26  ;;  %v2935_v40 = vunpack.c.1.s8 %v2485_v26  ;;  %v3518_v18 = vcvt.s32.f32 %v2750_v0 }
 0x311   :  { %4863 = vmatpush.bf16.msrb.mxu3 %v4303_v12  ;;  %v3524_v43 = vcvt.s32.f32 %v2756_v32  ;;  %v3217_v44 = vunpack.c.0.s8 %v2557_v1  ;;  %v3223_v15 = vunpack.c.1.s8 %v2557_v1  ;;  %v4148_v58 = vpack.c.bf16 %v3404_v17, %v3398_v8  ;;  %v2402_v1 = vld [vmem:[#allocation14 + $0x20] sm:$0xff] }
 0x312   :  { %4902 = vmatpush.bf16.msra.mxu2 %v4447_v37  ;;  %v3697_v16 = vcvt.s32.f32 %v2929_v10  ;;  %v3703_v49 = vcvt.s32.f32 %v2935_v40  ;;  %v2618_v46 = vunpack.c.0.s8 %v2408_v51  ;;  %v2624_v2 = vunpack.c.1.s8 %v2408_v51  ;;  %v4651_v17 = vpop.f32.mrf.mxu2  ;;  %v4729_v10 = vpop.f32.mrf.mxu0 }
 0x313   :  { %v4208_v60 = vpack.c.bf16 %v3524_v43, %v3518_v18  ;;  %v3985_v56 = vcvt.s32.f32 %v3217_v44  ;;  %v3991_v53 = vcvt.s32.f32 %v3223_v15  ;;  %4930 = vmatpush.bf16.msrb.mxu0 %v4148_v58  ;;  %v2738_v23 = vunpack.c.0.s8 %v2438_v25  ;;  %v2516_v15 = vld [vmem:[#allocation14 + $0x3b0] sm:$0xff] }
 0x314   :  { %v4297_v26 = vpack.c.bf16 %v3703_v49, %v3697_v16  ;;  %v3386_v29 = vcvt.s32.f32 %v2618_v46  ;;  %v2744_v38 = vunpack.c.1.s8 %v2438_v25  ;;  %v3392_v36 = vcvt.s32.f32 %v2624_v2 }
 0x315   :  { %4941 = vmatpush.bf16.msrb.mxu1 %v4208_v60  ;;  %v4441_v47 = vpack.c.bf16 %v3991_v53, %v3985_v56  ;;  %v8457_v24 = vadd.f32 %v8439_v54, %v8429_v13  ;;  %v2917_v52 = vunpack.c.2.s8 %v2479_v22  ;;  %v3506_v51 = vcvt.s32.f32 %v2738_v23  ;;  %v2473_v60 = vld [vmem:[#allocation14 + $0x258] sm:$0xff]  ;;  %v8459_v56 = vpop.f32.mrf.mxu1 }
 0x316   :  { %4864 = vmatpush.bf16.msrb.mxu3 %v4297_v26  ;;  %v3512_v3 = vcvt.s32.f32 %v2744_v38  ;;  %v2923_v20 = vunpack.c.3.s8 %v2479_v22  ;;  %v3205_v6 = vunpack.c.2.s8 %v2551_v5  ;;  %v4142_v33 = vpack.c.bf16 %v3392_v36, %v3386_v29 }
 0x317   :  { %4903 = vmatpush.bf16.msra.mxu2 %v4441_v47  ;;  %v3685_v62 = vcvt.s32.f32 %v2917_v52  ;;  %v3211_v31 = vunpack.c.3.s8 %v2551_v5  ;;  %v2606_v28 = vunpack.c.2.s8 %v2402_v1  ;;  %v2612_v4 = vunpack.c.3.s8 %v2402_v1 }
 0x318   :  { %v4202_v25 = vpack.c.bf16 %v3512_v3, %v3506_v51  ;;  %v3691_v57 = vcvt.s32.f32 %v2923_v20  ;;  %v3973_v63 = vcvt.s32.f32 %v3205_v6  ;;  %4931 = vmatpush.bf16.msrb.mxu0 %v4142_v33  ;;  %v2726_v54 = vunpack.c.2.s8 %v2432_v42 }
 0x319   :  { %v3979_v11 = vcvt.s32.f32 %v3211_v31  ;;  %v3374_v13 = vcvt.s32.f32 %v2606_v28  ;;  %v2732_v7 = vunpack.c.3.s8 %v2432_v42  ;;  %v3380_v50 = vcvt.s32.f32 %v2612_v4 }
 0x31a   :  { %4942 = vmatpush.bf16.msrb.mxu1 %v4202_v25  ;;  %v4291_v30 = vpack.c.bf16 %v3691_v57, %v3685_v62  ;;  %v2905_v27 = vunpack.c.0.s8 %v2479_v22  ;;  %v2911_v12 = vunpack.c.1.s8 %v2479_v22  ;;  %v3494_v0 = vcvt.s32.f32 %v2726_v54 }
 0x31b   :  { %v4435_v8 = vpack.c.bf16 %v3979_v11, %v3973_v63  ;;  %v3500_v32 = vcvt.s32.f32 %v2732_v7  ;;  %v3193_v37 = vunpack.c.0.s8 %v2551_v5  ;;  %v4136_v40 = vpack.c.bf16 %v3380_v50, %v3374_v13  ;;  %v8461_v13 = vpop.f32.mrf.mxu3 }
 0x31c   :  { %4865 = vmatpush.bf16.msrb.mxu3 %v4291_v30  ;;  %v3673_v18 = vcvt.s32.f32 %v2905_v27  ;;  %v3679_v43 = vcvt.s32.f32 %v2911_v12  ;;  %v3199_v44 = vunpack.c.1.s8 %v2551_v5  ;;  %v2594_v49 = vunpack.c.0.s8 %v2402_v1  ;;  %v2545_v5 = vld [vmem:[#allocation14 + $0x498] sm:$0xff] }
 0x31d   :  { %4904 = vmatpush.bf16.msra.mxu2 %v4435_v8  ;;  %v4196_v58 = vpack.c.bf16 %v3500_v32, %v3494_v0  ;;  %v3961_v16 = vcvt.s32.f32 %v3193_v37  ;;  %v2600_v46 = vunpack.c.1.s8 %v2402_v1  ;;  %4932 = vmatpush.bf16.msrb.mxu0 %v4136_v40  ;;  %v2714_v2 = vunpack.c.0.s8 %v2432_v42  ;;  %v2426_v1 = vld [vmem:[#allocation14 + $0xe0] sm:$0xff]  ;;  %v4742_v32 = vpop.f32.mrf.mxu1 }
 0x31e   :  { %v4285_v22 = vpack.c.bf16 %v3679_v43, %v3673_v18  ;;  %v3967_v53 = vcvt.s32.f32 %v3199_v44  ;;  %v2720_v26 = vunpack.c.1.s8 %v2432_v42  ;;  %v3362_v29 = vcvt.s32.f32 %v2594_v49  ;;  %v2587_v18 = vld [vmem:[#allocation14 + $0x5e8] sm:$0xff]  ;;  %v2468_v49 = vld [vmem:[#allocation14 + $0x230] sm:$0xff] }
 0x31f   :  { %4943 = vmatpush.bf16.msrb.mxu1 %v4196_v58  ;;  %v3368_v23 = vcvt.s32.f32 %v2600_v46  ;;  %v3062_v38 = vunpack.c.2.s8 %v2516_v15  ;;  %v3068_v47 = vunpack.c.3.s8 %v2516_v15  ;;  %v3482_v52 = vcvt.s32.f32 %v2714_v2 }
 0x320   :  { %4866 = vmatpush.bf16.msrb.mxu3 %v4285_v22  ;;  %v4429_v36 = vpack.c.bf16 %v3967_v53, %v3961_v16  ;;  %v3488_v51 = vcvt.s32.f32 %v2720_v26  ;;  %v2893_v3 = vunpack.c.2.s8 %v2473_v60  ;;  %v2899_v62 = vunpack.c.3.s8 %v2473_v60 }
 0x321   :  { %v4130_v20 = vpack.c.bf16 %v3368_v23, %v3362_v29  ;;  %v3830_v6 = vcvt.s32.f32 %v3062_v38  ;;  %v3836_v33 = vcvt.s32.f32 %v3068_v47  ;;  %v3181_v42 = vunpack.c.2.s8 %v2545_v5  ;;  %v2510_v38 = vld [vmem:[#allocation14 + $0x380] sm:$0xff]  ;;  %v8464_v47 = vpop.f32.mrf.mxu2 }
 0x322   :  { %4905 = vmatpush.bf16.msra.mxu2 %v4429_v36  ;;  %v4190_v31 = vpack.c.bf16 %v3488_v51, %v3482_v52  ;;  %v3661_v28 = vcvt.s32.f32 %v2893_v3  ;;  %v3187_v25 = vunpack.c.3.s8 %v2545_v5  ;;  %v3667_v63 = vcvt.s32.f32 %v2899_v62 }
 0x323   :  { %4933 = vmatpush.bf16.msrb.mxu0 %v4130_v20  ;;  %v4364_v57 = vpack.c.bf16 %v3836_v33, %v3830_v6  ;;  %v2702_v4 = vunpack.c.2.s8 %v2426_v1  ;;  %v2708_v11 = vunpack.c.3.s8 %v2426_v1  ;;  %v3949_v54 = vcvt.s32.f32 %v3181_v42  ;;  %v4612_v62 = vpop.f32.mrf.mxu3 }
 0x324   :  { %4944 = vmatpush.bf16.msrb.mxu1 %v4190_v31  ;;  %v3955_v7 = vcvt.s32.f32 %v3187_v25  ;;  %v3050_v30 = vunpack.c.0.s8 %v2516_v15  ;;  %v3056_v50 = vunpack.c.1.s8 %v2516_v15  ;;  %v4279_v27 = vpack.c.bf16 %v3667_v63, %v3661_v28 }
 0x325   :  { %v3470_v12 = vcvt.s32.f32 %v2702_v4  ;;  %v3476_v8 = vcvt.s32.f32 %v2708_v11  ;;  %v2881_v0 = vunpack.c.0.s8 %v2473_v60  ;;  %v2887_v40 = vunpack.c.1.s8 %v2473_v60 }
 0x326   :  { %4934 = vmatmul.bf16.vlgmr.msrb.gmra.mxu0 %v8209_v45  ;;  %v4423_v37 = vpack.c.bf16 %v3955_v7, %v3949_v54  ;;  %v3818_v17 = vcvt.s32.f32 %v3050_v30  ;;  %v3824_v10 = vcvt.s32.f32 %v3056_v50  ;;  %4867 = vmatpush.bf16.msrb.mxu3 %v4279_v27  ;;  %v3169_v58 = vunpack.c.0.s8 %v2545_v5 }
 0x327   :  { %4978 = vmatpush.bf16.msra.mxu0 %v4364_v57  ;;  %v4184_v43 = vpack.c.bf16 %v3476_v8, %v3470_v12  ;;  %v3649_v44 = vcvt.s32.f32 %v2881_v0  ;;  %v3175_v16 = vunpack.c.1.s8 %v2545_v5  ;;  %v3655_v46 = vcvt.s32.f32 %v2887_v40  ;;  %v2540_v5 = vld [vmem:[#allocation14 + $0x470] sm:$0xff] }
 0x328   :  { %4906 = vmatpush.bf16.msra.mxu2 %v4423_v37  ;;  %v4358_v15 = vpack.c.bf16 %v3824_v10, %v3818_v17  ;;  %v2690_v22 = vunpack.c.0.s8 %v2426_v1  ;;  %v2696_v53 = vunpack.c.1.s8 %v2426_v1  ;;  %v3937_v2 = vcvt.s32.f32 %v3169_v58  ;;  %v2581_v10 = vld [vmem:[#allocation14 + $0x5b8] sm:$0xff] }
 0x329   :  { %4945 = vmatpush.bf16.msrb.mxu1 %v4184_v43  ;;  %v3943_v26 = vcvt.s32.f32 %v3175_v16  ;;  %v3349_v29 = vunpack.c.2.s8 %v2587_v18  ;;  %v3355_v23 = vunpack.c.3.s8 %v2587_v18  ;;  %v4273_v60 = vpack.c.bf16 %v3655_v46, %v3649_v44  ;;  %v4703_v44 = vpop.f32.mrf.mxu2  ;;  %v2462_v46 = vld [vmem:[#allocation14 + $0x200] sm:$0xff] }
 0x32a   :  { %v3458_v36 = vcvt.s32.f32 %v2690_v22  ;;  %v3464_v52 = vcvt.s32.f32 %v2696_v53  ;;  %v2870_v51 = vunpack.c.2.s8 %v2468_v49  ;;  %v2876_v33 = vunpack.c.3.s8 %v2468_v49  ;;  %v8482_v44 = vld [vmem:[#allocation16] sm:$0x3f] }
 0x32b   :  { %4979 = vmatpush.bf16.msra.mxu0 %v4358_v15  ;;  %v4417_v3 = vpack.c.bf16 %v3943_v26, %v3937_v2  ;;  %v4117_v20 = vcvt.s32.f32 %v3349_v29  ;;  %v4123_v6 = vcvt.s32.f32 %v3355_v23  ;;  %4868 = vmatpush.bf16.msrb.mxu3 %v4273_v60  ;;  %v3038_v28 = vunpack.c.2.s8 %v2510_v38  ;;  %v2504_v26 = vld [vmem:[#allocation14 + $0x350] sm:$0xff] }
 0x32c   :  { %v4178_v1 = vpack.c.bf16 %v3464_v52, %v3458_v36  ;;  %v3638_v31 = vcvt.s32.f32 %v2870_v51  ;;  %v3044_v42 = vunpack.c.3.s8 %v2510_v38  ;;  %v3644_v57 = vcvt.s32.f32 %v2876_v33  ;;  %v2534_v52 = vld [vmem:[#allocation14 + $0x440] sm:$0xff] }
 0x32d   :  { %4907 = vmatpush.bf16.msra.mxu2 %v4417_v3  ;;  %v4507_v25 = vpack.c.bf16 %v4123_v6, %v4117_v20  ;;  %v3158_v63 = vunpack.c.2.s8 %v2540_v5  ;;  %v3164_v4 = vunpack.c.3.s8 %v2540_v5  ;;  %v3806_v11 = vcvt.s32.f32 %v3038_v28 }
 0x32e   :  { %4946 = vmatpush.bf16.msrb.mxu1 %v4178_v1  ;;  %v3812_v54 = vcvt.s32.f32 %v3044_v42  ;;  %v8468_v7 = vadd.f32 %v8451_v55, %v8443_v61  ;;  %v3337_v30 = vunpack.c.0.s8 %v2587_v18  ;;  %v4268_v50 = vpack.c.bf16 %v3644_v57, %v3638_v31  ;;  %4869 = vmatmul.bf16.vlgmr.msrb.gmra.mxu3 %v8294_v34 }
 0x32f   :  { %4913 = vmatpush.bf16.msra.mxu3 %v4507_v25  ;;  %v3926_v27 = vcvt.s32.f32 %v3158_v63  ;;  %v3932_v12 = vcvt.s32.f32 %v3164_v4  ;;  %v3343_v8 = vunpack.c.1.s8 %v2587_v18  ;;  %v2858_v37 = vunpack.c.0.s8 %v2468_v49 }
 0x330   :  { %v4352_v0 = vpack.c.bf16 %v3812_v54, %v3806_v11  ;;  %4908 = vmatmul.bf16.vlgmr.msra.gmra.mxu2 %v8354_v35  ;;  %v4105_v32 = vcvt.s32.f32 %v3337_v30  ;;  %v2864_v17 = vunpack.c.1.s8 %v2468_v49  ;;  %v3026_v55 = vunpack.c.0.s8 %v2510_v38 }
 0x331   :  { %4952 = vmatpush.bf16.msrb.mxu2 %v4268_v50  ;;  %v4412_v40 = vpack.c.bf16 %v3932_v12, %v3926_v27  ;;  %4947 = vmatmul.bf16.vlgmr.msrb.gmra.mxu1 %v8242_v21  ;;  %v4111_v61 = vcvt.s32.f32 %v3343_v8  ;;  %v3032_v43 = vunpack.c.1.s8 %v2510_v38  ;;  %v3626_v58 = vcvt.s32.f32 %v2858_v37 }
 0x332   :  { %4980 = vmatpush.bf16.msra.mxu0 %v4352_v0  ;;  %v3632_v18 = vcvt.s32.f32 %v2864_v17  ;;  %v3146_v16 = vunpack.c.0.s8 %v2540_v5  ;;  %v3152_v15 = vunpack.c.1.s8 %v2540_v5  ;;  %v3794_v53 = vcvt.s32.f32 %v3026_v55 }
 0x333   :  { %4991 = vmatpush.bf16.msra.mxu1 %v4412_v40  ;;  %v4501_v22 = vpack.c.bf16 %v4111_v61, %v4105_v32  ;;  %v3800_v2 = vcvt.s32.f32 %v3032_v43  ;;  %v3325_v49 = vunpack.c.2.s8 %v2581_v10  ;;  %v3331_v36 = vunpack.c.3.s8 %v2581_v10  ;;  %v8480_v61 = vld [vmem:[%s9289_s8] sm:$0x3f] }
 0x334   :  { %v4262_v29 = vpack.c.bf16 %v3632_v18, %v3626_v58  ;;  %v3914_v23 = vcvt.s32.f32 %v3146_v16  ;;  %v3920_v60 = vcvt.s32.f32 %v3152_v15  ;;  %v2846_v3 = vunpack.c.2.s8 %v2462_v46 }
 0x335   :  { %4914 = vmatpush.bf16.msra.mxu3 %v4501_v22  ;;  %v4346_v38 = vpack.c.bf16 %v3800_v2, %v3794_v53  ;;  %v4093_v51 = vcvt.s32.f32 %v3325_v49  ;;  %v2852_v20 = vunpack.c.3.s8 %v2462_v46  ;;  %v4099_v5 = vcvt.s32.f32 %v3331_v36 }
 0x336   :  { %4953 = vmatpush.bf16.msrb.mxu2 %v4262_v29  ;;  %v4406_v6 = vpack.c.bf16 %v3920_v60, %v3914_v23  ;;  %v3014_v33 = vunpack.c.2.s8 %v2504_v26  ;;  %v3020_v62 = vunpack.c.3.s8 %v2504_v26  ;;  %v3614_v1 = vcvt.s32.f32 %v2846_v3  ;;  %v8489_v29 = vpop.f32.mrf.mxu3  ;;  %v8491_v23 = vpop.f32.mrf.mxu0 }
 0x337   :  { %4981 = vmatpush.bf16.msra.mxu0 %v4346_v38  ;;  %v3620_v31 = vcvt.s32.f32 %v2852_v20  ;;  %v3134_v28 = vunpack.c.2.s8 %v2534_v52  ;;  %v3140_v42 = vunpack.c.3.s8 %v2534_v52  ;;  %v4495_v25 = vpack.c.bf16 %v4099_v5, %v4093_v51  ;;  %v2528_v20 = vld [vmem:[#allocation14 + $0x410] sm:$0xff] }
 0x338   :  { %4992 = vmatpush.bf16.msra.mxu1 %v4406_v6  ;;  %v3782_v57 = vcvt.s32.f32 %v3014_v33  ;;  %v3788_v63 = vcvt.s32.f32 %v3020_v62  ;;  %v8475_v4 = vadd.f32 %v8459_v56, %v8453_v59  ;;  %v3313_v50 = vunpack.c.0.s8 %v2581_v10 }
 0x339   :  { %v4256_v11 = vpack.c.bf16 %v3620_v31, %v3614_v1  ;;  %v3902_v54 = vcvt.s32.f32 %v3134_v28  ;;  %v3908_v30 = vcvt.s32.f32 %v3140_v42  ;;  %4915 = vmatpush.bf16.msra.mxu3 %v4495_v25  ;;  %v3319_v12 = vunpack.c.1.s8 %v2581_v10  ;;  %v2575_v10 = vld [vmem:[#allocation14 + $0x588] sm:$0xff] }
 0x33a   :  { %v4340_v27 = vpack.c.bf16 %v3788_v63, %v3782_v57  ;;  %v2834_v8 = vunpack.c.0.s8 %v2462_v46  ;;  %v2840_v0 = vunpack.c.1.s8 %v2462_v46  ;;  %v4081_v37 = vcvt.s32.f32 %v3313_v50  ;;  %v2456_v46 = vld [vmem:[#allocation14 + $0x1d0] sm:$0xff] }
 0x33b   :  { %4954 = vmatpush.bf16.msrb.mxu2 %v4256_v11  ;;  %v4400_v32 = vpack.c.bf16 %v3908_v30, %v3902_v54  ;;  %v3002_v17 = vunpack.c.0.s8 %v2504_v26  ;;  %v3008_v40 = vunpack.c.1.s8 %v2504_v26  ;;  %v4087_v59 = vcvt.s32.f32 %v3319_v12  ;;  %v8487_v26 = vld [vmem:[#allocation14 + $0x320] sm:$0xff] }
 0x33c   :  { %4982 = vmatpush.bf16.msra.mxu0 %v4340_v27  ;;  %v3602_v56 = vcvt.s32.f32 %v2834_v8  ;;  %v3608_v55 = vcvt.s32.f32 %v2840_v0  ;;  %v3122_v43 = vunpack.c.0.s8 %v2534_v52  ;;  %v3128_v16 = vunpack.c.1.s8 %v2534_v52 }
 0x33d   :  { %4993 = vmatpush.bf16.msra.mxu1 %v4400_v32  ;;  %v3770_v58 = vcvt.s32.f32 %v3002_v17  ;;  %v3776_v18 = vcvt.s32.f32 %v3008_v40  ;;  %v4611_v15 = vadd.f32 %v8461_v13, %v8457_v24  ;;  %v4489_v22 = vpack.c.bf16 %v4087_v59, %v4081_v37  ;;  %v2421_v59 = vld [vmem:[#allocation14 + $0xb8] sm:$0xff] }
 0x33e   :  { %v4250_v53 = vpack.c.bf16 %v3608_v55, %v3602_v56  ;;  %v3890_v2 = vcvt.s32.f32 %v3122_v43  ;;  %v5136_v49 = vperm.slane %v8480_v61, 0  ;;  %v3896_v36 = vcvt.s32.f32 %v3128_v16  ;;  %v4664_v56 = vpop.f32.mrf.mxu3  ;;  %v4781_v55 = vpop.f32.mrf.mxu0 }
 0x33f   :  { %v4334_v60 = vpack.c.bf16 %v3776_v18, %v3770_v58  ;;  %v5156_v38 = vperm.slane %v8482_v44, 0  ;;  %v3301_v52 = vunpack.c.2.s8 %v2575_v10  ;;  %4916 = vmatpush.bf16.msra.mxu3 %v4489_v22  ;;  %v3307_v13 = vunpack.c.3.s8 %v2575_v10 }
 0x340   :  { %4955 = vmatpush.bf16.msrb.mxu2 %v4250_v53  ;;  %v5148_v24 = vmul.f32 %v5136_v49, %v4611_v15  ;;  %v2822_v51 = vunpack.c.2.s8 %v2456_v46  ;;  %v2828_v3 = vunpack.c.3.s8 %v2456_v46  ;;  %v4394_v6 = vpack.c.bf16 %v3896_v36, %v3890_v2  ;;  %v2569_v49 = vld [vmem:[#allocation14 + $0x558] sm:$0xff] }
 0x341   :  { %4983 = vmatpush.bf16.msra.mxu0 %v4334_v60  ;;  %v4069_v5 = vcvt.s32.f32 %v3301_v52  ;;  %v2990_v33 = vunpack.c.2.s8 %v8487_v26  ;;  %v2996_v62 = vunpack.c.3.s8 %v8487_v26  ;;  %v4075_v31 = vcvt.s32.f32 %v3307_v13  ;;  %v8500_v52 = vpop.f32.mrf.mxu1 }
 0x342   :  { %v5168_v1 = vadd.f32 %v5156_v38, %v5148_v24  ;;  %v3590_v28 = vcvt.s32.f32 %v2822_v51  ;;  %v3596_v42 = vcvt.s32.f32 %v2828_v3  ;;  %4994 = vmatpush.bf16.msra.mxu1 %v4394_v6  ;;  %v3110_v63 = vunpack.c.2.s8 %v2528_v20  ;;  %v2450_v38 = vld [vmem:[#allocation14 + $0x1a0] sm:$0xff] }
 0x343   :  { %v3758_v25 = vcvt.s32.f32 %v2990_v33  ;;  %v3764_v57 = vcvt.s32.f32 %v2996_v62  ;;  %v3116_v11 = vunpack.c.3.s8 %v2528_v20  ;;  %v4483_v30 = vpack.c.bf16 %v4075_v31, %v4069_v5  ;;  %v2522_v6 = vld [vmem:[#allocation14 + $0x3e0] sm:$0xff] }
 0x344   :  { %vm5174_vm12 = vcmp.ge.f32.partialorder %v5168_v1, 0.0  ;;  %v5180_v54 = vmul.f32 0.01, %v5168_v1  ;;  %v4244_v50 = vpack.c.bf16 %v3596_v42, %v3590_v28  ;;  %v3878_v12 = vcvt.s32.f32 %v3110_v63 }
 0x345   :  { %v4328_v27 = vpack.c.bf16 %v3764_v57, %v3758_v25  ;;  %v3884_v8 = vcvt.s32.f32 %v3116_v11  ;;  %v3289_v0 = vunpack.c.0.s8 %v2575_v10  ;;  %4917 = vmatpush.bf16.msra.mxu3 %v4483_v30  ;;  %v3295_v37 = vunpack.c.1.s8 %v2575_v10 }
 0x346   :  { %v5186_v32 = vsel %vm5174_vm12, %v5168_v1, %v5180_v54  ;;  %4956 = vmatpush.bf16.msrb.mxu2 %v4244_v50  ;;  %v2810_v17 = vunpack.c.0.s8 %v2456_v46  ;;  %v2816_v40 = vunpack.c.1.s8 %v2456_v46  ;;  %v2978_v16 = vunpack.c.0.s8 %v8487_v26 }
 0x347   :  { %v8496_v43 = vpack.c.bf16 %v5186_v32, %v5186_v32  ;;  %4984 = vmatpush.bf16.msra.mxu0 %v4328_v27  ;;  %v4388_v58 = vpack.c.bf16 %v3884_v8, %v3878_v12  ;;  %v4057_v18 = vcvt.s32.f32 %v3289_v0  ;;  %v4063_v15 = vcvt.s32.f32 %v3295_v37 }
 0x348   :  { %v3578_v22 = vcvt.s32.f32 %v2810_v17  ;;  %v3584_v53 = vcvt.s32.f32 %v2816_v40  ;;  %v2984_v2 = vunpack.c.1.s8 %v8487_v26  ;;  %v3746_v10 = vcvt.s32.f32 %v2978_v16  ;;  %v8503_v16 = vld [vmem:[#allocation14 + $0x2f0] sm:$0xff] }
 0x349   :  { %4995 = vmatpush.bf16.msra.mxu1 %v4388_v58  ;;  %v3098_v60 = vunpack.c.0.s8 %v2528_v20  ;;  %v3104_v46 = vunpack.c.1.s8 %v2528_v20  ;;  %v2679_v36 = vunpack.c.2.s8 %v2421_v59  ;;  %v4477_v24 = vpack.c.bf16 %v4063_v15, %v4057_v18  ;;  %v4794_v15 = vpop.f32.mrf.mxu1 }
 0x34a   :  { %v4238_v13 = vpack.c.bf16 %v3584_v53, %v3578_v22  ;;  %v3752_v51 = vcvt.s32.f32 %v2984_v2  ;;  %v2685_v3 = vunpack.c.3.s8 %v2421_v59  ;;  %v3277_v1 = vunpack.c.2.s8 %v2569_v49 }
 0x34b   :  { %v3866_v5 = vcvt.s32.f32 %v3098_v60  ;;  %v3872_v33 = vcvt.s32.f32 %v3104_v46  ;;  %v3447_v62 = vcvt.s32.f32 %v2679_v36  ;;  %4918 = vmatpush.bf16.msra.mxu3 %v4477_v24  ;;  %v3283_v28 = vunpack.c.3.s8 %v2569_v49  ;;  %v8505_v60 = vpop.f32.mrf.mxu2  ;;  %v8507_v46 = vpop.f32.mrf.mxu3 }
 0x34c   :  { %4957 = vmatpush.bf16.msrb.mxu2 %v4238_v13  ;;  %v4322_v26 = vpack.c.bf16 %v3752_v51, %v3746_v10  ;;  %v3453_v31 = vcvt.s32.f32 %v2685_v3  ;;  %v2798_v42 = vunpack.c.2.s8 %v2450_v38  ;;  %v4045_v25 = vcvt.s32.f32 %v3277_v1  ;;  %v8509_v51 = vld [vmem:[#allocation14 + $0x88] sm:$0xff] }
 0x34d   :  { %v4382_v20 = vpack.c.bf16 %v3872_v33, %v3866_v5  ;;  %v2804_v57 = vunpack.c.3.s8 %v2450_v38  ;;  %v3086_v63 = vunpack.c.2.s8 %v2522_v6  ;;  %v4051_v54 = vcvt.s32.f32 %v3283_v28  ;;  %v2445_v28 = vld [vmem:[#allocation14 + $0x178] sm:$0xff] }
 0x34e   :  { %4985 = vmatpush.bf16.msra.mxu0 %v4322_v26  ;;  %v4173_v11 = vpack.c.bf16 %v3453_v31, %v3447_v62  ;;  %v3566_v30 = vcvt.s32.f32 %v2798_v42  ;;  %v3092_v50 = vunpack.c.3.s8 %v2522_v6  ;;  %v2667_v8 = vunpack.c.0.s8 %v2421_v59 }
 0x34f   :  { %4996 = vmatpush.bf16.msra.mxu1 %v4382_v20  ;;  %v3572_v27 = vcvt.s32.f32 %v2804_v57  ;;  %v3854_v12 = vcvt.s32.f32 %v3086_v63  ;;  %v2673_v0 = vunpack.c.1.s8 %v2421_v59  ;;  %v4471_v32 = vpack.c.bf16 %v4051_v54, %v4045_v25  ;;  %v2564_v59 = vld [vmem:[#allocation14 + $0x530] sm:$0xff] }
 0x350   :  { %v3860_v37 = vcvt.s32.f32 %v3092_v50  ;;  %v3265_v17 = vunpack.c.0.s8 %v2569_v49  ;;  %v3271_v40 = vunpack.c.1.s8 %v2569_v49  ;;  %v3435_v55 = vcvt.s32.f32 %v2667_v8 }
 0x351   :  { %4986 = vmatmul.bf16.vlgmr.msra.gmra.mxu0 %v8316_v48  ;;  %v4232_v56 = vpack.c.bf16 %v3572_v27, %v3566_v30  ;;  %v3441_v58 = vcvt.s32.f32 %v2673_v0  ;;  %v2786_v18 = vunpack.c.0.s8 %v2450_v38  ;;  %4919 = vmatpush.bf16.msra.mxu3 %v4471_v32  ;;  %v2792_v10 = vunpack.c.1.s8 %v2450_v38 }
 0x352   :  { %5030 = vmatpush.bf16.msrb.mxu0 %v4173_v11  ;;  %v4376_v22 = vpack.c.bf16 %v3860_v37, %v3854_v12  ;;  %v4033_v53 = vcvt.s32.f32 %v3265_v17  ;;  %v4039_v2 = vcvt.s32.f32 %v3271_v40  ;;  %v3074_v24 = vunpack.c.0.s8 %v2522_v6 }
 0x353   :  { %4958 = vmatpush.bf16.msrb.mxu2 %v4232_v56  ;;  %v4167_v49 = vpack.c.bf16 %v3441_v58, %v3435_v55  ;;  %v3554_v36 = vcvt.s32.f32 %v2786_v18  ;;  %v3080_v13 = vunpack.c.1.s8 %v2522_v6  ;;  %v3560_v5 = vcvt.s32.f32 %v2792_v10  ;;  %v4755_v58 = vpop.f32.mrf.mxu2  ;;  %v4716_v18 = vpop.f32.mrf.mxu3 }
 0x354   :  { %4997 = vmatpush.bf16.msra.mxu1 %v4376_v22  ;;  %v4465_v3 = vpack.c.bf16 %v4039_v2, %v4033_v53  ;;  %v2966_v33 = vunpack.c.2.s8 %v8503_v16  ;;  %v2972_v62 = vunpack.c.3.s8 %v8503_v16  ;;  %v3842_v38 = vcvt.s32.f32 %v3074_v24 }
 0x355   :  { %v3848_v1 = vcvt.s32.f32 %v3080_v13  ;;  %v3254_v26 = vunpack.c.2.s8 %v2564_v59  ;;  %v3260_v31 = vunpack.c.3.s8 %v2564_v59  ;;  %v4226_v42 = vpack.c.bf16 %v3560_v5, %v3554_v36 }
 0x356   :  { %5031 = vmatpush.bf16.msrb.mxu0 %v4167_v49  ;;  %4920 = vmatpush.bf16.msra.mxu3 %v4465_v3  ;;  %v3734_v20 = vcvt.s32.f32 %v2966_v33  ;;  %v3740_v25 = vcvt.s32.f32 %v2972_v62  ;;  %v2655_v6 = vunpack.c.2.s8 %v8509_v51  ;;  %v2661_v54 = vunpack.c.3.s8 %v8509_v51 }
 0x357   :  { %v4370_v57 = vpack.c.bf16 %v3848_v1, %v3842_v38  ;;  %v4022_v63 = vcvt.s32.f32 %v3254_v26  ;;  %v4028_v11 = vcvt.s32.f32 %v3260_v31  ;;  %4959 = vmatpush.bf16.msrb.mxu2 %v4226_v42  ;;  %v2775_v27 = vunpack.c.2.s8 %v2445_v28  ;;  %v2409_v38 = vld [vmem:[#allocation14 + $0x58] sm:$0xff] }
 0x358   :  { %v4316_v30 = vpack.c.bf16 %v3740_v25, %v3734_v20  ;;  %v3423_v50 = vcvt.s32.f32 %v2655_v6  ;;  %v2781_v12 = vunpack.c.3.s8 %v2445_v28  ;;  %v3429_v0 = vcvt.s32.f32 %v2661_v54  ;;  %v2439_v20 = vld [vmem:[#allocation14 + $0x148] sm:$0xff] }
 0x359   :  { %4998 = vmatpush.bf16.msra.mxu1 %v4370_v57  ;;  %v4460_v8 = vpack.c.bf16 %v4028_v11, %v4022_v63  ;;  %v4663_v32 = vadd.f32 %v8489_v29, %v8468_v7  ;;  %4921 = vmatmul.bf16.vlgmr.msra.gmra.mxu3 %v8381_v14  ;;  %v2954_v37 = vunpack.c.0.s8 %v8503_v16  ;;  %v3543_v17 = vcvt.s32.f32 %v2775_v27  ;;  %v2486_v7 = vld [vmem:[#allocation14 + $0x2c0] sm:$0xff] }
 0x35a   :  { %4965 = vmatpush.bf16.msrb.mxu3 %v4316_v30  ;;  %v3549_v40 = vcvt.s32.f32 %v2781_v12  ;;  %v2960_v56 = vunpack.c.1.s8 %v8503_v16  ;;  %v3242_v55 = vunpack.c.0.s8 %v2564_v59  ;;  %v4161_v15 = vpack.c.bf16 %v3429_v0, %v3423_v50  ;;  %4960 = vmatmul.bf16.vlgmr.msrb.gmra.mxu2 %v8253_v19 }
 0x35b   :  { %5004 = vmatpush.bf16.msra.mxu2 %v4460_v8  ;;  %v8521_v22 = vadd.f32 %v8431_v39, %v4663_v32  ;;  %v3722_v53 = vcvt.s32.f32 %v2954_v37  ;;  %v3248_v2 = vunpack.c.1.s8 %v2564_v59  ;;  %v2643_v16 = vunpack.c.0.s8 %v8509_v51  ;;  %v2558_v39 = vld [vmem:[#allocation14 + $0x500] sm:$0xff] }
 0x35c   :  { %v4221_v29 = vpack.c.bf16 %v3549_v40, %v3543_v17  ;;  %4999 = vmatmul.bf16.vlgmr.msra.gmra.mxu1 %v8332_v41  ;;  %v3728_v10 = vcvt.s32.f32 %v2960_v56  ;;  %v4010_v49 = vcvt.s32.f32 %v3242_v55  ;;  %5032 = vmatpush.bf16.msrb.mxu0 %v4161_v15  ;;  %v2649_v24 = vunpack.c.1.s8 %v8509_v51 }
 0x35d   :  { %v4016_v36 = vcvt.s32.f32 %v3248_v2  ;;  %v2763_v13 = vunpack.c.0.s8 %v2445_v28  ;;  %v2769_v3 = vunpack.c.1.s8 %v2445_v28  ;;  %v3411_v59 = vcvt.s32.f32 %v2643_v16  ;;  %v8527_v2 = vld [vmem:[#allocation14 + $0x290] sm:$0xff] }
 0x35e   :  { %5043 = vmatpush.bf16.msrb.mxu1 %v4221_v29  ;;  %v4310_v5 = vpack.c.bf16 %v3728_v10, %v3722_v53  ;;  %v2942_v33 = vunpack.c.2.s8 %v2486_v7  ;;  %v2948_v62 = vunpack.c.3.s8 %v2486_v7  ;;  %v3417_v26 = vcvt.s32.f32 %v2649_v24 }
 0x35f   :  { %v4454_v1 = vpack.c.bf16 %v4016_v36, %v4010_v49  ;;  %v3531_v31 = vcvt.s32.f32 %v2763_v13  ;;  %v3537_v42 = vcvt.s32.f32 %v2769_v3  ;;  %v3230_v57 = vunpack.c.2.s8 %v2558_v39 }
 0x360   :  { %4966 = vmatpush.bf16.msrb.mxu3 %v4310_v5  ;;  %v3710_v25 = vcvt.s32.f32 %v2942_v33  ;;  %v3716_v6 = vcvt.s32.f32 %v2948_v62  ;;  %v3236_v63 = vunpack.c.3.s8 %v2558_v39  ;;  %v4155_v51 = vpack.c.bf16 %v3417_v26, %v3411_v59  ;;  %v2552_v5 = vld [vmem:[#allocation14 + $0x4d0] sm:$0xff] }
 0x361   :  { %5005 = vmatpush.bf16.msra.mxu2 %v4454_v1  ;;  %v4215_v28 = vpack.c.bf16 %v3537_v42, %v3531_v31  ;;  %v2631_v11 = vunpack.c.2.s8 %v2409_v38  ;;  %v2637_v54 = vunpack.c.3.s8 %v2409_v38  ;;  %v3998_v50 = vcvt.s32.f32 %v3230_v57  ;;  %v2403_v1 = vld [vmem:[#allocation14 + $0x28] sm:$0xff] }
 0x362   :  { %v4304_v30 = vpack.c.bf16 %v3716_v6, %v3710_v25  ;;  %v4004_v27 = vcvt.s32.f32 %v3236_v63  ;;  %v2751_v12 = vunpack.c.2.s8 %v2439_v20  ;;  %5033 = vmatpush.bf16.msrb.mxu0 %v4155_v51  ;;  %v2757_v32 = vunpack.c.3.s8 %v2439_v20  ;;  %v2433_v25 = vld [vmem:[#allocation14 + $0x118] sm:$0xff] }
 0x363   :  { %5044 = vmatpush.bf16.msrb.mxu1 %v4215_v28  ;;  %v3399_v8 = vcvt.s32.f32 %v2631_v11  ;;  %v3405_v0 = vcvt.s32.f32 %v2637_v54  ;;  %v2930_v37 = vunpack.c.0.s8 %v2486_v7  ;;  %v2936_v56 = vunpack.c.1.s8 %v2486_v7 }
 0x364   :  { %4967 = vmatpush.bf16.msrb.mxu3 %v4304_v30  ;;  %v4448_v17 = vpack.c.bf16 %v4004_v27, %v3998_v50  ;;  %v3519_v40 = vcvt.s32.f32 %v2751_v12  ;;  %v3218_v55 = vunpack.c.0.s8 %v2558_v39  ;;  %v3525_v18 = vcvt.s32.f32 %v2757_v32 }
 0x365   :  { %v4149_v58 = vpack.c.bf16 %v3405_v0, %v3399_v8  ;;  %v3698_v15 = vcvt.s32.f32 %v2930_v37  ;;  %v3224_v53 = vunpack.c.1.s8 %v2558_v39  ;;  %v3704_v29 = vcvt.s32.f32 %v2936_v56 }
 0x366   :  { %5006 = vmatpush.bf16.msra.mxu2 %v4448_v17  ;;  %v3986_v10 = vcvt.s32.f32 %v3218_v55  ;;  %v2619_v49 = vunpack.c.0.s8 %v2409_v38  ;;  %v2625_v16 = vunpack.c.1.s8 %v2409_v38  ;;  %v4209_v36 = vpack.c.bf16 %v3525_v18, %v3519_v40 }
 0x367   :  { %5034 = vmatpush.bf16.msrb.mxu0 %v4149_v58  ;;  %v3992_v24 = vcvt.s32.f32 %v3224_v53  ;;  %v2739_v13 = vunpack.c.0.s8 %v2439_v20  ;;  %v2745_v3 = vunpack.c.1.s8 %v2439_v20  ;;  %v4298_v59 = vpack.c.bf16 %v3704_v29, %v3698_v15  ;;  %v8531_v20 = vpop.f32.mrf.mxu0 }
 0x368   :  { %v3387_v7 = vcvt.s32.f32 %v2619_v49  ;;  %v3393_v33 = vcvt.s32.f32 %v2625_v16  ;;  %v2918_v62 = vunpack.c.2.s8 %v8527_v2  ;;  %5045 = vmatpush.bf16.msrb.mxu1 %v4209_v36  ;;  %v2924_v42 = vunpack.c.3.s8 %v8527_v2 }
 0x369   :  { %v4442_v39 = vpack.c.bf16 %v3992_v24, %v3986_v10  ;;  %v3507_v26 = vcvt.s32.f32 %v2739_v13  ;;  %v3513_v31 = vcvt.s32.f32 %v2745_v3  ;;  %4968 = vmatpush.bf16.msrb.mxu3 %v4298_v59  ;;  %v3206_v57 = vunpack.c.2.s8 %v2552_v5 }
 0x36a   :  { %v4143_v38 = vpack.c.bf16 %v3393_v33, %v3387_v7  ;;  %v3686_v6 = vcvt.s32.f32 %v2918_v62  ;;  %v3212_v63 = vunpack.c.3.s8 %v2552_v5  ;;  %v3692_v28 = vcvt.s32.f32 %v2924_v42  ;;  %v2474_v62 = vld [vmem:[#allocation14 + $0x260] sm:$0xff] }
 0x36b   :  { %5007 = vmatpush.bf16.msra.mxu2 %v4442_v39  ;;  %v4203_v51 = vpack.c.bf16 %v3513_v31, %v3507_v26  ;;  %v2607_v11 = vunpack.c.2.s8 %v2403_v1  ;;  %v2613_v54 = vunpack.c.3.s8 %v2403_v1  ;;  %v3974_v30 = vcvt.s32.f32 %v3206_v57 }
 0x36c   :  { %5035 = vmatpush.bf16.msrb.mxu0 %v4143_v38  ;;  %v3980_v50 = vcvt.s32.f32 %v3212_v63  ;;  %v2727_v27 = vunpack.c.2.s8 %v2433_v25  ;;  %v2733_v12 = vunpack.c.3.s8 %v2433_v25  ;;  %v4292_v8 = vpack.c.bf16 %v3692_v28, %v3686_v6 }
 0x36d   :  { %5046 = vmatpush.bf16.msrb.mxu1 %v4203_v51  ;;  %v3375_v0 = vcvt.s32.f32 %v2607_v11  ;;  %v3381_v32 = vcvt.s32.f32 %v2613_v54  ;;  %v8535_v37 = vadd.f32 %v8505_v60, %v8475_v4  ;;  %v4689_v55 = vadd.f32 %v8435_v9, %v8521_v22  ;;  %v2517_v22 = vld [vmem:[#allocation14 + $0x3b8] sm:$0xff]  ;;  %v2427_v11 = vld [vmem:[#allocation14 + $0xe8] sm:$0xff] }
 0x36e   :  { %v4436_v17 = vpack.c.bf16 %v3980_v50, %v3974_v30  ;;  %v3495_v40 = vcvt.s32.f32 %v2727_v27  ;;  %v3501_v56 = vcvt.s32.f32 %v2733_v12  ;;  %4969 = vmatpush.bf16.msrb.mxu3 %v4292_v8  ;;  %v5137_v18 = vperm.slane %v8480_v61, 1 }
 0x36f   :  { %v4137_v58 = vpack.c.bf16 %v3381_v32, %v3375_v0  ;;  %v5157_v15 = vperm.slane %v8482_v44, 1  ;;  %v2906_v53 = vunpack.c.0.s8 %v8527_v2  ;;  %v4702_v10 = vadd.f32 %v8464_v47, %v4689_v55  ;;  %v4833_v3 = vpop.f32.mrf.mxu0 }
 0x370   :  { %5008 = vmatpush.bf16.msra.mxu2 %v4436_v17  ;;  %v4197_v29 = vpack.c.bf16 %v3501_v56, %v3495_v40  ;;  %v2912_v4 = vunpack.c.1.s8 %v8527_v2  ;;  %v3194_v60 = vunpack.c.0.s8 %v2552_v5  ;;  %v3200_v16 = vunpack.c.1.s8 %v2552_v5  ;;  %v8545_v2 = vpop.f32.mrf.mxu1  ;;  %v8552_v3 = vpop.f32.mrf.mxu2 }
 0x371   :  { %5036 = vmatpush.bf16.msrb.mxu0 %v4137_v58  ;;  %v3674_v49 = vcvt.s32.f32 %v2906_v53  ;;  %v2595_v36 = vunpack.c.0.s8 %v2403_v1  ;;  %v2601_v9 = vunpack.c.1.s8 %v2403_v1  ;;  %v4715_v61 = vadd.f32 %v8507_v46, %v4702_v10  ;;  %v2546_v1 = vld [vmem:[#allocation14 + $0x4a0] sm:$0xff] }
 0x372   :  { %5047 = vmatpush.bf16.msrb.mxu1 %v4197_v29  ;;  %v3680_v24 = vcvt.s32.f32 %v2912_v4  ;;  %v3962_v44 = vcvt.s32.f32 %v3194_v60  ;;  %v2715_v13 = vunpack.c.0.s8 %v2433_v25  ;;  %v3968_v59 = vcvt.s32.f32 %v3200_v16 }
 0x373   :  { %v3363_v7 = vcvt.s32.f32 %v2595_v36  ;;  %v3369_v33 = vcvt.s32.f32 %v2601_v9  ;;  %v2721_v47 = vunpack.c.1.s8 %v2433_v25  ;;  %v5149_v39 = vmul.f32 %v5137_v18, %v4715_v61 }
 0x374   :  { %v4286_v26 = vpack.c.bf16 %v3680_v24, %v3674_v49  ;;  %v3483_v5 = vcvt.s32.f32 %v2715_v13  ;;  %v3063_v31 = vunpack.c.2.s8 %v2517_v22  ;;  %v4430_v42 = vpack.c.bf16 %v3968_v59, %v3962_v44  ;;  %v2588_v44 = vld [vmem:[#allocation14 + $0x5f0] sm:$0xff]  ;;  %v8550_v13 = vpop.f32.mrf.mxu3 }
 0x375   :  { %v4131_v38 = vpack.c.bf16 %v3369_v33, %v3363_v7  ;;  %v3489_v6 = vcvt.s32.f32 %v2721_v47  ;;  %v3069_v46 = vunpack.c.3.s8 %v2517_v22  ;;  %v5169_v57 = vadd.f32 %v5157_v15, %v5149_v39  ;;  %v2469_v47 = vld [vmem:[#allocation14 + $0x238] sm:$0xff]  ;;  %v2511_v39 = vld [vmem:[#allocation14 + $0x388] sm:$0xff] }
 0x376   :  { %4970 = vmatpush.bf16.msrb.mxu3 %v4286_v26  ;;  %v3831_v63 = vcvt.s32.f32 %v3063_v31  ;;  %v2894_v51 = vunpack.c.2.s8 %v2474_v62  ;;  %v2900_v28 = vunpack.c.3.s8 %v2474_v62  ;;  %5009 = vmatpush.bf16.msra.mxu2 %v4430_v42  ;;  %v3182_v30 = vunpack.c.2.s8 %v2546_v1 }
 0x377   :  { %5037 = vmatpush.bf16.msrb.mxu0 %v4131_v38  ;;  %v4191_v25 = vpack.c.bf16 %v3489_v6, %v3483_v5  ;;  %v3837_v54 = vcvt.s32.f32 %v3069_v46  ;;  %v3188_v50 = vunpack.c.3.s8 %v2546_v1  ;;  %vm5175_vm13 = vcmp.ge.f32.partialorder %v5169_v57, 0.0  ;;  %v2541_v46 = vld [vmem:[#allocation14 + $0x478] sm:$0xff] }
 0x378   :  { %v5181_v27 = vmul.f32 0.01, %v5169_v57  ;;  %v3662_v12 = vcvt.s32.f32 %v2894_v51  ;;  %v3668_v8 = vcvt.s32.f32 %v2900_v28  ;;  %v3950_v32 = vcvt.s32.f32 %v3182_v30  ;;  %v4846_v4 = vpop.f32.mrf.mxu1 }
 0x379   :  { %5048 = vmatpush.bf16.msrb.mxu1 %v4191_v25  ;;  %v4365_v0 = vpack.c.bf16 %v3837_v54, %v3831_v63  ;;  %v3956_v17 = vcvt.s32.f32 %v3188_v50  ;;  %v2703_v40 = vunpack.c.2.s8 %v2427_v11  ;;  %v2709_v58 = vunpack.c.3.s8 %v2427_v11 }
 0x37a   :  { %v5187_v56 = vsel %vm5175_vm13, %v5169_v57, %v5181_v27  ;;  %5038 = vmatmul.bf16.vlgmr.msrb.gmra.mxu0 %v8209_v45  ;;  %v4280_v55 = vpack.c.bf16 %v3668_v8, %v3662_v12  ;;  %v3051_v18 = vunpack.c.0.s8 %v2517_v22  ;;  %v3057_v10 = vunpack.c.1.s8 %v2517_v22 }
 0x37b   :  { %v8548_v15 = vpack.c.bf16 %v5187_v56, %v5187_v56  ;;  %5082 = vmatpush.bf16.msra.mxu0 %v4365_v0  ;;  %v4424_v53 = vpack.c.bf16 %v3956_v17, %v3950_v32  ;;  %v3471_v29 = vcvt.s32.f32 %v2703_v40  ;;  %v3477_v60 = vcvt.s32.f32 %v2709_v58 }
 0x37c   :  { %4971 = vmatpush.bf16.msrb.mxu3 %v4280_v55  ;;  %v3819_v49 = vcvt.s32.f32 %v3051_v18  ;;  %v2882_v16 = vunpack.c.0.s8 %v2474_v62  ;;  %v2888_v36 = vunpack.c.1.s8 %v2474_v62  ;;  %v3825_v9 = vcvt.s32.f32 %v3057_v10 }
 0x37d   :  { %5010 = vmatpush.bf16.msra.mxu2 %v4424_v53  ;;  %v3170_v61 = vunpack.c.0.s8 %v2546_v1  ;;  %v3176_v24 = vunpack.c.1.s8 %v2546_v1  ;;  %v2691_v45 = vunpack.c.0.s8 %v2427_v11  ;;  %v4185_v59 = vpack.c.bf16 %v3477_v60, %v3471_v29  ;;  %v4768_v53 = vpop.f32.mrf.mxu3  ;;  %v4807_v29 = vpop.f32.mrf.mxu2 }
 0x37e   :  { %v3650_v7 = vcvt.s32.f32 %v2882_v16  ;;  %v3656_v33 = vcvt.s32.f32 %v2888_v36  ;;  %v2697_v22 = vunpack.c.1.s8 %v2427_v11  ;;  %v4359_v26 = vpack.c.bf16 %v3825_v9, %v3819_v49  ;;  %v2582_v16 = vld [vmem:[#allocation14 + $0x5c0] sm:$0xff]  ;;  %v2576_v29 = vld [vmem:[#allocation14 + $0x590] sm:$0xff] }
 0x37f   :  { %v3938_v5 = vcvt.s32.f32 %v3170_v61  ;;  %v3944_v31 = vcvt.s32.f32 %v3176_v24  ;;  %v3459_v62 = vcvt.s32.f32 %v2691_v45  ;;  %5049 = vmatpush.bf16.msrb.mxu1 %v4185_v59  ;;  %v3350_v1 = vunpack.c.2.s8 %v2588_v44 }
 0x380   :  { %v4274_v42 = vpack.c.bf16 %v3656_v33, %v3650_v7  ;;  %v3465_v38 = vcvt.s32.f32 %v2697_v22  ;;  %v3356_v6 = vunpack.c.3.s8 %v2588_v44  ;;  %5083 = vmatpush.bf16.msra.mxu0 %v4359_v26  ;;  %v2871_v63 = vunpack.c.2.s8 %v2469_v47  ;;  %v2463_v33 = vld [vmem:[#allocation14 + $0x208] sm:$0xff] }
 0x381   :  { %v4418_v57 = vpack.c.bf16 %v3944_v31, %v3938_v5  ;;  %v2877_v51 = vunpack.c.3.s8 %v2469_v47  ;;  %v3039_v28 = vunpack.c.2.s8 %v2511_v39  ;;  %v4118_v11 = vcvt.s32.f32 %v3350_v1  ;;  %v2535_v1 = vld [vmem:[#allocation14 + $0x448] sm:$0xff] }
 0x382   :  { %4972 = vmatpush.bf16.msrb.mxu3 %v4274_v42  ;;  %v4179_v25 = vpack.c.bf16 %v3465_v38, %v3459_v62  ;;  %v4124_v54 = vcvt.s32.f32 %v3356_v6  ;;  %v3045_v30 = vunpack.c.3.s8 %v2511_v39  ;;  %v3639_v50 = vcvt.s32.f32 %v2871_v63  ;;  %v2505_v62 = vld [vmem:[#allocation14 + $0x358] sm:$0xff] }
 0x383   :  { %5011 = vmatpush.bf16.msra.mxu2 %v4418_v57  ;;  %v3645_v27 = vcvt.s32.f32 %v2877_v51  ;;  %v3807_v12 = vcvt.s32.f32 %v3039_v28  ;;  %v3159_v8 = vunpack.c.2.s8 %v2541_v46  ;;  %v3165_v17 = vunpack.c.3.s8 %v2541_v46 }
 0x384   :  { %5050 = vmatpush.bf16.msrb.mxu1 %v4179_v25  ;;  %v4508_v0 = vpack.c.bf16 %v4124_v54, %v4118_v11  ;;  %v3813_v32 = vcvt.s32.f32 %v3045_v30  ;;  %v3338_v40 = vunpack.c.0.s8 %v2588_v44  ;;  %v3344_v58 = vunpack.c.1.s8 %v2588_v44 }
 0x385   :  { %v4269_v56 = vpack.c.bf16 %v3645_v27, %v3639_v50  ;;  %v3927_v55 = vcvt.s32.f32 %v3159_v8  ;;  %4973 = vmatmul.bf16.vlgmr.msrb.gmra.mxu3 %v8294_v34  ;;  %v2859_v18 = vunpack.c.0.s8 %v2469_v47  ;;  %v3933_v4 = vcvt.s32.f32 %v3165_v17 }
 0x386   :  { %5017 = vmatpush.bf16.msra.mxu3 %v4508_v0  ;;  %v4353_v10 = vpack.c.bf16 %v3813_v32, %v3807_v12  ;;  %5012 = vmatmul.bf16.vlgmr.msra.gmra.mxu2 %v8354_v35  ;;  %v4106_v60 = vcvt.s32.f32 %v3338_v40  ;;  %v2865_v49 = vunpack.c.1.s8 %v2469_v47  ;;  %v4112_v36 = vcvt.s32.f32 %v3344_v58 }
 0x387   :  { %5056 = vmatpush.bf16.msrb.mxu2 %v4269_v56  ;;  %5051 = vmatmul.bf16.vlgmr.msrb.gmra.mxu1 %v8242_v21  ;;  %v3627_v9 = vcvt.s32.f32 %v2859_v18  ;;  %v3027_v61 = vunpack.c.0.s8 %v2511_v39  ;;  %v3033_v24 = vunpack.c.1.s8 %v2511_v39  ;;  %v4413_v45 = vpack.c.bf16 %v3933_v4, %v3927_v55 }
 0x388   :  { %5084 = vmatpush.bf16.msra.mxu0 %v4353_v10  ;;  %v3633_v44 = vcvt.s32.f32 %v2865_v49  ;;  %v3147_v59 = vunpack.c.0.s8 %v2541_v46  ;;  %v3153_v7 = vunpack.c.1.s8 %v2541_v46  ;;  %v4502_v22 = vpack.c.bf16 %v4112_v36, %v4106_v60 }
 0x389   :  { %v3795_v26 = vcvt.s32.f32 %v3027_v61  ;;  %v3801_v5 = vcvt.s32.f32 %v3033_v24  ;;  %v3326_v31 = vunpack.c.2.s8 %v2582_v16  ;;  %5095 = vmatpush.bf16.msra.mxu1 %v4413_v45  ;;  %v3332_v21 = vunpack.c.3.s8 %v2582_v16  ;;  %v2457_v61 = vld [vmem:[#allocation14 + $0x1d8] sm:$0xff] }
 0x38a   :  { %v4263_v47 = vpack.c.bf16 %v3633_v44, %v3627_v9  ;;  %v3915_v42 = vcvt.s32.f32 %v3147_v59  ;;  %v3921_v38 = vcvt.s32.f32 %v3153_v7  ;;  %5018 = vmatpush.bf16.msra.mxu3 %v4502_v22  ;;  %v2847_v57 = vunpack.c.2.s8 %v2463_v33  ;;  %v8561_v7 = vpop.f32.mrf.mxu0 }
 0x38b   :  { %v4347_v6 = vpack.c.bf16 %v3801_v5, %v3795_v26  ;;  %v4094_v39 = vcvt.s32.f32 %v3326_v31  ;;  %v2853_v63 = vunpack.c.3.s8 %v2463_v33  ;;  %v4100_v46 = vcvt.s32.f32 %v3332_v21  ;;  %v2529_v31 = vld [vmem:[#allocation14 + $0x418] sm:$0xff] }
 0x38c   :  { %5057 = vmatpush.bf16.msrb.mxu2 %v4263_v47  ;;  %v4407_v51 = vpack.c.bf16 %v3921_v38, %v3915_v42  ;;  %v3015_v28 = vunpack.c.2.s8 %v2505_v62  ;;  %v3021_v25 = vunpack.c.3.s8 %v2505_v62  ;;  %v3615_v11 = vcvt.s32.f32 %v2847_v57 }
 0x38d   :  { %5085 = vmatpush.bf16.msra.mxu0 %v4347_v6  ;;  %v3621_v54 = vcvt.s32.f32 %v2853_v63  ;;  %v3135_v30 = vunpack.c.2.s8 %v2535_v1  ;;  %v3141_v50 = vunpack.c.3.s8 %v2535_v1  ;;  %v4496_v27 = vpack.c.bf16 %v4100_v46, %v4094_v39 }
 0x38e   :  { %5096 = vmatpush.bf16.msra.mxu1 %v4407_v51  ;;  %v3783_v12 = vcvt.s32.f32 %v3015_v28  ;;  %v3789_v8 = vcvt.s32.f32 %v3021_v25  ;;  %v8559_v0 = vadd.f32 %v8545_v2, %v8531_v20  ;;  %v3314_v56 = vunpack.c.0.s8 %v2582_v16 }
 0x38f   :  { %v4257_v32 = vpack.c.bf16 %v3621_v54, %v3615_v11  ;;  %v3903_v17 = vcvt.s32.f32 %v3135_v30  ;;  %v3909_v40 = vcvt.s32.f32 %v3141_v50  ;;  %5019 = vmatpush.bf16.msra.mxu3 %v4496_v27  ;;  %v3320_v58 = vunpack.c.1.s8 %v2582_v16  ;;  %v2499_v16 = vld [vmem:[#allocation14 + $0x328] sm:$0xff] }
 0x390   :  { %v4341_v55 = vpack.c.bf16 %v3789_v8, %v3783_v12  ;;  %v2835_v18 = vunpack.c.0.s8 %v2463_v33  ;;  %v2841_v53 = vunpack.c.1.s8 %v2463_v33  ;;  %v4082_v4 = vcvt.s32.f32 %v3314_v56 }
 0x391   :  { %5058 = vmatpush.bf16.msrb.mxu2 %v4257_v32  ;;  %v4401_v10 = vpack.c.bf16 %v3909_v40, %v3903_v17  ;;  %v3003_v60 = vunpack.c.0.s8 %v2505_v62  ;;  %v3009_v49 = vunpack.c.1.s8 %v2505_v62  ;;  %v4088_v36 = vcvt.s32.f32 %v3320_v58 }
 0x392   :  { %5086 = vmatpush.bf16.msra.mxu0 %v4341_v55  ;;  %v3603_v9 = vcvt.s32.f32 %v2835_v18  ;;  %v3609_v20 = vcvt.s32.f32 %v2841_v53  ;;  %v3123_v2 = vunpack.c.0.s8 %v2535_v1  ;;  %v3129_v44 = vunpack.c.1.s8 %v2535_v1  ;;  %v5216_v53 = vld [vmem:[#allocation17 + $0x90] sm:$0xff] }
 0x393   :  { %5097 = vmatpush.bf16.msra.mxu1 %v4401_v10  ;;  %v3771_v24 = vcvt.s32.f32 %v3003_v60  ;;  %v3777_v45 = vcvt.s32.f32 %v3009_v49  ;;  %v3302_v59 = vunpack.c.2.s8 %v2576_v29  ;;  %v4490_v33 = vpack.c.bf16 %v4088_v36, %v4082_v4  ;;  %v4885_v10 = vpop.f32.mrf.mxu0 }
 0x394   :  { %v4251_v22 = vpack.c.bf16 %v3609_v20, %v3603_v9  ;;  %v3891_v26 = vcvt.s32.f32 %v3123_v2  ;;  %v3308_v5 = vunpack.c.3.s8 %v2576_v29  ;;  %v3897_v47 = vcvt.s32.f32 %v3129_v44  ;;  %v2570_v20 = vld [vmem:[#allocation14 + $0x560] sm:$0xff]  ;;  %v8567_v2 = vpop.f32.mrf.mxu1  ;;  %v2451_v44 = vld [vmem:[#allocation14 + $0x1a8] sm:$0xff] }
 0x395   :  { %v4335_v62 = vpack.c.bf16 %v3777_v45, %v3771_v24  ;;  %v4070_v42 = vcvt.s32.f32 %v3302_v59  ;;  %v2823_v38 = vunpack.c.2.s8 %v2457_v61  ;;  %5020 = vmatpush.bf16.msra.mxu3 %v4490_v33  ;;  %v2829_v6 = vunpack.c.3.s8 %v2457_v61 }
 0x396   :  { %5059 = vmatpush.bf16.msrb.mxu2 %v4251_v22  ;;  %v4076_v21 = vcvt.s32.f32 %v3308_v5  ;;  %v2991_v39 = vunpack.c.2.s8 %v2499_v16  ;;  %v2997_v57 = vunpack.c.3.s8 %v2499_v16  ;;  %v4395_v1 = vpack.c.bf16 %v3897_v47, %v3891_v26  ;;  %v2523_v26 = vld [vmem:[#allocation14 + $0x3e8] sm:$0xff] }
 0x397   :  { %5087 = vmatpush.bf16.msra.mxu0 %v4335_v62  ;;  %v3591_v63 = vcvt.s32.f32 %v2823_v38  ;;  %v3111_v51 = vunpack.c.2.s8 %v2529_v31  ;;  %v3117_v46 = vunpack.c.3.s8 %v2529_v31  ;;  %v3597_v25 = vcvt.s32.f32 %v2829_v6 }
 0x398   :  { %v4484_v28 = vpack.c.bf16 %v4076_v21, %v4070_v42  ;;  %v3759_v11 = vcvt.s32.f32 %v2991_v39  ;;  %v3765_v54 = vcvt.s32.f32 %v2997_v57  ;;  %5098 = vmatpush.bf16.msra.mxu1 %v4395_v1  ;;  %v4767_v27 = vadd.f32 %v8550_v13, %v8535_v37 }
 0x399   :  { %v3879_v30 = vcvt.s32.f32 %v3111_v51  ;;  %v3885_v50 = vcvt.s32.f32 %v3117_v46  ;;  %v3290_v12 = vunpack.c.0.s8 %v2576_v29  ;;  %v4245_v8 = vpack.c.bf16 %v3597_v25, %v3591_v63 }
 0x39a   :  { %5021 = vmatpush.bf16.msra.mxu3 %v4484_v28  ;;  %v4329_v32 = vpack.c.bf16 %v3765_v54, %v3759_v11  ;;  %v3296_v17 = vunpack.c.1.s8 %v2576_v29  ;;  %v2811_v40 = vunpack.c.0.s8 %v2457_v61  ;;  %v4780_v55 = vadd.f32 %v8491_v23, %v4767_v27 }
 0x39b   :  { %v4389_v56 = vpack.c.bf16 %v3885_v50, %v3879_v30  ;;  %v4058_v58 = vcvt.s32.f32 %v3290_v12  ;;  %v2817_v18 = vunpack.c.1.s8 %v2457_v61  ;;  %5060 = vmatpush.bf16.msrb.mxu2 %v4245_v8  ;;  %v2979_v49 = vunpack.c.0.s8 %v2499_v16  ;;  %v2493_v8 = vld [vmem:[#allocation14 + $0x2f8] sm:$0xff] }
 0x39c   :  { %5088 = vmatpush.bf16.msra.mxu0 %v4329_v32  ;;  %v4064_v4 = vcvt.s32.f32 %v3296_v17  ;;  %v3579_v60 = vcvt.s32.f32 %v2811_v40  ;;  %v2985_v36 = vunpack.c.1.s8 %v2499_v16  ;;  %v4793_v37 = vadd.f32 %v8500_v52, %v4780_v55  ;;  %v4898_v32 = vpop.f32.mrf.mxu1 }
 0x39d   :  { %5099 = vmatpush.bf16.msra.mxu1 %v4389_v56  ;;  %v3585_v13 = vcvt.s32.f32 %v2817_v18  ;;  %v3099_v9 = vunpack.c.0.s8 %v2529_v31  ;;  %v3105_v29 = vunpack.c.1.s8 %v2529_v31  ;;  %v3747_v24 = vcvt.s32.f32 %v2979_v49 }
 0x39e   :  { %v4478_v23 = vpack.c.bf16 %v4064_v4, %v4058_v58  ;;  %v3753_v61 = vcvt.s32.f32 %v2985_v36  ;;  %v5426_v45 = vunpack.c.2.s8 %v5216_v53  ;;  %v8570_v59 = vadd.f32 %v8552_v3, %v4793_v37 }
 0x39f   :  { %v4239_v33 = vpack.c.bf16 %v3585_v13, %v3579_v60  ;;  %v3867_v22 = vcvt.s32.f32 %v3099_v9  ;;  %v3873_v16 = vcvt.s32.f32 %v3105_v29  ;;  %v5432_v5 = vunpack.c.3.s8 %v5216_v53  ;;  %v8573_v60 = vpop.f32.mrf.mxu3  ;;  %v5210_v13 = vld [vmem:[#allocation17 + $0x60] sm:$0xff]  ;;  %v8575_v9 = vpop.f32.mrf.mxu2 }
 0x3a0   :  { %5022 = vmatpush.bf16.msra.mxu3 %v4478_v23  ;;  %v4323_v52 = vpack.c.bf16 %v3753_v61, %v3747_v24  ;;  %v6002_v62 = vcvt.s32.f32 %v5426_v45  ;;  %v3278_v31 = vunpack.c.2.s8 %v2570_v20  ;;  %v3284_v42 = vunpack.c.3.s8 %v2570_v20  ;;  %v5240_v61 = vld [vmem:[#allocation17 + $0x150] sm:$0xff] }
 0x3a1   :  { %5061 = vmatpush.bf16.msrb.mxu2 %v4239_v33  ;;  %v4383_v47 = vpack.c.bf16 %v3873_v16, %v3867_v22  ;;  %v2799_v38 = vunpack.c.2.s8 %v2451_v44  ;;  %v2805_v21 = vunpack.c.3.s8 %v2451_v44  ;;  %v6008_v6 = vcvt.s32.f32 %v5432_v5 }
 0x3a2   :  { %5089 = vmatpush.bf16.msra.mxu0 %v4323_v52  ;;  %v4046_v39 = vcvt.s32.f32 %v3278_v31  ;;  %v3087_v57 = vunpack.c.2.s8 %v2523_v26  ;;  %v3093_v3 = vunpack.c.3.s8 %v2523_v26  ;;  %v4052_v1 = vcvt.s32.f32 %v3284_v42 }
 0x3a3   :  { %5100 = vmatpush.bf16.msra.mxu1 %v4383_v47  ;;  %v3567_v63 = vcvt.s32.f32 %v2799_v38  ;;  %v3573_v51 = vcvt.s32.f32 %v2805_v21  ;;  %v5414_v46 = vunpack.c.0.s8 %v5216_v53  ;;  %v6536_v28 = vpack.c.bf16 %v6008_v6, %v6002_v62 }
 0x3a4   :  { %v3855_v25 = vcvt.s32.f32 %v3087_v57  ;;  %v3861_v11 = vcvt.s32.f32 %v3093_v3  ;;  %v5420_v54 = vunpack.c.1.s8 %v5216_v53  ;;  %v4472_v30 = vpack.c.bf16 %v4052_v1, %v4046_v39  ;;  %v2565_v53 = vld [vmem:[#allocation14 + $0x538] sm:$0xff] }
 0x3a5   :  { %5090 = vmatmul.bf16.vlgmr.msra.gmra.mxu0 %v8316_v48  ;;  %v4233_v50 = vpack.c.bf16 %v3573_v51, %v3567_v63  ;;  %v5990_v27 = vcvt.s32.f32 %v5414_v46  ;;  %v3266_v12 = vunpack.c.0.s8 %v2570_v20  ;;  %v3272_v56 = vunpack.c.1.s8 %v2570_v20 }
 0x3a6   :  { %6782 = vmatpush.bf16.msrb.mxu0 %v6536_v28  ;;  %v4377_v17 = vpack.c.bf16 %v3861_v11, %v3855_v25  ;;  %v5996_v40 = vcvt.s32.f32 %v5420_v54  ;;  %v2787_v55 = vunpack.c.0.s8 %v2451_v44  ;;  %5023 = vmatpush.bf16.msra.mxu3 %v4472_v30  ;;  %v2793_v18 = vunpack.c.1.s8 %v2451_v44 }
 0x3a7   :  { %5062 = vmatpush.bf16.msrb.mxu2 %v4233_v50  ;;  %v4034_v58 = vcvt.s32.f32 %v3266_v12  ;;  %v3075_v10 = vunpack.c.0.s8 %v2523_v26  ;;  %v3081_v4 = vunpack.c.1.s8 %v2523_v26  ;;  %v4040_v49 = vcvt.s32.f32 %v3272_v56  ;;  %v4820_v11 = vpop.f32.mrf.mxu3  ;;  %v2487_v12 = vld [vmem:[#allocation14 + $0x2c8] sm:$0xff]  ;;  %v4859_v32 = vpop.f32.mrf.mxu2 }
 0x3a8   :  { %5101 = vmatpush.bf16.msra.mxu1 %v4377_v17  ;;  %v6530_v48 = vpack.c.bf16 %v5996_v40, %v5990_v27  ;;  %v3555_v36 = vcvt.s32.f32 %v2787_v55  ;;  %v2967_v37 = vunpack.c.2.s8 %v2493_v8  ;;  %v3561_v29 = vcvt.s32.f32 %v2793_v18  ;;  %v2559_v55 = vld [vmem:[#allocation14 + $0x508] sm:$0xff] }
 0x3a9   :  { %v3843_v20 = vcvt.s32.f32 %v3075_v10  ;;  %v3849_v23 = vcvt.s32.f32 %v3081_v4  ;;  %v2973_v24 = vunpack.c.3.s8 %v2493_v8  ;;  %v4466_v45 = vpack.c.bf16 %v4040_v49, %v4034_v58 }
 0x3aa   :  { %6783 = vmatpush.bf16.msrb.mxu0 %v6530_v48  ;;  %v3735_v44 = vcvt.s32.f32 %v2967_v37  ;;  %v3255_v33 = vunpack.c.2.s8 %v2565_v53  ;;  %v3261_v22 = vunpack.c.3.s8 %v2565_v53  ;;  %v4227_v16 = vpack.c.bf16 %v3561_v29, %v3555_v36 }
 0x3ab   :  { %v4371_v26 = vpack.c.bf16 %v3849_v23, %v3843_v20  ;;  %v3741_v52 = vcvt.s32.f32 %v2973_v24  ;;  %v5402_v5 = vunpack.c.2.s8 %v5210_v13  ;;  %5024 = vmatpush.bf16.msra.mxu3 %v4466_v45  ;;  %v5408_v47 = vunpack.c.3.s8 %v5210_v13 }
 0x3ac   :  { %v4023_v62 = vcvt.s32.f32 %v3255_v33  ;;  %v4029_v31 = vcvt.s32.f32 %v3261_v22  ;;  %v5522_v42 = vunpack.c.2.s8 %v5240_v61  ;;  %5063 = vmatpush.bf16.msrb.mxu2 %v4227_v16  ;;  %v5528_v6 = vunpack.c.3.s8 %v5240_v61 }
 0x3ad   :  { %5102 = vmatpush.bf16.msra.mxu1 %v4371_v26  ;;  %v4317_v38 = vpack.c.bf16 %v3741_v52, %v3735_v44  ;;  %v5978_v21 = vcvt.s32.f32 %v5402_v5  ;;  %v2955_v39 = vunpack.c.0.s8 %v2493_v8  ;;  %v5984_v3 = vcvt.s32.f32 %v5408_v47 }
 0x3ae   :  { %v4461_v57 = vpack.c.bf16 %v4029_v31, %v4023_v62  ;;  %v6098_v1 = vcvt.s32.f32 %v5522_v42  ;;  %v2961_v63 = vunpack.c.1.s8 %v2493_v8  ;;  %v6104_v51 = vcvt.s32.f32 %v5528_v6  ;;  %5025 = vmatmul.bf16.vlgmr.msra.gmra.mxu3 %v8381_v14 }
 0x3af   :  { %5069 = vmatpush.bf16.msrb.mxu3 %v4317_v38  ;;  %v3723_v46 = vcvt.s32.f32 %v2955_v39  ;;  %v3243_v28 = vunpack.c.0.s8 %v2565_v53  ;;  %v3249_v25 = vunpack.c.1.s8 %v2565_v53  ;;  %v6524_v54 = vpack.c.bf16 %v5984_v3, %v5978_v21  ;;  %5064 = vmatmul.bf16.vlgmr.msrb.gmra.mxu2 %v8253_v19  ;;  %v5204_v53 = vld [vmem:[#allocation17 + $0x30] sm:$0xff]  ;;  %v8580_v3 = vpop.f32.mrf.mxu0 }
 0x3b0   :  { %5108 = vmatpush.bf16.msra.mxu2 %v4461_v57  ;;  %v3729_v30 = vcvt.s32.f32 %v2961_v63  ;;  %v5390_v50 = vunpack.c.0.s8 %v5210_v13  ;;  %v5396_v27 = vunpack.c.1.s8 %v5210_v13  ;;  %v6584_v17 = vpack.c.bf16 %v6104_v51, %v6098_v1  ;;  %5103 = vmatmul.bf16.vlgmr.msra.gmra.mxu1 %v8332_v41  ;;  %v5234_v13 = vld [vmem:[#allocation17 + $0x120] sm:$0xff] }
 0x3b1   :  { %v4011_v8 = vcvt.s32.f32 %v3243_v28  ;;  %v4017_v40 = vcvt.s32.f32 %v3249_v25  ;;  %v5510_v56 = vunpack.c.0.s8 %v5240_v61  ;;  %6784 = vmatpush.bf16.msrb.mxu0 %v6524_v54  ;;  %v5516_v4 = vunpack.c.1.s8 %v5240_v61  ;;  %v8582_v28 = vld [vmem:[#allocation14 + $0x298] sm:$0xff] }
 0x3b2   :  { %v4311_v58 = vpack.c.bf16 %v3729_v30, %v3723_v46  ;;  %v5966_v18 = vcvt.s32.f32 %v5390_v50  ;;  %v5972_v10 = vcvt.s32.f32 %v5396_v27  ;;  %6795 = vmatpush.bf16.msrb.mxu1 %v6584_v17  ;;  %v2943_v36 = vunpack.c.2.s8 %v2487_v12  ;;  %v2553_v50 = vld [vmem:[#allocation14 + $0x4d8] sm:$0xff] }
 0x3b3   :  { %v4455_v48 = vpack.c.bf16 %v4017_v40, %v4011_v8  ;;  %v6086_v49 = vcvt.s32.f32 %v5510_v56  ;;  %v2949_v37 = vunpack.c.3.s8 %v2487_v12  ;;  %v6092_v29 = vcvt.s32.f32 %v5516_v4  ;;  %v5198_v8 = vld [vmem:[#allocation17] sm:$0xff] }
 0x3b4   :  { %5070 = vmatpush.bf16.msrb.mxu3 %v4311_v58  ;;  %v6518_v19 = vpack.c.bf16 %v5972_v10, %v5966_v18  ;;  %v3231_v41 = vunpack.c.2.s8 %v2559_v55  ;;  %v3237_v20 = vunpack.c.3.s8 %v2559_v55  ;;  %v3711_v23 = vcvt.s32.f32 %v2943_v36  ;;  %v8586_v18 = vld [vmem:[#allocation17 + $0xf0] sm:$0xff] }
 0x3b5   :  { %5109 = vmatpush.bf16.msra.mxu2 %v4455_v48  ;;  %v3717_v24 = vcvt.s32.f32 %v2949_v37  ;;  %v5378_v45 = vunpack.c.2.s8 %v5204_v53  ;;  %v5384_v44 = vunpack.c.3.s8 %v5204_v53  ;;  %v6578_v33 = vpack.c.bf16 %v6092_v29, %v6086_v49 }
 0x3b6   :  { %6785 = vmatpush.bf16.msrb.mxu0 %v6518_v19  ;;  %v3999_v61 = vcvt.s32.f32 %v3231_v41  ;;  %v4005_v22 = vcvt.s32.f32 %v3237_v20  ;;  %v5498_v16 = vunpack.c.2.s8 %v5234_v13  ;;  %v5504_v62 = vunpack.c.3.s8 %v5234_v13 }
 0x3b7   :  { %v4305_v26 = vpack.c.bf16 %v3717_v24, %v3711_v23  ;;  %v5954_v52 = vcvt.s32.f32 %v5378_v45  ;;  %v5960_v5 = vcvt.s32.f32 %v5384_v44  ;;  %6796 = vmatpush.bf16.msrb.mxu1 %v6578_v33  ;;  %v2931_v42 = vunpack.c.0.s8 %v2487_v12  ;;  %v8589_v23 = vpop.f32.mrf.mxu1 }
 0x3b8   :  { %v4449_v31 = vpack.c.bf16 %v4005_v22, %v3999_v61  ;;  %v6074_v47 = vcvt.s32.f32 %v5498_v16  ;;  %v2937_v38 = vunpack.c.1.s8 %v2487_v12  ;;  %v6080_v6 = vcvt.s32.f32 %v5504_v62  ;;  %v4937_v61 = vpop.f32.mrf.mxu0 }
 0x3b9   :  { %5071 = vmatpush.bf16.msrb.mxu3 %v4305_v26  ;;  %v6512_v21 = vpack.c.bf16 %v5960_v5, %v5954_v52  ;;  %v3219_v39 = vunpack.c.0.s8 %v2559_v55  ;;  %v3225_v57 = vunpack.c.1.s8 %v2559_v55  ;;  %v3699_v1 = vcvt.s32.f32 %v2931_v42  ;;  %v8597_v52 = vld [vmem:[%s9289_s8] sm:$0x3f] }
 0x3ba   :  { %5110 = vmatpush.bf16.msra.mxu2 %v4449_v31  ;;  %v3705_v63 = vcvt.s32.f32 %v2937_v38  ;;  %v5366_v51 = vunpack.c.0.s8 %v5204_v53  ;;  %v5372_v46 = vunpack.c.1.s8 %v5204_v53  ;;  %v6572_v25 = vpack.c.bf16 %v6080_v6, %v6074_v47  ;;  %v8600_v47 = vld [vmem:[#allocation16] sm:$0x3f] }
 0x3bb   :  { %6786 = vmatpush.bf16.msrb.mxu0 %v6512_v21  ;;  %v3987_v11 = vcvt.s32.f32 %v3219_v39  ;;  %v3993_v54 = vcvt.s32.f32 %v3225_v57  ;;  %v5486_v30 = vunpack.c.0.s8 %v5234_v13  ;;  %v5492_v17 = vunpack.c.1.s8 %v5234_v13 }
 0x3bc   :  { %v4299_v27 = vpack.c.bf16 %v3705_v63, %v3699_v1  ;;  %v5942_v12 = vcvt.s32.f32 %v5366_v51  ;;  %v5948_v32 = vcvt.s32.f32 %v5372_v46  ;;  %6797 = vmatpush.bf16.msrb.mxu1 %v6572_v25  ;;  %v2919_v55 = vunpack.c.2.s8 %v8582_v28 }
 0x3bd   :  { %v4443_v40 = vpack.c.bf16 %v3993_v54, %v3987_v11  ;;  %v6062_v56 = vcvt.s32.f32 %v5486_v30  ;;  %v2925_v58 = vunpack.c.3.s8 %v8582_v28  ;;  %v6068_v4 = vcvt.s32.f32 %v5492_v17  ;;  %v2475_v54 = vld [vmem:[#allocation14 + $0x268] sm:$0xff] }
 0x3be   :  { %5072 = vmatpush.bf16.msrb.mxu3 %v4299_v27  ;;  %v6506_v10 = vpack.c.bf16 %v5948_v32, %v5942_v12  ;;  %v3207_v53 = vunpack.c.2.s8 %v2553_v50  ;;  %v3213_v48 = vunpack.c.3.s8 %v2553_v50  ;;  %v3687_v49 = vcvt.s32.f32 %v2919_v55  ;;  %v2547_v12 = vld [vmem:[#allocation14 + $0x4a8] sm:$0xff] }
 0x3bf   :  { %5111 = vmatpush.bf16.msra.mxu2 %v4443_v40  ;;  %v3693_v36 = vcvt.s32.f32 %v2925_v58  ;;  %v5354_v37 = vunpack.c.2.s8 %v5198_v8  ;;  %v5360_v13 = vunpack.c.3.s8 %v5198_v8  ;;  %v6566_v19 = vpack.c.bf16 %v6068_v4, %v6062_v56  ;;  %v8611_v40 = vpop.f32.mrf.mxu3  ;;  %v4950_v4 = vpop.f32.mrf.mxu1 }
 0x3c0   :  { %6787 = vmatpush.bf16.msrb.mxu0 %v6506_v10  ;;  %v3975_v29 = vcvt.s32.f32 %v3207_v53  ;;  %v3981_v41 = vcvt.s32.f32 %v3213_v48  ;;  %v5474_v20 = vunpack.c.2.s8 %v8586_v18  ;;  %v5480_v33 = vunpack.c.3.s8 %v8586_v18  ;;  %v5258_v4 = vld [vmem:[#allocation17 + $0x1e0] sm:$0xff] }
 0x3c1   :  { %v4293_v24 = vpack.c.bf16 %v3693_v36, %v3687_v49  ;;  %v5930_v45 = vcvt.s32.f32 %v5354_v37  ;;  %v5936_v44 = vcvt.s32.f32 %v5360_v13  ;;  %6798 = vmatpush.bf16.msrb.mxu1 %v6566_v19  ;;  %v4819_v26 = vadd.f32 %v8573_v60, %v8570_v59 }
 0x3c2   :  { %v4437_v22 = vpack.c.bf16 %v3981_v41, %v3975_v29  ;;  %v6050_v16 = vcvt.s32.f32 %v5474_v20  ;;  %v5138_v5 = vperm.slane %v8597_v52, 2  ;;  %v6056_v31 = vcvt.s32.f32 %v5480_v33 }
 0x3c3   :  { %5073 = vmatpush.bf16.msrb.mxu3 %v4293_v24  ;;  %v6500_v62 = vpack.c.bf16 %v5936_v44, %v5930_v45  ;;  %v5158_v42 = vperm.slane %v8600_v47, 2  ;;  %v8605_v38 = vadd.f32 %v8575_v9, %v8559_v0  ;;  %v2907_v60 = vunpack.c.0.s8 %v8582_v28 }
 0x3c4   :  { %5112 = vmatpush.bf16.msra.mxu2 %v4437_v22  ;;  %v5150_v59 = vmul.f32 %v5138_v5, %v4819_v26  ;;  %v2913_v21 = vunpack.c.1.s8 %v8582_v28  ;;  %v3195_v6 = vunpack.c.0.s8 %v2553_v50  ;;  %v6560_v39 = vpack.c.bf16 %v6056_v31, %v6050_v16 }
 0x3c5   :  { %6788 = vmatpush.bf16.msrb.mxu0 %v6500_v62  ;;  %v3201_v57 = vunpack.c.1.s8 %v2553_v50  ;;  %v5342_v1 = vunpack.c.0.s8 %v5198_v8  ;;  %v5348_v63 = vunpack.c.1.s8 %v5198_v8  ;;  %v3675_v46 = vcvt.s32.f32 %v2907_v60  ;;  %v5222_v50 = vld [vmem:[#allocation17 + $0xc0] sm:$0xff]  ;;  %v8613_v8 = vpop.f32.mrf.mxu2  ;;  %v2589_v62 = vld [vmem:[#allocation14 + $0x5f8] sm:$0xff] }
 0x3c6   :  { %v5170_v51 = vadd.f32 %v5158_v42, %v5150_v59  ;;  %v3681_v25 = vcvt.s32.f32 %v2913_v21  ;;  %v3963_v11 = vcvt.s32.f32 %v3195_v6  ;;  %6799 = vmatpush.bf16.msrb.mxu1 %v6560_v39  ;;  %v5462_v27 = vunpack.c.0.s8 %v8586_v18  ;;  %v5264_v21 = vld [vmem:[#allocation17 + $0x210] sm:$0xff] }
 0x3c7   :  { %v3969_v0 = vcvt.s32.f32 %v3201_v57  ;;  %v5918_v9 = vcvt.s32.f32 %v5342_v1  ;;  %v5924_v30 = vcvt.s32.f32 %v5348_v63  ;;  %v5468_v17 = vunpack.c.1.s8 %v8586_v18  ;;  %v4872_v63 = vpop.f32.mrf.mxu3 }
 0x3c8   :  { %vm5176_vm14 = vcmp.ge.f32.partialorder %v5170_v51, 0.0  ;;  %v5182_v28 = vmul.f32 0.01, %v5170_v51  ;;  %v4287_v32 = vpack.c.bf16 %v3681_v25, %v3675_v46  ;;  %v6038_v58 = vcvt.s32.f32 %v5462_v27 }
 0x3c9   :  { %v4431_v56 = vpack.c.bf16 %v3969_v0, %v3963_v11  ;;  %v6494_v55 = vpack.c.bf16 %v5924_v30, %v5918_v9  ;;  %v2895_v10 = vunpack.c.2.s8 %v2475_v54  ;;  %v6044_v48 = vcvt.s32.f32 %v5468_v17 }
 0x3ca   :  { %v5188_v53 = vsel %vm5176_vm14, %v5170_v51, %v5182_v28  ;;  %5074 = vmatpush.bf16.msrb.mxu3 %v4287_v32  ;;  %v2901_v49 = vunpack.c.3.s8 %v2475_v54  ;;  %v3183_v36 = vunpack.c.2.s8 %v2547_v12  ;;  %v3189_v13 = vunpack.c.3.s8 %v2547_v12 }
 0x3cb   :  { %v8615_v37 = vpack.c.bf16 %v5188_v53, %v5188_v53  ;;  %5113 = vmatpush.bf16.msra.mxu2 %v4431_v56  ;;  %6789 = vmatpush.bf16.msrb.mxu0 %v6494_v55  ;;  %v3663_v18 = vcvt.s32.f32 %v2895_v10  ;;  %v5450_v19 = vunpack.c.2.s8 %v5222_v50  ;;  %v6554_v29 = vpack.c.bf16 %v6044_v48, %v6038_v58  ;;  %v2583_v56 = vld [vmem:[#allocation14 + $0x5c8] sm:$0xff] }
 0x3cc   :  { %v3669_v41 = vcvt.s32.f32 %v2901_v49  ;;  %v3951_v20 = vcvt.s32.f32 %v3183_v36  ;;  %v5456_v24 = vunpack.c.3.s8 %v5222_v50  ;;  %v3957_v45 = vcvt.s32.f32 %v3189_v13 }
 0x3cd   :  { %v6026_v44 = vcvt.s32.f32 %v5450_v19  ;;  %v2883_v33 = vunpack.c.0.s8 %v2475_v54  ;;  %v2889_v61 = vunpack.c.1.s8 %v2475_v54  ;;  %6800 = vmatpush.bf16.msrb.mxu1 %v6554_v29  ;;  %v3171_v26 = vunpack.c.0.s8 %v2547_v12  ;;  %v4911_v51 = vpop.f32.mrf.mxu2 }
 0x3ce   :  { %6790 = vmatmul.bf16.vlgmr.msrb.gmra.mxu0 %v8496_v43  ;;  %v4281_v22 = vpack.c.bf16 %v3669_v41, %v3663_v18  ;;  %v6032_v16 = vcvt.s32.f32 %v5456_v24  ;;  %v3177_v5 = vunpack.c.1.s8 %v2547_v12  ;;  %v4425_v31 = vpack.c.bf16 %v3957_v45, %v3951_v20 }
 0x3cf   :  { %v3651_v42 = vcvt.s32.f32 %v2883_v33  ;;  %v3657_v59 = vcvt.s32.f32 %v2889_v61  ;;  %v5438_v60 = vunpack.c.0.s8 %v5222_v50  ;;  %v3939_v39 = vcvt.s32.f32 %v3171_v26  ;;  %v2577_v26 = vld [vmem:[#allocation14 + $0x598] sm:$0xff] }
 0x3d0   :  { %5075 = vmatpush.bf16.msrb.mxu3 %v4281_v22  ;;  %v6548_v6 = vpack.c.bf16 %v6032_v16, %v6026_v44  ;;  %v3945_v57 = vcvt.s32.f32 %v3177_v5  ;;  %v5444_v1 = vunpack.c.1.s8 %v5222_v50  ;;  %5114 = vmatpush.bf16.msra.mxu2 %v4425_v31  ;;  %v3351_v11 = vunpack.c.2.s8 %v2589_v62  ;;  %v8618_v44 = vpop.f32.mrf.mxu0 }
 0x3d1   :  { %v4275_v46 = vpack.c.bf16 %v3657_v59, %v3651_v42  ;;  %v6014_v25 = vcvt.s32.f32 %v5438_v60  ;;  %v3357_v54 = vunpack.c.3.s8 %v2589_v62  ;;  %v5618_v30 = vunpack.c.2.s8 %v5264_v21  ;;  %v5252_v59 = vld [vmem:[#allocation17 + $0x1b0] sm:$0xff] }
 0x3d2   :  { %6801 = vmatpush.bf16.msrb.mxu1 %v6548_v6  ;;  %v4419_v0 = vpack.c.bf16 %v3945_v57, %v3939_v39  ;;  %v6020_v9 = vcvt.s32.f32 %v5444_v1  ;;  %v5624_v27 = vunpack.c.3.s8 %v5264_v21  ;;  %v4119_v12 = vcvt.s32.f32 %v3351_v11 }
 0x3d3   :  { %v4125_v28 = vcvt.s32.f32 %v3357_v54  ;;  %v3339_v32 = vunpack.c.0.s8 %v2589_v62  ;;  %v3345_v17 = vunpack.c.1.s8 %v2589_v62  ;;  %v6194_v50 = vcvt.s32.f32 %v5618_v30 }
 0x3d4   :  { %5076 = vmatpush.bf16.msrb.mxu3 %v4275_v46  ;;  %v6542_v55 = vpack.c.bf16 %v6020_v9, %v6014_v25  ;;  %v6200_v58 = vcvt.s32.f32 %v5624_v27  ;;  %v5606_v10 = vunpack.c.0.s8 %v5264_v21  ;;  %5115 = vmatpush.bf16.msra.mxu2 %v4419_v0  ;;  %v5612_v36 = vunpack.c.1.s8 %v5264_v21  ;;  %v2571_v0 = vld [vmem:[#allocation14 + $0x568] sm:$0xff] }
 0x3d5   :  { %v4509_v53 = vpack.c.bf16 %v4125_v28, %v4119_v12  ;;  %v4107_v48 = vcvt.s32.f32 %v3339_v32  ;;  %v4113_v49 = vcvt.s32.f32 %v3345_v17  ;;  %v3327_v19 = vunpack.c.2.s8 %v2583_v56 }
 0x3d6   :  { %6802 = vmatpush.bf16.msrb.mxu1 %v6542_v55  ;;  %v6632_v18 = vpack.c.bf16 %v6200_v58, %v6194_v50  ;;  %v6182_v13 = vcvt.s32.f32 %v5606_v10  ;;  %v3333_v29 = vunpack.c.3.s8 %v2583_v56  ;;  %v6188_v20 = vcvt.s32.f32 %v5612_v36  ;;  %v5246_v50 = vld [vmem:[#allocation17 + $0x180] sm:$0xff] }
 0x3d7   :  { %v4503_v41 = vpack.c.bf16 %v4113_v49, %v4107_v48  ;;  %v5594_v24 = vunpack.c.2.s8 %v5258_v4  ;;  %v5600_v45 = vunpack.c.3.s8 %v5258_v4  ;;  %5077 = vmatmul.bf16.vlgmr.msrb.gmra.mxu3 %v8294_v34  ;;  %v4095_v33 = vcvt.s32.f32 %v3327_v19  ;;  %5116 = vmatmul.bf16.vlgmr.msra.gmra.mxu2 %v8354_v35 }
 0x3d8   :  { %5121 = vmatpush.bf16.msra.mxu3 %v4509_v53  ;;  %6808 = vmatpush.bf16.msrb.mxu2 %v6632_v18  ;;  %v4101_v61 = vcvt.s32.f32 %v3333_v29  ;;  %v8623_v22 = vadd.f32 %v8589_v23, %v8580_v3  ;;  %v3315_v16 = vunpack.c.0.s8 %v2583_v56  ;;  %v6626_v5 = vpack.c.bf16 %v6188_v20, %v6182_v13  ;;  %v4989_v58 = vpop.f32.mrf.mxu0 }
 0x3d9   :  { %6803 = vmatmul.bf16.vlgmr.msrb.gmra.mxu1 %v8548_v15  ;;  %v6170_v62 = vcvt.s32.f32 %v5594_v24  ;;  %v6176_v31 = vcvt.s32.f32 %v5600_v45  ;;  %v3321_v42 = vunpack.c.1.s8 %v2583_v56  ;;  %v5582_v34 = vunpack.c.0.s8 %v5258_v4  ;;  %v8629_v9 = vpop.f32.mrf.mxu1  ;;  %v5288_v45 = vld [vmem:[#allocation17 + $0x2d0] sm:$0xff] }
 0x3da   :  { %v4497_v60 = vpack.c.bf16 %v4101_v61, %v4095_v33  ;;  %v4083_v21 = vcvt.s32.f32 %v3315_v16  ;;  %v5588_v6 = vunpack.c.1.s8 %v5258_v4  ;;  %v3303_v3 = vunpack.c.2.s8 %v2577_v26 }
 0x3db   :  { %v6620_v39 = vpack.c.bf16 %v6176_v31, %v6170_v62  ;;  %v4089_v57 = vcvt.s32.f32 %v3321_v42  ;;  %v3309_v23 = vunpack.c.3.s8 %v2577_v26  ;;  %v6158_v1 = vcvt.s32.f32 %v5582_v34 }
 0x3dc   :  { %5122 = vmatpush.bf16.msra.mxu3 %v4503_v41  ;;  %6809 = vmatpush.bf16.msrb.mxu2 %v6626_v5  ;;  %v6164_v63 = vcvt.s32.f32 %v5588_v6  ;;  %v5570_v35 = vunpack.c.2.s8 %v5252_v59  ;;  %v5576_v51 = vunpack.c.3.s8 %v5252_v59  ;;  %v4071_v25 = vcvt.s32.f32 %v3303_v3 }
 0x3dd   :  { %v4491_v46 = vpack.c.bf16 %v4089_v57, %v4083_v21  ;;  %v4077_v11 = vcvt.s32.f32 %v3309_v23  ;;  %v4871_v54 = vadd.f32 %v8611_v40, %v8605_v38  ;;  %v3291_v28 = vunpack.c.0.s8 %v2577_v26 }
 0x3de   :  { %v6614_v30 = vpack.c.bf16 %v6164_v63, %v6158_v1  ;;  %v6146_v27 = vcvt.s32.f32 %v5570_v35  ;;  %v6152_v12 = vcvt.s32.f32 %v5576_v51  ;;  %v3297_v56 = vunpack.c.1.s8 %v2577_v26  ;;  %v5217_v26 = vld [vmem:[#allocation17 + $0x98] sm:$0xff] }
 0x3df   :  { %v4485_v32 = vpack.c.bf16 %v4077_v11, %v4071_v25  ;;  %v4884_v17 = vadd.f32 %v8561_v7, %v4871_v54  ;;  %v5558_v55 = vunpack.c.0.s8 %v5252_v59  ;;  %v4059_v4 = vcvt.s32.f32 %v3291_v28  ;;  %v5282_v25 = vld [vmem:[#allocation17 + $0x2a0] sm:$0xff] }
 0x3e0   :  { %5123 = vmatpush.bf16.msra.mxu3 %v4497_v60  ;;  %6810 = vmatpush.bf16.msrb.mxu2 %v6620_v39  ;;  %v6608_v10 = vpack.c.bf16 %v6152_v12, %v6146_v27  ;;  %v5564_v53 = vunpack.c.1.s8 %v5252_v59  ;;  %v3279_v38 = vunpack.c.2.s8 %v2571_v0  ;;  %v4065_v48 = vcvt.s32.f32 %v3297_v56  ;;  %v8641_v59 = vpop.f32.mrf.mxu3  ;;  %v5211_v27 = vld [vmem:[#allocation17 + $0x68] sm:$0xff] }
 0x3e1   :  { %v4897_v40 = vadd.f32 %v8567_v2, %v4884_v17  ;;  %v6134_v49 = vcvt.s32.f32 %v5558_v55  ;;  %v3285_v36 = vunpack.c.3.s8 %v2571_v0  ;;  %v5546_v19 = vunpack.c.2.s8 %v5246_v50  ;;  %v5002_v39 = vpop.f32.mrf.mxu1 }
 0x3e2   :  { %v6140_v18 = vcvt.s32.f32 %v5564_v53  ;;  %v8633_v13 = vcvt.s32.f32 %v3279_v38  ;;  %v5552_v29 = vunpack.c.3.s8 %v5246_v50  ;;  %v4479_v41 = vpack.c.bf16 %v4065_v48, %v4059_v4 }
 0x3e3   :  { %v8636_v7 = vadd.f32 %v8613_v8, %v4897_v40  ;;  %v4053_v20 = vcvt.s32.f32 %v3285_v36  ;;  %v3267_v24 = vunpack.c.0.s8 %v2571_v0  ;;  %v6122_v61 = vcvt.s32.f32 %v5546_v19  ;;  %v8643_v8 = vpop.f32.mrf.mxu2 }
 0x3e4   :  { %5124 = vmatpush.bf16.msra.mxu3 %v4491_v46  ;;  %6811 = vmatpush.bf16.msrb.mxu2 %v6614_v30  ;;  %v6602_v33 = vpack.c.bf16 %v6140_v18, %v6134_v49  ;;  %v6128_v2 = vcvt.s32.f32 %v5552_v29  ;;  %v3273_v16 = vunpack.c.1.s8 %v2571_v0  ;;  %v5534_v31 = vunpack.c.0.s8 %v5246_v50  ;;  %v5276_v18 = vld [vmem:[#allocation17 + $0x270] sm:$0xff] }
 0x3e5   :  { %v4473_v5 = vpack.c.bf16 %v4053_v20, %v8633_v13  ;;  %v8639_v62 = vcvt.s32.f32 %v3267_v24  ;;  %v5540_v42 = vunpack.c.1.s8 %v5246_v50  ;;  %v5714_v34 = vunpack.c.2.s8 %v5288_v45 }
 0x3e6   :  { %v6596_v60 = vpack.c.bf16 %v6128_v2, %v6122_v61  ;;  %v8645_v21 = vcvt.s32.f32 %v3273_v16  ;;  %v5720_v6 = vunpack.c.3.s8 %v5288_v45  ;;  %v8647_v57 = vcvt.s32.f32 %v5534_v31 }
 0x3e7   :  { %v8649_v3 = vcvt.s32.f32 %v5540_v42  ;;  %v5427_v23 = vunpack.c.2.s8 %v5217_v26  ;;  %v5433_v1 = vunpack.c.3.s8 %v5217_v26  ;;  %v6290_v35 = vcvt.s32.f32 %v5714_v34 }
 0x3e8   :  { %5125 = vmatpush.bf16.msra.mxu3 %v4485_v32  ;;  %6812 = vmatpush.bf16.msrb.mxu2 %v6608_v10  ;;  %v4467_v63 = vpack.c.bf16 %v8645_v21, %v8639_v62  ;;  %v6296_v51 = vcvt.s32.f32 %v5720_v6  ;;  %v5702_v46 = vunpack.c.0.s8 %v5288_v45  ;;  %v5708_v30 = vunpack.c.1.s8 %v5288_v45  ;;  %v4924_v13 = vpop.f32.mrf.mxu3  ;;  %v5205_v45 = vld [vmem:[#allocation17 + $0x38] sm:$0xff] }
 0x3e9   :  { %v6590_v11 = vpack.c.bf16 %v8649_v3, %v8647_v57  ;;  %v6003_v54 = vcvt.s32.f32 %v5427_v23  ;;  %v6009_v0 = vcvt.s32.f32 %v5433_v1  ;;  %v5415_v32 = vunpack.c.0.s8 %v5217_v26 }
 0x3ea   :  { %v6680_v12 = vpack.c.bf16 %v6296_v51, %v6290_v35  ;;  %v8655_v28 = vcvt.s32.f32 %v5702_v46  ;;  %v5421_v17 = vunpack.c.1.s8 %v5217_v26  ;;  %v8657_v55 = vcvt.s32.f32 %v5708_v30  ;;  %v5270_v46 = vld [vmem:[#allocation17 + $0x240] sm:$0xff] }
 0x3eb   :  { %v6537_v56 = vpack.c.bf16 %v6009_v0, %v6003_v54  ;;  %v5690_v50 = vunpack.c.2.s8 %v5282_v25  ;;  %v5696_v58 = vunpack.c.3.s8 %v5282_v25  ;;  %v8659_v10 = vcvt.s32.f32 %v5415_v32  ;;  %v4963_v19 = vpop.f32.mrf.mxu2 }
 0x3ec   :  { %5126 = vmatpush.bf16.msra.mxu3 %v4479_v41  ;;  %6813 = vmatpush.bf16.msrb.mxu2 %v6602_v33  ;;  %v8661_v4 = vcvt.s32.f32 %v5421_v17  ;;  %v5403_v53 = vunpack.c.2.s8 %v5211_v27  ;;  %v5409_v38 = vunpack.c.3.s8 %v5211_v27  ;;  %v6674_v40 = vpack.c.bf16 %v8657_v55, %v8655_v28 }
 0x3ed   :  { %v8665_v48 = vcvt.s32.f32 %v5690_v50  ;;  %v8667_v49 = vcvt.s32.f32 %v5696_v58  ;;  %v5678_v36 = vunpack.c.0.s8 %v5282_v25  ;;  %v5684_v24 = vunpack.c.1.s8 %v5282_v25 }
 0x3ee   :  { %v6531_v29 = vpack.c.bf16 %v8661_v4, %v8659_v10  ;;  %v8671_v41 = vcvt.s32.f32 %v5403_v53  ;;  %v8673_v20 = vcvt.s32.f32 %v5409_v38  ;;  %v5391_v2 = vunpack.c.0.s8 %v5211_v27  ;;  %v5312_v38 = vld [vmem:[#allocation17 + $0x390] sm:$0xff] }
 0x3ef   :  { %v6668_v33 = vpack.c.bf16 %v8667_v49, %v8665_v48  ;;  %v8677_v61 = vcvt.s32.f32 %v5678_v36  ;;  %v5397_v16 = vunpack.c.1.s8 %v5211_v27  ;;  %v8681_v62 = vcvt.s32.f32 %v5684_v24 }
 0x3f0   :  { %5127 = vmatpush.bf16.msra.mxu3 %v4473_v5  ;;  %6814 = vmatpush.bf16.msrb.mxu2 %v6596_v60  ;;  %v6525_v26 = vpack.c.bf16 %v8673_v20, %v8671_v41  ;;  %v5666_v31 = vunpack.c.2.s8 %v5276_v18  ;;  %v5672_v42 = vunpack.c.3.s8 %v5276_v18  ;;  %v8683_v21 = vcvt.s32.f32 %v5391_v2  ;;  %v5241_v2 = vld [vmem:[#allocation17 + $0x158] sm:$0xff] }
 0x3f1   :  { %v8685_v34 = vcvt.s32.f32 %v5397_v16  ;;  %v5379_v5 = vunpack.c.2.s8 %v5205_v45  ;;  %v5385_v6 = vunpack.c.3.s8 %v5205_v45  ;;  %v6662_v39 = vpack.c.bf16 %v8681_v62, %v8677_v61  ;;  %v5313_v16 = vld [vmem:[#allocation17 + $0x398] sm:$0xff] }
 0x3f2   :  { %v8689_v57 = vcvt.s32.f32 %v5666_v31  ;;  %v8691_v3 = vcvt.s32.f32 %v5672_v42  ;;  %v4923_v60 = vadd.f32 %v8641_v59, %v8636_v7  ;;  %v5139_v51 = vperm.slane %v8597_v52, 3 }
 0x3f3   :  { %v6519_v23 = vpack.c.bf16 %v8685_v34, %v8683_v21  ;;  %v8697_v1 = vcvt.s32.f32 %v5379_v5  ;;  %v8699_v35 = vcvt.s32.f32 %v5385_v6  ;;  %v5159_v54 = vperm.slane %v8600_v47, 3 }
 0x3f4   :  { %5128 = vmatpush.bf16.msra.mxu3 %v4467_v63  ;;  %6815 = vmatpush.bf16.msrb.mxu2 %v6590_v11  ;;  %v6656_v25 = vpack.c.bf16 %v8691_v3, %v8689_v57  ;;  %v8707_v7 = vadd.f32 %v8643_v8, %v8623_v22  ;;  %v5654_v59 = vunpack.c.0.s8 %v5276_v18  ;;  %v5199_v63 = vld [vmem:[#allocation17 + $0x8] sm:$0xff]  ;;  %v5151_v30 = vmul.f32 %v5139_v51, %v4923_v60 }
 0x3f5   :  { %v6513_v0 = vpack.c.bf16 %v8699_v35, %v8697_v1  ;;  %v5660_v52 = vunpack.c.1.s8 %v5276_v18  ;;  %v5367_v27 = vunpack.c.0.s8 %v5205_v45  ;;  %v5642_v28 = vunpack.c.2.s8 %v5270_v46 }
 0x3f6   :  { %v8712_v11 = vcvt.s32.f32 %v5654_v59  ;;  %v5648_v47 = vunpack.c.3.s8 %v5270_v46  ;;  %v5171_v22 = vadd.f32 %v5159_v54, %v5151_v30  ;;  %v5355_v17 = vunpack.c.2.s8 %v5199_v63 }
 0x3f7   :  { %5129 = vmatmul.bf16.vlgmr.msra.gmra.mxu3 %v8381_v14  ;;  %6816 = vmatmul.bf16.vlgmr.msrb.gmra.mxu2 %v8615_v37  ;;  %v8715_v8 = vcvt.s32.f32 %v5660_v52  ;;  %v8717_v32 = vcvt.s32.f32 %v5367_v27  ;;  %v8723_v50 = vcvt.s32.f32 %v5642_v28  ;;  %v5361_v58 = vunpack.c.3.s8 %v5199_v63 }
 0x3f8   :  { %6821 = vmatpush.bf16.msrb.mxu3 %v6680_v12  ;;  %6860 = vmatpush.bf16.msra.mxu2 %v6537_v56  ;;  %v5373_v12 = vunpack.c.1.s8 %v5205_v45  ;;  %v8719_v56 = vpop.f32.mrf.mxu0  ;;  %v8725_v14 = vcvt.s32.f32 %v5648_v47  ;;  %vm5177_vm15 = vcmp.ge.f32.partialorder %v5171_v22, 0.0  ;;  %v5183_v10 = vmul.f32 0.01, %v5171_v22 }
 0x3f9   :  { %v6650_v4 = vpack.c.bf16 %v8715_v8, %v8712_v11  ;;  %v8729_v53 = vcvt.s32.f32 %v5355_v17  ;;  %v8735_v18 = vcvt.s32.f32 %v5361_v58  ;;  %v5630_v13 = vunpack.c.0.s8 %v5270_v46 }
 0x3fa   :  { %v8721_v55 = vcvt.s32.f32 %v5373_v12  ;;  %v5189_v19 = vsel %vm5177_vm15, %v5171_v22, %v5183_v10  ;;  %v5636_v24 = vunpack.c.1.s8 %v5270_v46  ;;  %v5349_v45 = vunpack.c.1.s8 %v5199_v63  ;;  %v5306_v10 = vld [vmem:[#allocation17 + $0x360] sm:$0xff] }
 0x3fb   :  { %v8740_v31 = vpack.c.bf16 %v5189_v19, %v5189_v19  ;;  %v6501_v42 = vpack.c.bf16 %v8735_v18, %v8729_v53  ;;  %v8744_v5 = vcvt.s32.f32 %v5630_v13  ;;  %v5810_v6 = vunpack.c.2.s8 %v5312_v38  ;;  %v5235_v19 = vld [vmem:[#allocation17 + $0x128] sm:$0xff] }
 0x3fc   :  { %6822 = vmatpush.bf16.msrb.mxu3 %v6674_v40  ;;  %6861 = vmatpush.bf16.msra.mxu2 %v6531_v29  ;;  %v6507_v36 = vpack.c.bf16 %v8721_v55, %v8717_v32  ;;  %v6644_v40 = vpack.c.bf16 %v8725_v14, %v8723_v50  ;;  %v5343_v29 = vunpack.c.0.s8 %v5199_v63  ;;  %v8749_v60 = vcvt.s32.f32 %v5636_v24 }
 0x3fd   :  { %v8753_v46 = vcvt.s32.f32 %v5349_v45  ;;  %v5816_v48 = vunpack.c.3.s8 %v5312_v38  ;;  %v6386_v49 = vcvt.s32.f32 %v5810_v6  ;;  %v5529_v54 = vunpack.c.3.s8 %v5241_v2 }
 0x3fe   :  { %v8751_v51 = vcvt.s32.f32 %v5343_v29  ;;  %v5811_v59 = vunpack.c.2.s8 %v5313_v16  ;;  %v6638_v63 = vpack.c.bf16 %v8749_v60, %v8744_v5  ;;  %v5817_v41 = vunpack.c.3.s8 %v5313_v16 }
 0x3ff   :  { %v6392_v52 = vcvt.s32.f32 %v5816_v48  ;;  %v8764_v27 = vcvt.s32.f32 %v5529_v54  ;;  %v5798_v28 = vunpack.c.0.s8 %v5312_v38  ;;  %v5804_v17 = vunpack.c.1.s8 %v5312_v38 }
 0x400   :  { %6823 = vmatpush.bf16.msrb.mxu3 %v6668_v33  ;;  %6862 = vmatpush.bf16.msra.mxu2 %v6525_v26  ;;  %v5523_v33 = vunpack.c.2.s8 %v5241_v2  ;;  %v6495_v30 = vpack.c.bf16 %v8753_v46, %v8751_v51  ;;  %v5041_v20 = vpop.f32.mrf.mxu0  ;;  %v8766_v12 = vcvt.s32.f32 %v5811_v59  ;;  %v8771_v22 = vcvt.s32.f32 %v5817_v41 }
 0x401   :  { %v6728_v47 = vpack.c.bf16 %v6392_v52, %v6386_v49  ;;  %v5511_v58 = vunpack.c.0.s8 %v5241_v2  ;;  %v6374_v62 = vcvt.s32.f32 %v5798_v28  ;;  %v5799_v13 = vunpack.c.0.s8 %v5313_v16 }
 0x402   :  { %v8762_v26 = vcvt.s32.f32 %v5523_v33  ;;  %v6729_v24 = vpack.c.bf16 %v8771_v22, %v8766_v12  ;;  %v6380_v29 = vcvt.s32.f32 %v5804_v17  ;;  %v5805_v34 = vunpack.c.1.s8 %v5313_v16  ;;  %v5300_v17 = vld [vmem:[#allocation17 + $0x330] sm:$0xff] }
 0x403   :  { %6834 = vmatpush.bf16.msra.mxu0 %v6728_v47  ;;  %v8777_v21 = vcvt.s32.f32 %v5511_v58  ;;  %v8784_v45 = vcvt.s32.f32 %v5799_v13  ;;  %v5792_v6 = vunpack.c.3.s8 %v5306_v10  ;;  %v5499_v16 = vunpack.c.2.s8 %v5235_v19 }
 0x404   :  { %6824 = vmatpush.bf16.msrb.mxu3 %v6662_v39  ;;  %6863 = vmatpush.bf16.msra.mxu2 %v6519_v23  ;;  %v6585_v61 = vpack.c.bf16 %v8764_v27, %v8762_v26  ;;  %v5517_v39 = vunpack.c.1.s8 %v5241_v2  ;;  %v5307_v23 = vld [vmem:[#allocation17 + $0x368] sm:$0xff]  ;;  %v5786_v2 = vunpack.c.2.s8 %v5306_v10  ;;  %v5052_v48 = vpop.f32.mrf.mxu1  ;;  %v6722_v49 = vpack.c.bf16 %v6380_v29, %v6374_v62 }
 0x405   :  { %v8789_v33 = vcvt.s32.f32 %v5805_v34  ;;  %v5505_v54 = vunpack.c.3.s8 %v5235_v19  ;;  %v5787_v59 = vunpack.c.2.s8 %v5307_v23  ;;  %v8795_v41 = vcvt.s32.f32 %v5499_v16  ;;  %v5223_v26 = vld [vmem:[#allocation17 + $0xc8] sm:$0xff] }
 0x406   :  { %v8782_v38 = vcvt.s32.f32 %v5517_v39  ;;  %v6362_v3 = vcvt.s32.f32 %v5786_v2  ;;  %v5793_v1 = vunpack.c.3.s8 %v5307_v23  ;;  %v8805_v28 = vadd.f32 %v5052_v48, %v8719_v56  ;;  %v5229_v2 = vld [vmem:[#allocation17 + $0xf8] sm:$0xff] }
 0x407   :  { %6835 = vmatpush.bf16.msra.mxu0 %v6722_v49  ;;  %v6723_v52 = vpack.c.bf16 %v8789_v33, %v8784_v45  ;;  %v8797_v20 = vcvt.s32.f32 %v5505_v54  ;;  %v5774_v47 = vunpack.c.0.s8 %v5306_v10  ;;  %v5780_v11 = vunpack.c.1.s8 %v5306_v10  ;;  %v5301_v48 = vld [vmem:[#allocation17 + $0x338] sm:$0xff] }
 0x408   :  { %6825 = vmatpush.bf16.msrb.mxu3 %v6656_v25  ;;  %6864 = vmatpush.bf16.msra.mxu2 %v6513_v0  ;;  %v6579_v57 = vpack.c.bf16 %v8782_v38, %v8777_v21  ;;  %v6368_v25 = vcvt.s32.f32 %v5792_v6  ;;  %v8802_v0 = vcvt.s32.f32 %v5787_v59  ;;  %v4974_v58 = vpop.f32.mrf.mxu3  ;;  %v8812_v39 = vcvt.s32.f32 %v5793_v1 }
 0x409   :  { %v6573_v62 = vpack.c.bf16 %v8797_v20, %v8795_v41  ;;  %v5487_v8 = vunpack.c.0.s8 %v5235_v19  ;;  %v6350_v13 = vcvt.s32.f32 %v5774_v47  ;;  %v5493_v29 = vunpack.c.1.s8 %v5235_v19 }
 0x40a   :  { %v6716_v35 = vpack.c.bf16 %v6368_v25, %v6362_v3  ;;  %v5775_v56 = vunpack.c.0.s8 %v5307_v23  ;;  %v5781_v34 = vunpack.c.1.s8 %v5307_v23  ;;  %v6717_v6 = vpack.c.bf16 %v8812_v39, %v8802_v0 }
 0x40b   :  { %v6356_v32 = vcvt.s32.f32 %v5780_v11  ;;  %v8818_v55 = vcvt.s32.f32 %v5487_v8  ;;  %v8823_v10 = vcvt.s32.f32 %v5493_v29  ;;  %v5768_v23 = vunpack.c.3.s8 %v5300_v17 }
 0x40c   :  { %6826 = vmatpush.bf16.msrb.mxu3 %v6650_v4  ;;  %6865 = vmatpush.bf16.msra.mxu2 %v6507_v36  ;;  %v8814_v4 = vpop.f32.mrf.mxu2  ;;  %v5762_v36 = vunpack.c.2.s8 %v5300_v17  ;;  %v8825_v49 = vcvt.s32.f32 %v5775_v56  ;;  %v8827_v19 = vcvt.s32.f32 %v5781_v34  ;;  %v5054_v16 = vpop.f32.mrf.mxu1  ;;  %v5475_v25 = vunpack.c.2.s8 %v5229_v2 }
 0x40d   :  { %6836 = vmatpush.bf16.msra.mxu0 %v6716_v35  ;;  %v6710_v54 = vpack.c.bf16 %v6356_v32, %v6350_v13  ;;  %v5481_v59 = vunpack.c.3.s8 %v5229_v2  ;;  %v6567_v50 = vpack.c.bf16 %v8823_v10, %v8818_v55  ;;  %v5763_v1 = vunpack.c.2.s8 %v5301_v48  ;;  %v5295_v32 = vld [vmem:[#allocation17 + $0x308] sm:$0xff] }
 0x40e   :  { %v6338_v3 = vcvt.s32.f32 %v5762_v36  ;;  %v6711_v14 = vpack.c.bf16 %v8827_v19, %v8825_v49  ;;  %v8836_v35 = vcvt.s32.f32 %v5475_v25  ;;  %v5769_v11 = vunpack.c.3.s8 %v5301_v48 }
 0x40f   :  { %v8838_v47 = vcvt.s32.f32 %v5481_v59  ;;  %v4975_v53 = vadd.f32 %v4974_v58, %v8707_v7  ;;  %v5750_v8 = vunpack.c.0.s8 %v5300_v17  ;;  %v5756_v13 = vunpack.c.1.s8 %v5300_v17 }
 0x410   :  { %6827 = vmatpush.bf16.msrb.mxu3 %v6644_v40  ;;  %6866 = vmatpush.bf16.msra.mxu2 %v6501_v42  ;;  %v6344_v40 = vcvt.s32.f32 %v5768_v23  ;;  %v8844_v42 = vcvt.s32.f32 %v5763_v1  ;;  %v4976_v29 = vpop.f32.mrf.mxu3  ;;  %v8854_v58 = vcvt.s32.f32 %v5769_v11  ;;  %v5463_v60 = vunpack.c.0.s8 %v5229_v2 }
 0x411   :  { %6837 = vmatpush.bf16.msra.mxu0 %v6710_v54  ;;  %v6561_v7 = vpack.c.bf16 %v8838_v47, %v8836_v35  ;;  %v4988_v5 = vadd.f32 %v8618_v44, %v4975_v53  ;;  %v6326_v51 = vcvt.s32.f32 %v5750_v8  ;;  %v6332_v46 = vcvt.s32.f32 %v5756_v13 }
 0x412   :  { %v6704_v18 = vpack.c.bf16 %v6344_v40, %v6338_v3  ;;  %v5751_v17 = vunpack.c.0.s8 %v5301_v48  ;;  %v6705_v27 = vpack.c.bf16 %v8854_v58, %v8844_v42  ;;  %v5757_v34 = vunpack.c.1.s8 %v5301_v48 }
 0x413   :  { %v5001_v44 = vadd.f32 %v8629_v9, %v4988_v5  ;;  %v6698_v12 = vpack.c.bf16 %v6332_v46, %v6326_v51  ;;  %v5451_v48 = vunpack.c.2.s8 %v5223_v26  ;;  %v5457_v3 = vunpack.c.3.s8 %v5223_v26 }
 0x414   :  { %6828 = vmatpush.bf16.msrb.mxu3 %v6638_v63  ;;  %6867 = vmatpush.bf16.msra.mxu2 %v6495_v30  ;;  %v5294_v63 = vld [vmem:[#allocation17 + $0x300] sm:$0xff]  ;;  %v5015_v56 = vpop.f32.mrf.mxu2  ;;  %v5469_v30 = vunpack.c.1.s8 %v5229_v2  ;;  %v8877_v9 = vcvt.s32.f32 %v5757_v34  ;;  %v5739_v25 = vunpack.c.2.s8 %v5295_v32  ;;  %v5439_v11 = vunpack.c.0.s8 %v5223_v26 }
 0x415   :  { %6838 = vmatpush.bf16.msra.mxu0 %v6704_v18  ;;  %v5738_v2 = vunpack.c.2.s8 %v5294_v63  ;;  %v8875_v36 = vadd.f32 %v8814_v4, %v5001_v44  ;;  %v5744_v23 = vunpack.c.3.s8 %v5294_v63  ;;  %v5745_v4 = vunpack.c.3.s8 %v5295_v32  ;;  %v5265_v18 = vld [vmem:[#allocation17 + $0x218] sm:$0xff] }
 0x416   :  { %v8867_v22 = vcvt.s32.f32 %v5469_v30  ;;  %v8888_v59 = vcvt.s32.f32 %v5457_v3  ;;  %v8890_v40 = vcvt.s32.f32 %v5739_v25  ;;  %v5726_v45 = vunpack.c.0.s8 %v5294_v63 }
 0x417   :  { %6829 = vmatmul.bf16.vlgmr.msrb.gmra.mxu3 %v8740_v31  ;;  %6868 = vmatmul.bf16.vlgmr.msra.gmra.mxu2 %v8496_v43  ;;  %v6314_v54 = vcvt.s32.f32 %v5738_v2  ;;  %v6320_v38 = vcvt.s32.f32 %v5744_v23  ;;  %v5732_v33 = vunpack.c.1.s8 %v5294_v63  ;;  %v8895_v1 = vcvt.s32.f32 %v5745_v4  ;;  %v5260_v23 = vld [vmem:[#allocation17 + $0x1f0] sm:$0xff] }
 0x418   :  { %6873 = vmatpush.bf16.msra.mxu3 %v6585_v61  ;;  %6912 = vmatpush.bf16.msrb.mxu2 %v6729_v24  ;;  %v8864_v61 = vcvt.s32.f32 %v5463_v60  ;;  %v8869_v24 = vcvt.s32.f32 %v5751_v17  ;;  %v5445_v53 = vunpack.c.1.s8 %v5223_v26  ;;  %v6302_v13 = vcvt.s32.f32 %v5726_v45  ;;  %v5266_v60 = vld [vmem:[#allocation17 + $0x220] sm:$0xff] }
 0x419   :  { %6839 = vmatpush.bf16.msra.mxu0 %v6698_v12  ;;  %v6308_v29 = vcvt.s32.f32 %v5732_v33  ;;  %v5727_v5 = vunpack.c.0.s8 %v5295_v32  ;;  %v6693_v41 = vpack.c.bf16 %v8895_v1, %v8890_v40  ;;  %v8904_v20 = vcvt.s32.f32 %v5439_v11  ;;  %v5259_v12 = vld [vmem:[#allocation17 + $0x1e8] sm:$0xff] }
 0x41a   :  { %v6555_v16 = vpack.c.bf16 %v8867_v22, %v8864_v61  ;;  %v6699_v21 = vpack.c.bf16 %v8877_v9, %v8869_v24  ;;  %v5733_v63 = vunpack.c.1.s8 %v5295_v32  ;;  %v5619_v0 = vunpack.c.2.s8 %v5265_v18  ;;  %v8961_v24 = vld [vmem:[%s9289_s8] sm:$0x3f]  ;;  %s7692_s8 = smov [#allocation22]  }
 0x41b   :  { %v6686_v56 = vpack.c.bf16 %v6308_v29, %v6302_v13  ;;  %v8908_v51 = vcvt.s32.f32 %v5727_v5  ;;  %v5625_v39 = vunpack.c.3.s8 %v5265_v18  ;;  %v5620_v30 = vunpack.c.2.s8 %v5266_v60  ;;  %s7301_s3 = sshll.u32 %s7692_s8, 4  ;;  %s7302_s3 = int_to_ptr.vmem [resolvable:$true] %s7301_s3 }
 0x41c   :  { %6874 = vmatpush.bf16.msra.mxu3 %v6579_v57  ;;  %6913 = vmatpush.bf16.msrb.mxu2 %v6723_v52  ;;  %v8886_v57 = vcvt.s32.f32 %v5451_v48  ;;  %v6692_v52 = vpack.c.bf16 %v6320_v38, %v6314_v54  ;;  %v8915_v46 = vcvt.s32.f32 %v5733_v63  ;;  %v5626_v17 = vunpack.c.3.s8 %v5266_v60 }
 0x41d   :  { %v6195_v26 = vcvt.s32.f32 %v5619_v0  ;;  %v6201_v44 = vcvt.s32.f32 %v5625_v39  ;;  %v5607_v34 = vunpack.c.0.s8 %v5265_v18  ;;  %v5613_v32 = vunpack.c.1.s8 %v5265_v18  ;;  %v5253_v18 = vld [vmem:[#allocation17 + $0x1b8] sm:$0xff] }
 0x41e   :  { %v6549_v8 = vpack.c.bf16 %v8888_v59, %v8886_v57  ;;  %6840 = vmatpush.bf16.msra.mxu0 %v6692_v52  ;;  %v6687_v55 = vpack.c.bf16 %v8915_v46, %v8908_v51  ;;  %v8922_v10 = vcvt.s32.f32 %v5620_v30  ;;  %v5608_v2 = vunpack.c.0.s8 %v5266_v60 }
 0x41f   :  { %v6633_v48 = vpack.c.bf16 %v6201_v44, %v6195_v26  ;;  %v6183_v54 = vcvt.s32.f32 %v5607_v34  ;;  %v6189_v3 = vcvt.s32.f32 %v5613_v32  ;;  %v5614_v49 = vunpack.c.1.s8 %v5266_v60 }
 0x420   :  { %6875 = vmatpush.bf16.msra.mxu3 %v6573_v62  ;;  %6914 = vmatpush.bf16.msrb.mxu2 %v6717_v6  ;;  %v8906_v62 = vcvt.s32.f32 %v5445_v53  ;;  %v5595_v25 = vunpack.c.2.s8 %v5259_v12  ;;  %v5601_v38 = vunpack.c.3.s8 %v5259_v12  ;;  %v5596_v52 = vunpack.c.2.s8 %v5260_v23 }
 0x421   :  { %v6627_v45 = vpack.c.bf16 %v6189_v3, %v6183_v54  ;;  %v8938_v33 = vcvt.s32.f32 %v5614_v49  ;;  %v5602_v35 = vunpack.c.3.s8 %v5260_v23  ;;  %v5583_v11 = vunpack.c.0.s8 %v5259_v12  ;;  %v5248_v3 = vld [vmem:[#allocation17 + $0x190] sm:$0xff] }
 0x422   :  { %v6543_v6 = vpack.c.bf16 %v8906_v62, %v8904_v20  ;;  %6841 = vmatpush.bf16.msra.mxu0 %v6686_v56  ;;  %v8936_v4 = vpop.f32.mrf.mxu0  ;;  %v6171_v47 = vcvt.s32.f32 %v5595_v25  ;;  %v5589_v53 = vunpack.c.1.s8 %v5259_v12  ;;  %v8942_v29 = vcvt.s32.f32 %v5596_v52  ;;  %v5247_v12 = vld [vmem:[#allocation17 + $0x188] sm:$0xff] }
 0x423   :  { %v8944_v42 = vcvt.s32.f32 %v5602_v35  ;;  %v5584_v58 = vunpack.c.0.s8 %v5260_v23  ;;  %v6159_v60 = vcvt.s32.f32 %v5583_v11  ;;  %v5590_v56 = vunpack.c.1.s8 %v5260_v23 }
 0x424   :  { %6876 = vmatpush.bf16.msra.mxu3 %v6567_v50  ;;  %6915 = vmatpush.bf16.msrb.mxu2 %v6711_v14  ;;  %v8924_v50 = vcvt.s32.f32 %v5626_v17  ;;  %v8931_v14 = vcvt.s32.f32 %v5608_v2  ;;  %v6165_v63 = vcvt.s32.f32 %v5589_v53  ;;  %v5571_v30 = vunpack.c.2.s8 %v5253_v18 }
 0x425   :  { %v6622_v0 = vpack.c.bf16 %v8944_v42, %v8942_v29  ;;  %v8954_v39 = vcvt.s32.f32 %v5584_v58  ;;  %v5577_v17 = vunpack.c.3.s8 %v5253_v18  ;;  %v8956_v44 = vcvt.s32.f32 %v5590_v56  ;;  %v5336_v58 = vld [vmem:[#allocation17 + $0x450] sm:$0xff] }
 0x426   :  { %v6634_v19 = vpack.c.bf16 %v8924_v50, %v8922_v10  ;;  %6886 = vmatpush.bf16.msrb.mxu0 %v6633_v48  ;;  %v6628_v13 = vpack.c.bf16 %v8938_v33, %v8931_v14  ;;  %v6615_v26 = vpack.c.bf16 %v6165_v63, %v6159_v60  ;;  %v5140_v9 = vperm.slane %v8961_v24, 4 }
 0x427   :  { %v6153_v34 = vcvt.s32.f32 %v5577_v17  ;;  %v6616_v2 = vpack.c.bf16 %v8956_v44, %v8954_v39  ;;  %v5559_v54 = vunpack.c.0.s8 %v5253_v18  ;;  %v5547_v52 = vunpack.c.2.s8 %v5247_v12 }
 0x428   :  { %6877 = vmatpush.bf16.msra.mxu3 %v6561_v7  ;;  %6916 = vmatpush.bf16.msrb.mxu2 %v6705_v27  ;;  %v6177_v7 = vcvt.s32.f32 %v5601_v38  ;;  %v5254_v27 = vld [vmem:[#allocation17 + $0x1c0] sm:$0xff]  ;;  %v5565_v38 = vunpack.c.1.s8 %v5253_v18  ;;  %v5553_v35 = vunpack.c.3.s8 %v5247_v12  ;;  %v5548_v53 = vunpack.c.2.s8 %v5248_v3 }
 0x429   :  { %v5572_v61 = vunpack.c.2.s8 %v5254_v27  ;;  %v5578_v22 = vunpack.c.3.s8 %v5254_v27  ;;  %v5566_v57 = vunpack.c.1.s8 %v5254_v27  ;;  %v8988_v40 = vcvt.s32.f32 %v5547_v52 }
 0x42a   :  { %v6621_v5 = vpack.c.bf16 %v6177_v7, %v6171_v47  ;;  %6887 = vmatpush.bf16.msrb.mxu0 %v6627_v45  ;;  %v5093_v49 = vpop.f32.mrf.mxu0  ;;  %v5560_v45 = vunpack.c.0.s8 %v5254_v27  ;;  %v6141_v47 = vcvt.s32.f32 %v5565_v38  ;;  %v8990_v1 = vcvt.s32.f32 %v5553_v35 }
 0x42b   :  { %v8972_v23 = vcvt.s32.f32 %v5572_v61  ;;  %v8974_v48 = vcvt.s32.f32 %v5578_v22  ;;  %v8983_v11 = vcvt.s32.f32 %v5566_v57  ;;  %v5535_v18 = vunpack.c.0.s8 %v5247_v12  ;;  %v5218_v61 = vld [vmem:[#allocation17 + $0xa0] sm:$0xff] }
 0x42c   :  { %6878 = vmatpush.bf16.msra.mxu3 %v6555_v16  ;;  %6917 = vmatpush.bf16.msrb.mxu2 %v6699_v21  ;;  %v6147_v16 = vcvt.s32.f32 %v5571_v30  ;;  %v8964_v21 = vld [vmem:[#allocation16] sm:$0x3f]  ;;  %v8981_v7 = vcvt.s32.f32 %v5560_v45  ;;  %v8999_v20 = vcvt.s32.f32 %v5548_v53  ;;  %v5541_v62 = vunpack.c.1.s8 %v5247_v12 }
 0x42d   :  { %v5160_v32 = vperm.slane %v8964_v21, 4  ;;  %v6610_v59 = vpack.c.bf16 %v8974_v48, %v8972_v23  ;;  %v8995_v27 = vpop.f32.mrf.mxu1  ;;  %v6597_v63 = vpack.c.bf16 %v8990_v1, %v8988_v40  ;;  %v9008_v46 = vcvt.s32.f32 %v5535_v18 }
 0x42e   :  { %6888 = vmatpush.bf16.msrb.mxu0 %v6621_v5  ;;  %v6609_v25 = vpack.c.bf16 %v6153_v34, %v6147_v16  ;;  %v6604_v60 = vpack.c.bf16 %v8983_v11, %v8981_v7  ;;  %v9011_v56 = vcvt.s32.f32 %v5541_v62  ;;  %v5542_v30 = vunpack.c.1.s8 %v5248_v3  ;;  %v9017_v16 = vld [vmem:[#allocation17 + $0xa8] sm:$0xff] }
 0x42f   :  { %v5906_v17 = vunpack.c.2.s8 %v5336_v58  ;;  %v5428_v57 = vunpack.c.2.s8 %v5218_v61  ;;  %v5429_v53 = vunpack.c.2.s8 %v9017_v16  ;;  %v5894_v62 = vunpack.c.0.s8 %v5336_v58 }
 0x430   :  { %6879 = vmatpush.bf16.msra.mxu3 %v6549_v8  ;;  %6918 = vmatpush.bf16.msrb.mxu2 %v6693_v41  ;;  %v6135_v8 = vcvt.s32.f32 %v5559_v54  ;;  %v5554_v41 = vunpack.c.3.s8 %v5248_v3  ;;  %v6591_v34 = vpack.c.bf16 %v9011_v56, %v9008_v46  ;;  %v9021_v12 = vcvt.s32.f32 %v5542_v30 }
 0x431   :  { %v6482_v54 = vcvt.s32.f32 %v5906_v17  ;;  %v5026_v49 = vpop.f32.mrf.mxu3  ;;  %v6004_v14 = vcvt.s32.f32 %v5428_v57  ;;  %v9036_v18 = vcvt.s32.f32 %v5429_v53  ;;  %v5212_v53 = vld [vmem:[#allocation17 + $0x70] sm:$0xff] }
 0x432   :  { %6889 = vmatpush.bf16.msrb.mxu0 %v6615_v26  ;;  %v6603_v5 = vpack.c.bf16 %v6141_v47, %v6135_v8  ;;  %v9006_v51 = vcvt.s32.f32 %v5554_v41  ;;  %v5912_v26 = vunpack.c.3.s8 %v5336_v58  ;;  %v5434_v8 = vunpack.c.3.s8 %v5218_v61  ;;  %v5065_v35 = vpop.f32.mrf.mxu2 }
 0x433   :  { %v5027_v52 = vadd.f32 %v5026_v49, %v8875_v36  ;;  %v9031_v40 = vadd.f32 %v5065_v35, %v8805_v28  ;;  %v5435_v36 = vunpack.c.3.s8 %v9017_v16  ;;  %v5422_v49 = vunpack.c.1.s8 %v5218_v61 }
 0x434   :  { %6880 = vmatpush.bf16.msra.mxu3 %v6543_v6  ;;  %6919 = vmatpush.bf16.msrb.mxu2 %v6687_v55  ;;  %v5337_v6 = vld [vmem:[#allocation17 + $0x458] sm:$0xff]  ;;  %v5536_v55 = vunpack.c.0.s8 %v5248_v3  ;;  %v6598_v10 = vpack.c.bf16 %v9006_v51, %v8999_v20  ;;  %v6488_v3 = vcvt.s32.f32 %v5912_v26  ;;  %v6010_v33 = vcvt.s32.f32 %v5434_v8 }
 0x435   :  { %v5913_v22 = vunpack.c.3.s8 %v5337_v6  ;;  %v5106_v41 = vpop.f32.mrf.mxu1  ;;  %v5895_v30 = vunpack.c.0.s8 %v5337_v6  ;;  %v5901_v17 = vunpack.c.1.s8 %v5337_v6  ;;  %v9043_v26 = vcvt.s32.f32 %v5435_v36 }
 0x436   :  { %v9015_v50 = vcvt.s32.f32 %v5536_v55  ;;  %6890 = vmatpush.bf16.msrb.mxu0 %v6609_v25  ;;  %v6776_v47 = vpack.c.bf16 %v6488_v3, %v6482_v54  ;;  %v6538_v28 = vpack.c.bf16 %v6010_v33, %v6004_v14  ;;  %v5900_v55 = vunpack.c.1.s8 %v5336_v58  ;;  %v5331_v58 = vld [vmem:[#allocation17 + $0x428] sm:$0xff] }
 0x437   :  { %6881 = vmatmul.bf16.vlgmr.msra.gmra.mxu3 %v8548_v15  ;;  %v6489_v45 = vcvt.s32.f32 %v5913_v22  ;;  %v6471_v54 = vcvt.s32.f32 %v5895_v30  ;;  %v6477_v3 = vcvt.s32.f32 %v5901_v17  ;;  %v6539_v42 = vpack.c.bf16 %v9043_v26, %v9036_v18 }
 0x438   :  { %6964 = vmatpush.bf16.msra.mxu2 %v6634_v19  ;;  %v5907_v19 = vunpack.c.2.s8 %v5337_v6  ;;  %v6592_v25 = vpack.c.bf16 %v9021_v12, %v9015_v50  ;;  %6847 = vmatpush.bf16.msra.mxu1 %v6776_v47  ;;  %v6476_v22 = vcvt.s32.f32 %v5900_v55  ;;  %v5998_v57 = vcvt.s32.f32 %v5422_v49 }
 0x439   :  { %v5417_v8 = vunpack.c.0.s8 %v9017_v16  ;;  %v5423_v35 = vunpack.c.1.s8 %v9017_v16  ;;  %v5889_v41 = vunpack.c.3.s8 %v5331_v58  ;;  %v5410_v55 = vunpack.c.3.s8 %v5212_v53 }
 0x43a   :  { %v6483_v38 = vcvt.s32.f32 %v5907_v19  ;;  %6891 = vmatpush.bf16.msrb.mxu0 %v6603_v5  ;;  %v6470_v5 = vcvt.s32.f32 %v5894_v62  ;;  %v5416_v19 = vunpack.c.0.s8 %v5218_v61  ;;  %v5404_v62 = vunpack.c.2.s8 %v5212_v53 }
 0x43b   :  { %v9054_v44 = vcvt.s32.f32 %v5417_v8  ;;  %v9059_v33 = vcvt.s32.f32 %v5423_v35  ;;  %v5877_v49 = vunpack.c.1.s8 %v5331_v58  ;;  %v5325_v8 = vld [vmem:[#allocation17 + $0x3f8] sm:$0xff] }
 0x43c   :  { %6965 = vmatpush.bf16.msra.mxu2 %v6628_v13  ;;  %v6777_v1 = vpack.c.bf16 %v6489_v45, %v6483_v38  ;;  %v5152_v13 = vmul.f32 %v5140_v9, %v5027_v52  ;;  %v5330_v38 = vld [vmem:[#allocation17 + $0x420] sm:$0xff]  ;;  %v6770_v6 = vpack.c.bf16 %v6476_v22, %v6470_v5  ;;  %v6771_v45 = vpack.c.bf16 %v6477_v3, %v6471_v54  ;;  %v5067_v52 = vpop.f32.mrf.mxu2 }
 0x43d   :  { %v5888_v47 = vunpack.c.3.s8 %v5330_v38  ;;  %v6533_v46 = vpack.c.bf16 %v9059_v33, %v9054_v44  ;;  %v5986_v5 = vcvt.s32.f32 %v5410_v55  ;;  %v5870_v23 = vunpack.c.0.s8 %v5330_v38 }
 0x43e   :  { %6925 = vmatpush.bf16.msrb.mxu3 %v6777_v1  ;;  %v5172_v9 = vadd.f32 %v5160_v32, %v5152_v13  ;;  %6892 = vmatpush.bf16.msrb.mxu0 %v6597_v63  ;;  %v5028_v32 = vpop.f32.mrf.mxu3  ;;  %v5882_v63 = vunpack.c.2.s8 %v5330_v38  ;;  %v5213_v1 = vld [vmem:[#allocation17 + $0x78] sm:$0xff]  ;;  %v5876_v22 = vunpack.c.1.s8 %v5330_v38  ;;  %v5871_v54 = vunpack.c.0.s8 %v5331_v58 }
 0x43f   :  { %6848 = vmatpush.bf16.msra.mxu1 %v6770_v6  ;;  %v6464_v16 = vcvt.s32.f32 %v5888_v47  ;;  %v5405_v30 = vunpack.c.2.s8 %v5213_v1  ;;  %v5411_v17 = vunpack.c.3.s8 %v5213_v1  ;;  %v6446_v3 = vcvt.s32.f32 %v5870_v23 }
 0x440   :  { %6966 = vmatpush.bf16.msra.mxu2 %v6622_v0  ;;  %vm5178_vm0 = vcmp.ge.f32.partialorder %v5172_v9, 0.0  ;;  %v5184_v29 = vmul.f32 0.01, %v5172_v9  ;;  %v5992_v0 = vcvt.s32.f32 %v5416_v19  ;;  %v6458_v13 = vcvt.s32.f32 %v5882_v63 }
 0x441   :  { %v9068_v19 = vcvt.s32.f32 %v5405_v30  ;;  %v6452_v6 = vcvt.s32.f32 %v5876_v22  ;;  %v6453_v38 = vcvt.s32.f32 %v5877_v49  ;;  %v5393_v52 = vunpack.c.0.s8 %v5213_v1 }
 0x442   :  { %v5190_v61 = vsel %vm5178_vm0, %v5172_v9, %v5184_v29  ;;  %6926 = vmatpush.bf16.msrb.mxu3 %v6771_v45  ;;  %v6532_v39 = vpack.c.bf16 %v5998_v57, %v5992_v0  ;;  %6893 = vmatpush.bf16.msrb.mxu0 %v6591_v34  ;;  %v6764_v56 = vpack.c.bf16 %v6464_v16, %v6458_v13  ;;  %v6465_v34 = vcvt.s32.f32 %v5889_v41  ;;  %v5324_v0 = vld [vmem:[#allocation17 + $0x3f0] sm:$0xff]  ;;  %v5207_v13 = vld [vmem:[#allocation17 + $0x48] sm:$0xff] }
 0x443   :  { %v9052_v14 = vpack.c.bf16 %v5190_v61, %v5190_v61  ;;  %v5980_v9 = vcvt.s32.f32 %v5404_v62  ;;  %v5392_v29 = vunpack.c.0.s8 %v5212_v53  ;;  %v6447_v45 = vcvt.s32.f32 %v5871_v54 }
 0x444   :  { %6967 = vmatpush.bf16.msra.mxu2 %v6616_v2  ;;  %v5883_v2 = vunpack.c.2.s8 %v5331_v58  ;;  %6849 = vmatpush.bf16.msra.mxu1 %v6764_v56  ;;  %v5398_v57 = vunpack.c.1.s8 %v5212_v53  ;;  %v5399_v35 = vunpack.c.1.s8 %v5213_v1  ;;  %v6758_v7 = vpack.c.bf16 %v6452_v6, %v6446_v3  ;;  %v5206_v58 = vld [vmem:[#allocation17 + $0x40] sm:$0xff] }
 0x445   :  { %6842 = vmatmul.bf16.vlgmr.msra.gmra.mxu0 %v9052_v14  ;;  %6920 = vmatmul.bf16.vlgmr.msrb.gmra.mxu2 %v9052_v14  ;;  %v5968_v61 = vcvt.s32.f32 %v5392_v29  ;;  %v5864_v63 = vunpack.c.3.s8 %v5324_v0  ;;  %v6759_v47 = vpack.c.bf16 %v6453_v38, %v6447_v45  ;;  %v5859_v53 = vunpack.c.2.s8 %v5325_v8  ;;  %v5318_v29 = vld [vmem:[#allocation17 + $0x3c0] sm:$0xff] }
 0x446   :  { %v6459_v36 = vcvt.s32.f32 %v5883_v2  ;;  %6938 = vmatpush.bf16.msra.mxu0 %v6538_v28  ;;  %v6526_v28 = vpack.c.bf16 %v5986_v5, %v5980_v9  ;;  %v5974_v11 = vcvt.s32.f32 %v5398_v57  ;;  %v9082_v2 = vcvt.s32.f32 %v5399_v35 }
 0x447   :  { %v6440_v41 = vcvt.s32.f32 %v5864_v63  ;;  %v6435_v55 = vcvt.s32.f32 %v5859_v53  ;;  %v5380_v20 = vunpack.c.2.s8 %v5206_v58  ;;  %v5386_v51 = vunpack.c.3.s8 %v5206_v58  ;;  %v5201_v53 = vld [vmem:[#allocation17 + $0x18] sm:$0xff] }
 0x448   :  { %6968 = vmatpush.bf16.msra.mxu2 %v6610_v59  ;;  %v6765_v48 = vpack.c.bf16 %v6465_v34, %v6459_v36  ;;  %v9070_v59 = vcvt.s32.f32 %v5411_v17  ;;  %6850 = vmatpush.bf16.msra.mxu1 %v6758_v7  ;;  %v6520_v16 = vpack.c.bf16 %v5974_v11, %v5968_v61  ;;  %v5865_v36 = vunpack.c.3.s8 %v5325_v8  ;;  %v5200_v11 = vld [vmem:[#allocation17 + $0x10] sm:$0xff] }
 0x449   :  { %v5381_v56 = vunpack.c.2.s8 %v5207_v13  ;;  %v5387_v34 = vunpack.c.3.s8 %v5207_v13  ;;  %v5956_v9 = vcvt.s32.f32 %v5380_v20  ;;  %v5962_v5 = vcvt.s32.f32 %v5386_v51 }
 0x44a   :  { %6939 = vmatpush.bf16.msra.mxu0 %v6532_v39  ;;  %6927 = vmatpush.bf16.msrb.mxu3 %v6765_v48  ;;  %v6527_v32 = vpack.c.bf16 %v9070_v59, %v9068_v19  ;;  %v9080_v39 = vcvt.s32.f32 %v5393_v52  ;;  %v6441_v30 = vcvt.s32.f32 %v5865_v36  ;;  %v5846_v23 = vunpack.c.0.s8 %v5324_v0 }
 0x44b   :  { %v9089_v17 = vpop.f32.mrf.mxu0  ;;  %v5852_v48 = vunpack.c.1.s8 %v5324_v0  ;;  %v9094_v54 = vcvt.s32.f32 %v5381_v56  ;;  %v5847_v3 = vunpack.c.0.s8 %v5325_v8  ;;  %v6514_v50 = vpack.c.bf16 %v5962_v5, %v5956_v9 }
 0x44c   :  { %6969 = vmatpush.bf16.msra.mxu2 %v6604_v60  ;;  %v5858_v60 = vunpack.c.2.s8 %v5324_v0  ;;  %v6521_v62 = vpack.c.bf16 %v9082_v2, %v9080_v39  ;;  %v6753_v22 = vpack.c.bf16 %v6441_v30, %v6435_v55  ;;  %v6422_v12 = vcvt.s32.f32 %v5846_v23 }
 0x44d   :  { %v5853_v49 = vunpack.c.1.s8 %v5325_v8  ;;  %v6423_v6 = vcvt.s32.f32 %v5847_v3  ;;  %v5368_v18 = vunpack.c.0.s8 %v5206_v58  ;;  %v5374_v26 = vunpack.c.1.s8 %v5206_v58 }
 0x44e   :  { %6940 = vmatpush.bf16.msra.mxu0 %v6526_v28  ;;  %v6434_v1 = vcvt.s32.f32 %v5858_v60  ;;  %6928 = vmatpush.bf16.msrb.mxu3 %v6759_v47  ;;  %v9096_v28 = vcvt.s32.f32 %v5387_v34  ;;  %v5369_v38 = vunpack.c.0.s8 %v5207_v13  ;;  %v5375_v61 = vunpack.c.1.s8 %v5207_v13 }
 0x44f   :  { %v6429_v57 = vcvt.s32.f32 %v5853_v49  ;;  %v5944_v8 = vcvt.s32.f32 %v5368_v18  ;;  %v5950_v52 = vcvt.s32.f32 %v5374_v26  ;;  %v5834_v35 = vunpack.c.2.s8 %v5318_v29  ;;  %v9132_v26 = vld [vmem:[#allocation17 + $0x2e0] sm:$0xff] }
 0x450   :  { %6970 = vmatpush.bf16.msra.mxu2 %v6598_v10  ;;  %v6752_v10 = vpack.c.bf16 %v6440_v41, %v6434_v1  ;;  %v6515_v0 = vpack.c.bf16 %v9096_v28, %v9094_v54  ;;  %v5840_v7 = vunpack.c.3.s8 %v5318_v29  ;;  %v9107_v63 = vcvt.s32.f32 %v5369_v38 }
 0x451   :  { %v6747_v60 = vpack.c.bf16 %v6429_v57, %v6423_v6  ;;  %v9109_v58 = vcvt.s32.f32 %v5375_v61  ;;  %v6508_v13 = vpack.c.bf16 %v5950_v52, %v5944_v8  ;;  %v6410_v44 = vcvt.s32.f32 %v5834_v35 }
 0x452   :  { %6941 = vmatpush.bf16.msra.mxu0 %v6520_v16  ;;  %6851 = vmatpush.bf16.msra.mxu1 %v6752_v10  ;;  %v6416_v33 = vcvt.s32.f32 %v5840_v7  ;;  %v5356_v36 = vunpack.c.2.s8 %v5200_v11  ;;  %v5362_v55 = vunpack.c.3.s8 %v5200_v11  ;;  %v5357_v10 = vunpack.c.2.s8 %v5201_v53 }
 0x453   :  { %6929 = vmatpush.bf16.msrb.mxu3 %v6753_v22  ;;  %v6793_v16 = vpop.f32.mrf.mxu0  ;;  %v6509_v1 = vpack.c.bf16 %v9109_v58, %v9107_v63  ;;  %v5363_v30 = vunpack.c.3.s8 %v5201_v53  ;;  %v5822_v9 = vunpack.c.0.s8 %v5318_v29  ;;  %v5828_v5 = vunpack.c.1.s8 %v5318_v29 }
 0x454   :  { %6971 = vmatpush.bf16.msra.mxu2 %v6592_v25  ;;  %v6428_v25 = vcvt.s32.f32 %v5852_v48  ;;  %v6740_v20 = vpack.c.bf16 %v6416_v33, %v6410_v44  ;;  %v5932_v56 = vcvt.s32.f32 %v5356_v36  ;;  %v5938_v34 = vcvt.s32.f32 %v5362_v55  ;;  %v5315_v33 = vld [vmem:[#allocation17 + $0x3a8] sm:$0xff] }
 0x455   :  { %6894 = vmatmul.bf16.vlgmr.msrb.gmra.mxu0 %v8615_v37  ;;  %v9118_v22 = vcvt.s32.f32 %v5357_v10  ;;  %v9120_v3 = vcvt.s32.f32 %v5363_v30  ;;  %v5344_v18 = vunpack.c.0.s8 %v5200_v11  ;;  %v5345_v57 = vunpack.c.0.s8 %v5201_v53 }
 0x456   :  { %v6746_v45 = vpack.c.bf16 %v6428_v25, %v6422_v12  ;;  %6942 = vmatpush.bf16.msra.mxu0 %v6514_v50  ;;  %v6804_v23 = vpop.f32.mrf.mxu1  ;;  %v6502_v59 = vpack.c.bf16 %v5938_v34, %v5932_v56  ;;  %v6404_v12 = vcvt.s32.f32 %v5828_v5  ;;  %v5289_v25 = vld [vmem:[#allocation17 + $0x2d8] sm:$0xff]  ;;  %v5351_v38 = vunpack.c.1.s8 %v5201_v53 }
 0x457   :  { %6972 = vmatmul.bf16.vlgmr.msra.gmra.mxu2 %v8615_v37  ;;  %6930 = vmatpush.bf16.msrb.mxu3 %v6747_v60  ;;  %v9124_v19 = vadd.f32 %v6804_v23, %v9089_v17  ;;  %v6503_v49 = vpack.c.bf16 %v9120_v3, %v9118_v22  ;;  %v5920_v8 = vcvt.s32.f32 %v5344_v18  ;;  %v5715_v52 = vunpack.c.2.s8 %v5289_v25  ;;  %v5314_v60 = vld [vmem:[#allocation17 + $0x3a0] sm:$0xff]  ;;  %v5284_v18 = vld [vmem:[#allocation17 + $0x2b0] sm:$0xff] }
 0x458   :  { %7016 = vmatpush.bf16.msrb.mxu2 %v6539_v42  ;;  %v9100_v42 = vld [vmem:[#allocation17 + $0x3c8] sm:$0xff]  ;;  %6852 = vmatpush.bf16.msra.mxu1 %v6746_v45  ;;  %v5350_v45 = vunpack.c.1.s8 %v5200_v11  ;;  %v5721_v39 = vunpack.c.3.s8 %v5289_v25  ;;  %v9134_v35 = vcvt.s32.f32 %v5345_v57  ;;  %v9136_v7 = vcvt.s32.f32 %v5351_v38 }
 0x459   :  { %v5835_v47 = vunpack.c.2.s8 %v9100_v42  ;;  %v5823_v50 = vunpack.c.0.s8 %v9100_v42  ;;  %v5829_v29 = vunpack.c.1.s8 %v9100_v42  ;;  %v5812_v28 = vunpack.c.2.s8 %v5314_v60 }
 0x45a   :  { %6943 = vmatpush.bf16.msra.mxu0 %v6508_v13  ;;  %v5078_v2 = vpop.f32.mrf.mxu3  ;;  %v6291_v13 = vcvt.s32.f32 %v5715_v52  ;;  %v6297_v44 = vcvt.s32.f32 %v5721_v39  ;;  %v6497_v16 = vpack.c.bf16 %v9136_v7, %v9134_v35  ;;  %v5819_v10 = vunpack.c.3.s8 %v5315_v33 }
 0x45b   :  { %v6411_v41 = vcvt.s32.f32 %v5835_v47  ;;  %v6399_v6 = vcvt.s32.f32 %v5823_v50  ;;  %v6405_v61 = vcvt.s32.f32 %v5829_v29  ;;  %v5079_v11 = vadd.f32 %v5078_v2, %v9031_v40  ;;  %v5117_v47 = vpop.f32.mrf.mxu2  ;;  %v5283_v29 = vld [vmem:[#allocation17 + $0x2a8] sm:$0xff] }
 0x45c   :  { %7017 = vmatpush.bf16.msrb.mxu2 %v6533_v46  ;;  %v5841_v46 = vunpack.c.3.s8 %v9100_v42  ;;  %6853 = vmatpush.bf16.msra.mxu1 %v6740_v20  ;;  %v5716_v42 = vunpack.c.2.s8 %v9132_v26  ;;  %v6681_v54 = vpack.c.bf16 %v6297_v44, %v6291_v13  ;;  %v5703_v30 = vunpack.c.0.s8 %v5289_v25 }
 0x45d   :  { %v6735_v53 = vpack.c.bf16 %v6405_v61, %v6399_v6  ;;  %v5092_v55 = vadd.f32 %v8936_v4, %v5079_v11  ;;  %v6388_v34 = vcvt.s32.f32 %v5812_v28  ;;  %v5709_v4 = vunpack.c.1.s8 %v5289_v25 }
 0x45e   :  { %v6417_v51 = vcvt.s32.f32 %v5841_v46  ;;  %6944 = vmatpush.bf16.msra.mxu0 %v6502_v59  ;;  %v6292_v36 = vcvt.s32.f32 %v5716_v42  ;;  %v6806_v20 = vpop.f32.mrf.mxu1  ;;  %v6279_v50 = vcvt.s32.f32 %v5703_v30  ;;  %v5710_v58 = vunpack.c.1.s8 %v9132_v26 }
 0x45f   :  { %v5105_v56 = vadd.f32 %v8995_v27, %v5092_v55  ;;  %v5704_v27 = vunpack.c.0.s8 %v9132_v26  ;;  %v5806_v25 = vunpack.c.1.s8 %v5314_v60  ;;  %v5801_v38 = vunpack.c.0.s8 %v5315_v33 }
 0x460   :  { %7018 = vmatpush.bf16.msrb.mxu2 %v6527_v32  ;;  %v6741_v48 = vpack.c.bf16 %v6417_v51, %v6411_v41  ;;  %v6398_v32 = vcvt.s32.f32 %v5822_v9  ;;  %v5722_v41 = vunpack.c.3.s8 %v9132_v26  ;;  %v5813_v51 = vunpack.c.2.s8 %v5315_v33 }
 0x461   :  { %v9151_v59 = vadd.f32 %v5117_v47, %v5105_v56  ;;  %v6280_v57 = vcvt.s32.f32 %v5704_v27  ;;  %v5807_v61 = vunpack.c.1.s8 %v5315_v33  ;;  %v6382_v39 = vcvt.s32.f32 %v5806_v25  ;;  %v5302_v25 = vld [vmem:[#allocation17 + $0x340] sm:$0xff] }
 0x462   :  { %6931 = vmatpush.bf16.msrb.mxu3 %v6741_v48  ;;  %v6734_v17 = vpack.c.bf16 %v6404_v12, %v6398_v32  ;;  %v6298_v40 = vcvt.s32.f32 %v5722_v41  ;;  %v6389_v23 = vcvt.s32.f32 %v5813_v51  ;;  %v6395_v48 = vcvt.s32.f32 %v5819_v10  ;;  %v5080_v6 = vpop.f32.mrf.mxu3 }
 0x463   :  { %v6285_v12 = vcvt.s32.f32 %v5709_v4  ;;  %v5691_v2 = vunpack.c.2.s8 %v5283_v29  ;;  %v6377_v26 = vcvt.s32.f32 %v5801_v38  ;;  %v6383_v35 = vcvt.s32.f32 %v5807_v61  ;;  %v5303_v38 = vld [vmem:[#allocation17 + $0x348] sm:$0xff] }
 0x464   :  { %7019 = vmatpush.bf16.msrb.mxu2 %v6521_v62  ;;  %6854 = vmatpush.bf16.msra.mxu1 %v6734_v17  ;;  %v5926_v62 = vcvt.s32.f32 %v5350_v45  ;;  %v6682_v5 = vpack.c.bf16 %v6298_v40, %v6292_v36  ;;  %v6731_v63 = vpack.c.bf16 %v6395_v48, %v6389_v23  ;;  %v5119_v17 = vpop.f32.mrf.mxu2  ;;  %v5697_v7 = vunpack.c.3.s8 %v5283_v29 }
 0x465   :  { %v6675_v45 = vpack.c.bf16 %v6285_v12, %v6279_v50  ;;  %v5692_v42 = vunpack.c.2.s8 %v5284_v18  ;;  %v6267_v3 = vcvt.s32.f32 %v5691_v2  ;;  %v6725_v47 = vpack.c.bf16 %v6383_v35, %v6377_v26  ;;  %v5278_v50 = vld [vmem:[#allocation17 + $0x280] sm:$0xff] }
 0x466   :  { %v6496_v46 = vpack.c.bf16 %v5926_v62, %v5920_v8  ;;  %6932 = vmatpush.bf16.msrb.mxu3 %v6735_v53  ;;  %v6286_v8 = vcvt.s32.f32 %v5710_v58  ;;  %v5308_v62 = vld [vmem:[#allocation17 + $0x370] sm:$0xff]  ;;  %v6273_v53 = vcvt.s32.f32 %v5697_v7  ;;  %v5685_v28 = vunpack.c.1.s8 %v5283_v29 }
 0x467   :  { %v6268_v13 = vcvt.s32.f32 %v5692_v42  ;;  %v5788_v44 = vunpack.c.2.s8 %v5308_v62  ;;  %v5680_v56 = vunpack.c.0.s8 %v5284_v18  ;;  %v5776_v23 = vunpack.c.0.s8 %v5308_v62 }
 0x468   :  { %7020 = vmatpush.bf16.msrb.mxu2 %v6515_v0  ;;  %v5818_v0 = vunpack.c.3.s8 %v5314_v60  ;;  %6945 = vmatpush.bf16.msra.mxu0 %v6496_v46  ;;  %v6676_v11 = vpack.c.bf16 %v6286_v8, %v6280_v57  ;;  %v5794_v46 = vunpack.c.3.s8 %v5308_v62  ;;  %v6669_v55 = vpack.c.bf16 %v6273_v53, %v6267_v3 }
 0x469   :  { %6899 = vmatpush.bf16.msrb.mxu1 %v6681_v54  ;;  %v6364_v20 = vcvt.s32.f32 %v5788_v44  ;;  %v5679_v54 = vunpack.c.0.s8 %v5283_v29  ;;  %v6261_v30 = vcvt.s32.f32 %v5685_v28  ;;  %v5782_v48 = vunpack.c.1.s8 %v5308_v62 }
 0x46a   :  { %v6394_v9 = vcvt.s32.f32 %v5818_v0  ;;  %6977 = vmatpush.bf16.msra.mxu3 %v6682_v5  ;;  %v6370_v40 = vcvt.s32.f32 %v5794_v46  ;;  %v6256_v12 = vcvt.s32.f32 %v5680_v56  ;;  %v6352_v6 = vcvt.s32.f32 %v5776_v23 }
 0x46b   :  { %6946 = vmatmul.bf16.vlgmr.msra.gmra.mxu0 %v8496_v43  ;;  %v6255_v10 = vcvt.s32.f32 %v5679_v54  ;;  %v5668_v57 = vunpack.c.2.s8 %v5278_v50  ;;  %v5764_v26 = vunpack.c.2.s8 %v5302_v25  ;;  %v5770_v35 = vunpack.c.3.s8 %v5302_v25 }
 0x46c   :  { %7021 = vmatpush.bf16.msrb.mxu2 %v6509_v1  ;;  %v6730_v32 = vpack.c.bf16 %v6394_v9, %v6388_v34  ;;  %v5800_v1 = vunpack.c.0.s8 %v5314_v60  ;;  %v5309_v60 = vld [vmem:[#allocation17 + $0x378] sm:$0xff]  ;;  %v5686_v34 = vunpack.c.1.s8 %v5284_v18  ;;  %v6718_v4 = vpack.c.bf16 %v6370_v40, %v6364_v20  ;;  %v9162_v40 = vld [vmem:[#allocation17 + $0x248] sm:$0xff] }
 0x46d   :  { %6900 = vmatpush.bf16.msrb.mxu1 %v6675_v45  ;;  %v5789_v41 = vunpack.c.2.s8 %v5309_v60  ;;  %v5795_v36 = vunpack.c.3.s8 %v5309_v60  ;;  %v5277_v9 = vld [vmem:[#allocation17 + $0x278] sm:$0xff]  ;;  %v5777_v29 = vunpack.c.0.s8 %v5309_v60  ;;  %v5783_v58 = vunpack.c.1.s8 %v5309_v60 }
 0x46e   :  { %6990 = vmatpush.bf16.msrb.mxu0 %v6730_v32  ;;  %v6376_v52 = vcvt.s32.f32 %v5800_v1  ;;  %6978 = vmatpush.bf16.msra.mxu3 %v6676_v11  ;;  %v6663_v32 = vpack.c.bf16 %v6261_v30, %v6255_v10  ;;  %v6262_v27 = vcvt.s32.f32 %v5686_v34  ;;  %v5667_v1 = vunpack.c.2.s8 %v5277_v9 }
 0x46f   :  { %v6371_v51 = vcvt.s32.f32 %v5795_v36  ;;  %v6353_v17 = vcvt.s32.f32 %v5777_v29  ;;  %v5673_v45 = vunpack.c.3.s8 %v5277_v9  ;;  %v6359_v8 = vcvt.s32.f32 %v5783_v58  ;;  %v5297_v58 = vld [vmem:[#allocation17 + $0x318] sm:$0xff] }
 0x470   :  { %7022 = vmatpush.bf16.msrb.mxu2 %v6503_v49  ;;  %v6724_v22 = vpack.c.bf16 %v6382_v39, %v6376_v52  ;;  %v5698_v49 = vunpack.c.3.s8 %v5284_v18  ;;  %v6664_v18 = vpack.c.bf16 %v6262_v27, %v6256_v12  ;;  %v6243_v52 = vcvt.s32.f32 %v5667_v1  ;;  %v5296_v12 = vld [vmem:[#allocation17 + $0x310] sm:$0xff] }
 0x471   :  { %6901 = vmatpush.bf16.msrb.mxu1 %v6669_v55  ;;  %v5674_v39 = vunpack.c.3.s8 %v5278_v50  ;;  %v6249_v2 = vcvt.s32.f32 %v5673_v45  ;;  %v6244_v62 = vcvt.s32.f32 %v5668_v57  ;;  %v6713_v7 = vpack.c.bf16 %v6359_v8, %v6353_v17 }
 0x472   :  { %v6274_v33 = vcvt.s32.f32 %v5698_v49  ;;  %6991 = vmatpush.bf16.msrb.mxu0 %v6724_v22  ;;  %v5765_v60 = vunpack.c.2.s8 %v5303_v38  ;;  %v5771_v11 = vunpack.c.3.s8 %v5303_v38  ;;  %v6340_v3 = vcvt.s32.f32 %v5764_v26 }
 0x473   :  { %v6250_v42 = vcvt.s32.f32 %v5674_v39  ;;  %v6657_v22 = vpack.c.bf16 %v6249_v2, %v6243_v52  ;;  %v6346_v49 = vcvt.s32.f32 %v5770_v35  ;;  %v5661_v36 = vunpack.c.1.s8 %v5277_v9 }
 0x474   :  { %7023 = vmatpush.bf16.msrb.mxu2 %v6497_v16  ;;  %v6670_v0 = vpack.c.bf16 %v6274_v33, %v6268_v13  ;;  %v6365_v16 = vcvt.s32.f32 %v5789_v41  ;;  %v6341_v13 = vcvt.s32.f32 %v5765_v60  ;;  %v6347_v44 = vcvt.s32.f32 %v5771_v11 }
 0x475   :  { %6902 = vmatpush.bf16.msrb.mxu1 %v6663_v32  ;;  %v6658_v53 = vpack.c.bf16 %v6250_v42, %v6244_v62  ;;  %v5161_v33 = vperm.slane %v8964_v21, 5  ;;  %v6706_v46 = vpack.c.bf16 %v6346_v49, %v6340_v3  ;;  %v5655_v41 = vunpack.c.0.s8 %v5277_v9  ;;  %v5272_v9 = vld [vmem:[#allocation17 + $0x250] sm:$0xff] }
 0x476   :  { %6979 = vmatpush.bf16.msra.mxu3 %v6670_v0  ;;  %v6719_v5 = vpack.c.bf16 %v6371_v51, %v6365_v16  ;;  %6992 = vmatpush.bf16.msrb.mxu0 %v6718_v4  ;;  %v5656_v55 = vunpack.c.0.s8 %v5278_v50  ;;  %v6707_v20 = vpack.c.bf16 %v6347_v44, %v6341_v13  ;;  %v5662_v54 = vunpack.c.1.s8 %v5278_v50 }
 0x477   :  { %7024 = vmatmul.bf16.vlgmr.msrb.gmra.mxu2 %v8496_v43  ;;  %v5752_v28 = vunpack.c.0.s8 %v5302_v25  ;;  %v5758_v0 = vunpack.c.1.s8 %v5302_v25  ;;  %v6237_v16 = vcvt.s32.f32 %v5661_v36  ;;  %v5753_v10 = vunpack.c.0.s8 %v5303_v38 }
 0x478   :  { %7068 = vmatpush.bf16.msra.mxu2 %v6731_v63  ;;  %v6358_v63 = vcvt.s32.f32 %v5782_v48  ;;  %v6232_v51 = vcvt.s32.f32 %v5656_v55  ;;  %v6238_v21 = vcvt.s32.f32 %v5662_v54  ;;  %v5759_v4 = vunpack.c.1.s8 %v5303_v38 }
 0x479   :  { %6903 = vmatpush.bf16.msrb.mxu1 %v6657_v22  ;;  %v6328_v56 = vcvt.s32.f32 %v5752_v28  ;;  %v6334_v34 = vcvt.s32.f32 %v5758_v0  ;;  %v6329_v50 = vcvt.s32.f32 %v5753_v10  ;;  %v5643_v32 = vunpack.c.2.s8 %v9162_v40 }
 0x47a   :  { %v6712_v61 = vpack.c.bf16 %v6358_v63, %v6352_v6  ;;  %6980 = vmatpush.bf16.msra.mxu3 %v6664_v18  ;;  %v5130_v30 = vpop.f32.mrf.mxu3  ;;  %v6817_v23 = vpop.f32.mrf.mxu2  ;;  %v6652_v29 = vpack.c.bf16 %v6238_v21, %v6232_v51  ;;  %v6335_v63 = vcvt.s32.f32 %v5759_v4  ;;  %v5649_v25 = vunpack.c.3.s8 %v9162_v40  ;;  %v5267_v21 = vld [vmem:[#allocation17 + $0x228] sm:$0xff] }
 0x47b   :  { %v9167_v27 = vadd.f32 %v6817_v23, %v9124_v19  ;;  %v6700_v6 = vpack.c.bf16 %v6334_v34, %v6328_v56  ;;  %v6219_v18 = vcvt.s32.f32 %v5643_v32  ;;  %v5644_v17 = vunpack.c.2.s8 %v5272_v9 }
 0x47c   :  { %7069 = vmatpush.bf16.msra.mxu2 %v6725_v47  ;;  %6993 = vmatpush.bf16.msrb.mxu0 %v6712_v61  ;;  %v5141_v47 = vperm.slane %v8961_v24, 5  ;;  %v6231_v24 = vcvt.s32.f32 %v5655_v41  ;;  %v5650_v45 = vunpack.c.3.s8 %v5272_v9  ;;  %v5740_v57 = vunpack.c.2.s8 %v5296_v12 }
 0x47d   :  { %v5746_v38 = vunpack.c.3.s8 %v5296_v12  ;;  %v6225_v8 = vcvt.s32.f32 %v5649_v25  ;;  %v6220_v19 = vcvt.s32.f32 %v5644_v17  ;;  %v5741_v52 = vunpack.c.2.s8 %v5297_v58 }
 0x47e   :  { %6981 = vmatpush.bf16.msra.mxu3 %v6658_v53  ;;  %v6651_v48 = vpack.c.bf16 %v6237_v16, %v6231_v24  ;;  %v6226_v39 = vcvt.s32.f32 %v5650_v45  ;;  %v6316_v2 = vcvt.s32.f32 %v5740_v57  ;;  %v5747_v26 = vunpack.c.3.s8 %v5297_v58  ;;  %v5243_v16 = vld [vmem:[#allocation17 + $0x168] sm:$0xff] }
 0x47f   :  { %v6322_v62 = vcvt.s32.f32 %v5746_v38  ;;  %v6317_v42 = vcvt.s32.f32 %v5741_v52  ;;  %v5631_v49 = vunpack.c.0.s8 %v9162_v40  ;;  %v5637_v13 = vunpack.c.1.s8 %v9162_v40 }
 0x480   :  { %7070 = vmatpush.bf16.msra.mxu2 %v6719_v5  ;;  %6994 = vmatpush.bf16.msrb.mxu0 %v6706_v46  ;;  %v5131_v5 = vadd.f32 %v5130_v30, %v9151_v59  ;;  %v6701_v59 = vpack.c.bf16 %v6335_v63, %v6329_v50  ;;  %v6646_v60 = vpack.c.bf16 %v6226_v39, %v6220_v19  ;;  %v6323_v22 = vcvt.s32.f32 %v5747_v26  ;;  %v5242_v46 = vld [vmem:[#allocation17 + $0x160] sm:$0xff] }
 0x481   :  { %6904 = vmatpush.bf16.msrb.mxu1 %v6651_v48  ;;  %v6694_v11 = vpack.c.bf16 %v6322_v62, %v6316_v2  ;;  %v5632_v44 = vunpack.c.0.s8 %v5272_v9  ;;  %v6207_v55 = vcvt.s32.f32 %v5631_v49  ;;  %v6213_v54 = vcvt.s32.f32 %v5637_v13 }
 0x482   :  { %v5153_v1 = vmul.f32 %v5141_v47, %v5131_v5  ;;  %6982 = vmatpush.bf16.msra.mxu3 %v6652_v29  ;;  %v5132_v3 = vpop.f32.mrf.mxu3  ;;  %v6819_v53 = vpop.f32.mrf.mxu2  ;;  %v6695_v36 = vpack.c.bf16 %v6323_v22, %v6317_v42  ;;  %v5734_v24 = vunpack.c.1.s8 %v5296_v12  ;;  %v5729_v10 = vunpack.c.0.s8 %v5297_v58  ;;  %v5268_v5 = vld [vmem:[#allocation17 + $0x230] sm:$0xff] }
 0x483   :  { %v6208_v28 = vcvt.s32.f32 %v5632_v44  ;;  %v5735_v30 = vunpack.c.1.s8 %v5297_v58  ;;  %v5524_v40 = vunpack.c.2.s8 %v5242_v46  ;;  %v6639_v56 = vpack.c.bf16 %v6213_v54, %v6207_v55 }
 0x484   :  { %7071 = vmatpush.bf16.msra.mxu2 %v6713_v7  ;;  %6995 = vmatpush.bf16.msrb.mxu0 %v6700_v6  ;;  %v5173_v61 = vadd.f32 %v5161_v33, %v5153_v1  ;;  %v6645_v7 = vpack.c.bf16 %v6225_v8, %v6219_v18  ;;  %v5638_v33 = vunpack.c.1.s8 %v5272_v9  ;;  %v6310_v4 = vcvt.s32.f32 %v5734_v24 }
 0x485   :  { %v5530_v9 = vunpack.c.3.s8 %v5242_v46  ;;  %v6305_v23 = vcvt.s32.f32 %v5729_v10  ;;  %v6311_v48 = vcvt.s32.f32 %v5735_v30  ;;  %v6100_v50 = vcvt.s32.f32 %v5524_v40 }
 0x486   :  { %vm5179_vm1 = vcmp.ge.f32.partialorder %v5173_v61, 0.0  ;;  %v5185_v35 = vmul.f32 0.01, %v5173_v61  ;;  %6905 = vmatpush.bf16.msrb.mxu1 %v6645_v7  ;;  %6983 = vmatpush.bf16.msra.mxu3 %v6646_v60  ;;  %v6214_v0 = vcvt.s32.f32 %v5638_v33  ;;  %v5525_v32 = vunpack.c.2.s8 %v5243_v16  ;;  %v5236_v60 = vld [vmem:[#allocation17 + $0x130] sm:$0xff] }
 0x487   :  { %v6106_v29 = vcvt.s32.f32 %v5530_v9  ;;  %v5531_v6 = vunpack.c.3.s8 %v5243_v16  ;;  %v5621_v63 = vunpack.c.2.s8 %v5267_v21  ;;  %v6689_v58 = vpack.c.bf16 %v6311_v48, %v6305_v23 }
 0x488   :  { %7072 = vmatpush.bf16.msra.mxu2 %v6707_v20  ;;  %v5191_v47 = vsel %vm5179_vm1, %v5173_v61, %v5185_v35  ;;  %6996 = vmatpush.bf16.msrb.mxu0 %v6694_v11  ;;  %v5728_v20 = vunpack.c.0.s8 %v5296_v12  ;;  %v6640_v34 = vpack.c.bf16 %v6214_v0, %v6208_v28  ;;  %v6101_v1 = vcvt.s32.f32 %v5525_v32 }
 0x489   :  { %v9172_v41 = vpack.c.bf16 %v5191_v47, %v5191_v47  ;;  %v5627_v25 = vunpack.c.3.s8 %v5267_v21  ;;  %v5622_v18 = vunpack.c.2.s8 %v5268_v5  ;;  %v6586_v17 = vpack.c.bf16 %v6106_v29, %v6100_v50  ;;  %v5237_v47 = vld [vmem:[#allocation17 + $0x138] sm:$0xff] }
 0x48a   :  { %v6304_v51 = vcvt.s32.f32 %v5728_v20  ;;  %6906 = vmatpush.bf16.msrb.mxu1 %v6639_v56  ;;  %6984 = vmatpush.bf16.msra.mxu3 %v6640_v34  ;;  %v6197_v45 = vcvt.s32.f32 %v5621_v63  ;;  %v5628_v57 = vunpack.c.3.s8 %v5268_v5  ;;  %v5512_v8 = vunpack.c.0.s8 %v5242_v46 }
 0x48b   :  { %6855 = vmatmul.bf16.vlgmr.msra.gmra.mxu1 %v9172_v41  ;;  %6933 = vmatmul.bf16.vlgmr.msrb.gmra.mxu3 %v9172_v41  ;;  %v6203_v38 = vcvt.s32.f32 %v5627_v25  ;;  %v6198_v61 = vcvt.s32.f32 %v5622_v18  ;;  %v5518_v19 = vunpack.c.1.s8 %v5242_v46  ;;  %v5513_v2 = vunpack.c.0.s8 %v5243_v16  ;;  %v5261_v46 = vld [vmem:[#allocation17 + $0x1f8] sm:$0xff] }
 0x48c   :  { %7073 = vmatpush.bf16.msra.mxu2 %v6701_v59  ;;  %v6688_v12 = vpack.c.bf16 %v6310_v4, %v6304_v51  ;;  %v6107_v59 = vcvt.s32.f32 %v5531_v6  ;;  %v6204_v39 = vcvt.s32.f32 %v5628_v57  ;;  %v5519_v62 = vunpack.c.1.s8 %v5243_v16  ;;  %v5262_v51 = vld [vmem:[#allocation17 + $0x200] sm:$0xff] }
 0x48d   :  { %v6635_v26 = vpack.c.bf16 %v6203_v38, %v6197_v45  ;;  %v6088_v35 = vcvt.s32.f32 %v5512_v8  ;;  %v6094_v7 = vcvt.s32.f32 %v5518_v19  ;;  %v5609_v42 = vunpack.c.0.s8 %v5267_v21  ;;  %v5230_v38 = vld [vmem:[#allocation17 + $0x100] sm:$0xff] }
 0x48e   :  { %6997 = vmatpush.bf16.msrb.mxu0 %v6688_v12  ;;  %6951 = vmatpush.bf16.msra.mxu1 %v6586_v17  ;;  %v6587_v52 = vpack.c.bf16 %v6107_v59, %v6101_v1  ;;  %v6636_v11 = vpack.c.bf16 %v6204_v39, %v6198_v61  ;;  %v6089_v22 = vcvt.s32.f32 %v5513_v2  ;;  %v6095_v3 = vcvt.s32.f32 %v5519_v62  ;;  %v5231_v2 = vld [vmem:[#allocation17 + $0x108] sm:$0xff] }
 0x48f   :  { %v5615_v49 = vunpack.c.1.s8 %v5267_v21  ;;  %v6580_v53 = vpack.c.bf16 %v6094_v7, %v6088_v35  ;;  %v6185_v13 = vcvt.s32.f32 %v5609_v42  ;;  %v5610_v44 = vunpack.c.0.s8 %v5268_v5  ;;  %v5255_v42 = vld [vmem:[#allocation17 + $0x1c8] sm:$0xff] }
 0x490   :  { %7074 = vmatpush.bf16.msra.mxu2 %v6695_v36  ;;  %7029 = vmatpush.bf16.msrb.mxu3 %v6587_v52  ;;  %v5616_v33 = vunpack.c.1.s8 %v5268_v5  ;;  %v6581_v36 = vpack.c.bf16 %v6095_v3, %v6089_v22  ;;  %v5500_v20 = vunpack.c.2.s8 %v5236_v60  ;;  %v5506_v54 = vunpack.c.3.s8 %v5236_v60 }
 0x491   :  { %6998 = vmatmul.bf16.vlgmr.msrb.gmra.mxu0 %v9052_v14  ;;  %v6191_v55 = vcvt.s32.f32 %v5615_v49  ;;  %v6186_v28 = vcvt.s32.f32 %v5610_v44  ;;  %v5501_v24 = vunpack.c.2.s8 %v5237_v47  ;;  %v5507_v16 = vunpack.c.3.s8 %v5237_v47  ;;  %v5256_v44 = vld [vmem:[#allocation17 + $0x1d0] sm:$0xff] }
 0x492   :  { %7042 = vmatpush.bf16.msra.mxu0 %v6635_v26  ;;  %6952 = vmatpush.bf16.msra.mxu1 %v6580_v53  ;;  %v6192_v0 = vcvt.s32.f32 %v5616_v33  ;;  %v6076_v30 = vcvt.s32.f32 %v5500_v20  ;;  %v6082_v40 = vcvt.s32.f32 %v5506_v54  ;;  %v5597_v21 = vunpack.c.2.s8 %v5261_v46 }
 0x493   :  { %v6629_v10 = vpack.c.bf16 %v6191_v55, %v6185_v13  ;;  %v6077_v34 = vcvt.s32.f32 %v5501_v24  ;;  %v6083_v4 = vcvt.s32.f32 %v5507_v16  ;;  %v5603_v9 = vunpack.c.3.s8 %v5261_v46 }
 0x494   :  { %7075 = vmatpush.bf16.msra.mxu2 %v6689_v58  ;;  %7030 = vmatpush.bf16.msrb.mxu3 %v6581_v36  ;;  %v6630_v56 = vpack.c.bf16 %v6192_v0, %v6186_v28  ;;  %v6574_v5 = vpack.c.bf16 %v6082_v40, %v6076_v30  ;;  %v6173_v23 = vcvt.s32.f32 %v5597_v21  ;;  %v5598_v48 = vunpack.c.2.s8 %v5262_v51 }
 0x495   :  { %v5604_v50 = vunpack.c.3.s8 %v5262_v51  ;;  %v6575_v32 = vpack.c.bf16 %v6083_v4, %v6077_v34  ;;  %v6179_v12 = vcvt.s32.f32 %v5603_v9  ;;  %v5488_v29 = vunpack.c.0.s8 %v5236_v60 }
 0x496   :  { %7043 = vmatpush.bf16.msra.mxu0 %v6629_v10  ;;  %v5494_v6 = vunpack.c.1.s8 %v5236_v60  ;;  %6953 = vmatpush.bf16.msra.mxu1 %v6574_v5  ;;  %v6174_v63 = vcvt.s32.f32 %v5598_v48  ;;  %v5489_v1 = vunpack.c.0.s8 %v5237_v47  ;;  %v5495_v25 = vunpack.c.1.s8 %v5237_v47 }
 0x497   :  { %7076 = vmatmul.bf16.vlgmr.msra.gmra.mxu2 %v9052_v14  ;;  %v6180_v58 = vcvt.s32.f32 %v5604_v50  ;;  %v6623_v17 = vpack.c.bf16 %v6179_v12, %v6173_v23  ;;  %v6064_v59 = vcvt.s32.f32 %v5488_v29  ;;  %v5585_v57 = vunpack.c.0.s8 %v5261_v46 }
 0x498   :  { %7120 = vmatpush.bf16.msrb.mxu2 %v6636_v11  ;;  %7031 = vmatpush.bf16.msrb.mxu3 %v6575_v32  ;;  %v6070_v45 = vcvt.s32.f32 %v5494_v6  ;;  %v6065_v19 = vcvt.s32.f32 %v5489_v1  ;;  %v6071_v52 = vcvt.s32.f32 %v5495_v25  ;;  %v5591_v39 = vunpack.c.1.s8 %v5261_v46  ;;  %v5224_v6 = vld [vmem:[#allocation17 + $0xd0] sm:$0xff] }
 0x499   :  { %v6624_v8 = vpack.c.bf16 %v6180_v58, %v6174_v63  ;;  %v6161_v26 = vcvt.s32.f32 %v5585_v57  ;;  %v5586_v35 = vunpack.c.0.s8 %v5262_v51  ;;  %v5592_v7 = vunpack.c.1.s8 %v5262_v51 }
 0x49a   :  { %v6830_v18 = vpop.f32.mrf.mxu3  ;;  %v9180_v61 = vpop.f32.mrf.mxu2  ;;  %7044 = vmatpush.bf16.msra.mxu0 %v6623_v17  ;;  %v6568_v62 = vpack.c.bf16 %v6070_v45, %v6064_v59  ;;  %v6569_v60 = vpack.c.bf16 %v6071_v52, %v6065_v19  ;;  %v6167_v11 = vcvt.s32.f32 %v5591_v39  ;;  %v5476_v22 = vunpack.c.2.s8 %v5230_v38  ;;  %v5225_v17 = vld [vmem:[#allocation17 + $0xd8] sm:$0xff] }
 0x49b   :  { %6907 = vmatmul.bf16.vlgmr.msrb.gmra.mxu1 %v8740_v31  ;;  %6985 = vmatmul.bf16.vlgmr.msra.gmra.mxu3 %v8740_v31  ;;  %v5482_v3 = vunpack.c.3.s8 %v5230_v38  ;;  %v6162_v49 = vcvt.s32.f32 %v5586_v35  ;;  %v6168_v47 = vcvt.s32.f32 %v5592_v7  ;;  %v5477_v53 = vunpack.c.2.s8 %v5231_v2  ;;  %v5249_v52 = vld [vmem:[#allocation17 + $0x198] sm:$0xff]  ;;  %v5250_v35 = vld [vmem:[#allocation17 + $0x1a0] sm:$0xff] }
 0x49c   :  { %7121 = vmatpush.bf16.msrb.mxu2 %v6630_v56  ;;  %6954 = vmatpush.bf16.msra.mxu1 %v6568_v62  ;;  %v5483_v13 = vunpack.c.3.s8 %v5231_v2  ;;  %v6617_v33 = vpack.c.bf16 %v6167_v11, %v6161_v26  ;;  %v6052_v46 = vcvt.s32.f32 %v5476_v22  ;;  %v5573_v55 = vunpack.c.2.s8 %v5255_v42 }
 0x49d   :  { %7032 = vmatpush.bf16.msrb.mxu3 %v6569_v60  ;;  %v6058_v36 = vcvt.s32.f32 %v5482_v3  ;;  %v6618_v20 = vpack.c.bf16 %v6168_v47, %v6162_v49  ;;  %v6053_v54 = vcvt.s32.f32 %v5477_v53  ;;  %v5579_v0 = vunpack.c.3.s8 %v5255_v42 }
 0x49e   :  { %v6059_v28 = vcvt.s32.f32 %v5483_v13  ;;  %7045 = vmatpush.bf16.msra.mxu0 %v6617_v33  ;;  %v6149_v16 = vcvt.s32.f32 %v5573_v55  ;;  %v5574_v51 = vunpack.c.2.s8 %v5256_v44  ;;  %v5580_v10 = vunpack.c.3.s8 %v5256_v44 }
 0x49f   :  { %v6562_v24 = vpack.c.bf16 %v6058_v36, %v6052_v46  ;;  %v6155_v21 = vcvt.s32.f32 %v5579_v0  ;;  %v9183_v56 = vadd.f32 %v6830_v18, %v9167_v27  ;;  %v5464_v34 = vunpack.c.0.s8 %v5230_v38 }
 0x4a0   :  { %7122 = vmatpush.bf16.msrb.mxu2 %v6624_v8  ;;  %v6563_v40 = vpack.c.bf16 %v6059_v28, %v6053_v54  ;;  %v6150_v9 = vcvt.s32.f32 %v5574_v51  ;;  %v6156_v5 = vcvt.s32.f32 %v5580_v10  ;;  %v5470_v23 = vunpack.c.1.s8 %v5230_v38 }
 0x4a1   :  { %6955 = vmatpush.bf16.msra.mxu1 %v6562_v24  ;;  %v5465_v48 = vunpack.c.0.s8 %v5231_v2  ;;  %v6611_v50 = vpack.c.bf16 %v6155_v21, %v6149_v16  ;;  %v6040_v32 = vcvt.s32.f32 %v5464_v34  ;;  %v5471_v12 = vunpack.c.1.s8 %v5231_v2 }
 0x4a2   :  { %v6832_v30 = vpop.f32.mrf.mxu3  ;;  %v6871_v4 = vpop.f32.mrf.mxu2  ;;  %7033 = vmatpush.bf16.msrb.mxu3 %v6563_v40  ;;  %v5561_v29 = vunpack.c.0.s8 %v5255_v42  ;;  %v6612_v63 = vpack.c.bf16 %v6156_v5, %v6150_v9  ;;  %v6046_v58 = vcvt.s32.f32 %v5470_v23  ;;  %v5567_v25 = vunpack.c.1.s8 %v5255_v42  ;;  %v5338_v40 = vld [vmem:[#allocation17 + $0x460] sm:$0xff]  ;;  %v5339_v5 = vld [vmem:[#allocation17 + $0x468] sm:$0xff] }
 0x4a3   :  { %v6041_v1 = vcvt.s32.f32 %v5465_v48  ;;  %7046 = vmatpush.bf16.msra.mxu0 %v6611_v50  ;;  %v6047_v27 = vcvt.s32.f32 %v5471_v12  ;;  %v5562_v59 = vunpack.c.0.s8 %v5256_v44  ;;  %v5568_v45 = vunpack.c.1.s8 %v5256_v44 }
 0x4a4   :  { %7123 = vmatpush.bf16.msrb.mxu2 %v6618_v20  ;;  %v6137_v18 = vcvt.s32.f32 %v5561_v29  ;;  %v6556_v57 = vpack.c.bf16 %v6046_v58, %v6040_v32  ;;  %v6143_v38 = vcvt.s32.f32 %v5567_v25  ;;  %v5452_v8 = vunpack.c.2.s8 %v5224_v6  ;;  %v5220_v58 = vld [vmem:[#allocation17 + $0xb0] sm:$0xff] }
 0x4a5   :  { %v5458_v19 = vunpack.c.3.s8 %v5224_v6  ;;  %v6557_v39 = vpack.c.bf16 %v6047_v27, %v6041_v1  ;;  %v6138_v2 = vcvt.s32.f32 %v5562_v59  ;;  %v6144_v62 = vcvt.s32.f32 %v5568_v45 }
 0x4a6   :  { %v5453_v26 = vunpack.c.2.s8 %v5225_v17  ;;  %6956 = vmatpush.bf16.msra.mxu1 %v6556_v57  ;;  %v6605_v7 = vpack.c.bf16 %v6143_v38, %v6137_v18  ;;  %v6028_v42 = vcvt.s32.f32 %v5452_v8  ;;  %v5459_v11 = vunpack.c.3.s8 %v5225_v17  ;;  %v5221_v18 = vld [vmem:[#allocation17 + $0xb8] sm:$0xff] }
 0x4a7   :  { %v6034_v60 = vcvt.s32.f32 %v5458_v19  ;;  %7034 = vmatpush.bf16.msrb.mxu3 %v6557_v39  ;;  %v6606_v22 = vpack.c.bf16 %v6144_v62, %v6138_v2  ;;  %v5549_v49 = vunpack.c.2.s8 %v5249_v52  ;;  %v5555_v47 = vunpack.c.3.s8 %v5249_v52 }
 0x4a8   :  { %7124 = vmatpush.bf16.msrb.mxu2 %v6612_v63  ;;  %v6029_v3 = vcvt.s32.f32 %v5453_v26  ;;  %7047 = vmatpush.bf16.msra.mxu0 %v6605_v7  ;;  %v6035_v13 = vcvt.s32.f32 %v5459_v11  ;;  %v5550_v44 = vunpack.c.2.s8 %v5250_v35  ;;  %v5556_v33 = vunpack.c.3.s8 %v5250_v35 }
 0x4a9   :  { %v6550_v53 = vpack.c.bf16 %v6034_v60, %v6028_v42  ;;  %v6125_v46 = vcvt.s32.f32 %v5549_v49  ;;  %v6131_v36 = vcvt.s32.f32 %v5555_v47  ;;  %v5440_v55 = vunpack.c.0.s8 %v5224_v6 }
 0x4aa   :  { %v5446_v20 = vunpack.c.1.s8 %v5224_v6  ;;  %v6551_v54 = vpack.c.bf16 %v6035_v13, %v6029_v3  ;;  %v6126_v28 = vcvt.s32.f32 %v5550_v44  ;;  %v6132_v0 = vcvt.s32.f32 %v5556_v33 }
 0x4ab   :  { %6957 = vmatpush.bf16.msra.mxu1 %v6550_v53  ;;  %v5441_v24 = vunpack.c.0.s8 %v5225_v17  ;;  %v6599_v16 = vpack.c.bf16 %v6131_v36, %v6125_v46  ;;  %v6016_v51 = vcvt.s32.f32 %v5440_v55  ;;  %v5447_v30 = vunpack.c.1.s8 %v5225_v17  ;;  %v5332_v36 = vld [vmem:[#allocation17 + $0x430] sm:$0xff] }
 0x4ac   :  { %7125 = vmatpush.bf16.msrb.mxu2 %v6606_v22  ;;  %v6022_v10 = vcvt.s32.f32 %v5446_v20  ;;  %7035 = vmatpush.bf16.msrb.mxu3 %v6551_v54  ;;  %v6600_v21 = vpack.c.bf16 %v6132_v0, %v6126_v28  ;;  %v5537_v4 = vunpack.c.0.s8 %v5249_v52  ;;  %v5543_v9 = vunpack.c.1.s8 %v5249_v52  ;;  %v5333_v0 = vld [vmem:[#allocation17 + $0x438] sm:$0xff] }
 0x4ad   :  { %v6017_v34 = vcvt.s32.f32 %v5441_v24  ;;  %7048 = vmatpush.bf16.msra.mxu0 %v6599_v16  ;;  %v6023_v48 = vcvt.s32.f32 %v5447_v30  ;;  %v5538_v50 = vunpack.c.0.s8 %v5250_v35  ;;  %v5544_v32 = vunpack.c.1.s8 %v5250_v35 }
 0x4ae   :  { %v6544_v23 = vpack.c.bf16 %v6022_v10, %v6016_v51  ;;  %v6113_v12 = vcvt.s32.f32 %v5537_v4  ;;  %v6119_v29 = vcvt.s32.f32 %v5543_v9  ;;  %v5908_v6 = vunpack.c.2.s8 %v5338_v40  ;;  %v5214_v4 = vld [vmem:[#allocation17 + $0x80] sm:$0xff] }
 0x4af   :  { %v5914_v63 = vunpack.c.3.s8 %v5338_v40  ;;  %v6545_v1 = vpack.c.bf16 %v6023_v48, %v6017_v34  ;;  %v6114_v25 = vcvt.s32.f32 %v5538_v50  ;;  %v6120_v17 = vcvt.s32.f32 %v5544_v32  ;;  %v5215_v50 = vld [vmem:[#allocation17 + $0x88] sm:$0xff] }
 0x4b0   :  { %7126 = vmatpush.bf16.msrb.mxu2 %v6600_v21  ;;  %6958 = vmatpush.bf16.msra.mxu1 %v6544_v23  ;;  %v5909_v27 = vunpack.c.2.s8 %v5339_v5  ;;  %v6593_v59 = vpack.c.bf16 %v6119_v29, %v6113_v12  ;;  %v6484_v45 = vcvt.s32.f32 %v5908_v6  ;;  %v5915_v38 = vunpack.c.3.s8 %v5339_v5 }
 0x4b1   :  { %v6490_v57 = vcvt.s32.f32 %v5914_v63  ;;  %7036 = vmatpush.bf16.msrb.mxu3 %v6545_v1  ;;  %v6594_v8 = vpack.c.bf16 %v6120_v17, %v6114_v25  ;;  %v5430_v52 = vunpack.c.2.s8 %v5220_v58  ;;  %v5436_v39 = vunpack.c.3.s8 %v5220_v58 }
 0x4b2   :  { %v6485_v19 = vcvt.s32.f32 %v5909_v27  ;;  %7049 = vmatpush.bf16.msra.mxu0 %v6593_v59  ;;  %v6491_v62 = vcvt.s32.f32 %v5915_v38  ;;  %v5431_v26 = vunpack.c.2.s8 %v5221_v18  ;;  %v5437_v35 = vunpack.c.3.s8 %v5221_v18 }
 0x4b3   :  { %v6778_v2 = vpack.c.bf16 %v6490_v57, %v6484_v45  ;;  %6959 = vmatmul.bf16.vlgmr.msra.gmra.mxu1 %v8548_v15  ;;  %v6006_v7 = vcvt.s32.f32 %v5430_v52  ;;  %v6012_v42 = vcvt.s32.f32 %v5436_v39  ;;  %v5896_v60 = vunpack.c.0.s8 %v5338_v40 }
 0x4b4   :  { %7127 = vmatpush.bf16.msrb.mxu2 %v6594_v8  ;;  %v5902_v11 = vunpack.c.1.s8 %v5338_v40  ;;  %v6779_v3 = vpack.c.bf16 %v6491_v62, %v6485_v19  ;;  %v6007_v49 = vcvt.s32.f32 %v5431_v26  ;;  %v6013_v47 = vcvt.s32.f32 %v5437_v35  ;;  %7037 = vmatmul.bf16.vlgmr.msrb.gmra.mxu3 %v8548_v15 }
 0x4b5   :  { %7003 = vmatpush.bf16.msrb.mxu1 %v6778_v2  ;;  %v5897_v53 = vunpack.c.0.s8 %v5339_v5  ;;  %v6540_v13 = vpack.c.bf16 %v6012_v42, %v6006_v7  ;;  %7050 = vmatmul.bf16.vlgmr.msra.gmra.mxu0 %v8615_v37  ;;  %v6472_v44 = vcvt.s32.f32 %v5896_v60  ;;  %v5903_v46 = vunpack.c.1.s8 %v5339_v5  ;;  %v5326_v60 = vld [vmem:[#allocation17 + $0x400] sm:$0xff] }
 0x4b6   :  { %v6478_v33 = vcvt.s32.f32 %v5902_v11  ;;  %7081 = vmatpush.bf16.msra.mxu3 %v6779_v3  ;;  %v6541_v55 = vpack.c.bf16 %v6013_v47, %v6007_v49  ;;  %v5418_v54 = vunpack.c.0.s8 %v5220_v58  ;;  %v5424_v28 = vunpack.c.1.s8 %v5220_v58 }
 0x4b7   :  { %7128 = vmatmul.bf16.vlgmr.msrb.gmra.mxu2 %v8615_v37  ;;  %v6473_v20 = vcvt.s32.f32 %v5897_v53  ;;  %7094 = vmatpush.bf16.msrb.mxu0 %v6540_v13  ;;  %v6479_v16 = vcvt.s32.f32 %v5903_v46  ;;  %v5419_v51 = vunpack.c.0.s8 %v5221_v18  ;;  %v5425_v10 = vunpack.c.1.s8 %v5221_v18  ;;  %v5327_v53 = vld [vmem:[#allocation17 + $0x408] sm:$0xff] }
 0x4b8   :  { %v6772_v24 = vpack.c.bf16 %v6478_v33, %v6472_v44  ;;  %7172 = vmatpush.bf16.msra.mxu2 %v6541_v55  ;;  %v5994_v30 = vcvt.s32.f32 %v5418_v54  ;;  %v6000_v40 = vcvt.s32.f32 %v5424_v28  ;;  %v5884_v21 = vunpack.c.2.s8 %v5332_v36  ;;  %v5208_v28 = vld [vmem:[#allocation17 + $0x50] sm:$0xff] }
 0x4b9   :  { %v5890_v34 = vunpack.c.3.s8 %v5332_v36  ;;  %v6773_v9 = vpack.c.bf16 %v6479_v16, %v6473_v20  ;;  %v5995_v5 = vcvt.s32.f32 %v5419_v51  ;;  %v6001_v23 = vcvt.s32.f32 %v5425_v10  ;;  %v5209_v10 = vld [vmem:[#allocation17 + $0x58] sm:$0xff] }
 0x4ba   :  { %v9186_v22 = vpop.f32.mrf.mxu3  ;;  %7004 = vmatpush.bf16.msrb.mxu1 %v6772_v24  ;;  %v5885_v48 = vunpack.c.2.s8 %v5333_v0  ;;  %v6534_v32 = vpack.c.bf16 %v6000_v40, %v5994_v30  ;;  %v6460_v12 = vcvt.s32.f32 %v5884_v21  ;;  %v5891_v6 = vunpack.c.3.s8 %v5333_v0 }
 0x4bb   :  { %v6466_v29 = vcvt.s32.f32 %v5890_v34  ;;  %7082 = vmatpush.bf16.msra.mxu3 %v6773_v9  ;;  %v6535_v63 = vpack.c.bf16 %v6001_v23, %v5995_v5  ;;  %v5406_v1 = vunpack.c.2.s8 %v5214_v4  ;;  %v5412_v25 = vunpack.c.3.s8 %v5214_v4 }
 0x4bc   :  { %v6461_v58 = vcvt.s32.f32 %v5885_v48  ;;  %7095 = vmatpush.bf16.msrb.mxu0 %v6534_v32  ;;  %v6467_v18 = vcvt.s32.f32 %v5891_v6  ;;  %v5407_v59 = vunpack.c.2.s8 %v5215_v50  ;;  %v5413_v45 = vunpack.c.3.s8 %v5215_v50 }
 0x4bd   :  { %v6766_v27 = vpack.c.bf16 %v6466_v29, %v6460_v12  ;;  %7173 = vmatpush.bf16.msra.mxu2 %v6535_v63  ;;  %v5982_v57 = vcvt.s32.f32 %v5406_v1  ;;  %v5988_v38 = vcvt.s32.f32 %v5412_v25  ;;  %v5872_v8 = vunpack.c.0.s8 %v5332_v36 }
 0x4be   :  { %v5878_v19 = vunpack.c.1.s8 %v5332_v36  ;;  %v6767_v52 = vpack.c.bf16 %v6467_v18, %v6461_v58  ;;  %v5983_v39 = vcvt.s32.f32 %v5407_v59  ;;  %v5989_v2 = vcvt.s32.f32 %v5413_v45 }
 0x4bf   :  { %7005 = vmatpush.bf16.msrb.mxu1 %v6766_v27  ;;  %v5873_v62 = vunpack.c.0.s8 %v5333_v0  ;;  %v6528_v26 = vpack.c.bf16 %v5988_v38, %v5982_v57  ;;  %v6448_v35 = vcvt.s32.f32 %v5872_v8  ;;  %v5879_v42 = vunpack.c.1.s8 %v5333_v0  ;;  %v5320_v38 = vld [vmem:[#allocation17 + $0x3d0] sm:$0xff] }
 0x4c0   :  { %v6454_v7 = vcvt.s32.f32 %v5878_v19  ;;  %7083 = vmatpush.bf16.msra.mxu3 %v6767_v52  ;;  %v6529_v11 = vpack.c.bf16 %v5989_v2, %v5983_v39  ;;  %v5394_v49 = vunpack.c.0.s8 %v5214_v4  ;;  %v5400_v47 = vunpack.c.1.s8 %v5214_v4 }
 0x4c1   :  { %v6449_v3 = vcvt.s32.f32 %v5873_v62  ;;  %7096 = vmatpush.bf16.msrb.mxu0 %v6528_v26  ;;  %v6455_v44 = vcvt.s32.f32 %v5879_v42  ;;  %v5395_v33 = vunpack.c.0.s8 %v5215_v50  ;;  %v5401_v46 = vunpack.c.1.s8 %v5215_v50 }
 0x4c2   :  { %v6884_v17 = vpop.f32.mrf.mxu3  ;;  %v6760_v13 = vpack.c.bf16 %v6454_v7, %v6448_v35  ;;  %7174 = vmatpush.bf16.msra.mxu2 %v6529_v11  ;;  %v5970_v36 = vcvt.s32.f32 %v5394_v49  ;;  %v5976_v55 = vcvt.s32.f32 %v5400_v47  ;;  %v5860_v20 = vunpack.c.2.s8 %v5326_v60  ;;  %v9195_v2 = vpop.f32.mrf.mxu0  ;;  %v5321_v35 = vld [vmem:[#allocation17 + $0x3d8] sm:$0xff] }
 0x4c3   :  { %v5866_v54 = vunpack.c.3.s8 %v5326_v60  ;;  %v6761_v0 = vpack.c.bf16 %v6455_v44, %v6449_v3  ;;  %v5971_v24 = vcvt.s32.f32 %v5395_v33  ;;  %v5977_v16 = vcvt.s32.f32 %v5401_v46  ;;  %v5202_v3 = vld [vmem:[#allocation17 + $0x20] sm:$0xff]  ;;  %v5203_v44 = vld [vmem:[#allocation17 + $0x28] sm:$0xff] }
 0x4c4   :  { %7006 = vmatpush.bf16.msrb.mxu1 %v6760_v13  ;;  %v5861_v51 = vunpack.c.2.s8 %v5327_v53  ;;  %v6522_v30 = vpack.c.bf16 %v5976_v55, %v5970_v36  ;;  %v6436_v40 = vcvt.s32.f32 %v5860_v20  ;;  %v5867_v34 = vunpack.c.3.s8 %v5327_v53 }
 0x4c5   :  { %v6442_v21 = vcvt.s32.f32 %v5866_v54  ;;  %7084 = vmatpush.bf16.msra.mxu3 %v6761_v0  ;;  %v6523_v4 = vpack.c.bf16 %v5977_v16, %v5971_v24  ;;  %v5382_v5 = vunpack.c.2.s8 %v5208_v28  ;;  %v5388_v23 = vunpack.c.3.s8 %v5208_v28 }
 0x4c6   :  { %v6437_v9 = vcvt.s32.f32 %v5861_v51  ;;  %7097 = vmatpush.bf16.msrb.mxu0 %v6522_v30  ;;  %v6443_v50 = vcvt.s32.f32 %v5867_v34  ;;  %v5383_v32 = vunpack.c.2.s8 %v5209_v10  ;;  %v5389_v12 = vunpack.c.3.s8 %v5209_v10 }
 0x4c7   :  { %v6754_v48 = vpack.c.bf16 %v6442_v21, %v6436_v40  ;;  %7175 = vmatpush.bf16.msra.mxu2 %v6523_v4  ;;  %v5958_v29 = vcvt.s32.f32 %v5382_v5  ;;  %v5964_v6 = vcvt.s32.f32 %v5388_v23  ;;  %v9193_v63 = vadd.f32 %v9186_v22, %v9180_v61 }
 0x4c8   :  { %v5848_v58 = vunpack.c.0.s8 %v5326_v60  ;;  %v6755_v1 = vpack.c.bf16 %v6443_v50, %v6437_v9  ;;  %v5959_v25 = vcvt.s32.f32 %v5383_v32  ;;  %v5965_v17 = vcvt.s32.f32 %v5389_v12  ;;  %v9197_v30 = vpop.f32.mrf.mxu2 }
 0x4c9   :  { %7007 = vmatpush.bf16.msrb.mxu1 %v6754_v48  ;;  %v5854_v27 = vunpack.c.1.s8 %v5326_v60  ;;  %v6516_v18 = vpack.c.bf16 %v5964_v6, %v5958_v29  ;;  %v5849_v45 = vunpack.c.0.s8 %v5327_v53  ;;  %v5855_v57 = vunpack.c.1.s8 %v5327_v53 }
 0x4ca   :  { %v6424_v59 = vcvt.s32.f32 %v5848_v58  ;;  %7085 = vmatpush.bf16.msra.mxu3 %v6755_v1  ;;  %v6517_v8 = vpack.c.bf16 %v5965_v17, %v5959_v25  ;;  %v5370_v52 = vunpack.c.0.s8 %v5208_v28  ;;  %v5376_v39 = vunpack.c.1.s8 %v5208_v28  ;;  %v6845_v50 = vpop.f32.mrf.mxu0  ;;  %v5291_v58 = vld [vmem:[#allocation17 + $0x2e8] sm:$0xff] }
 0x4cb   :  { %v6430_v19 = vcvt.s32.f32 %v5854_v27  ;;  %7098 = vmatpush.bf16.msrb.mxu0 %v6516_v18  ;;  %v6425_v61 = vcvt.s32.f32 %v5849_v45  ;;  %v6431_v22 = vcvt.s32.f32 %v5855_v57  ;;  %v5371_v62 = vunpack.c.0.s8 %v5209_v10 }
 0x4cc   :  { %v5377_v26 = vunpack.c.1.s8 %v5209_v10  ;;  %7176 = vmatpush.bf16.msra.mxu2 %v6517_v8  ;;  %v5946_v42 = vcvt.s32.f32 %v5370_v52  ;;  %v5952_v60 = vcvt.s32.f32 %v5376_v39  ;;  %v5836_v11 = vunpack.c.2.s8 %v5320_v38  ;;  %v5292_v8 = vld [vmem:[#allocation17 + $0x2f0] sm:$0xff] }
 0x4cd   :  { %v6748_v7 = vpack.c.bf16 %v6430_v19, %v6424_v59  ;;  %v6749_v49 = vpack.c.bf16 %v6431_v22, %v6425_v61  ;;  %v5947_v47 = vcvt.s32.f32 %v5371_v62  ;;  %v5842_v13 = vunpack.c.3.s8 %v5320_v38  ;;  %v5316_v61 = vld [vmem:[#allocation17 + $0x3b0] sm:$0xff] }
 0x4ce   :  { %v5953_v53 = vcvt.s32.f32 %v5377_v26  ;;  %v6510_v33 = vpack.c.bf16 %v5952_v60, %v5946_v42  ;;  %v6412_v46 = vcvt.s32.f32 %v5836_v11  ;;  %v5837_v36 = vunpack.c.2.s8 %v5321_v35 }
 0x4cf   :  { %7008 = vmatpush.bf16.msrb.mxu1 %v6748_v7  ;;  %v5843_v55 = vunpack.c.3.s8 %v5321_v35  ;;  %7086 = vmatpush.bf16.msra.mxu3 %v6749_v49  ;;  %v6418_v54 = vcvt.s32.f32 %v5842_v13  ;;  %v5358_v28 = vunpack.c.2.s8 %v5202_v3  ;;  %v5364_v0 = vunpack.c.3.s8 %v5202_v3  ;;  %v5317_v7 = vld [vmem:[#allocation17 + $0x3b8] sm:$0xff] }
 0x4d0   :  { %v6511_v20 = vpack.c.bf16 %v5953_v53, %v5947_v47  ;;  %7099 = vmatpush.bf16.msrb.mxu0 %v6510_v33  ;;  %v6413_v24 = vcvt.s32.f32 %v5837_v36  ;;  %v5359_v51 = vunpack.c.2.s8 %v5203_v44  ;;  %v5365_v10 = vunpack.c.3.s8 %v5203_v44  ;;  %v6923_v49 = vpop.f32.mrf.mxu2 }
 0x4d1   :  { %v6419_v16 = vcvt.s32.f32 %v5843_v55  ;;  %v6742_v40 = vpack.c.bf16 %v6418_v54, %v6412_v46  ;;  %v5934_v21 = vcvt.s32.f32 %v5358_v28  ;;  %v5940_v34 = vcvt.s32.f32 %v5364_v0 }
 0x4d2   :  { %7177 = vmatpush.bf16.msra.mxu2 %v6511_v20  ;;  %v5824_v4 = vunpack.c.0.s8 %v5320_v38  ;;  %v5935_v5 = vcvt.s32.f32 %v5359_v51  ;;  %v5941_v23 = vcvt.s32.f32 %v5365_v10  ;;  %v5830_v48 = vunpack.c.1.s8 %v5320_v38 }
 0x4d3   :  { %v6743_v9 = vpack.c.bf16 %v6419_v16, %v6413_v24  ;;  %7009 = vmatpush.bf16.msrb.mxu1 %v6742_v40  ;;  %v6504_v32 = vpack.c.bf16 %v5940_v34, %v5934_v21  ;;  %v5825_v29 = vunpack.c.0.s8 %v5321_v35  ;;  %v5831_v6 = vunpack.c.1.s8 %v5321_v35 }
 0x4d4   :  { %v6400_v12 = vcvt.s32.f32 %v5824_v4  ;;  %v6505_v1 = vpack.c.bf16 %v5941_v23, %v5935_v5  ;;  %v6406_v25 = vcvt.s32.f32 %v5830_v48  ;;  %v5346_v17 = vunpack.c.0.s8 %v5202_v3 }
 0x4d5   :  { %7087 = vmatpush.bf16.msra.mxu3 %v6743_v9  ;;  %v5352_v27 = vunpack.c.1.s8 %v5202_v3  ;;  %7100 = vmatpush.bf16.msrb.mxu0 %v6504_v32  ;;  %v6401_v18 = vcvt.s32.f32 %v5825_v29  ;;  %v6407_v59 = vcvt.s32.f32 %v5831_v6  ;;  %v5347_v45 = vunpack.c.0.s8 %v5203_v44  ;;  %v9202_v9 = vld [vmem:[#allocation17 + $0x2b8] sm:$0xff] }
 0x4d6   :  { %v5353_v57 = vunpack.c.1.s8 %v5203_v44  ;;  %7178 = vmatpush.bf16.msra.mxu2 %v6505_v1  ;;  %v6736_v38 = vpack.c.bf16 %v6406_v25, %v6400_v12  ;;  %v5922_v19 = vcvt.s32.f32 %v5346_v17  ;;  %v5717_v39 = vunpack.c.2.s8 %v5291_v58  ;;  %v9205_v1 = vpop.f32.mrf.mxu0 }
 0x4d7   :  { %v5928_v52 = vcvt.s32.f32 %v5352_v27  ;;  %v6737_v22 = vpack.c.bf16 %v6407_v59, %v6401_v18  ;;  %v5923_v62 = vcvt.s32.f32 %v5347_v45  ;;  %v5723_v35 = vunpack.c.3.s8 %v5291_v58  ;;  %v5310_v59 = vld [vmem:[#allocation17 + $0x380] sm:$0xff] }
 0x4d8   :  { %v5929_v26 = vcvt.s32.f32 %v5353_v57  ;;  %7010 = vmatpush.bf16.msrb.mxu1 %v6736_v38  ;;  %v6293_v60 = vcvt.s32.f32 %v5717_v39  ;;  %v5718_v11 = vunpack.c.2.s8 %v5292_v8  ;;  %v5724_v3 = vunpack.c.3.s8 %v5292_v8  ;;  %v5311_v38 = vld [vmem:[#allocation17 + $0x388] sm:$0xff] }
 0x4d9   :  { %v6498_v42 = vpack.c.bf16 %v5928_v52, %v5922_v19  ;;  %7088 = vmatpush.bf16.msra.mxu3 %v6737_v22  ;;  %v6299_v53 = vcvt.s32.f32 %v5723_v35  ;;  %v5814_v13 = vunpack.c.2.s8 %v5316_v61  ;;  %v5820_v44 = vunpack.c.3.s8 %v5316_v61 }
 0x4da   :  { %v6499_v47 = vpack.c.bf16 %v5929_v26, %v5923_v62  ;;  %v6294_v33 = vcvt.s32.f32 %v5718_v11  ;;  %v6300_v46 = vcvt.s32.f32 %v5724_v3  ;;  %v5815_v36 = vunpack.c.2.s8 %v5317_v7 }
 0x4db   :  { %7101 = vmatpush.bf16.msrb.mxu0 %v6498_v42  ;;  %v5821_v55 = vunpack.c.3.s8 %v5317_v7  ;;  %v6683_v20 = vpack.c.bf16 %v6299_v53, %v6293_v60  ;;  %v6390_v54 = vcvt.s32.f32 %v5814_v13  ;;  %v6396_v28 = vcvt.s32.f32 %v5820_v44  ;;  %7011 = vmatmul.bf16.vlgmr.msrb.gmra.mxu1 %v9172_v41 }
 0x4dc   :  { %7179 = vmatpush.bf16.msra.mxu2 %v6499_v47  ;;  %v5705_v0 = vunpack.c.0.s8 %v5291_v58  ;;  %v6684_v24 = vpack.c.bf16 %v6300_v46, %v6294_v33  ;;  %v6391_v16 = vcvt.s32.f32 %v5815_v36  ;;  %7089 = vmatmul.bf16.vlgmr.msra.gmra.mxu3 %v9172_v41  ;;  %v5711_v10 = vunpack.c.1.s8 %v5291_v58  ;;  %v5286_v58 = vld [vmem:[#allocation17 + $0x2c0] sm:$0xff] }
 0x4dd   :  { %v6397_v51 = vcvt.s32.f32 %v5821_v55  ;;  %7055 = vmatpush.bf16.msra.mxu1 %v6683_v20  ;;  %v6732_v40 = vpack.c.bf16 %v6396_v28, %v6390_v54  ;;  %v5706_v34 = vunpack.c.0.s8 %v5292_v8  ;;  %v5712_v4 = vunpack.c.1.s8 %v5292_v8  ;;  %v5279_v28 = vld [vmem:[#allocation17 + $0x288] sm:$0xff] }
 0x4de   :  { %7102 = vmatmul.bf16.vlgmr.msrb.gmra.mxu0 %v8496_v43  ;;  %v6281_v21 = vcvt.s32.f32 %v5705_v0  ;;  %7133 = vmatpush.bf16.msrb.mxu3 %v6684_v24  ;;  %v6287_v23 = vcvt.s32.f32 %v5711_v10  ;;  %v5802_v48 = vunpack.c.0.s8 %v5316_v61  ;;  %v5808_v50 = vunpack.c.1.s8 %v5316_v61  ;;  %v6897_v0 = vpop.f32.mrf.mxu0 }
 0x4df   :  { %v6733_v5 = vpack.c.bf16 %v6397_v51, %v6391_v16  ;;  %7180 = vmatmul.bf16.vlgmr.msra.gmra.mxu2 %v8496_v43  ;;  %7146 = vmatpush.bf16.msra.mxu0 %v6732_v40  ;;  %v6282_v32 = vcvt.s32.f32 %v5706_v34  ;;  %v6288_v12 = vcvt.s32.f32 %v5712_v4  ;;  %v5803_v29 = vunpack.c.0.s8 %v5317_v7  ;;  %v5280_v4 = vld [vmem:[#allocation17 + $0x290] sm:$0xff] }
 0x4e0   :  { %v5809_v6 = vunpack.c.1.s8 %v5317_v7  ;;  %v6677_v25 = vpack.c.bf16 %v6287_v23, %v6281_v21  ;;  %v6378_v17 = vcvt.s32.f32 %v5802_v48  ;;  %v6384_v27 = vcvt.s32.f32 %v5808_v50  ;;  %v5304_v50 = vld [vmem:[#allocation17 + $0x350] sm:$0xff] }
 0x4e1   :  { %7224 = vmatpush.bf16.msrb.mxu2 %v6733_v5  ;;  %v5693_v18 = vunpack.c.2.s8 %v9202_v9  ;;  %v6678_v45 = vpack.c.bf16 %v6288_v12, %v6282_v32  ;;  %v6379_v43 = vcvt.s32.f32 %v5803_v29  ;;  %v5699_v8 = vunpack.c.3.s8 %v9202_v9 }
 0x4e2   :  { %v6385_v57 = vcvt.s32.f32 %v5809_v6  ;;  %7056 = vmatpush.bf16.msra.mxu1 %v6677_v25  ;;  %v6726_v19 = vpack.c.bf16 %v6384_v27, %v6378_v17  ;;  %v5694_v39 = vunpack.c.2.s8 %v5286_v58  ;;  %v5700_v61 = vunpack.c.3.s8 %v5286_v58 }
 0x4e3   :  { %v6269_v52 = vcvt.s32.f32 %v5693_v18  ;;  %7134 = vmatpush.bf16.msrb.mxu3 %v6678_v45  ;;  %v6275_v62 = vcvt.s32.f32 %v5699_v8  ;;  %v5790_v26 = vunpack.c.2.s8 %v5310_v59  ;;  %v5796_v35 = vunpack.c.3.s8 %v5310_v59 }
 0x4e4   :  { %v6727_v22 = vpack.c.bf16 %v6385_v57, %v6379_v43  ;;  %7147 = vmatpush.bf16.msra.mxu0 %v6726_v19  ;;  %v6270_v7 = vcvt.s32.f32 %v5694_v39  ;;  %v6276_v42 = vcvt.s32.f32 %v5700_v61  ;;  %v5791_v60 = vunpack.c.2.s8 %v5311_v38 }
 0x4e5   :  { %v5797_v11 = vunpack.c.3.s8 %v5311_v38  ;;  %v6671_v3 = vpack.c.bf16 %v6275_v62, %v6269_v52  ;;  %v6366_v49 = vcvt.s32.f32 %v5790_v26  ;;  %v6372_v47 = vcvt.s32.f32 %v5796_v35 }
 0x4e6   :  { %7225 = vmatpush.bf16.msrb.mxu2 %v6727_v22  ;;  %v9211_v53 = vadd.f32 %v9195_v2, %v9183_v56  ;;  %v6672_v13 = vpack.c.bf16 %v6276_v42, %v6270_v7  ;;  %v6367_v44 = vcvt.s32.f32 %v5791_v60  ;;  %v5681_v46 = vunpack.c.0.s8 %v9202_v9  ;;  %v9215_v56 = vpop.f32.mrf.mxu2 }
 0x4e7   :  { %v6373_v33 = vcvt.s32.f32 %v5797_v11  ;;  %7057 = vmatpush.bf16.msra.mxu1 %v6671_v3  ;;  %v6720_v36 = vpack.c.bf16 %v6372_v47, %v6366_v49  ;;  %v5687_v55 = vunpack.c.1.s8 %v9202_v9  ;;  %v5682_v20 = vunpack.c.0.s8 %v5286_v58 }
 0x4e8   :  { %v5688_v54 = vunpack.c.1.s8 %v5286_v58  ;;  %7135 = vmatpush.bf16.msrb.mxu3 %v6672_v13  ;;  %v6257_v16 = vcvt.s32.f32 %v5681_v46  ;;  %v5778_v51 = vunpack.c.0.s8 %v5310_v59  ;;  %v5784_v10 = vunpack.c.1.s8 %v5310_v59  ;;  %v5305_v58 = vld [vmem:[#allocation17 + $0x358] sm:$0xff]  ;;  %v9217_v11 = vpop.f32.mrf.mxu0 }
 0x4e9   :  { %v6721_v24 = vpack.c.bf16 %v6373_v33, %v6367_v44  ;;  %7148 = vmatpush.bf16.msra.mxu0 %v6720_v36  ;;  %v6263_v2 = vcvt.s32.f32 %v5687_v55  ;;  %v6258_v40 = vcvt.s32.f32 %v5682_v20  ;;  %v5779_v34 = vunpack.c.0.s8 %v5311_v38  ;;  %v5273_v44 = vld [vmem:[#allocation17 + $0x258] sm:$0xff] }
 0x4ea   :  { %v6264_v21 = vcvt.s32.f32 %v5688_v54  ;;  %v6354_v5 = vcvt.s32.f32 %v5778_v51  ;;  %v6360_v9 = vcvt.s32.f32 %v5784_v10  ;;  %v5785_v23 = vunpack.c.1.s8 %v5311_v38 }
 0x4eb   :  { %7226 = vmatpush.bf16.msrb.mxu2 %v6721_v24  ;;  %v5669_v48 = vunpack.c.2.s8 %v5279_v28  ;;  %v6665_v32 = vpack.c.bf16 %v6263_v2, %v6257_v16  ;;  %v6355_v29 = vcvt.s32.f32 %v5779_v34  ;;  %v5675_v6 = vunpack.c.3.s8 %v5279_v28 }
 0x4ec   :  { %v6666_v12 = vpack.c.bf16 %v6264_v21, %v6258_v40  ;;  %v6714_v25 = vpack.c.bf16 %v6360_v9, %v6354_v5  ;;  %v6361_v17 = vcvt.s32.f32 %v5785_v23  ;;  %v5670_v18 = vunpack.c.2.s8 %v5280_v4  ;;  %v5298_v40 = vld [vmem:[#allocation17 + $0x320] sm:$0xff]  ;;  %v5299_v9 = vld [vmem:[#allocation17 + $0x328] sm:$0xff] }
 0x4ed   :  { %v6245_v27 = vcvt.s32.f32 %v5669_v48  ;;  %7058 = vmatpush.bf16.msra.mxu1 %v6665_v32  ;;  %v6251_v59 = vcvt.s32.f32 %v5675_v6  ;;  %v5676_v45 = vunpack.c.3.s8 %v5280_v4  ;;  %v5766_v43 = vunpack.c.2.s8 %v5304_v50 }
 0x4ee   :  { %7136 = vmatpush.bf16.msrb.mxu3 %v6666_v12  ;;  %v5772_v57 = vunpack.c.3.s8 %v5304_v50  ;;  %7149 = vmatpush.bf16.msra.mxu0 %v6714_v25  ;;  %v6715_v8 = vpack.c.bf16 %v6361_v17, %v6355_v29  ;;  %v6246_v38 = vcvt.s32.f32 %v5670_v18  ;;  %v5767_v19 = vunpack.c.2.s8 %v5305_v58  ;;  %v6975_v60 = vpop.f32.mrf.mxu2 }
 0x4ef   :  { %v5773_v52 = vunpack.c.3.s8 %v5305_v58  ;;  %v6659_v39 = vpack.c.bf16 %v6251_v59, %v6245_v27  ;;  %v6252_v61 = vcvt.s32.f32 %v5676_v45  ;;  %v6342_v22 = vcvt.s32.f32 %v5766_v43 }
 0x4f0   :  { %v6348_v62 = vcvt.s32.f32 %v5772_v57  ;;  %7227 = vmatpush.bf16.msrb.mxu2 %v6715_v8  ;;  %v6343_v26 = vcvt.s32.f32 %v5767_v19  ;;  %v5657_v7 = vunpack.c.0.s8 %v5279_v28  ;;  %v5663_v42 = vunpack.c.1.s8 %v5279_v28  ;;  %v5274_v28 = vld [vmem:[#allocation17 + $0x260] sm:$0xff]  ;;  %v6949_v45 = vpop.f32.mrf.mxu0 }
 0x4f1   :  { %v6349_v35 = vcvt.s32.f32 %v5773_v52  ;;  %7059 = vmatpush.bf16.msra.mxu1 %v6659_v39  ;;  %v6660_v3 = vpack.c.bf16 %v6252_v61, %v6246_v38  ;;  %v5658_v47 = vunpack.c.0.s8 %v5280_v4  ;;  %v5664_v13 = vunpack.c.1.s8 %v5280_v4 }
 0x4f2   :  { %v6708_v49 = vpack.c.bf16 %v6348_v62, %v6342_v22  ;;  %v6233_v46 = vcvt.s32.f32 %v5657_v7  ;;  %v6239_v36 = vcvt.s32.f32 %v5663_v42  ;;  %v5754_v55 = vunpack.c.0.s8 %v5304_v50 }
 0x4f3   :  { %v6709_v33 = vpack.c.bf16 %v6349_v35, %v6343_v26  ;;  %7137 = vmatpush.bf16.msrb.mxu3 %v6660_v3  ;;  %v6234_v20 = vcvt.s32.f32 %v5658_v47  ;;  %v6240_v54 = vcvt.s32.f32 %v5664_v13  ;;  %v5760_v0 = vunpack.c.1.s8 %v5304_v50 }
 0x4f4   :  { %7150 = vmatpush.bf16.msra.mxu0 %v6708_v49  ;;  %v5755_v24 = vunpack.c.0.s8 %v5305_v58  ;;  %v6653_v16 = vpack.c.bf16 %v6239_v36, %v6233_v46  ;;  %v6330_v51 = vcvt.s32.f32 %v5754_v55  ;;  %v5761_v10 = vunpack.c.1.s8 %v5305_v58  ;;  %v5244_v49 = vld [vmem:[#allocation17 + $0x170] sm:$0xff]  ;;  %v5245_v36 = vld [vmem:[#allocation17 + $0x178] sm:$0xff] }
 0x4f5   :  { %7228 = vmatpush.bf16.msrb.mxu2 %v6709_v33  ;;  %v5645_v2 = vunpack.c.2.s8 %v5273_v44  ;;  %v6654_v21 = vpack.c.bf16 %v6240_v54, %v6234_v20  ;;  %v6336_v34 = vcvt.s32.f32 %v5760_v0  ;;  %v5651_v5 = vunpack.c.3.s8 %v5273_v44  ;;  %v5269_v54 = vld [vmem:[#allocation17 + $0x238] sm:$0xff] }
 0x4f6   :  { %v6331_v4 = vcvt.s32.f32 %v5755_v24  ;;  %7060 = vmatpush.bf16.msra.mxu1 %v6653_v16  ;;  %v6337_v23 = vcvt.s32.f32 %v5761_v10  ;;  %v5646_v32 = vunpack.c.2.s8 %v5274_v28  ;;  %v5652_v12 = vunpack.c.3.s8 %v5274_v28 }
 0x4f7   :  { %v6221_v48 = vcvt.s32.f32 %v5645_v2  ;;  %7138 = vmatpush.bf16.msrb.mxu3 %v6654_v21  ;;  %v6702_v50 = vpack.c.bf16 %v6336_v34, %v6330_v51  ;;  %v6227_v29 = vcvt.s32.f32 %v5651_v5  ;;  %v5742_v6 = vunpack.c.2.s8 %v5298_v40 }
 0x4f8   :  { %v5748_v25 = vunpack.c.3.s8 %v5298_v40  ;;  %v6703_v17 = vpack.c.bf16 %v6337_v23, %v6331_v4  ;;  %v6222_v27 = vcvt.s32.f32 %v5646_v32  ;;  %v6228_v58 = vcvt.s32.f32 %v5652_v12 }
 0x4f9   :  { %v5743_v18 = vunpack.c.2.s8 %v5299_v9  ;;  %7151 = vmatpush.bf16.msra.mxu0 %v6702_v50  ;;  %v6647_v43 = vpack.c.bf16 %v6227_v29, %v6221_v48  ;;  %v6318_v57 = vcvt.s32.f32 %v5742_v6  ;;  %v5749_v38 = vunpack.c.3.s8 %v5299_v9 }
 0x4fa   :  { %v9219_v59 = vpop.f32.mrf.mxu2  ;;  %v6324_v8 = vcvt.s32.f32 %v5748_v25  ;;  %7229 = vmatpush.bf16.msrb.mxu2 %v6703_v17  ;;  %v6648_v19 = vpack.c.bf16 %v6228_v58, %v6222_v27  ;;  %v9223_v39 = vadd.f32 %v9205_v1, %v9193_v63  ;;  %v5633_v61 = vunpack.c.0.s8 %v5273_v44  ;;  %v5238_v25 = vld [vmem:[#allocation17 + $0x140] sm:$0xff] }
 0x4fb   :  { %v6319_v52 = vcvt.s32.f32 %v5743_v18  ;;  %7061 = vmatpush.bf16.msra.mxu1 %v6647_v43  ;;  %v6325_v62 = vcvt.s32.f32 %v5749_v38  ;;  %v5639_v26 = vunpack.c.1.s8 %v5273_v44  ;;  %v5634_v35 = vunpack.c.0.s8 %v5274_v28  ;;  %v5239_v38 = vld [vmem:[#allocation17 + $0x148] sm:$0xff] }
 0x4fc   :  { %v6696_v22 = vpack.c.bf16 %v6324_v8, %v6318_v57  ;;  %7139 = vmatpush.bf16.msrb.mxu3 %v6648_v19  ;;  %v6209_v7 = vcvt.s32.f32 %v5633_v61  ;;  %v5640_v42 = vunpack.c.1.s8 %v5274_v28  ;;  %v5730_v60 = vunpack.c.0.s8 %v5298_v40 }
 0x4fd   :  { %v5736_v3 = vunpack.c.1.s8 %v5298_v40  ;;  %v6697_v47 = vpack.c.bf16 %v6325_v62, %v6319_v52  ;;  %v6215_v13 = vcvt.s32.f32 %v5639_v26  ;;  %v6210_v33 = vcvt.s32.f32 %v5634_v35  ;;  %v5263_v62 = vld [vmem:[#allocation17 + $0x208] sm:$0xff] }
 0x4fe   :  { %7152 = vmatpush.bf16.msra.mxu0 %v6696_v22  ;;  %v5731_v46 = vunpack.c.0.s8 %v5299_v9  ;;  %v6216_v63 = vcvt.s32.f32 %v5640_v42  ;;  %v6306_v1 = vcvt.s32.f32 %v5730_v60  ;;  %v5737_v20 = vunpack.c.1.s8 %v5299_v9 }
 0x4ff   :  { %v6312_v55 = vcvt.s32.f32 %v5736_v3  ;;  %7230 = vmatpush.bf16.msrb.mxu2 %v6697_v47  ;;  %v6641_v44 = vpack.c.bf16 %v6215_v13, %v6209_v7  ;;  %v5526_v24 = vunpack.c.2.s8 %v5244_v49  ;;  %v5532_v16 = vunpack.c.3.s8 %v5244_v49 }
 0x500   :  { %v6307_v0 = vcvt.s32.f32 %v5731_v46  ;;  %v6642_v28 = vpack.c.bf16 %v6216_v63, %v6210_v33  ;;  %v6313_v10 = vcvt.s32.f32 %v5737_v20  ;;  %v5527_v2 = vunpack.c.2.s8 %v5245_v36 }
 0x501   :  { %v6690_v51 = vpack.c.bf16 %v6312_v55, %v6306_v1  ;;  %7062 = vmatpush.bf16.msra.mxu1 %v6641_v44  ;;  %v6102_v21 = vcvt.s32.f32 %v5526_v24  ;;  %v6108_v34 = vcvt.s32.f32 %v5532_v16  ;;  %v5533_v4 = vunpack.c.3.s8 %v5245_v36  ;;  %v5232_v24 = vld [vmem:[#allocation17 + $0x110] sm:$0xff] }
 0x502   :  { %v7027_v40 = vpop.f32.mrf.mxu2  ;;  %v5623_v5 = vunpack.c.2.s8 %v5269_v54  ;;  %7140 = vmatpush.bf16.msrb.mxu3 %v6642_v28  ;;  %v6691_v23 = vpack.c.bf16 %v6313_v10, %v6307_v0  ;;  %v6103_v9 = vcvt.s32.f32 %v5527_v2  ;;  %v5629_v48 = vunpack.c.3.s8 %v5269_v54  ;;  %v5233_v2 = vld [vmem:[#allocation17 + $0x118] sm:$0xff] }
 0x503   :  { %7153 = vmatpush.bf16.msra.mxu0 %v6690_v51  ;;  %v5514_v32 = vunpack.c.0.s8 %v5244_v49  ;;  %v6588_v12 = vpack.c.bf16 %v6108_v34, %v6102_v21  ;;  %v6109_v50 = vcvt.s32.f32 %v5533_v4  ;;  %v5520_v6 = vunpack.c.1.s8 %v5244_v49 }
 0x504   :  { %v6199_v29 = vcvt.s32.f32 %v5623_v5  ;;  %7231 = vmatpush.bf16.msrb.mxu2 %v6691_v23  ;;  %v6205_v17 = vcvt.s32.f32 %v5629_v48  ;;  %7063 = vmatmul.bf16.vlgmr.msra.gmra.mxu1 %v8740_v31  ;;  %v5515_v58 = vunpack.c.0.s8 %v5245_v36  ;;  %v5521_v18 = vunpack.c.1.s8 %v5245_v36 }
 0x505   :  { %v6090_v27 = vcvt.s32.f32 %v5514_v32  ;;  %7107 = vmatpush.bf16.msrb.mxu1 %v6588_v12  ;;  %v6589_v45 = vpack.c.bf16 %v6109_v50, %v6103_v9  ;;  %7141 = vmatmul.bf16.vlgmr.msrb.gmra.mxu3 %v8740_v31  ;;  %v6096_v43 = vcvt.s32.f32 %v5520_v6  ;;  %v5611_v57 = vunpack.c.0.s8 %v5269_v54  ;;  %v5257_v9 = vld [vmem:[#allocation17 + $0x1d8] sm:$0xff] }
 0x506   :  { %v5617_v8 = vunpack.c.1.s8 %v5269_v54  ;;  %v6637_v19 = vpack.c.bf16 %v6205_v17, %v6199_v29  ;;  %7154 = vmatmul.bf16.vlgmr.msra.gmra.mxu0 %v9052_v14  ;;  %v6091_v52 = vcvt.s32.f32 %v5515_v58  ;;  %v6097_v61 = vcvt.s32.f32 %v5521_v18 }
 0x507   :  { %v5502_v22 = vunpack.c.2.s8 %v5238_v25  ;;  %7185 = vmatpush.bf16.msra.mxu3 %v6589_v45  ;;  %7232 = vmatmul.bf16.vlgmr.msrb.gmra.mxu2 %v9052_v14  ;;  %v6582_v26 = vpack.c.bf16 %v6096_v43, %v6090_v27  ;;  %v6187_v35 = vcvt.s32.f32 %v5611_v57  ;;  %v5508_v42 = vunpack.c.3.s8 %v5238_v25 }
 0x508   :  { %v6193_v7 = vcvt.s32.f32 %v5617_v8  ;;  %7198 = vmatpush.bf16.msrb.mxu0 %v6637_v19  ;;  %v6583_v60 = vpack.c.bf16 %v6097_v61, %v6091_v52  ;;  %v5503_v49 = vunpack.c.2.s8 %v5239_v38  ;;  %v5509_v47 = vunpack.c.3.s8 %v5239_v38  ;;  %v9229_v40 = vpop.f32.mrf.mxu1 }
 0x509   :  { %v6078_v3 = vcvt.s32.f32 %v5502_v22  ;;  %7108 = vmatpush.bf16.msrb.mxu1 %v6582_v26  ;;  %v6084_v33 = vcvt.s32.f32 %v5508_v42  ;;  %v5599_v46 = vunpack.c.2.s8 %v5263_v62  ;;  %v5605_v36 = vunpack.c.3.s8 %v5263_v62  ;;  %v5226_v26 = vld [vmem:[#allocation17 + $0xe0] sm:$0xff] }
 0x50a   :  { %v6631_v13 = vpack.c.bf16 %v6193_v7, %v6187_v35  ;;  %v6079_v63 = vcvt.s32.f32 %v5503_v49  ;;  %v6085_v1 = vcvt.s32.f32 %v5509_v47  ;;  %v5490_v55 = vunpack.c.0.s8 %v5238_v25 }
 0x50b   :  { %v5496_v20 = vunpack.c.1.s8 %v5238_v25  ;;  %7186 = vmatpush.bf16.msra.mxu3 %v6583_v60  ;;  %v6576_v14 = vpack.c.bf16 %v6084_v33, %v6078_v3  ;;  %v6175_v54 = vcvt.s32.f32 %v5599_v46  ;;  %v6181_v44 = vcvt.s32.f32 %v5605_v36  ;;  %v5227_v33 = vld [vmem:[#allocation17 + $0xe8] sm:$0xff] }
 0x50c   :  { %v5491_v0 = vunpack.c.0.s8 %v5239_v38  ;;  %7199 = vmatpush.bf16.msrb.mxu0 %v6631_v13  ;;  %v6577_v16 = vpack.c.bf16 %v6085_v1, %v6079_v63  ;;  %v6066_v28 = vcvt.s32.f32 %v5490_v55  ;;  %v5497_v10 = vunpack.c.1.s8 %v5239_v38 }
 0x50d   :  { %v6072_v51 = vcvt.s32.f32 %v5496_v20  ;;  %7109 = vmatpush.bf16.msrb.mxu1 %v6576_v14  ;;  %v6625_v34 = vpack.c.bf16 %v6181_v44, %v6175_v54  ;;  %v5587_v5 = vunpack.c.0.s8 %v5263_v62  ;;  %v5593_v23 = vunpack.c.1.s8 %v5263_v62  ;;  %v5251_v14 = vld [vmem:[#allocation17 + $0x1a8] sm:$0xff] }
 0x50e   :  { %v9231_v21 = vpop.f32.mrf.mxu0  ;;  %v6067_v4 = vcvt.s32.f32 %v5491_v0  ;;  %v6073_v32 = vcvt.s32.f32 %v5497_v10  ;;  %v5478_v12 = vunpack.c.2.s8 %v5232_v24  ;;  %v5484_v50 = vunpack.c.3.s8 %v5232_v24  ;;  %v9233_v43 = vpop.f32.mrf.mxu3 }
 0x50f   :  { %v6570_v48 = vpack.c.bf16 %v6072_v51, %v6066_v28  ;;  %7187 = vmatpush.bf16.msra.mxu3 %v6577_v16  ;;  %v6163_v29 = vcvt.s32.f32 %v5587_v5  ;;  %v6169_v6 = vcvt.s32.f32 %v5593_v23  ;;  %v5479_v25 = vunpack.c.2.s8 %v5233_v2 }
 0x510   :  { %v5485_v17 = vunpack.c.3.s8 %v5233_v2  ;;  %7200 = vmatpush.bf16.msrb.mxu0 %v6625_v34  ;;  %v6571_v27 = vpack.c.bf16 %v6073_v32, %v6067_v4  ;;  %v6054_v58 = vcvt.s32.f32 %v5478_v12  ;;  %v6060_v18 = vcvt.s32.f32 %v5484_v50  ;;  %v6858_v46 = vpop.f32.mrf.mxu1 }
 0x511   :  { %v5575_v45 = vunpack.c.2.s8 %v5257_v9  ;;  %7110 = vmatpush.bf16.msrb.mxu1 %v6570_v48  ;;  %v6619_v57 = vpack.c.bf16 %v6169_v6, %v6163_v29  ;;  %v6055_v8 = vcvt.s32.f32 %v5479_v25  ;;  %v5581_v19 = vunpack.c.3.s8 %v5257_v9 }
 0x512   :  { %v6061_v38 = vcvt.s32.f32 %v5485_v17  ;;  %v6564_v52 = vpack.c.bf16 %v6060_v18, %v6054_v58  ;;  %v5466_v22 = vunpack.c.0.s8 %v5232_v24  ;;  %v5472_v62 = vunpack.c.1.s8 %v5232_v24 }
 0x513   :  { %v6151_v61 = vcvt.s32.f32 %v5575_v45  ;;  %7188 = vmatpush.bf16.msra.mxu3 %v6571_v27  ;;  %v6157_v7 = vcvt.s32.f32 %v5581_v19  ;;  %v5467_v42 = vunpack.c.0.s8 %v5233_v2  ;;  %v5473_v60 = vunpack.c.1.s8 %v5233_v2  ;;  %v5340_v27 = vld [vmem:[#allocation17 + $0x470] sm:$0xff] }
 0x514   :  { %v6565_v35 = vpack.c.bf16 %v6061_v38, %v6055_v8  ;;  %7201 = vmatpush.bf16.msrb.mxu0 %v6619_v57  ;;  %v6042_v3 = vcvt.s32.f32 %v5466_v22  ;;  %v6048_v49 = vcvt.s32.f32 %v5472_v62  ;;  %v5563_v47 = vunpack.c.0.s8 %v5257_v9  ;;  %v5341_v8 = vld [vmem:[#allocation17 + $0x478] sm:$0xff] }
 0x515   :  { %v5569_v13 = vunpack.c.1.s8 %v5257_v9  ;;  %7111 = vmatpush.bf16.msrb.mxu1 %v6564_v52  ;;  %v6613_v63 = vpack.c.bf16 %v6157_v7, %v6151_v61  ;;  %v6043_v1 = vcvt.s32.f32 %v5467_v42  ;;  %v6049_v55 = vcvt.s32.f32 %v5473_v60 }
 0x516   :  { %v5454_v20 = vunpack.c.2.s8 %v5226_v26  ;;  %v7001_v54 = vpop.f32.mrf.mxu0  ;;  %v6558_v44 = vpack.c.bf16 %v6048_v49, %v6042_v3  ;;  %v6139_v0 = vcvt.s32.f32 %v5563_v47  ;;  %v5460_v16 = vunpack.c.3.s8 %v5226_v26  ;;  %v6936_v9 = vpop.f32.mrf.mxu3 }
 0x517   :  { %v6145_v24 = vcvt.s32.f32 %v5569_v13  ;;  %7189 = vmatpush.bf16.msra.mxu3 %v6565_v35  ;;  %v6559_v28 = vpack.c.bf16 %v6049_v55, %v6043_v1  ;;  %v5455_v10 = vunpack.c.2.s8 %v5227_v33  ;;  %v5461_v2 = vunpack.c.3.s8 %v5227_v33  ;;  %v5334_v1 = vld [vmem:[#allocation17 + $0x440] sm:$0xff] }
 0x518   :  { %v6030_v51 = vcvt.s32.f32 %v5454_v20  ;;  %7202 = vmatpush.bf16.msrb.mxu0 %v6613_v63  ;;  %v6036_v4 = vcvt.s32.f32 %v5460_v16  ;;  %v5551_v5 = vunpack.c.2.s8 %v5251_v14  ;;  %v5557_v23 = vunpack.c.3.s8 %v5251_v14  ;;  %v9237_v22 = vpop.f32.mrf.mxu1 }
 0x519   :  { %v6607_v34 = vpack.c.bf16 %v6145_v24, %v6139_v0  ;;  %7112 = vmatpush.bf16.msrb.mxu1 %v6558_v44  ;;  %v6031_v48 = vcvt.s32.f32 %v5455_v10  ;;  %v6037_v32 = vcvt.s32.f32 %v5461_v2  ;;  %v5442_v12 = vunpack.c.0.s8 %v5226_v26  ;;  %v5335_v44 = vld [vmem:[#allocation17 + $0x448] sm:$0xff] }
 0x51a   :  { %v9235_v36 = vpop.f32.mrf.mxu2  ;;  %v5448_v50 = vunpack.c.1.s8 %v5226_v26  ;;  %v6552_v29 = vpack.c.bf16 %v6036_v4, %v6030_v51  ;;  %v6127_v6 = vcvt.s32.f32 %v5551_v5  ;;  %v6133_v25 = vcvt.s32.f32 %v5557_v23  ;;  %v9241_v5 = vld [vmem:[#allocation19] sm:$0x3f] }
 0x51b   :  { %v5443_v17 = vunpack.c.0.s8 %v5227_v33  ;;  %7190 = vmatpush.bf16.msra.mxu3 %v6559_v28  ;;  %v6553_v58 = vpack.c.bf16 %v6037_v32, %v6031_v48  ;;  %v6018_v18 = vcvt.s32.f32 %v5442_v12  ;;  %v5449_v57 = vunpack.c.1.s8 %v5227_v33  ;;  %v9243_v12 = vld [vmem:[#allocation20] sm:$0x3f] }
 0x51c   :  { %v6024_v45 = vcvt.s32.f32 %v5448_v50  ;;  %7203 = vmatpush.bf16.msrb.mxu0 %v6607_v34  ;;  %v6601_v38 = vpack.c.bf16 %v6133_v25, %v6127_v6  ;;  %v5539_v52 = vunpack.c.0.s8 %v5251_v14  ;;  %v5545_v61 = vunpack.c.1.s8 %v5251_v14 }
 0x51d   :  { %v6019_v19 = vcvt.s32.f32 %v5443_v17  ;;  %7113 = vmatpush.bf16.msrb.mxu1 %v6552_v29  ;;  %v6025_v35 = vcvt.s32.f32 %v5449_v57  ;;  %v5910_v7 = vunpack.c.2.s8 %v5340_v27  ;;  %v5916_v42 = vunpack.c.3.s8 %v5340_v27  ;;  %v5328_v57 = vld [vmem:[#allocation17 + $0x410] sm:$0xff] }
 0x51e   :  { %v6546_v26 = vpack.c.bf16 %v6024_v45, %v6018_v18  ;;  %v6115_v60 = vcvt.s32.f32 %v5539_v52  ;;  %v6121_v3 = vcvt.s32.f32 %v5545_v61  ;;  %v5911_v49 = vunpack.c.2.s8 %v5341_v8  ;;  %v9239_v0 = vpop.f32.mrf.mxu3  ;;  %v5329_v61 = vld [vmem:[#allocation17 + $0x418] sm:$0xff] }
 0x51f   :  { %v5917_v47 = vunpack.c.3.s8 %v5341_v8  ;;  %7191 = vmatpush.bf16.msra.mxu3 %v6553_v58  ;;  %v6547_v13 = vpack.c.bf16 %v6025_v35, %v6019_v19  ;;  %v6486_v33 = vcvt.s32.f32 %v5910_v7  ;;  %v6492_v46 = vcvt.s32.f32 %v5916_v42 }
 0x520   :  { %v5898_v63 = vunpack.c.0.s8 %v5340_v27  ;;  %7204 = vmatpush.bf16.msrb.mxu0 %v6601_v38  ;;  %v6595_v55 = vpack.c.bf16 %v6121_v3, %v6115_v60  ;;  %v6487_v20 = vcvt.s32.f32 %v5911_v49  ;;  %v5904_v54 = vunpack.c.1.s8 %v5340_v27  ;;  %v6910_v17 = vpop.f32.mrf.mxu1 }
 0x521   :  { %v6493_v14 = vcvt.s32.f32 %v5917_v47  ;;  %7114 = vmatpush.bf16.msrb.mxu1 %v6546_v26  ;;  %v6780_v24 = vpack.c.bf16 %v6492_v46, %v6486_v33  ;;  %v5899_v28 = vunpack.c.0.s8 %v5341_v8  ;;  %v5905_v51 = vunpack.c.1.s8 %v5341_v8  ;;  %v5293_v17 = vld [vmem:[#allocation17 + $0x2f8] sm:$0xff] }
 0x522   :  { %v7079_v62 = vpop.f32.mrf.mxu2  ;;  %v6474_v16 = vcvt.s32.f32 %v5898_v63  ;;  %v6480_v2 = vcvt.s32.f32 %v5904_v54  ;;  %v5886_v34 = vunpack.c.2.s8 %v5334_v1  ;;  %v5892_v4 = vunpack.c.3.s8 %v5334_v1  ;;  %v5323_v54 = vld [vmem:[#allocation17 + $0x3e8] sm:$0xff] }
 0x523   :  { %v6781_v10 = vpack.c.bf16 %v6493_v14, %v6487_v20  ;;  %7192 = vmatpush.bf16.msra.mxu3 %v6547_v13  ;;  %v6475_v23 = vcvt.s32.f32 %v5899_v28  ;;  %v6481_v9 = vcvt.s32.f32 %v5905_v51  ;;  %v5887_v48 = vunpack.c.2.s8 %v5335_v44 }
 0x524   :  { %v5893_v32 = vunpack.c.3.s8 %v5335_v44  ;;  %7205 = vmatpush.bf16.msrb.mxu0 %v6595_v55  ;;  %v6774_v50 = vpack.c.bf16 %v6480_v2, %v6474_v16  ;;  %v6462_v29 = vcvt.s32.f32 %v5886_v34  ;;  %v6468_v6 = vcvt.s32.f32 %v5892_v4  ;;  %7115 = vmatmul.bf16.vlgmr.msrb.gmra.mxu1 %v8548_v15 }
 0x525   :  { %7159 = vmatpush.bf16.msra.mxu1 %v6780_v24  ;;  %v6857_v25 = vadd.f32 %v9229_v40, %v9211_v53  ;;  %v6775_v27 = vpack.c.bf16 %v6481_v9, %v6475_v23  ;;  %v6463_v58 = vcvt.s32.f32 %v5887_v48  ;;  %v7252_v45 = vperm.slane %v9241_v5, 0 }
 0x526   :  { %v6469_v18 = vcvt.s32.f32 %v5893_v32  ;;  %7193 = vmatmul.bf16.vlgmr.msra.gmra.mxu3 %v8548_v15  ;;  %v6768_v8 = vpack.c.bf16 %v6468_v6, %v6462_v29  ;;  %v7272_v38 = vperm.slane %v9243_v12, 0  ;;  %v5874_v19 = vunpack.c.0.s8 %v5334_v1  ;;  %v6988_v3 = vpop.f32.mrf.mxu3 }
 0x527   :  { %7237 = vmatpush.bf16.msrb.mxu3 %v6781_v10  ;;  %v5880_v52 = vunpack.c.1.s8 %v5334_v1  ;;  %7206 = vmatmul.bf16.vlgmr.msrb.gmra.mxu0 %v8615_v37  ;;  %v7264_v40 = vmul.f32 %v7252_v45, %v6857_v25  ;;  %v5875_v62 = vunpack.c.0.s8 %v5335_v44  ;;  %v5881_v26 = vunpack.c.1.s8 %v5335_v44  ;;  %v5322_v1 = vld [vmem:[#allocation17 + $0x3e0] sm:$0xff] }
 0x528   :  { %v6769_v53 = vpack.c.bf16 %v6469_v18, %v6463_v58  ;;  %v6450_v35 = vcvt.s32.f32 %v5874_v19  ;;  %v5862_v42 = vunpack.c.2.s8 %v5328_v57  ;;  %v5868_v60 = vunpack.c.3.s8 %v5328_v57 }
 0x529   :  { %7160 = vmatpush.bf16.msra.mxu1 %v6774_v50  ;;  %v6456_v7 = vcvt.s32.f32 %v5880_v52  ;;  %v7284_v15 = vadd.f32 %v7272_v38, %v7264_v40  ;;  %v6451_v49 = vcvt.s32.f32 %v5875_v62  ;;  %v6457_v47 = vcvt.s32.f32 %v5881_v26 }
 0x52a   :  { %v5863_v13 = vunpack.c.2.s8 %v5329_v61  ;;  %v6438_v46 = vcvt.s32.f32 %v5862_v42  ;;  %v5869_v63 = vunpack.c.3.s8 %v5329_v61  ;;  %v6444_v37 = vcvt.s32.f32 %v5868_v60 }
 0x52b   :  { %7238 = vmatpush.bf16.msrb.mxu3 %v6775_v27  ;;  %v6762_v33 = vpack.c.bf16 %v6456_v7, %v6450_v35  ;;  %7290 = vst [vmem:[#allocation22] sm:$0xff] %v7284_v15  ;;  %v5850_v20 = vunpack.c.0.s8 %v5328_v57  ;;  %v5856_v14 = vunpack.c.1.s8 %v5328_v57  ;;  %v6763_v44 = vpack.c.bf16 %v6457_v47, %v6451_v49 }
 0x52c   :  { %v6439_v55 = vcvt.s32.f32 %v5863_v13  ;;  %v6445_v24 = vcvt.s32.f32 %v5869_v63  ;;  %v5851_v16 = vunpack.c.0.s8 %v5329_v61  ;;  %v5857_v28 = vunpack.c.1.s8 %v5329_v61 }
 0x52d   :  { %7161 = vmatpush.bf16.msra.mxu1 %v6768_v8  ;;  %v6426_v51 = vcvt.s32.f32 %v5850_v20  ;;  %v6432_v10 = vcvt.s32.f32 %v5856_v14  ;;  %v5838_v2 = vunpack.c.2.s8 %v5322_v1  ;;  %v5844_v34 = vunpack.c.3.s8 %v5322_v1 }
 0x52e   :  { %v5839_v4 = vunpack.c.2.s8 %v5323_v54  ;;  %v6756_v23 = vpack.c.bf16 %v6444_v37, %v6438_v46  ;;  %v6757_v9 = vpack.c.bf16 %v6445_v24, %v6439_v55  ;;  %v5845_v48 = vunpack.c.3.s8 %v5323_v54  ;;  %v5287_v37 = vld [vmem:[#allocation17 + $0x2c8] sm:$0xff] }
 0x52f   :  { %7239 = vmatpush.bf16.msrb.mxu3 %v6769_v53  ;;  %v6750_v50 = vpack.c.bf16 %v6432_v10, %v6426_v51  ;;  %v6427_v29 = vcvt.s32.f32 %v5851_v16  ;;  %v6433_v6 = vcvt.s32.f32 %v5857_v28  ;;  %v6909_v25 = vadd.f32 %v9237_v22, %v9223_v39 }
 0x530   :  { %v6960_v32 = vpop.f32.mrf.mxu1  ;;  %v6414_v27 = vcvt.s32.f32 %v5838_v2  ;;  %v6420_v58 = vcvt.s32.f32 %v5844_v34  ;;  %v6415_v18 = vcvt.s32.f32 %v5839_v4  ;;  %v7253_v45 = vperm.slane %v9241_v5, 1 }
 0x531   :  { %7162 = vmatpush.bf16.msra.mxu1 %v6762_v33  ;;  %v6421_v57 = vcvt.s32.f32 %v5845_v48  ;;  %v6922_v8 = vadd.f32 %v9197_v30, %v6909_v25  ;;  %v5826_v38 = vunpack.c.0.s8 %v5322_v1  ;;  %v5832_v19 = vunpack.c.1.s8 %v5322_v1 }
 0x532   :  { %v7051_v52 = vpop.f32.mrf.mxu0  ;;  %v5827_v61 = vunpack.c.0.s8 %v5323_v54  ;;  %v5833_v53 = vunpack.c.1.s8 %v5323_v54  ;;  %v5719_v40 = vunpack.c.2.s8 %v5293_v17  ;;  %v5725_v62 = vunpack.c.3.s8 %v5293_v17 }
 0x533   :  { %7240 = vmatpush.bf16.msrb.mxu3 %v6763_v44  ;;  %v6751_v26 = vpack.c.bf16 %v6433_v6, %v6427_v29  ;;  %v6935_v39 = vadd.f32 %v9233_v43, %v6922_v8  ;;  %v7273_v22 = vperm.slane %v9243_v12, 1  ;;  %v6744_v35 = vpack.c.bf16 %v6420_v58, %v6414_v27 }
 0x534   :  { %v6745_v7 = vpack.c.bf16 %v6421_v57, %v6415_v18  ;;  %v6402_v60 = vcvt.s32.f32 %v5826_v38  ;;  %v6408_v3 = vcvt.s32.f32 %v5832_v19  ;;  %v6403_v30 = vcvt.s32.f32 %v5827_v61  ;;  %v5275_v38 = vld [vmem:[#allocation17 + $0x268] sm:$0xff] }
 0x535   :  { %7163 = vmatpush.bf16.msra.mxu1 %v6756_v23  ;;  %v7265_v42 = vmul.f32 %v7253_v45, %v6935_v39  ;;  %v6409_v15 = vcvt.s32.f32 %v5833_v53  ;;  %v6295_v49 = vcvt.s32.f32 %v5719_v40  ;;  %v6301_v47 = vcvt.s32.f32 %v5725_v62 }
 0x536   :  { %v5707_v63 = vunpack.c.0.s8 %v5293_v17  ;;  %v5713_v1 = vunpack.c.1.s8 %v5293_v17  ;;  %v6961_v43 = vadd.f32 %v6960_v32, %v9217_v11  ;;  %v6738_v54 = vpack.c.bf16 %v6408_v3, %v6402_v60  ;;  %v5281_v32 = vld [vmem:[#allocation17 + $0x298] sm:$0xff] }
 0x537   :  { %7241 = vmatpush.bf16.msrb.mxu3 %v6757_v9  ;;  %v7038_v13 = vpop.f32.mrf.mxu3  ;;  %v7285_v46 = vadd.f32 %v7273_v22, %v7265_v42  ;;  %v6739_v44 = vpack.c.bf16 %v6409_v15, %v6403_v30  ;;  %v5695_v24 = vunpack.c.2.s8 %v5287_v37  ;;  %v6685_v28 = vpack.c.bf16 %v6301_v47, %v6295_v49 }
 0x538   :  { %v6962_v33 = vpop.f32.mrf.mxu1  ;;  %v7039_v20 = vadd.f32 %v7038_v13, %v9219_v59  ;;  %v6974_v16 = vadd.f32 %v9215_v56, %v6961_v43  ;;  %v6283_v51 = vcvt.s32.f32 %v5707_v63  ;;  %v6289_v10 = vcvt.s32.f32 %v5713_v1 }
 0x539   :  { %7164 = vmatpush.bf16.msra.mxu1 %v6750_v50  ;;  %7291 = vst [vmem:[#allocation22 + $0x8] sm:$0xff] %v7285_v46  ;;  %v5701_v2 = vunpack.c.3.s8 %v5287_v37  ;;  %v6271_v34 = vcvt.s32.f32 %v5695_v24  ;;  %v5683_v11 = vunpack.c.0.s8 %v5287_v37  ;;  %v5689_v48 = vunpack.c.1.s8 %v5287_v37 }
 0x53a   :  { %v9259_v55 = vpop.f32.mrf.mxu2  ;;  %v7053_v14 = vpop.f32.mrf.mxu0  ;;  %v6987_v23 = vadd.f32 %v9239_v0, %v6974_v16  ;;  %v6679_v59 = vpack.c.bf16 %v6289_v10, %v6283_v51  ;;  %v7052_v50 = vadd.f32 %v7051_v52, %v7039_v20  ;;  %v5671_v6 = vunpack.c.2.s8 %v5281_v32 }
 0x53b   :  { %7242 = vmatpush.bf16.msrb.mxu3 %v6751_v26  ;;  %v6277_v9 = vcvt.s32.f32 %v5701_v2  ;;  %v6259_v17 = vcvt.s32.f32 %v5683_v11  ;;  %v6265_v27 = vcvt.s32.f32 %v5689_v48  ;;  %v5677_v0 = vunpack.c.3.s8 %v5281_v32 }
 0x53c   :  { %v7000_v56 = vadd.f32 %v9231_v21, %v6987_v23  ;;  %v6247_v58 = vcvt.s32.f32 %v5671_v6  ;;  %v5659_v57 = vunpack.c.0.s8 %v5281_v32  ;;  %v5665_v8 = vunpack.c.1.s8 %v5281_v32 }
 0x53d   :  { %7165 = vmatpush.bf16.msra.mxu1 %v6744_v35  ;;  %v6673_v25 = vpack.c.bf16 %v6277_v9, %v6271_v34  ;;  %v6667_v18 = vpack.c.bf16 %v6265_v27, %v6259_v17  ;;  %v6253_v45 = vcvt.s32.f32 %v5677_v0  ;;  %v5647_v19 = vunpack.c.2.s8 %v5275_v38 }
 0x53e   :  { %v6235_v52 = vcvt.s32.f32 %v5659_v57  ;;  %v6241_v61 = vcvt.s32.f32 %v5665_v8  ;;  %v5653_v53 = vunpack.c.3.s8 %v5275_v38  ;;  %v5641_v39 = vunpack.c.1.s8 %v5275_v38 }
 0x53f   :  { %7243 = vmatpush.bf16.msrb.mxu3 %v6745_v7  ;;  %v7040_v4 = vpop.f32.mrf.mxu3  ;;  %v6661_v21 = vpack.c.bf16 %v6253_v45, %v6247_v58  ;;  %v6223_v62 = vcvt.s32.f32 %v5647_v19  ;;  %v7254_v42 = vperm.slane %v9241_v5, 2  ;;  %v7274_v15 = vperm.slane %v9243_v12, 2 }
 0x540   :  { %v6655_v40 = vpack.c.bf16 %v6241_v61, %v6235_v52  ;;  %v6229_v26 = vcvt.s32.f32 %v5653_v53  ;;  %v6217_v7 = vcvt.s32.f32 %v5641_v39  ;;  %v7255_v24 = vperm.slane %v9241_v5, 3 }
 0x541   :  { %7166 = vmatpush.bf16.msra.mxu1 %v6738_v54  ;;  %v7256_v17 = vperm.slane %v9241_v5, 4  ;;  %v7276_v58 = vperm.slane %v9243_v12, 4 }
 0x542   :  { %v7131_v29 = vpop.f32.mrf.mxu2  ;;  %v6649_v22 = vpack.c.bf16 %v6229_v26, %v6223_v62 }
 0x543   :  { %7244 = vmatpush.bf16.msrb.mxu3 %v6739_v44 }
 0x544   :  { %7167 = vmatmul.bf16.vlgmr.msra.gmra.mxu1 %v9172_v41 }
 0x545   :  { %7211 = vmatpush.bf16.msrb.mxu1 %v6685_v28  ;;  %v7275_v28 = vperm.slane %v9243_v12, 3 }
 0x546   :  { %7245 = vmatmul.bf16.vlgmr.msrb.gmra.mxu3 %v9172_v41  ;;  %v5635_v41 = vunpack.c.0.s8 %v5275_v38 }
 0x548   :  { %v6211_v35 = vcvt.s32.f32 %v5635_v41 }
 0x549   :  { %7212 = vmatpush.bf16.msrb.mxu1 %v6679_v59 }
 0x54a   :  { %v6643_v60 = vpack.c.bf16 %v6217_v7, %v6211_v35 }
 0x54d   :  { %7213 = vmatpush.bf16.msrb.mxu1 %v6673_v25 }
 0x551   :  { %7214 = vmatpush.bf16.msrb.mxu1 %v6667_v18 }
 0x555   :  { %7215 = vmatpush.bf16.msrb.mxu1 %v6661_v21 }
 0x558   :  { %v7012_v3 = vpop.f32.mrf.mxu1 }
 0x559   :  { %7216 = vmatpush.bf16.msrb.mxu1 %v6655_v40  ;;  %v7013_v30 = vadd.f32 %v7012_v3, %v7000_v56  ;;  %v7277_v40 = vperm.slane %v9243_v12, 5 }
 0x55b   :  { %v7103_v49 = vpop.f32.mrf.mxu0  ;;  %v7266_v47 = vmul.f32 %v7254_v42, %v7013_v30 }
 0x55d   :  { %7217 = vmatpush.bf16.msrb.mxu1 %v6649_v22  ;;  %v7286_v13 = vadd.f32 %v7274_v15, %v7266_v47 }
 0x55f   :  { %7292 = vst [vmem:[#allocation22 + $0x10] sm:$0xff] %v7286_v13  ;;  %v7090_v33 = vpop.f32.mrf.mxu3 }
 0x560   :  { %v7014_v46 = vpop.f32.mrf.mxu1 }
 0x561   :  { %7218 = vmatpush.bf16.msrb.mxu1 %v6643_v60 }
 0x562   :  { %v7181_v63 = vpop.f32.mrf.mxu2 }
 0x563   :  { %v7105_v1 = vpop.f32.mrf.mxu0 }
 0x564   :  { %7219 = vmatmul.bf16.vlgmr.msrb.gmra.mxu1 %v8740_v31 }
 0x567   :  { %v7092_v37 = vpop.f32.mrf.mxu3 }
 0x56a   :  { %v7183_v43 = vpop.f32.mrf.mxu2 }
 0x581   :  { %v7064_v20 = vpop.f32.mrf.mxu1 }
 0x582   :  { %v7065_v14 = vadd.f32 %v7064_v20, %v7052_v50 }
 0x583   :  { %v7155_v54 = vpop.f32.mrf.mxu0 }
 0x584   :  { %v7078_v44 = vadd.f32 %v9235_v36, %v7065_v14 }
 0x586   :  { %v7091_v16 = vadd.f32 %v7090_v33, %v7078_v44 }
 0x588   :  { %v7267_v51 = vmul.f32 %v7255_v24, %v7091_v16  ;;  %v7142_v10 = vpop.f32.mrf.mxu3 }
 0x589   :  { %v7066_v31 = vpop.f32.mrf.mxu1 }
 0x58a   :  { %v7287_v2 = vadd.f32 %v7275_v28, %v7267_v51  ;;  %v7233_v34 = vpop.f32.mrf.mxu2 }
 0x58b   :  { %v7157_v11 = vpop.f32.mrf.mxu0 }
 0x58c   :  { %7293 = vst [vmem:[#allocation22 + $0x18] sm:$0xff] %v7287_v2 }
 0x590   :  { %v7144_v4 = vpop.f32.mrf.mxu3 }
 0x592   :  { %v7235_v23 = vpop.f32.mrf.mxu2 }
 0x5a1   :  { %v7116_v59 = vpop.f32.mrf.mxu1 }
 0x5a2   :  { %v7117_v29 = vadd.f32 %v7116_v59, %v7103_v49 }
 0x5a4   :  { %v7207_v9 = vpop.f32.mrf.mxu0  ;;  %v7130_v56 = vadd.f32 %v9259_v55, %v7117_v29  ;;  %v7257_v55 = vperm.slane %v9241_v5, 5 }
 0x5a6   :  { %v7143_v6 = vadd.f32 %v7142_v10, %v7130_v56 }
 0x5a8   :  { %v7156_v25 = vadd.f32 %v7155_v54, %v7143_v6 }
 0x5a9   :  { %v7194_v48 = vpop.f32.mrf.mxu3  ;;  %v7118_v32 = vpop.f32.mrf.mxu1 }
 0x5aa   :  { %v7195_v19 = vadd.f32 %v7194_v48, %v7181_v63 }
 0x5ac   :  { %v7209_v50 = vpop.f32.mrf.mxu0  ;;  %v7208_v21 = vadd.f32 %v7207_v9, %v7195_v19 }
 0x5b1   :  { %v7196_v36 = vpop.f32.mrf.mxu3 }
 0x5c1   :  { %v7168_v27 = vpop.f32.mrf.mxu1 }
 0x5c2   :  { %v7169_v0 = vadd.f32 %v7168_v27, %v7156_v25 }
 0x5c4   :  { %v7268_v18 = vmul.f32 %v7256_v17, %v7169_v0 }
 0x5c6   :  { %v7288_v45 = vadd.f32 %v7276_v58, %v7268_v18 }
 0x5c8   :  { %7294 = vst [vmem:[#allocation22 + $0x20] sm:$0xff] %v7288_v45 }
 0x5c9   :  { %v7246_v57 = vpop.f32.mrf.mxu3  ;;  %v7170_v8 = vpop.f32.mrf.mxu1 }
 0x5d1   :  { %v7248_v38 = vpop.f32.mrf.mxu3 }
 0x5e1   :  { %v7220_v52 = vpop.f32.mrf.mxu1 }
 0x5e2   :  { %v7221_v61 = vadd.f32 %v7220_v52, %v7208_v21 }
 0x5e4   :  { %v7234_v53 = vadd.f32 %v7233_v34, %v7221_v61 }
 0x5e6   :  { %v7247_v41 = vadd.f32 %v7246_v57, %v7234_v53 }
 0x5e8   :  { %v7269_v62 = vmul.f32 %v7257_v55, %v7247_v41 }
 0x5e9   :  { %v7222_v26 = vpop.f32.mrf.mxu1 }
 0x5ea   :  { %v7289_v39 = vadd.f32 %v7277_v40, %v7269_v62 }
 0x5ec   :  { %7295 = vst [vmem:[#allocation22 + $0x28] sm:$0xff] %v7289_v39 }
 0x5ed   :  { %7306 = dma.vmem_to_hbm [thread:$0]  %s7302_s3, 768, %s7304_s29, [#allocation4]  }
 0x5ee   :  { %7672 = dma.done.wait [#allocation4], 768  }
 0x5ef   :  { %7673 = vsyncadd [#allocation4], 4294966528 }
 0x5f0   :  { %7311 = vsyncpa [#allocation3], 1 }
 0x5f1   :  { %7312 = vsyncpa [#allocation6], 1 }
 0x5f2   :  { %7313 = vsyncpa [#allocation9], 1 }
 0x5f3   :  { %7314 = vsyncpa [#allocation12], 1 }
 0x5f4   :  { %7315 = vsyncpa [#allocation15], 1 }
 0x5f5   :  { %7316 = vsyncpa [#allocation18], 1 }
 0x5f6   :  { %7317 = vsyncpa [#allocation21], 1 }
 0x5f7   :  { %7318 = vsyncpa [#allocation4], 1 }

</bundles_post_ra>
